<compile_context>
chip_gen: v7x
topology: tpu7x:2x2x1
jax: 0.10.0
libtpu: 0.0.40
codegen_flags: <defaults>
</compile_context>

<pallas_src>
import functools

import jax
import jax.numpy as jnp
from jax import lax
from jax.experimental import pallas as pl
from jax.experimental.pallas import tpu as pltpu

_BN_EPS = 1e-5
_VMEM_LIMIT = 32 * 1024 * 1024  # explicit scoped-VMEM budget; fits v5e/v6e/v7x


def _round_up(x, m):
    return -(-x // m) * m


def _row_tiles(m, cap):
    """Pad a row count so it tiles evenly; returns (padded_rows, tile_rows)."""
    if m <= cap:
        mp = _round_up(m, 8)
        return mp, mp
    mp = _round_up(m, cap)
    return mp, cap


# --------------------------------------------------------------------------
# Pallas kernels
# --------------------------------------------------------------------------

def _gemm_bn_kernel(p_ref, w_ref, s_ref, b_ref, o_ref, acc_ref, *, relu):
    """out = act((patches @ w) * scale + bias); accumulated over grid axis 2 (K)."""
    @pl.when(pl.program_id(2) == 0)
    def _():
        acc_ref[...] = jnp.zeros_like(acc_ref)

    acc_ref[...] += jnp.dot(p_ref[...], w_ref[...],
                            preferred_element_type=jnp.float32)

    @pl.when(pl.program_id(2) == pl.num_programs(2) - 1)
    def _():
        y = acc_ref[...] * s_ref[...] + b_ref[...]
        if relu:
            y = jnp.maximum(y, 0.0)
        o_ref[...] = y.astype(o_ref.dtype)


def _gemm_bn_res_kernel(p_ref, w_ref, s_ref, b_ref, r_ref, o_ref, acc_ref):
    """Bottleneck tail: relu((patches @ w) * scale + bias + residual)."""
    @pl.when(pl.program_id(2) == 0)
    def _():
        acc_ref[...] = jnp.zeros_like(acc_ref)

    acc_ref[...] += jnp.dot(p_ref[...], w_ref[...],
                            preferred_element_type=jnp.float32)

    @pl.when(pl.program_id(2) == pl.num_programs(2) - 1)
    def _():
        y = acc_ref[...] * s_ref[...] + b_ref[...] + r_ref[...].astype(jnp.float32)
        o_ref[...] = jnp.maximum(y, 0.0).astype(o_ref.dtype)


def _max9_kernel(*refs):
    """Elementwise max of 9 (tile_m, 128) tiles (MaxPool 3x3 taps)."""
    o_ref = refs[-1]
    m = refs[0][...]
    for r in refs[1:-1]:
        m = jnp.maximum(m, r[...])
    o_ref[...] = m


def _gap_bn_l2_kernel(x_ref, s_ref, b_ref, o_ref, *, inv_hw):
    """Global average pool + eval-mode BatchNorm1d (folded) + F.normalize."""
    x = x_ref[...].astype(jnp.float32)              # (N, HW, C)
    f = jnp.sum(x, axis=1) * inv_hw                 # (N, C) global average pool
    y = f * s_ref[...] + b_ref[...]                 # folded BN1d
    ssq = jnp.sum(y * y, axis=-1, keepdims=True)
    inv = lax.rsqrt(jnp.maximum(ssq, 1e-24))        # F.normalize, eps = 1e-12 on the norm
    o_ref[...] = y * inv


# --------------------------------------------------------------------------
# Pallas wrappers
# --------------------------------------------------------------------------

def gemm_bn(patches, w2, scale, bias, *, relu, residual=None):
    """y = act((patches @ w2) * scale + bias [+ residual]).

    patches: (M, Kp) bf16, w2: (Kp, Np) bf16 (Kp, Np multiples of 128),
    scale/bias: (1, Np) f32, residual: (M, Np) bf16 or None.  Returns (M, Np) bf16.
    """
    M, K = patches.shape
    Kp, Np = w2.shape
    assert K == Kp and Kp % 128 == 0 and Np % 128 == 0

    Mp, tm = _row_tiles(M, 256)
    tn = 128
    tk = 512 if Kp % 512 == 0 else (256 if Kp % 256 == 0 else 128)

    if Mp != M:
        patches = jnp.pad(patches, ((0, Mp - M), (0, 0)))
        if residual is not None:
            residual = jnp.pad(residual, ((0, Mp - M), (0, 0)))

    grid = (Mp // tm, Np // tn, Kp // tk)

    in_specs = [
        pl.BlockSpec((tm, tk), lambda i, j, k: (i, k)),
        pl.BlockSpec((tk, tn), lambda i, j, k: (k, j)),
        pl.BlockSpec((1, tn), lambda i, j, k: (0, j)),
        pl.BlockSpec((1, tn), lambda i, j, k: (0, j)),
    ]
    args = [patches.astype(jnp.bfloat16), w2, scale, bias]
    if residual is None:
        kern = functools.partial(_gemm_bn_kernel, relu=relu)
    else:
        in_specs.append(pl.BlockSpec((tm, tn), lambda i, j, k: (i, j)))
        args.append(residual.astype(jnp.bfloat16))
        kern = _gemm_bn_res_kernel

    n_big = 2 if residual is not None else 1
    cost = pl.CostEstimate(
        flops=2 * Mp * Kp * Np,
        transcendentals=0,
        bytes_accessed=(Mp * Kp + Kp * Np + n_big * Mp * Np) * 2 + 2 * Np * 4,
    )

    out = pl.pallas_call(
        kern,
        out_shape=jax.ShapeDtypeStruct((Mp, Np), jnp.bfloat16),
        grid=grid,
        in_specs=in_specs,
        out_specs=pl.BlockSpec((tm, tn), lambda i, j, k: (i, j)),
        scratch_shapes=[pltpu.VMEM((tm, tn), jnp.float32)],
        compiler_params=pltpu.CompilerParams(
            dimension_semantics=("parallel", "parallel", "arbitrary"),
            vmem_limit_bytes=_VMEM_LIMIT),
        cost_estimate=cost,
    )(*args)
    return out[:M] if Mp != M else out


def conv_bn(x, p, *, relu, residual=None):
    """Conv2d (no bias) + folded eval-mode BN (+ optional residual add + ReLU).

    x: (N, H, W, Cin_pad) bf16.  Returns (N, Ho, Wo, Cout_pad) bf16.
    """
    kh, kw, stride, pad = p["kh"], p["kw"], p["stride"], p["pad"]
    N, H, W, C = x.shape
    if kh == 1 and kw == 1 and pad == 0:
        if stride != 1:
            x = x[:, ::stride, ::stride, :]
        Ho, Wo = x.shape[1], x.shape[2]
        patches = x.reshape(N * Ho * Wo, C)
    else:
        # One fused XLA gather; feature dim is channel-major: c*kh*kw + i*kw + j,
        # matching the weight packing in make_convbn.
        patches4 = lax.conv_general_dilated_patches(
            x, (kh, kw), (stride, stride), ((pad, pad), (pad, pad)),
            dimension_numbers=("NHWC", "HWIO", "NHWC"))
        Ho, Wo = patches4.shape[1], patches4.shape[2]
        patches = patches4.reshape(N * Ho * Wo, patches4.shape[3])

    Kp = p["w"].shape[0]
    if patches.shape[1] < Kp:  # e.g. conv1: K = 3*49 = 147 -> 256
        patches = jnp.pad(patches, ((0, 0), (0, Kp - patches.shape[1])))

    M = patches.shape[0]
    r2 = None if residual is None else residual.reshape(M, -1)
    y = gemm_bn(patches, p["w"], p["scale"], p["bias"], relu=relu, residual=r2)
    return y.reshape(N, Ho, Wo, y.shape[-1])


def maxpool_3x3_s2(x):
    """MaxPool2d(kernel=3, stride=2, padding=1) on NHWC with C % 128 == 0.

    The input is post-ReLU (>= 0), so zero padding is equivalent to -inf padding.
    The window is decomposed into 9 shifted strided views (no (M, 9, C) patch
    tensor) reduced by one tiled, lane-dense elementwise-max kernel.
    """
    N, H, W, C = x.shape
    assert C % 128 == 0
    xp = jnp.pad(x, ((0, 0), (1, 1), (1, 1), (0, 0)))
    Ho = (H + 2 - 3) // 2 + 1
    Wo = (W + 2 - 3) // 2 + 1
    M = N * Ho * Wo
    views = [xp[:, i:i + 2 * Ho - 1:2, j:j + 2 * Wo - 1:2, :].reshape(M, C)
             for i in range(3) for j in range(3)]
    Mp, tm = _row_tiles(M, 512)
    if Mp != M:
        views = [jnp.pad(v, ((0, Mp - M), (0, 0))) for v in views]

    out = pl.pallas_call(
        _max9_kernel,
        out_shape=jax.ShapeDtypeStruct((Mp, C), x.dtype),
        grid=(Mp // tm, C // 128),
        in_specs=[pl.BlockSpec((tm, 128), lambda i, j: (i, j))] * 9,
        out_specs=pl.BlockSpec((tm, 128), lambda i, j: (i, j)),
        compiler_params=pltpu.CompilerParams(
            dimension_semantics=("parallel", "parallel"),
            vmem_limit_bytes=_VMEM_LIMIT),
    )(*views)
    if Mp != M:
        out = out[:M]
    return out.reshape(N, Ho, Wo, C)


def gap_bn_l2norm(x, scale, bias, num_real):
    """Fused gap -> feat_bn (eval) -> F.normalize.  Padded channels are zero and
    therefore do not affect the norm; the real features are sliced at the end."""
    N, H, W, C = x.shape
    x3 = x.reshape(N, H * W, C)
    out = pl.pallas_call(
        functools.partial(_gap_bn_l2_kernel, inv_hw=1.0 / float(H * W)),
        out_shape=jax.ShapeDtypeStruct((N, C), jnp.float32),
        grid=(1,),
        in_specs=[pl.BlockSpec((N, H * W, C), lambda i: (0, 0, 0)),
                  pl.BlockSpec((1, C), lambda i: (0, 0)),
                  pl.BlockSpec((1, C), lambda i: (0, 0))],
        out_specs=pl.BlockSpec((N, C), lambda i: (0, 0)),
        compiler_params=pltpu.CompilerParams(
            dimension_semantics=("arbitrary",),
            vmem_limit_bytes=_VMEM_LIMIT),
    )(x3, scale, bias)
    return out[:, :num_real]


# --------------------------------------------------------------------------
# Deterministic parameter construction (no checkpoint load)
# --------------------------------------------------------------------------

def make_bn(key, c):
    """Eval-mode BN folded into scale/bias (stand-in for pretrained running stats)."""
    k1, k2, k3, k4 = jax.random.split(key, 4)
    gamma = 1.0 + 0.1 * jax.random.normal(k1, (c,), jnp.float32)
    beta = 0.1 * jax.random.normal(k2, (c,), jnp.float32)
    mean = 0.1 * jax.random.normal(k3, (c,), jnp.float32)
    var = 1.0 + 0.1 * jnp.abs(jax.random.normal(k4, (c,), jnp.float32))
    scale = gamma / jnp.sqrt(var + _BN_EPS)
    bias = beta - mean * scale
    return scale, bias


def make_convbn(key, kh, kw, cin, cout, *, cin_pad, stride, pad):
    """Build a conv weight + folded BN, packed as a lane-dense (Kp, Np) GEMM matrix.

    K ordering is channel-major (c*kh*kw + i*kw + j) to match
    lax.conv_general_dilated_patches; Cout/K are zero-padded to multiples of 128 so
    padded output lanes stay exactly zero through the network.
    """
    kw_key, kb_key = jax.random.split(key)
    fan_out = cout * kh * kw                       # kaiming_normal_(mode='fan_out')
    std = (2.0 / fan_out) ** 0.5
    w = std * jax.random.normal(kw_key, (kh, kw, cin, cout), jnp.float32)
    scale, bias = make_bn(kb_key, cout)

    cout_pad = _round_up(cout, 128)
    w = jnp.pad(w, ((0, 0), (0, 0), (0, cin_pad - cin), (0, cout_pad - cout)))
    if kh == 1 and kw == 1:
        w2 = w.reshape(cin_pad, cout_pad)
    else:
        w2 = jnp.transpose(w, (2, 0, 1, 3)).reshape(cin_pad * kh * kw, cout_pad)
    Kp = _round_up(w2.shape[0], 128)
    if Kp != w2.shape[0]:
        w2 = jnp.pad(w2, ((0, Kp - w2.shape[0]), (0, 0)))

    scale = jnp.pad(scale, (0, cout_pad - cout)).reshape(1, cout_pad)
    bias = jnp.pad(bias, (0, cout_pad - cout)).reshape(1, cout_pad)
    return {"w": w2.astype(jnp.bfloat16), "scale": scale, "bias": bias,
            "kh": kh, "kw": kw, "stride": stride, "pad": pad}


def build_params(key, base=8, blocks=(3, 4, 6, 3)):
    # TODO(synk): pretrained resnet50 checkpoint load has no Pallas equivalent;
    # weights / running stats are synthesized deterministically instead.
    keys = iter(jax.random.split(key, 256))
    params = {"conv1": make_convbn(next(keys), 7, 7, 3, base,
                                   cin_pad=3, stride=2, pad=3)}
    inplanes = base
    strides = (1, 2, 2, 1)       # layer4[0] conv2 / downsample stride forced to 1
    layers = []
    for li, nb in enumerate(blocks):
        planes = base * (2 ** li)
        blocks_p = []
        for bi in range(nb):
            s = strides[li] if bi == 0 else 1
            outp = planes * 4
            inp_pad = _round_up(inplanes, 128)
            pln_pad = _round_up(planes, 128)
            blk = {
                "conv1": make_convbn(next(keys), 1, 1, inplanes, planes,
                                     cin_pad=inp_pad, stride=1, pad=0),
                "conv2": make_convbn(next(keys), 3, 3, planes, planes,
                                     cin_pad=pln_pad, stride=s, pad=1),
                "conv3": make_convbn(next(keys), 1, 1, planes, outp,
                                     cin_pad=pln_pad, stride=1, pad=0),
                "downsample": None,
            }
            if s != 1 or inplanes != outp:
                blk["downsample"] = make_convbn(next(keys), 1, 1, inplanes, outp,
                                                cin_pad=inp_pad, stride=s, pad=0)
            blocks_p.append(blk)
            inplanes = outp
        layers.append(blocks_p)
    params["layers"] = layers

    # feat_bn: weight=1, bias=0, fresh running stats (mean=0, var=1), eval mode.
    c = inplanes
    c_pad = _round_up(c, 128)
    fb_scale = jnp.ones((c,), jnp.float32) / jnp.sqrt(1.0 + _BN_EPS)
    fb_bias = jnp.zeros((c,), jnp.float32)
    params["feat_bn"] = (jnp.pad(fb_scale, (0, c_pad - c)).reshape(1, c_pad),
                         jnp.pad(fb_bias, (0, c_pad - c)).reshape(1, c_pad))
    params["num_features"] = c
    return params


# --------------------------------------------------------------------------
# Forward pass (eval path of ResNet.forward)
# --------------------------------------------------------------------------

def bottleneck(x, blk):
    identity = x
    out = conv_bn(x, blk["conv1"], relu=True)
    out = conv_bn(out, blk["conv2"], relu=True)
    if blk["downsample"] is not None:
        identity = conv_bn(x, blk["downsample"], relu=False)
    # conv3 + bn3 + residual add + relu fused in one tiled Pallas GEMM
    return conv_bn(out, blk["conv3"], relu=False, residual=identity)


def resnet_forward(x_nchw, params):
    # NCHW (PyTorch) -> NHWC (kernel layout), bf16 activations
    x = jnp.transpose(x_nchw, (0, 2, 3, 1)).astype(jnp.bfloat16)

    # base = conv1 -> bn1 -> relu -> maxpool -> layer1..layer4
    x = conv_bn(x, params["conv1"], relu=True)
    x = maxpool_3x3_s2(x)
    for layer in params["layers"]:
        for blk in layer:
            x = bottleneck(x, blk)

    # gap -> view(bs, -1) -> feat_bn -> F.normalize   (eval path)
    fb_scale, fb_bias = params["feat_bn"]
    return gap_bn_l2norm(x, fb_scale, fb_bias, params["num_features"])


# --------------------------------------------------------------------------

if __name__ == "__main__":
    # NCHW input, small shapes: batch=2, 3 channels, 32x32 spatial.
    x = jax.random.normal(jax.random.PRNGKey(0), (2, 3, 32, 32), dtype=jnp.float32)
    params = build_params(jax.random.PRNGKey(1), base=8, blocks=(3, 4, 6, 3))

    forward = jax.jit(functools.partial(resnet_forward, params=params))
    out = jax.block_until_ready(forward(x))

    assert out.shape == (2, params["num_features"])
    assert bool(jnp.all(jnp.isfinite(out)))
    norms = jnp.sqrt(jnp.sum(out.astype(jnp.float32) ** 2, axis=-1))
    assert bool(jnp.all(jnp.abs(norms - 1.0) < 1e-3))

    print("KERNEL_OK")
</pallas_src>

<mosaic_0001>
module attributes {stable_mosaic.version = 11 : i64} {
  func.func @_gemm_bn_kernel(%arg0: i32, %arg1: i32, %arg2: i32, %arg3: memref<256x256xbf16, #tpu.memory_space<vmem>>, %arg4: memref<256x128xbf16, #tpu.memory_space<vmem>>, %arg5: memref<1x128xf32, #tpu.memory_space<vmem>>, %arg6: memref<1x128xf32, #tpu.memory_space<vmem>>, %arg7: memref<256x128xbf16, #tpu.memory_space<vmem>>, %arg8: memref<256x128xf32, #tpu.memory_space<vmem>>) attributes {dimension_semantics = [#tpu.dimension_semantics<parallel>, #tpu.dimension_semantics<parallel>, #tpu.dimension_semantics<arbitrary>], iteration_bounds = array<i64: 2, 1, 1>, scalar_prefetch = 0 : i64, scratch_operands = 1 : i64, tpu.core_type = #tpu.core_type<tc>, window_params = [{transform_indices = @transform_0, window_bounds = array<i64: 256, 256>}, {transform_indices = @transform_1, window_bounds = array<i64: 256, 128>}, {transform_indices = @transform_2, window_bounds = array<i64: 1, 128>}, {transform_indices = @transform_3, window_bounds = array<i64: 1, 128>}, {transform_indices = @transform_4, window_bounds = array<i64: 256, 128>}]} {
    %c0_i32 = arith.constant 0 : i32
    %0 = arith.cmpi eq, %arg2, %c0_i32 : i32
    %1 = arith.extui %0 : i1 to i32
    %c0_i32_0 = arith.constant 0 : i32
    %2 = arith.cmpi ne, %1, %c0_i32_0 : i32
    scf.if %2 {
      %cst_10 = arith.constant 0.000000e+00 : f32
      %12 = vector.broadcast %cst_10 : f32 to vector<256x128xf32>
      %c0_11 = arith.constant 0 : index
      %c0_12 = arith.constant 0 : index
      %13 = vector.load %arg8[%c0_11, %c0_12] : memref<256x128xf32, #tpu.memory_space<vmem>>, vector<256x128xf32>
      tpu.vector_store %arg8[%c0_11, %c0_12], %12 {strides = array<i32>} : memref<256x128xf32, #tpu.memory_space<vmem>>, vector<256x128xf32>,
    } else {
    }
    %c0 = arith.constant 0 : index
    %c0_1 = arith.constant 0 : index
    %3 = vector.load %arg8[%c0, %c0_1] : memref<256x128xf32, #tpu.memory_space<vmem>>, vector<256x128xf32>
    %c0_2 = arith.constant 0 : index
    %c0_3 = arith.constant 0 : index
    %4 = vector.load %arg3[%c0_2, %c0_3] : memref<256x256xbf16, #tpu.memory_space<vmem>>, vector<256x256xbf16>
    %c0_4 = arith.constant 0 : index
    %c0_5 = arith.constant 0 : index
    %5 = vector.load %arg4[%c0_4, %c0_5] : memref<256x128xbf16, #tpu.memory_space<vmem>>, vector<256x128xbf16>
    %cst = arith.constant dense<0.000000e+00> : vector<256x128xf32>
    %6 = tpu.matmul %4, %5, %cst {dimension_numbers = #tpu.dot_dimension_numbers<[1], [0], [0], [1], [0, 0, 1, 1], [], []>} : vector<256x256xbf16>, vector<256x128xbf16>, vector<256x128xf32> -> vector<256x128xf32>
    %7 = arith.addf %3, %6 : vector<256x128xf32>
    %c0_6 = arith.constant 0 : index
    %c0_7 = arith.constant 0 : index
    %8 = vector.load %arg8[%c0_6, %c0_7] : memref<256x128xf32, #tpu.memory_space<vmem>>, vector<256x128xf32>
    tpu.vector_store %arg8[%c0_6, %c0_7], %7 {strides = array<i32>} : memref<256x128xf32, #tpu.memory_space<vmem>>, vector<256x128xf32>,
    %c0_i32_8 = arith.constant 0 : i32
    %9 = arith.cmpi eq, %arg2, %c0_i32_8 : i32
    %10 = arith.extui %9 : i1 to i32
    %c0_i32_9 = arith.constant 0 : i32
    %11 = arith.cmpi ne, %10, %c0_i32_9 : i32
    scf.if %11 {
      %c0_10 = arith.constant 0 : index
      %c0_11 = arith.constant 0 : index
      %12 = vector.load %arg8[%c0_10, %c0_11] : memref<256x128xf32, #tpu.memory_space<vmem>>, vector<256x128xf32>
      %c0_12 = arith.constant 0 : index
      %c0_13 = arith.constant 0 : index
      %13 = vector.load %arg5[%c0_12, %c0_13] : memref<1x128xf32, #tpu.memory_space<vmem>>, vector<1x128xf32>
      %14 = vector.broadcast %13 : vector<1x128xf32> to vector<256x128xf32>
      %15 = arith.mulf %12, %14 : vector<256x128xf32>
      %c0_14 = arith.constant 0 : index
      %c0_15 = arith.constant 0 : index
      %16 = vector.load %arg6[%c0_14, %c0_15] : memref<1x128xf32, #tpu.memory_space<vmem>>, vector<1x128xf32>
      %17 = vector.broadcast %16 : vector<1x128xf32> to vector<256x128xf32>
      %18 = arith.addf %15, %17 : vector<256x128xf32>
      %cst_16 = arith.constant 0.000000e+00 : f32
      %19 = vector.broadcast %cst_16 : f32 to vector<256x128xf32>
      %20 = arith.maximumf %18, %19 : vector<256x128xf32>
      %21 = arith.truncf %20 : vector<256x128xf32> to vector<256x128xbf16>
      %c0_17 = arith.constant 0 : index
      %c0_18 = arith.constant 0 : index
      %22 = vector.load %arg7[%c0_17, %c0_18] : memref<256x128xbf16, #tpu.memory_space<vmem>>, vector<256x128xbf16>
      tpu.vector_store %arg7[%c0_17, %c0_18], %21 {strides = array<i32>} : memref<256x128xbf16, #tpu.memory_space<vmem>>, vector<256x128xbf16>,
    } else {
    }
    return
  }
  func.func @transform_0(%arg0: i32, %arg1: i32, %arg2: i32) -> (i32, i32) {
    %c0_i32 = arith.constant 0 : i32
    return %arg0, %arg2 : i32, i32
  }
  func.func @transform_1(%arg0: i32, %arg1: i32, %arg2: i32) -> (i32, i32) {
    %c0_i32 = arith.constant 0 : i32
    return %arg2, %arg1 : i32, i32
  }
  func.func @transform_2(%arg0: i32, %arg1: i32, %arg2: i32) -> (i32, i32) {
    %c0_i32 = arith.constant 0 : i32
    %c0_i32_0 = arith.constant 0 : i32
    return %c0_i32, %arg1 : i32, i32
  }
  func.func @transform_3(%arg0: i32, %arg1: i32, %arg2: i32) -> (i32, i32) {
    %c0_i32 = arith.constant 0 : i32
    %c0_i32_0 = arith.constant 0 : i32
    return %c0_i32, %arg1 : i32, i32
  }
  func.func @transform_4(%arg0: i32, %arg1: i32, %arg2: i32) -> (i32, i32) {
    %c0_i32 = arith.constant 0 : i32
    return %arg0, %arg1 : i32, i32
  }
}

module attributes {stable_mosaic.version = 11 : i64} {
  func.func @_max9_kernel(%arg0: i32, %arg1: i32, %arg2: memref<128x128xbf16, #tpu.memory_space<vmem>>, %arg3: memref<128x128xbf16, #tpu.memory_space<vmem>>, %arg4: memref<128x128xbf16, #tpu.memory_space<vmem>>, %arg5: memref<128x128xbf16, #tpu.memory_space<vmem>>, %arg6: memref<128x128xbf16, #tpu.memory_space<vmem>>, %arg7: memref<128x128xbf16, #tpu.memory_space<vmem>>, %arg8: memref<128x128xbf16, #tpu.memory_space<vmem>>, %arg9: memref<128x128xbf16, #tpu.memory_space<vmem>>, %arg10: memref<128x128xbf16, #tpu.memory_space<vmem>>, %arg11: memref<128x128xbf16, #tpu.memory_space<vmem>>) attributes {dimension_semantics = [#tpu.dimension_semantics<parallel>, #tpu.dimension_semantics<parallel>], iteration_bounds = array<i64: 1, 1>, scalar_prefetch = 0 : i64, scratch_operands = 0 : i64, tpu.core_type = #tpu.core_type<tc>, window_params = [{transform_indices = @transform_0, window_bounds = array<i64: 128, 128>}, {transform_indices = @transform_1, window_bounds = array<i64: 128, 128>}, {transform_indices = @transform_2, window_bounds = array<i64: 128, 128>}, {transform_indices = @transform_3, window_bounds = array<i64: 128, 128>}, {transform_indices = @transform_4, window_bounds = array<i64: 128, 128>}, {transform_indices = @transform_5, window_bounds = array<i64: 128, 128>}, {transform_indices = @transform_6, window_bounds = array<i64: 128, 128>}, {transform_indices = @transform_7, window_bounds = array<i64: 128, 128>}, {transform_indices = @transform_8, window_bounds = array<i64: 128, 128>}, {transform_indices = @transform_9, window_bounds = array<i64: 128, 128>}]} {
    %c0 = arith.constant 0 : index
    %c0_0 = arith.constant 0 : index
    %0 = vector.load %arg2[%c0, %c0_0] : memref<128x128xbf16, #tpu.memory_space<vmem>>, vector<128x128xbf16>
    %c0_1 = arith.constant 0 : index
    %c0_2 = arith.constant 0 : index
    %1 = vector.load %arg3[%c0_1, %c0_2] : memref<128x128xbf16, #tpu.memory_space<vmem>>, vector<128x128xbf16>
    %2 = arith.maximumf %0, %1 : vector<128x128xbf16>
    %c0_3 = arith.constant 0 : index
    %c0_4 = arith.constant 0 : index
    %3 = vector.load %arg4[%c0_3, %c0_4] : memref<128x128xbf16, #tpu.memory_space<vmem>>, vector<128x128xbf16>
    %4 = arith.maximumf %2, %3 : vector<128x128xbf16>
    %c0_5 = arith.constant 0 : index
    %c0_6 = arith.constant 0 : index
    %5 = vector.load %arg5[%c0_5, %c0_6] : memref<128x128xbf16, #tpu.memory_space<vmem>>, vector<128x128xbf16>
    %6 = arith.maximumf %4, %5 : vector<128x128xbf16>
    %c0_7 = arith.constant 0 : index
    %c0_8 = arith.constant 0 : index
    %7 = vector.load %arg6[%c0_7, %c0_8] : memref<128x128xbf16, #tpu.memory_space<vmem>>, vector<128x128xbf16>
    %8 = arith.maximumf %6, %7 : vector<128x128xbf16>
    %c0_9 = arith.constant 0 : index
    %c0_10 = arith.constant 0 : index
    %9 = vector.load %arg7[%c0_9, %c0_10] : memref<128x128xbf16, #tpu.memory_space<vmem>>, vector<128x128xbf16>
    %10 = arith.maximumf %8, %9 : vector<128x128xbf16>
    %c0_11 = arith.constant 0 : index
    %c0_12 = arith.constant 0 : index
    %11 = vector.load %arg8[%c0_11, %c0_12] : memref<128x128xbf16, #tpu.memory_space<vmem>>, vector<128x128xbf16>
    %12 = arith.maximumf %10, %11 : vector<128x128xbf16>
    %c0_13 = arith.constant 0 : index
    %c0_14 = arith.constant 0 : index
    %13 = vector.load %arg9[%c0_13, %c0_14] : memref<128x128xbf16, #tpu.memory_space<vmem>>, vector<128x128xbf16>
    %14 = arith.maximumf %12, %13 : vector<128x128xbf16>
    %c0_15 = arith.constant 0 : index
    %c0_16 = arith.constant 0 : index
    %15 = vector.load %arg10[%c0_15, %c0_16] : memref<128x128xbf16, #tpu.memory_space<vmem>>, vector<128x128xbf16>
    %16 = arith.maximumf %14, %15 : vector<128x128xbf16>
    %c0_17 = arith.constant 0 : index
    %c0_18 = arith.constant 0 : index
    %17 = vector.load %arg11[%c0_17, %c0_18] : memref<128x128xbf16, #tpu.memory_space<vmem>>, vector<128x128xbf16>
    tpu.vector_store %arg11[%c0_17, %c0_18], %16 {strides = array<i32>} : memref<128x128xbf16, #tpu.memory_space<vmem>>, vector<128x128xbf16>,
    return
  }
  func.func @transform_0(%arg0: i32, %arg1: i32) -> (i32, i32) {
    %c0_i32 = arith.constant 0 : i32
    return %arg0, %arg1 : i32, i32
  }
  func.func @transform_1(%arg0: i32, %arg1: i32) -> (i32, i32) {
    %c0_i32 = arith.constant 0 : i32
    return %arg0, %arg1 : i32, i32
  }
  func.func @transform_2(%arg0: i32, %arg1: i32) -> (i32, i32) {
    %c0_i32 = arith.constant 0 : i32
    return %arg0, %arg1 : i32, i32
  }
  func.func @transform_3(%arg0: i32, %arg1: i32) -> (i32, i32) {
    %c0_i32 = arith.constant 0 : i32
    return %arg0, %arg1 : i32, i32
  }
  func.func @transform_4(%arg0: i32, %arg1: i32) -> (i32, i32) {
    %c0_i32 = arith.constant 0 : i32
    return %arg0, %arg1 : i32, i32
  }
  func.func @transform_5(%arg0: i32, %arg1: i32) -> (i32, i32) {
    %c0_i32 = arith.constant 0 : i32
    return %arg0, %arg1 : i32, i32
  }
  func.func @transform_6(%arg0: i32, %arg1: i32) -> (i32, i32) {
    %c0_i32 = arith.constant 0 : i32
    return %arg0, %arg1 : i32, i32
  }
  func.func @transform_7(%arg0: i32, %arg1: i32) -> (i32, i32) {
    %c0_i32 = arith.constant 0 : i32
    return %arg0, %arg1 : i32, i32
  }
  func.func @transform_8(%arg0: i32, %arg1: i32) -> (i32, i32) {
    %c0_i32 = arith.constant 0 : i32
    return %arg0, %arg1 : i32, i32
  }
  func.func @transform_9(%arg0: i32, %arg1: i32) -> (i32, i32) {
    %c0_i32 = arith.constant 0 : i32
    return %arg0, %arg1 : i32, i32
  }
}

module attributes {stable_mosaic.version = 11 : i64} {
  func.func @_gemm_bn_kernel(%arg0: i32, %arg1: i32, %arg2: i32, %arg3: memref<128x128xbf16, #tpu.memory_space<vmem>>, %arg4: memref<128x128xbf16, #tpu.memory_space<vmem>>, %arg5: memref<1x128xf32, #tpu.memory_space<vmem>>, %arg6: memref<1x128xf32, #tpu.memory_space<vmem>>, %arg7: memref<128x128xbf16, #tpu.memory_space<vmem>>, %arg8: memref<128x128xf32, #tpu.memory_space<vmem>>) attributes {dimension_semantics = [#tpu.dimension_semantics<parallel>, #tpu.dimension_semantics<parallel>, #tpu.dimension_semantics<arbitrary>], iteration_bounds = array<i64: 1, 1, 1>, scalar_prefetch = 0 : i64, scratch_operands = 1 : i64, tpu.core_type = #tpu.core_type<tc>, window_params = [{transform_indices = @transform_0, window_bounds = array<i64: 128, 128>}, {transform_indices = @transform_1, window_bounds = array<i64: 128, 128>}, {transform_indices = @transform_2, window_bounds = array<i64: 1, 128>}, {transform_indices = @transform_3, window_bounds = array<i64: 1, 128>}, {transform_indices = @transform_4, window_bounds = array<i64: 128, 128>}]} {
    %c0_i32 = arith.constant 0 : i32
    %0 = arith.cmpi eq, %arg2, %c0_i32 : i32
    %1 = arith.extui %0 : i1 to i32
    %c0_i32_0 = arith.constant 0 : i32
    %2 = arith.cmpi ne, %1, %c0_i32_0 : i32
    scf.if %2 {
      %cst_10 = arith.constant 0.000000e+00 : f32
      %12 = vector.broadcast %cst_10 : f32 to vector<128x128xf32>
      %c0_11 = arith.constant 0 : index
      %c0_12 = arith.constant 0 : index
      %13 = vector.load %arg8[%c0_11, %c0_12] : memref<128x128xf32, #tpu.memory_space<vmem>>, vector<128x128xf32>
      tpu.vector_store %arg8[%c0_11, %c0_12], %12 {strides = array<i32>} : memref<128x128xf32, #tpu.memory_space<vmem>>, vector<128x128xf32>,
    } else {
    }
    %c0 = arith.constant 0 : index
    %c0_1 = arith.constant 0 : index
    %3 = vector.load %arg8[%c0, %c0_1] : memref<128x128xf32, #tpu.memory_space<vmem>>, vector<128x128xf32>
    %c0_2 = arith.constant 0 : index
    %c0_3 = arith.constant 0 : index
    %4 = vector.load %arg3[%c0_2, %c0_3] : memref<128x128xbf16, #tpu.memory_space<vmem>>, vector<128x128xbf16>
    %c0_4 = arith.constant 0 : index
    %c0_5 = arith.constant 0 : index
    %5 = vector.load %arg4[%c0_4, %c0_5] : memref<128x128xbf16, #tpu.memory_space<vmem>>, vector<128x128xbf16>
    %cst = arith.constant dense<0.000000e+00> : vector<128x128xf32>
    %6 = tpu.matmul %4, %5, %cst {dimension_numbers = #tpu.dot_dimension_numbers<[1], [0], [0], [1], [0, 0, 1, 1], [], []>} : vector<128x128xbf16>, vector<128x128xbf16>, vector<128x128xf32> -> vector<128x128xf32>
    %7 = arith.addf %3, %6 : vector<128x128xf32>
    %c0_6 = arith.constant 0 : index
    %c0_7 = arith.constant 0 : index
    %8 = vector.load %arg8[%c0_6, %c0_7] : memref<128x128xf32, #tpu.memory_space<vmem>>, vector<128x128xf32>
    tpu.vector_store %arg8[%c0_6, %c0_7], %7 {strides = array<i32>} : memref<128x128xf32, #tpu.memory_space<vmem>>, vector<128x128xf32>,
    %c0_i32_8 = arith.constant 0 : i32
    %9 = arith.cmpi eq, %arg2, %c0_i32_8 : i32
    %10 = arith.extui %9 : i1 to i32
    %c0_i32_9 = arith.constant 0 : i32
    %11 = arith.cmpi ne, %10, %c0_i32_9 : i32
    scf.if %11 {
      %c0_10 = arith.constant 0 : index
      %c0_11 = arith.constant 0 : index
      %12 = vector.load %arg8[%c0_10, %c0_11] : memref<128x128xf32, #tpu.memory_space<vmem>>, vector<128x128xf32>
      %c0_12 = arith.constant 0 : index
      %c0_13 = arith.constant 0 : index
      %13 = vector.load %arg5[%c0_12, %c0_13] : memref<1x128xf32, #tpu.memory_space<vmem>>, vector<1x128xf32>
      %14 = vector.broadcast %13 : vector<1x128xf32> to vector<128x128xf32>
      %15 = arith.mulf %12, %14 : vector<128x128xf32>
      %c0_14 = arith.constant 0 : index
      %c0_15 = arith.constant 0 : index
      %16 = vector.load %arg6[%c0_14, %c0_15] : memref<1x128xf32, #tpu.memory_space<vmem>>, vector<1x128xf32>
      %17 = vector.broadcast %16 : vector<1x128xf32> to vector<128x128xf32>
      %18 = arith.addf %15, %17 : vector<128x128xf32>
      %cst_16 = arith.constant 0.000000e+00 : f32
      %19 = vector.broadcast %cst_16 : f32 to vector<128x128xf32>
      %20 = arith.maximumf %18, %19 : vector<128x128xf32>
      %21 = arith.truncf %20 : vector<128x128xf32> to vector<128x128xbf16>
      %c0_17 = arith.constant 0 : index
      %c0_18 = arith.constant 0 : index
      %22 = vector.load %arg7[%c0_17, %c0_18] : memref<128x128xbf16, #tpu.memory_space<vmem>>, vector<128x128xbf16>
      tpu.vector_store %arg7[%c0_17, %c0_18], %21 {strides = array<i32>} : memref<128x128xbf16, #tpu.memory_space<vmem>>, vector<128x128xbf16>,
    } else {
    }
    return
  }
  func.func @transform_0(%arg0: i32, %arg1: i32, %arg2: i32) -> (i32, i32) {
    %c0_i32 = arith.constant 0 : i32
    return %arg0, %arg2 : i32, i32
  }
  func.func @transform_1(%arg0: i32, %arg1: i32, %arg2: i32) -> (i32, i32) {
    %c0_i32 = arith.constant 0 : i32
    return %arg2, %arg1 : i32, i32
  }
  func.func @transform_2(%arg0: i32, %arg1: i32, %arg2: i32) -> (i32, i32) {
    %c0_i32 = arith.constant 0 : i32
    %c0_i32_0 = arith.constant 0 : i32
    return %c0_i32, %arg1 : i32, i32
  }
  func.func @transform_3(%arg0: i32, %arg1: i32, %arg2: i32) -> (i32, i32) {
    %c0_i32 = arith.constant 0 : i32
    %c0_i32_0 = arith.constant 0 : i32
    return %c0_i32, %arg1 : i32, i32
  }
  func.func @transform_4(%arg0: i32, %arg1: i32, %arg2: i32) -> (i32, i32) {
    %c0_i32 = arith.constant 0 : i32
    return %arg0, %arg1 : i32, i32
  }
}

module attributes {stable_mosaic.version = 11 : i64} {
  func.func @_gemm_bn_kernel(%arg0: i32, %arg1: i32, %arg2: i32, %arg3: memref<128x128xbf16, #tpu.memory_space<vmem>>, %arg4: memref<128x128xbf16, #tpu.memory_space<vmem>>, %arg5: memref<1x128xf32, #tpu.memory_space<vmem>>, %arg6: memref<1x128xf32, #tpu.memory_space<vmem>>, %arg7: memref<128x128xbf16, #tpu.memory_space<vmem>>, %arg8: memref<128x128xf32, #tpu.memory_space<vmem>>) attributes {dimension_semantics = [#tpu.dimension_semantics<parallel>, #tpu.dimension_semantics<parallel>, #tpu.dimension_semantics<arbitrary>], iteration_bounds = array<i64: 1, 1, 9>, scalar_prefetch = 0 : i64, scratch_operands = 1 : i64, tpu.core_type = #tpu.core_type<tc>, window_params = [{transform_indices = @transform_0, window_bounds = array<i64: 128, 128>}, {transform_indices = @transform_1, window_bounds = array<i64: 128, 128>}, {transform_indices = @transform_2, window_bounds = array<i64: 1, 128>}, {transform_indices = @transform_3, window_bounds = array<i64: 1, 128>}, {transform_indices = @transform_4, window_bounds = array<i64: 128, 128>}]} {
    %c0_i32 = arith.constant 0 : i32
    %0 = arith.cmpi eq, %arg2, %c0_i32 : i32
    %1 = arith.extui %0 : i1 to i32
    %c0_i32_0 = arith.constant 0 : i32
    %2 = arith.cmpi ne, %1, %c0_i32_0 : i32
    scf.if %2 {
      %cst_9 = arith.constant 0.000000e+00 : f32
      %12 = vector.broadcast %cst_9 : f32 to vector<128x128xf32>
      %c0_10 = arith.constant 0 : index
      %c0_11 = arith.constant 0 : index
      %13 = vector.load %arg8[%c0_10, %c0_11] : memref<128x128xf32, #tpu.memory_space<vmem>>, vector<128x128xf32>
      tpu.vector_store %arg8[%c0_10, %c0_11], %12 {strides = array<i32>} : memref<128x128xf32, #tpu.memory_space<vmem>>, vector<128x128xf32>,
    } else {
    }
    %c0 = arith.constant 0 : index
    %c0_1 = arith.constant 0 : index
    %3 = vector.load %arg8[%c0, %c0_1] : memref<128x128xf32, #tpu.memory_space<vmem>>, vector<128x128xf32>
    %c0_2 = arith.constant 0 : index
    %c0_3 = arith.constant 0 : index
    %4 = vector.load %arg3[%c0_2, %c0_3] : memref<128x128xbf16, #tpu.memory_space<vmem>>, vector<128x128xbf16>
    %c0_4 = arith.constant 0 : index
    %c0_5 = arith.constant 0 : index
    %5 = vector.load %arg4[%c0_4, %c0_5] : memref<128x128xbf16, #tpu.memory_space<vmem>>, vector<128x128xbf16>
    %cst = arith.constant dense<0.000000e+00> : vector<128x128xf32>
    %6 = tpu.matmul %4, %5, %cst {dimension_numbers = #tpu.dot_dimension_numbers<[1], [0], [0], [1], [0, 0, 1, 1], [], []>} : vector<128x128xbf16>, vector<128x128xbf16>, vector<128x128xf32> -> vector<128x128xf32>
    %7 = arith.addf %3, %6 : vector<128x128xf32>
    %c0_6 = arith.constant 0 : index
    %c0_7 = arith.constant 0 : index
    %8 = vector.load %arg8[%c0_6, %c0_7] : memref<128x128xf32, #tpu.memory_space<vmem>>, vector<128x128xf32>
    tpu.vector_store %arg8[%c0_6, %c0_7], %7 {strides = array<i32>} : memref<128x128xf32, #tpu.memory_space<vmem>>, vector<128x128xf32>,
    %c8_i32 = arith.constant 8 : i32
    %9 = arith.cmpi eq, %arg2, %c8_i32 : i32
    %10 = arith.extui %9 : i1 to i32
    %c0_i32_8 = arith.constant 0 : i32
    %11 = arith.cmpi ne, %10, %c0_i32_8 : i32
    scf.if %11 {
      %c0_9 = arith.constant 0 : index
      %c0_10 = arith.constant 0 : index
      %12 = vector.load %arg8[%c0_9, %c0_10] : memref<128x128xf32, #tpu.memory_space<vmem>>, vector<128x128xf32>
      %c0_11 = arith.constant 0 : index
      %c0_12 = arith.constant 0 : index
      %13 = vector.load %arg5[%c0_11, %c0_12] : memref<1x128xf32, #tpu.memory_space<vmem>>, vector<1x128xf32>
      %14 = vector.broadcast %13 : vector<1x128xf32> to vector<128x128xf32>
      %15 = arith.mulf %12, %14 : vector<128x128xf32>
      %c0_13 = arith.constant 0 : index
      %c0_14 = arith.constant 0 : index
      %16 = vector.load %arg6[%c0_13, %c0_14] : memref<1x128xf32, #tpu.memory_space<vmem>>, vector<1x128xf32>
      %17 = vector.broadcast %16 : vector<1x128xf32> to vector<128x128xf32>
      %18 = arith.addf %15, %17 : vector<128x128xf32>
      %cst_15 = arith.constant 0.000000e+00 : f32
      %19 = vector.broadcast %cst_15 : f32 to vector<128x128xf32>
      %20 = arith.maximumf %18, %19 : vector<128x128xf32>
      %21 = arith.truncf %20 : vector<128x128xf32> to vector<128x128xbf16>
      %c0_16 = arith.constant 0 : index
      %c0_17 = arith.constant 0 : index
      %22 = vector.load %arg7[%c0_16, %c0_17] : memref<128x128xbf16, #tpu.memory_space<vmem>>, vector<128x128xbf16>
      tpu.vector_store %arg7[%c0_16, %c0_17], %21 {strides = array<i32>} : memref<128x128xbf16, #tpu.memory_space<vmem>>, vector<128x128xbf16>,
    } else {
    }
    return
  }
  func.func @transform_0(%arg0: i32, %arg1: i32, %arg2: i32) -> (i32, i32) {
    %c0_i32 = arith.constant 0 : i32
    return %arg0, %arg2 : i32, i32
  }
  func.func @transform_1(%arg0: i32, %arg1: i32, %arg2: i32) -> (i32, i32) {
    %c0_i32 = arith.constant 0 : i32
    return %arg2, %arg1 : i32, i32
  }
  func.func @transform_2(%arg0: i32, %arg1: i32, %arg2: i32) -> (i32, i32) {
    %c0_i32 = arith.constant 0 : i32
    %c0_i32_0 = arith.constant 0 : i32
    return %c0_i32, %arg1 : i32, i32
  }
  func.func @transform_3(%arg0: i32, %arg1: i32, %arg2: i32) -> (i32, i32) {
    %c0_i32 = arith.constant 0 : i32
    %c0_i32_0 = arith.constant 0 : i32
    return %c0_i32, %arg1 : i32, i32
  }
  func.func @transform_4(%arg0: i32, %arg1: i32, %arg2: i32) -> (i32, i32) {
    %c0_i32 = arith.constant 0 : i32
    return %arg0, %arg1 : i32, i32
  }
}

module attributes {stable_mosaic.version = 11 : i64} {
  func.func @_gemm_bn_kernel(%arg0: i32, %arg1: i32, %arg2: i32, %arg3: memref<128x128xbf16, #tpu.memory_space<vmem>>, %arg4: memref<128x128xbf16, #tpu.memory_space<vmem>>, %arg5: memref<1x128xf32, #tpu.memory_space<vmem>>, %arg6: memref<1x128xf32, #tpu.memory_space<vmem>>, %arg7: memref<128x128xbf16, #tpu.memory_space<vmem>>, %arg8: memref<128x128xf32, #tpu.memory_space<vmem>>) attributes {dimension_semantics = [#tpu.dimension_semantics<parallel>, #tpu.dimension_semantics<parallel>, #tpu.dimension_semantics<arbitrary>], iteration_bounds = array<i64: 1, 1, 1>, scalar_prefetch = 0 : i64, scratch_operands = 1 : i64, tpu.core_type = #tpu.core_type<tc>, window_params = [{transform_indices = @transform_0, window_bounds = array<i64: 128, 128>}, {transform_indices = @transform_1, window_bounds = array<i64: 128, 128>}, {transform_indices = @transform_2, window_bounds = array<i64: 1, 128>}, {transform_indices = @transform_3, window_bounds = array<i64: 1, 128>}, {transform_indices = @transform_4, window_bounds = array<i64: 128, 128>}]} {
    %c0_i32 = arith.constant 0 : i32
    %0 = arith.cmpi eq, %arg2, %c0_i32 : i32
    %1 = arith.extui %0 : i1 to i32
    %c0_i32_0 = arith.constant 0 : i32
    %2 = arith.cmpi ne, %1, %c0_i32_0 : i32
    scf.if %2 {
      %cst_10 = arith.constant 0.000000e+00 : f32
      %12 = vector.broadcast %cst_10 : f32 to vector<128x128xf32>
      %c0_11 = arith.constant 0 : index
      %c0_12 = arith.constant 0 : index
      %13 = vector.load %arg8[%c0_11, %c0_12] : memref<128x128xf32, #tpu.memory_space<vmem>>, vector<128x128xf32>
      tpu.vector_store %arg8[%c0_11, %c0_12], %12 {strides = array<i32>} : memref<128x128xf32, #tpu.memory_space<vmem>>, vector<128x128xf32>,
    } else {
    }
    %c0 = arith.constant 0 : index
    %c0_1 = arith.constant 0 : index
    %3 = vector.load %arg8[%c0, %c0_1] : memref<128x128xf32, #tpu.memory_space<vmem>>, vector<128x128xf32>
    %c0_2 = arith.constant 0 : index
    %c0_3 = arith.constant 0 : index
    %4 = vector.load %arg3[%c0_2, %c0_3] : memref<128x128xbf16, #tpu.memory_space<vmem>>, vector<128x128xbf16>
    %c0_4 = arith.constant 0 : index
    %c0_5 = arith.constant 0 : index
    %5 = vector.load %arg4[%c0_4, %c0_5] : memref<128x128xbf16, #tpu.memory_space<vmem>>, vector<128x128xbf16>
    %cst = arith.constant dense<0.000000e+00> : vector<128x128xf32>
    %6 = tpu.matmul %4, %5, %cst {dimension_numbers = #tpu.dot_dimension_numbers<[1], [0], [0], [1], [0, 0, 1, 1], [], []>} : vector<128x128xbf16>, vector<128x128xbf16>, vector<128x128xf32> -> vector<128x128xf32>
    %7 = arith.addf %3, %6 : vector<128x128xf32>
    %c0_6 = arith.constant 0 : index
    %c0_7 = arith.constant 0 : index
    %8 = vector.load %arg8[%c0_6, %c0_7] : memref<128x128xf32, #tpu.memory_space<vmem>>, vector<128x128xf32>
    tpu.vector_store %arg8[%c0_6, %c0_7], %7 {strides = array<i32>} : memref<128x128xf32, #tpu.memory_space<vmem>>, vector<128x128xf32>,
    %c0_i32_8 = arith.constant 0 : i32
    %9 = arith.cmpi eq, %arg2, %c0_i32_8 : i32
    %10 = arith.extui %9 : i1 to i32
    %c0_i32_9 = arith.constant 0 : i32
    %11 = arith.cmpi ne, %10, %c0_i32_9 : i32
    scf.if %11 {
      %c0_10 = arith.constant 0 : index
      %c0_11 = arith.constant 0 : index
      %12 = vector.load %arg8[%c0_10, %c0_11] : memref<128x128xf32, #tpu.memory_space<vmem>>, vector<128x128xf32>
      %c0_12 = arith.constant 0 : index
      %c0_13 = arith.constant 0 : index
      %13 = vector.load %arg5[%c0_12, %c0_13] : memref<1x128xf32, #tpu.memory_space<vmem>>, vector<1x128xf32>
      %14 = vector.broadcast %13 : vector<1x128xf32> to vector<128x128xf32>
      %15 = arith.mulf %12, %14 : vector<128x128xf32>
      %c0_14 = arith.constant 0 : index
      %c0_15 = arith.constant 0 : index
      %16 = vector.load %arg6[%c0_14, %c0_15] : memref<1x128xf32, #tpu.memory_space<vmem>>, vector<1x128xf32>
      %17 = vector.broadcast %16 : vector<1x128xf32> to vector<128x128xf32>
      %18 = arith.addf %15, %17 : vector<128x128xf32>
      %19 = arith.truncf %18 : vector<128x128xf32> to vector<128x128xbf16>
      %c0_16 = arith.constant 0 : index
      %c0_17 = arith.constant 0 : index
      %20 = vector.load %arg7[%c0_16, %c0_17] : memref<128x128xbf16, #tpu.memory_space<vmem>>, vector<128x128xbf16>
      tpu.vector_store %arg7[%c0_16, %c0_17], %19 {strides = array<i32>} : memref<128x128xbf16, #tpu.memory_space<vmem>>, vector<128x128xbf16>,
    } else {
    }
    return
  }
  func.func @transform_0(%arg0: i32, %arg1: i32, %arg2: i32) -> (i32, i32) {
    %c0_i32 = arith.constant 0 : i32
    return %arg0, %arg2 : i32, i32
  }
  func.func @transform_1(%arg0: i32, %arg1: i32, %arg2: i32) -> (i32, i32) {
    %c0_i32 = arith.constant 0 : i32
    return %arg2, %arg1 : i32, i32
  }
  func.func @transform_2(%arg0: i32, %arg1: i32, %arg2: i32) -> (i32, i32) {
    %c0_i32 = arith.constant 0 : i32
    %c0_i32_0 = arith.constant 0 : i32
    return %c0_i32, %arg1 : i32, i32
  }
  func.func @transform_3(%arg0: i32, %arg1: i32, %arg2: i32) -> (i32, i32) {
    %c0_i32 = arith.constant 0 : i32
    %c0_i32_0 = arith.constant 0 : i32
    return %c0_i32, %arg1 : i32, i32
  }
  func.func @transform_4(%arg0: i32, %arg1: i32, %arg2: i32) -> (i32, i32) {
    %c0_i32 = arith.constant 0 : i32
    return %arg0, %arg1 : i32, i32
  }
}

module attributes {stable_mosaic.version = 11 : i64} {
  func.func @_gemm_bn_res_kernel(%arg0: i32, %arg1: i32, %arg2: i32, %arg3: memref<128x128xbf16, #tpu.memory_space<vmem>>, %arg4: memref<128x128xbf16, #tpu.memory_space<vmem>>, %arg5: memref<1x128xf32, #tpu.memory_space<vmem>>, %arg6: memref<1x128xf32, #tpu.memory_space<vmem>>, %arg7: memref<128x128xbf16, #tpu.memory_space<vmem>>, %arg8: memref<128x128xbf16, #tpu.memory_space<vmem>>, %arg9: memref<128x128xf32, #tpu.memory_space<vmem>>) attributes {dimension_semantics = [#tpu.dimension_semantics<parallel>, #tpu.dimension_semantics<parallel>, #tpu.dimension_semantics<arbitrary>], iteration_bounds = array<i64: 1, 1, 1>, scalar_prefetch = 0 : i64, scratch_operands = 1 : i64, tpu.core_type = #tpu.core_type<tc>, window_params = [{transform_indices = @transform_0, window_bounds = array<i64: 128, 128>}, {transform_indices = @transform_1, window_bounds = array<i64: 128, 128>}, {transform_indices = @transform_2, window_bounds = array<i64: 1, 128>}, {transform_indices = @transform_3, window_bounds = array<i64: 1, 128>}, {transform_indices = @transform_4, window_bounds = array<i64: 128, 128>}, {transform_indices = @transform_5, window_bounds = array<i64: 128, 128>}]} {
    %c0_i32 = arith.constant 0 : i32
    %0 = arith.cmpi eq, %arg2, %c0_i32 : i32
    %1 = arith.extui %0 : i1 to i32
    %c0_i32_0 = arith.constant 0 : i32
    %2 = arith.cmpi ne, %1, %c0_i32_0 : i32
    scf.if %2 {
      %cst_10 = arith.constant 0.000000e+00 : f32
      %12 = vector.broadcast %cst_10 : f32 to vector<128x128xf32>
      %c0_11 = arith.constant 0 : index
      %c0_12 = arith.constant 0 : index
      %13 = vector.load %arg9[%c0_11, %c0_12] : memref<128x128xf32, #tpu.memory_space<vmem>>, vector<128x128xf32>
      tpu.vector_store %arg9[%c0_11, %c0_12], %12 {strides = array<i32>} : memref<128x128xf32, #tpu.memory_space<vmem>>, vector<128x128xf32>,
    } else {
    }
    %c0 = arith.constant 0 : index
    %c0_1 = arith.constant 0 : index
    %3 = vector.load %arg9[%c0, %c0_1] : memref<128x128xf32, #tpu.memory_space<vmem>>, vector<128x128xf32>
    %c0_2 = arith.constant 0 : index
    %c0_3 = arith.constant 0 : index
    %4 = vector.load %arg3[%c0_2, %c0_3] : memref<128x128xbf16, #tpu.memory_space<vmem>>, vector<128x128xbf16>
    %c0_4 = arith.constant 0 : index
    %c0_5 = arith.constant 0 : index
    %5 = vector.load %arg4[%c0_4, %c0_5] : memref<128x128xbf16, #tpu.memory_space<vmem>>, vector<128x128xbf16>
    %cst = arith.constant dense<0.000000e+00> : vector<128x128xf32>
    %6 = tpu.matmul %4, %5, %cst {dimension_numbers = #tpu.dot_dimension_numbers<[1], [0], [0], [1], [0, 0, 1, 1], [], []>} : vector<128x128xbf16>, vector<128x128xbf16>, vector<128x128xf32> -> vector<128x128xf32>
    %7 = arith.addf %3, %6 : vector<128x128xf32>
    %c0_6 = arith.constant 0 : index
    %c0_7 = arith.constant 0 : index
    %8 = vector.load %arg9[%c0_6, %c0_7] : memref<128x128xf32, #tpu.memory_space<vmem>>, vector<128x128xf32>
    tpu.vector_store %arg9[%c0_6, %c0_7], %7 {strides = array<i32>} : memref<128x128xf32, #tpu.memory_space<vmem>>, vector<128x128xf32>,
    %c0_i32_8 = arith.constant 0 : i32
    %9 = arith.cmpi eq, %arg2, %c0_i32_8 : i32
    %10 = arith.extui %9 : i1 to i32
    %c0_i32_9 = arith.constant 0 : i32
    %11 = arith.cmpi ne, %10, %c0_i32_9 : i32
    scf.if %11 {
      %c0_10 = arith.constant 0 : index
      %c0_11 = arith.constant 0 : index
      %12 = vector.load %arg9[%c0_10, %c0_11] : memref<128x128xf32, #tpu.memory_space<vmem>>, vector<128x128xf32>
      %c0_12 = arith.constant 0 : index
      %c0_13 = arith.constant 0 : index
      %13 = vector.load %arg5[%c0_12, %c0_13] : memref<1x128xf32, #tpu.memory_space<vmem>>, vector<1x128xf32>
      %14 = vector.broadcast %13 : vector<1x128xf32> to vector<128x128xf32>
      %15 = arith.mulf %12, %14 : vector<128x128xf32>
      %c0_14 = arith.constant 0 : index
      %c0_15 = arith.constant 0 : index
      %16 = vector.load %arg6[%c0_14, %c0_15] : memref<1x128xf32, #tpu.memory_space<vmem>>, vector<1x128xf32>
      %17 = vector.broadcast %16 : vector<1x128xf32> to vector<128x128xf32>
      %18 = arith.addf %15, %17 : vector<128x128xf32>
      %c0_16 = arith.constant 0 : index
      %c0_17 = arith.constant 0 : index
      %19 = vector.load %arg7[%c0_16, %c0_17] : memref<128x128xbf16, #tpu.memory_space<vmem>>, vector<128x128xbf16>
      %20 = arith.extf %19 : vector<128x128xbf16> to vector<128x128xf32>
      %21 = arith.addf %18, %20 : vector<128x128xf32>
      %cst_18 = arith.constant 0.000000e+00 : f32
      %22 = vector.broadcast %cst_18 : f32 to vector<128x128xf32>
      %23 = arith.maximumf %21, %22 : vector<128x128xf32>
      %24 = arith.truncf %23 : vector<128x128xf32> to vector<128x128xbf16>
      %c0_19 = arith.constant 0 : index
      %c0_20 = arith.constant 0 : index
      %25 = vector.load %arg8[%c0_19, %c0_20] : memref<128x128xbf16, #tpu.memory_space<vmem>>, vector<128x128xbf16>
      tpu.vector_store %arg8[%c0_19, %c0_20], %24 {strides = array<i32>} : memref<128x128xbf16, #tpu.memory_space<vmem>>, vector<128x128xbf16>,
    } else {
    }
    return
  }
  func.func @transform_0(%arg0: i32, %arg1: i32, %arg2: i32) -> (i32, i32) {
    %c0_i32 = arith.constant 0 : i32
    return %arg0, %arg2 : i32, i32
  }
  func.func @transform_1(%arg0: i32, %arg1: i32, %arg2: i32) -> (i32, i32) {
    %c0_i32 = arith.constant 0 : i32
    return %arg2, %arg1 : i32, i32
  }
  func.func @transform_2(%arg0: i32, %arg1: i32, %arg2: i32) -> (i32, i32) {
    %c0_i32 = arith.constant 0 : i32
    %c0_i32_0 = arith.constant 0 : i32
    return %c0_i32, %arg1 : i32, i32
  }
  func.func @transform_3(%arg0: i32, %arg1: i32, %arg2: i32) -> (i32, i32) {
    %c0_i32 = arith.constant 0 : i32
    %c0_i32_0 = arith.constant 0 : i32
    return %c0_i32, %arg1 : i32, i32
  }
  func.func @transform_4(%arg0: i32, %arg1: i32, %arg2: i32) -> (i32, i32) {
    %c0_i32 = arith.constant 0 : i32
    return %arg0, %arg1 : i32, i32
  }
  func.func @transform_5(%arg0: i32, %arg1: i32, %arg2: i32) -> (i32, i32) {
    %c0_i32 = arith.constant 0 : i32
    return %arg0, %arg1 : i32, i32
  }
}

module attributes {stable_mosaic.version = 11 : i64} {
  func.func @_gemm_bn_kernel(%arg0: i32, %arg1: i32, %arg2: i32, %arg3: memref<32x128xbf16, #tpu.memory_space<vmem>>, %arg4: memref<128x128xbf16, #tpu.memory_space<vmem>>, %arg5: memref<1x128xf32, #tpu.memory_space<vmem>>, %arg6: memref<1x128xf32, #tpu.memory_space<vmem>>, %arg7: memref<32x128xbf16, #tpu.memory_space<vmem>>, %arg8: memref<32x128xf32, #tpu.memory_space<vmem>>) attributes {dimension_semantics = [#tpu.dimension_semantics<parallel>, #tpu.dimension_semantics<parallel>, #tpu.dimension_semantics<arbitrary>], iteration_bounds = array<i64: 1, 1, 9>, scalar_prefetch = 0 : i64, scratch_operands = 1 : i64, tpu.core_type = #tpu.core_type<tc>, window_params = [{transform_indices = @transform_0, window_bounds = array<i64: 32, 128>}, {transform_indices = @transform_1, window_bounds = array<i64: 128, 128>}, {transform_indices = @transform_2, window_bounds = array<i64: 1, 128>}, {transform_indices = @transform_3, window_bounds = array<i64: 1, 128>}, {transform_indices = @transform_4, window_bounds = array<i64: 32, 128>}]} {
    %c0_i32 = arith.constant 0 : i32
    %0 = arith.cmpi eq, %arg2, %c0_i32 : i32
    %1 = arith.extui %0 : i1 to i32
    %c0_i32_0 = arith.constant 0 : i32
    %2 = arith.cmpi ne, %1, %c0_i32_0 : i32
    scf.if %2 {
      %cst_9 = arith.constant 0.000000e+00 : f32
      %12 = vector.broadcast %cst_9 : f32 to vector<32x128xf32>
      %c0_10 = arith.constant 0 : index
      %c0_11 = arith.constant 0 : index
      %13 = vector.load %arg8[%c0_10, %c0_11] : memref<32x128xf32, #tpu.memory_space<vmem>>, vector<32x128xf32>
      tpu.vector_store %arg8[%c0_10, %c0_11], %12 {strides = array<i32>} : memref<32x128xf32, #tpu.memory_space<vmem>>, vector<32x128xf32>,
    } else {
    }
    %c0 = arith.constant 0 : index
    %c0_1 = arith.constant 0 : index
    %3 = vector.load %arg8[%c0, %c0_1] : memref<32x128xf32, #tpu.memory_space<vmem>>, vector<32x128xf32>
    %c0_2 = arith.constant 0 : index
    %c0_3 = arith.constant 0 : index
    %4 = vector.load %arg3[%c0_2, %c0_3] : memref<32x128xbf16, #tpu.memory_space<vmem>>, vector<32x128xbf16>
    %c0_4 = arith.constant 0 : index
    %c0_5 = arith.constant 0 : index
    %5 = vector.load %arg4[%c0_4, %c0_5] : memref<128x128xbf16, #tpu.memory_space<vmem>>, vector<128x128xbf16>
    %cst = arith.constant dense<0.000000e+00> : vector<32x128xf32>
    %6 = tpu.matmul %4, %5, %cst {dimension_numbers = #tpu.dot_dimension_numbers<[1], [0], [0], [1], [0, 0, 1, 1], [], []>} : vector<32x128xbf16>, vector<128x128xbf16>, vector<32x128xf32> -> vector<32x128xf32>
    %7 = arith.addf %3, %6 : vector<32x128xf32>
    %c0_6 = arith.constant 0 : index
    %c0_7 = arith.constant 0 : index
    %8 = vector.load %arg8[%c0_6, %c0_7] : memref<32x128xf32, #tpu.memory_space<vmem>>, vector<32x128xf32>
    tpu.vector_store %arg8[%c0_6, %c0_7], %7 {strides = array<i32>} : memref<32x128xf32, #tpu.memory_space<vmem>>, vector<32x128xf32>,
    %c8_i32 = arith.constant 8 : i32
    %9 = arith.cmpi eq, %arg2, %c8_i32 : i32
    %10 = arith.extui %9 : i1 to i32
    %c0_i32_8 = arith.constant 0 : i32
    %11 = arith.cmpi ne, %10, %c0_i32_8 : i32
    scf.if %11 {
      %c0_9 = arith.constant 0 : index
      %c0_10 = arith.constant 0 : index
      %12 = vector.load %arg8[%c0_9, %c0_10] : memref<32x128xf32, #tpu.memory_space<vmem>>, vector<32x128xf32>
      %c0_11 = arith.constant 0 : index
      %c0_12 = arith.constant 0 : index
      %13 = vector.load %arg5[%c0_11, %c0_12] : memref<1x128xf32, #tpu.memory_space<vmem>>, vector<1x128xf32>
      %14 = vector.broadcast %13 : vector<1x128xf32> to vector<32x128xf32>
      %15 = arith.mulf %12, %14 : vector<32x128xf32>
      %c0_13 = arith.constant 0 : index
      %c0_14 = arith.constant 0 : index
      %16 = vector.load %arg6[%c0_13, %c0_14] : memref<1x128xf32, #tpu.memory_space<vmem>>, vector<1x128xf32>
      %17 = vector.broadcast %16 : vector<1x128xf32> to vector<32x128xf32>
      %18 = arith.addf %15, %17 : vector<32x128xf32>
      %cst_15 = arith.constant 0.000000e+00 : f32
      %19 = vector.broadcast %cst_15 : f32 to vector<32x128xf32>
      %20 = arith.maximumf %18, %19 : vector<32x128xf32>
      %21 = arith.truncf %20 : vector<32x128xf32> to vector<32x128xbf16>
      %c0_16 = arith.constant 0 : index
      %c0_17 = arith.constant 0 : index
      %22 = vector.load %arg7[%c0_16, %c0_17] : memref<32x128xbf16, #tpu.memory_space<vmem>>, vector<32x128xbf16>
      tpu.vector_store %arg7[%c0_16, %c0_17], %21 {strides = array<i32>} : memref<32x128xbf16, #tpu.memory_space<vmem>>, vector<32x128xbf16>,
    } else {
    }
    return
  }
  func.func @transform_0(%arg0: i32, %arg1: i32, %arg2: i32) -> (i32, i32) {
    %c0_i32 = arith.constant 0 : i32
    return %arg0, %arg2 : i32, i32
  }
  func.func @transform_1(%arg0: i32, %arg1: i32, %arg2: i32) -> (i32, i32) {
    %c0_i32 = arith.constant 0 : i32
    return %arg2, %arg1 : i32, i32
  }
  func.func @transform_2(%arg0: i32, %arg1: i32, %arg2: i32) -> (i32, i32) {
    %c0_i32 = arith.constant 0 : i32
    %c0_i32_0 = arith.constant 0 : i32
    return %c0_i32, %arg1 : i32, i32
  }
  func.func @transform_3(%arg0: i32, %arg1: i32, %arg2: i32) -> (i32, i32) {
    %c0_i32 = arith.constant 0 : i32
    %c0_i32_0 = arith.constant 0 : i32
    return %c0_i32, %arg1 : i32, i32
  }
  func.func @transform_4(%arg0: i32, %arg1: i32, %arg2: i32) -> (i32, i32) {
    %c0_i32 = arith.constant 0 : i32
    return %arg0, %arg1 : i32, i32
  }
}

module attributes {stable_mosaic.version = 11 : i64} {
  func.func @_gemm_bn_kernel(%arg0: i32, %arg1: i32, %arg2: i32, %arg3: memref<32x128xbf16, #tpu.memory_space<vmem>>, %arg4: memref<128x128xbf16, #tpu.memory_space<vmem>>, %arg5: memref<1x128xf32, #tpu.memory_space<vmem>>, %arg6: memref<1x128xf32, #tpu.memory_space<vmem>>, %arg7: memref<32x128xbf16, #tpu.memory_space<vmem>>, %arg8: memref<32x128xf32, #tpu.memory_space<vmem>>) attributes {dimension_semantics = [#tpu.dimension_semantics<parallel>, #tpu.dimension_semantics<parallel>, #tpu.dimension_semantics<arbitrary>], iteration_bounds = array<i64: 1, 1, 1>, scalar_prefetch = 0 : i64, scratch_operands = 1 : i64, tpu.core_type = #tpu.core_type<tc>, window_params = [{transform_indices = @transform_0, window_bounds = array<i64: 32, 128>}, {transform_indices = @transform_1, window_bounds = array<i64: 128, 128>}, {transform_indices = @transform_2, window_bounds = array<i64: 1, 128>}, {transform_indices = @transform_3, window_bounds = array<i64: 1, 128>}, {transform_indices = @transform_4, window_bounds = array<i64: 32, 128>}]} {
    %c0_i32 = arith.constant 0 : i32
    %0 = arith.cmpi eq, %arg2, %c0_i32 : i32
    %1 = arith.extui %0 : i1 to i32
    %c0_i32_0 = arith.constant 0 : i32
    %2 = arith.cmpi ne, %1, %c0_i32_0 : i32
    scf.if %2 {
      %cst_10 = arith.constant 0.000000e+00 : f32
      %12 = vector.broadcast %cst_10 : f32 to vector<32x128xf32>
      %c0_11 = arith.constant 0 : index
      %c0_12 = arith.constant 0 : index
      %13 = vector.load %arg8[%c0_11, %c0_12] : memref<32x128xf32, #tpu.memory_space<vmem>>, vector<32x128xf32>
      tpu.vector_store %arg8[%c0_11, %c0_12], %12 {strides = array<i32>} : memref<32x128xf32, #tpu.memory_space<vmem>>, vector<32x128xf32>,
    } else {
    }
    %c0 = arith.constant 0 : index
    %c0_1 = arith.constant 0 : index
    %3 = vector.load %arg8[%c0, %c0_1] : memref<32x128xf32, #tpu.memory_space<vmem>>, vector<32x128xf32>
    %c0_2 = arith.constant 0 : index
    %c0_3 = arith.constant 0 : index
    %4 = vector.load %arg3[%c0_2, %c0_3] : memref<32x128xbf16, #tpu.memory_space<vmem>>, vector<32x128xbf16>
    %c0_4 = arith.constant 0 : index
    %c0_5 = arith.constant 0 : index
    %5 = vector.load %arg4[%c0_4, %c0_5] : memref<128x128xbf16, #tpu.memory_space<vmem>>, vector<128x128xbf16>
    %cst = arith.constant dense<0.000000e+00> : vector<32x128xf32>
    %6 = tpu.matmul %4, %5, %cst {dimension_numbers = #tpu.dot_dimension_numbers<[1], [0], [0], [1], [0, 0, 1, 1], [], []>} : vector<32x128xbf16>, vector<128x128xbf16>, vector<32x128xf32> -> vector<32x128xf32>
    %7 = arith.addf %3, %6 : vector<32x128xf32>
    %c0_6 = arith.constant 0 : index
    %c0_7 = arith.constant 0 : index
    %8 = vector.load %arg8[%c0_6, %c0_7] : memref<32x128xf32, #tpu.memory_space<vmem>>, vector<32x128xf32>
    tpu.vector_store %arg8[%c0_6, %c0_7], %7 {strides = array<i32>} : memref<32x128xf32, #tpu.memory_space<vmem>>, vector<32x128xf32>,
    %c0_i32_8 = arith.constant 0 : i32
    %9 = arith.cmpi eq, %arg2, %c0_i32_8 : i32
    %10 = arith.extui %9 : i1 to i32
    %c0_i32_9 = arith.constant 0 : i32
    %11 = arith.cmpi ne, %10, %c0_i32_9 : i32
    scf.if %11 {
      %c0_10 = arith.constant 0 : index
      %c0_11 = arith.constant 0 : index
      %12 = vector.load %arg8[%c0_10, %c0_11] : memref<32x128xf32, #tpu.memory_space<vmem>>, vector<32x128xf32>
      %c0_12 = arith.constant 0 : index
      %c0_13 = arith.constant 0 : index
      %13 = vector.load %arg5[%c0_12, %c0_13] : memref<1x128xf32, #tpu.memory_space<vmem>>, vector<1x128xf32>
      %14 = vector.broadcast %13 : vector<1x128xf32> to vector<32x128xf32>
      %15 = arith.mulf %12, %14 : vector<32x128xf32>
      %c0_14 = arith.constant 0 : index
      %c0_15 = arith.constant 0 : index
      %16 = vector.load %arg6[%c0_14, %c0_15] : memref<1x128xf32, #tpu.memory_space<vmem>>, vector<1x128xf32>
      %17 = vector.broadcast %16 : vector<1x128xf32> to vector<32x128xf32>
      %18 = arith.addf %15, %17 : vector<32x128xf32>
      %19 = arith.truncf %18 : vector<32x128xf32> to vector<32x128xbf16>
      %c0_16 = arith.constant 0 : index
      %c0_17 = arith.constant 0 : index
      %20 = vector.load %arg7[%c0_16, %c0_17] : memref<32x128xbf16, #tpu.memory_space<vmem>>, vector<32x128xbf16>
      tpu.vector_store %arg7[%c0_16, %c0_17], %19 {strides = array<i32>} : memref<32x128xbf16, #tpu.memory_space<vmem>>, vector<32x128xbf16>,
    } else {
    }
    return
  }
  func.func @transform_0(%arg0: i32, %arg1: i32, %arg2: i32) -> (i32, i32) {
    %c0_i32 = arith.constant 0 : i32
    return %arg0, %arg2 : i32, i32
  }
  func.func @transform_1(%arg0: i32, %arg1: i32, %arg2: i32) -> (i32, i32) {
    %c0_i32 = arith.constant 0 : i32
    return %arg2, %arg1 : i32, i32
  }
  func.func @transform_2(%arg0: i32, %arg1: i32, %arg2: i32) -> (i32, i32) {
    %c0_i32 = arith.constant 0 : i32
    %c0_i32_0 = arith.constant 0 : i32
    return %c0_i32, %arg1 : i32, i32
  }
  func.func @transform_3(%arg0: i32, %arg1: i32, %arg2: i32) -> (i32, i32) {
    %c0_i32 = arith.constant 0 : i32
    %c0_i32_0 = arith.constant 0 : i32
    return %c0_i32, %arg1 : i32, i32
  }
  func.func @transform_4(%arg0: i32, %arg1: i32, %arg2: i32) -> (i32, i32) {
    %c0_i32 = arith.constant 0 : i32
    return %arg0, %arg1 : i32, i32
  }
}

module attributes {stable_mosaic.version = 11 : i64} {
  func.func @_gemm_bn_res_kernel(%arg0: i32, %arg1: i32, %arg2: i32, %arg3: memref<32x128xbf16, #tpu.memory_space<vmem>>, %arg4: memref<128x128xbf16, #tpu.memory_space<vmem>>, %arg5: memref<1x128xf32, #tpu.memory_space<vmem>>, %arg6: memref<1x128xf32, #tpu.memory_space<vmem>>, %arg7: memref<32x128xbf16, #tpu.memory_space<vmem>>, %arg8: memref<32x128xbf16, #tpu.memory_space<vmem>>, %arg9: memref<32x128xf32, #tpu.memory_space<vmem>>) attributes {dimension_semantics = [#tpu.dimension_semantics<parallel>, #tpu.dimension_semantics<parallel>, #tpu.dimension_semantics<arbitrary>], iteration_bounds = array<i64: 1, 1, 1>, scalar_prefetch = 0 : i64, scratch_operands = 1 : i64, tpu.core_type = #tpu.core_type<tc>, window_params = [{transform_indices = @transform_0, window_bounds = array<i64: 32, 128>}, {transform_indices = @transform_1, window_bounds = array<i64: 128, 128>}, {transform_indices = @transform_2, window_bounds = array<i64: 1, 128>}, {transform_indices = @transform_3, window_bounds = array<i64: 1, 128>}, {transform_indices = @transform_4, window_bounds = array<i64: 32, 128>}, {transform_indices = @transform_5, window_bounds = array<i64: 32, 128>}]} {
    %c0_i32 = arith.constant 0 : i32
    %0 = arith.cmpi eq, %arg2, %c0_i32 : i32
    %1 = arith.extui %0 : i1 to i32
    %c0_i32_0 = arith.constant 0 : i32
    %2 = arith.cmpi ne, %1, %c0_i32_0 : i32
    scf.if %2 {
      %cst_10 = arith.constant 0.000000e+00 : f32
      %12 = vector.broadcast %cst_10 : f32 to vector<32x128xf32>
      %c0_11 = arith.constant 0 : index
      %c0_12 = arith.constant 0 : index
      %13 = vector.load %arg9[%c0_11, %c0_12] : memref<32x128xf32, #tpu.memory_space<vmem>>, vector<32x128xf32>
      tpu.vector_store %arg9[%c0_11, %c0_12], %12 {strides = array<i32>} : memref<32x128xf32, #tpu.memory_space<vmem>>, vector<32x128xf32>,
    } else {
    }
    %c0 = arith.constant 0 : index
    %c0_1 = arith.constant 0 : index
    %3 = vector.load %arg9[%c0, %c0_1] : memref<32x128xf32, #tpu.memory_space<vmem>>, vector<32x128xf32>
    %c0_2 = arith.constant 0 : index
    %c0_3 = arith.constant 0 : index
    %4 = vector.load %arg3[%c0_2, %c0_3] : memref<32x128xbf16, #tpu.memory_space<vmem>>, vector<32x128xbf16>
    %c0_4 = arith.constant 0 : index
    %c0_5 = arith.constant 0 : index
    %5 = vector.load %arg4[%c0_4, %c0_5] : memref<128x128xbf16, #tpu.memory_space<vmem>>, vector<128x128xbf16>
    %cst = arith.constant dense<0.000000e+00> : vector<32x128xf32>
    %6 = tpu.matmul %4, %5, %cst {dimension_numbers = #tpu.dot_dimension_numbers<[1], [0], [0], [1], [0, 0, 1, 1], [], []>} : vector<32x128xbf16>, vector<128x128xbf16>, vector<32x128xf32> -> vector<32x128xf32>
    %7 = arith.addf %3, %6 : vector<32x128xf32>
    %c0_6 = arith.constant 0 : index
    %c0_7 = arith.constant 0 : index
    %8 = vector.load %arg9[%c0_6, %c0_7] : memref<32x128xf32, #tpu.memory_space<vmem>>, vector<32x128xf32>
    tpu.vector_store %arg9[%c0_6, %c0_7], %7 {strides = array<i32>} : memref<32x128xf32, #tpu.memory_space<vmem>>, vector<32x128xf32>,
    %c0_i32_8 = arith.constant 0 : i32
    %9 = arith.cmpi eq, %arg2, %c0_i32_8 : i32
    %10 = arith.extui %9 : i1 to i32
    %c0_i32_9 = arith.constant 0 : i32
    %11 = arith.cmpi ne, %10, %c0_i32_9 : i32
    scf.if %11 {
      %c0_10 = arith.constant 0 : index
      %c0_11 = arith.constant 0 : index
      %12 = vector.load %arg9[%c0_10, %c0_11] : memref<32x128xf32, #tpu.memory_space<vmem>>, vector<32x128xf32>
      %c0_12 = arith.constant 0 : index
      %c0_13 = arith.constant 0 : index
      %13 = vector.load %arg5[%c0_12, %c0_13] : memref<1x128xf32, #tpu.memory_space<vmem>>, vector<1x128xf32>
      %14 = vector.broadcast %13 : vector<1x128xf32> to vector<32x128xf32>
      %15 = arith.mulf %12, %14 : vector<32x128xf32>
      %c0_14 = arith.constant 0 : index
      %c0_15 = arith.constant 0 : index
      %16 = vector.load %arg6[%c0_14, %c0_15] : memref<1x128xf32, #tpu.memory_space<vmem>>, vector<1x128xf32>
      %17 = vector.broadcast %16 : vector<1x128xf32> to vector<32x128xf32>
      %18 = arith.addf %15, %17 : vector<32x128xf32>
      %c0_16 = arith.constant 0 : index
      %c0_17 = arith.constant 0 : index
      %19 = vector.load %arg7[%c0_16, %c0_17] : memref<32x128xbf16, #tpu.memory_space<vmem>>, vector<32x128xbf16>
      %20 = arith.extf %19 : vector<32x128xbf16> to vector<32x128xf32>
      %21 = arith.addf %18, %20 : vector<32x128xf32>
      %cst_18 = arith.constant 0.000000e+00 : f32
      %22 = vector.broadcast %cst_18 : f32 to vector<32x128xf32>
      %23 = arith.maximumf %21, %22 : vector<32x128xf32>
      %24 = arith.truncf %23 : vector<32x128xf32> to vector<32x128xbf16>
      %c0_19 = arith.constant 0 : index
      %c0_20 = arith.constant 0 : index
      %25 = vector.load %arg8[%c0_19, %c0_20] : memref<32x128xbf16, #tpu.memory_space<vmem>>, vector<32x128xbf16>
      tpu.vector_store %arg8[%c0_19, %c0_20], %24 {strides = array<i32>} : memref<32x128xbf16, #tpu.memory_space<vmem>>, vector<32x128xbf16>,
    } else {
    }
    return
  }
  func.func @transform_0(%arg0: i32, %arg1: i32, %arg2: i32) -> (i32, i32) {
    %c0_i32 = arith.constant 0 : i32
    return %arg0, %arg2 : i32, i32
  }
  func.func @transform_1(%arg0: i32, %arg1: i32, %arg2: i32) -> (i32, i32) {
    %c0_i32 = arith.constant 0 : i32
    return %arg2, %arg1 : i32, i32
  }
  func.func @transform_2(%arg0: i32, %arg1: i32, %arg2: i32) -> (i32, i32) {
    %c0_i32 = arith.constant 0 : i32
    %c0_i32_0 = arith.constant 0 : i32
    return %c0_i32, %arg1 : i32, i32
  }
  func.func @transform_3(%arg0: i32, %arg1: i32, %arg2: i32) -> (i32, i32) {
    %c0_i32 = arith.constant 0 : i32
    %c0_i32_0 = arith.constant 0 : i32
    return %c0_i32, %arg1 : i32, i32
  }
  func.func @transform_4(%arg0: i32, %arg1: i32, %arg2: i32) -> (i32, i32) {
    %c0_i32 = arith.constant 0 : i32
    return %arg0, %arg1 : i32, i32
  }
  func.func @transform_5(%arg0: i32, %arg1: i32, %arg2: i32) -> (i32, i32) {
    %c0_i32 = arith.constant 0 : i32
    return %arg0, %arg1 : i32, i32
  }
}

module attributes {stable_mosaic.version = 11 : i64} {
  func.func @_gemm_bn_kernel(%arg0: i32, %arg1: i32, %arg2: i32, %arg3: memref<32x128xbf16, #tpu.memory_space<vmem>>, %arg4: memref<128x128xbf16, #tpu.memory_space<vmem>>, %arg5: memref<1x128xf32, #tpu.memory_space<vmem>>, %arg6: memref<1x128xf32, #tpu.memory_space<vmem>>, %arg7: memref<32x128xbf16, #tpu.memory_space<vmem>>, %arg8: memref<32x128xf32, #tpu.memory_space<vmem>>) attributes {dimension_semantics = [#tpu.dimension_semantics<parallel>, #tpu.dimension_semantics<parallel>, #tpu.dimension_semantics<arbitrary>], iteration_bounds = array<i64: 1, 1, 1>, scalar_prefetch = 0 : i64, scratch_operands = 1 : i64, tpu.core_type = #tpu.core_type<tc>, window_params = [{transform_indices = @transform_0, window_bounds = array<i64: 32, 128>}, {transform_indices = @transform_1, window_bounds = array<i64: 128, 128>}, {transform_indices = @transform_2, window_bounds = array<i64: 1, 128>}, {transform_indices = @transform_3, window_bounds = array<i64: 1, 128>}, {transform_indices = @transform_4, window_bounds = array<i64: 32, 128>}]} {
    %c0_i32 = arith.constant 0 : i32
    %0 = arith.cmpi eq, %arg2, %c0_i32 : i32
    %1 = arith.extui %0 : i1 to i32
    %c0_i32_0 = arith.constant 0 : i32
    %2 = arith.cmpi ne, %1, %c0_i32_0 : i32
    scf.if %2 {
      %cst_10 = arith.constant 0.000000e+00 : f32
      %12 = vector.broadcast %cst_10 : f32 to vector<32x128xf32>
      %c0_11 = arith.constant 0 : index
      %c0_12 = arith.constant 0 : index
      %13 = vector.load %arg8[%c0_11, %c0_12] : memref<32x128xf32, #tpu.memory_space<vmem>>, vector<32x128xf32>
      tpu.vector_store %arg8[%c0_11, %c0_12], %12 {strides = array<i32>} : memref<32x128xf32, #tpu.memory_space<vmem>>, vector<32x128xf32>,
    } else {
    }
    %c0 = arith.constant 0 : index
    %c0_1 = arith.constant 0 : index
    %3 = vector.load %arg8[%c0, %c0_1] : memref<32x128xf32, #tpu.memory_space<vmem>>, vector<32x128xf32>
    %c0_2 = arith.constant 0 : index
    %c0_3 = arith.constant 0 : index
    %4 = vector.load %arg3[%c0_2, %c0_3] : memref<32x128xbf16, #tpu.memory_space<vmem>>, vector<32x128xbf16>
    %c0_4 = arith.constant 0 : index
    %c0_5 = arith.constant 0 : index
    %5 = vector.load %arg4[%c0_4, %c0_5] : memref<128x128xbf16, #tpu.memory_space<vmem>>, vector<128x128xbf16>
    %cst = arith.constant dense<0.000000e+00> : vector<32x128xf32>
    %6 = tpu.matmul %4, %5, %cst {dimension_numbers = #tpu.dot_dimension_numbers<[1], [0], [0], [1], [0, 0, 1, 1], [], []>} : vector<32x128xbf16>, vector<128x128xbf16>, vector<32x128xf32> -> vector<32x128xf32>
    %7 = arith.addf %3, %6 : vector<32x128xf32>
    %c0_6 = arith.constant 0 : index
    %c0_7 = arith.constant 0 : index
    %8 = vector.load %arg8[%c0_6, %c0_7] : memref<32x128xf32, #tpu.memory_space<vmem>>, vector<32x128xf32>
    tpu.vector_store %arg8[%c0_6, %c0_7], %7 {strides = array<i32>} : memref<32x128xf32, #tpu.memory_space<vmem>>, vector<32x128xf32>,
    %c0_i32_8 = arith.constant 0 : i32
    %9 = arith.cmpi eq, %arg2, %c0_i32_8 : i32
    %10 = arith.extui %9 : i1 to i32
    %c0_i32_9 = arith.constant 0 : i32
    %11 = arith.cmpi ne, %10, %c0_i32_9 : i32
    scf.if %11 {
      %c0_10 = arith.constant 0 : index
      %c0_11 = arith.constant 0 : index
      %12 = vector.load %arg8[%c0_10, %c0_11] : memref<32x128xf32, #tpu.memory_space<vmem>>, vector<32x128xf32>
      %c0_12 = arith.constant 0 : index
      %c0_13 = arith.constant 0 : index
      %13 = vector.load %arg5[%c0_12, %c0_13] : memref<1x128xf32, #tpu.memory_space<vmem>>, vector<1x128xf32>
      %14 = vector.broadcast %13 : vector<1x128xf32> to vector<32x128xf32>
      %15 = arith.mulf %12, %14 : vector<32x128xf32>
      %c0_14 = arith.constant 0 : index
      %c0_15 = arith.constant 0 : index
      %16 = vector.load %arg6[%c0_14, %c0_15] : memref<1x128xf32, #tpu.memory_space<vmem>>, vector<1x128xf32>
      %17 = vector.broadcast %16 : vector<1x128xf32> to vector<32x128xf32>
      %18 = arith.addf %15, %17 : vector<32x128xf32>
      %cst_16 = arith.constant 0.000000e+00 : f32
      %19 = vector.broadcast %cst_16 : f32 to vector<32x128xf32>
      %20 = arith.maximumf %18, %19 : vector<32x128xf32>
      %21 = arith.truncf %20 : vector<32x128xf32> to vector<32x128xbf16>
      %c0_17 = arith.constant 0 : index
      %c0_18 = arith.constant 0 : index
      %22 = vector.load %arg7[%c0_17, %c0_18] : memref<32x128xbf16, #tpu.memory_space<vmem>>, vector<32x128xbf16>
      tpu.vector_store %arg7[%c0_17, %c0_18], %21 {strides = array<i32>} : memref<32x128xbf16, #tpu.memory_space<vmem>>, vector<32x128xbf16>,
    } else {
    }
    return
  }
  func.func @transform_0(%arg0: i32, %arg1: i32, %arg2: i32) -> (i32, i32) {
    %c0_i32 = arith.constant 0 : i32
    return %arg0, %arg2 : i32, i32
  }
  func.func @transform_1(%arg0: i32, %arg1: i32, %arg2: i32) -> (i32, i32) {
    %c0_i32 = arith.constant 0 : i32
    return %arg2, %arg1 : i32, i32
  }
  func.func @transform_2(%arg0: i32, %arg1: i32, %arg2: i32) -> (i32, i32) {
    %c0_i32 = arith.constant 0 : i32
    %c0_i32_0 = arith.constant 0 : i32
    return %c0_i32, %arg1 : i32, i32
  }
  func.func @transform_3(%arg0: i32, %arg1: i32, %arg2: i32) -> (i32, i32) {
    %c0_i32 = arith.constant 0 : i32
    %c0_i32_0 = arith.constant 0 : i32
    return %c0_i32, %arg1 : i32, i32
  }
  func.func @transform_4(%arg0: i32, %arg1: i32, %arg2: i32) -> (i32, i32) {
    %c0_i32 = arith.constant 0 : i32
    return %arg0, %arg1 : i32, i32
  }
}

module attributes {stable_mosaic.version = 11 : i64} {
  func.func @_gemm_bn_res_kernel(%arg0: i32, %arg1: i32, %arg2: i32, %arg3: memref<32x128xbf16, #tpu.memory_space<vmem>>, %arg4: memref<128x128xbf16, #tpu.memory_space<vmem>>, %arg5: memref<1x128xf32, #tpu.memory_space<vmem>>, %arg6: memref<1x128xf32, #tpu.memory_space<vmem>>, %arg7: memref<32x128xbf16, #tpu.memory_space<vmem>>, %arg8: memref<32x128xbf16, #tpu.memory_space<vmem>>, %arg9: memref<32x128xf32, #tpu.memory_space<vmem>>) attributes {dimension_semantics = [#tpu.dimension_semantics<parallel>, #tpu.dimension_semantics<parallel>, #tpu.dimension_semantics<arbitrary>], iteration_bounds = array<i64: 1, 1, 1>, scalar_prefetch = 0 : i64, scratch_operands = 1 : i64, tpu.core_type = #tpu.core_type<tc>, window_params = [{transform_indices = @transform_0, window_bounds = array<i64: 32, 128>}, {transform_indices = @transform_1, window_bounds = array<i64: 128, 128>}, {transform_indices = @transform_2, window_bounds = array<i64: 1, 128>}, {transform_indices = @transform_3, window_bounds = array<i64: 1, 128>}, {transform_indices = @transform_4, window_bounds = array<i64: 32, 128>}, {transform_indices = @transform_5, window_bounds = array<i64: 32, 128>}]} {
    %c0_i32 = arith.constant 0 : i32
    %0 = arith.cmpi eq, %arg2, %c0_i32 : i32
    %1 = arith.extui %0 : i1 to i32
    %c0_i32_0 = arith.constant 0 : i32
    %2 = arith.cmpi ne, %1, %c0_i32_0 : i32
    scf.if %2 {
      %cst_10 = arith.constant 0.000000e+00 : f32
      %12 = vector.broadcast %cst_10 : f32 to vector<32x128xf32>
      %c0_11 = arith.constant 0 : index
      %c0_12 = arith.constant 0 : index
      %13 = vector.load %arg9[%c0_11, %c0_12] : memref<32x128xf32, #tpu.memory_space<vmem>>, vector<32x128xf32>
      tpu.vector_store %arg9[%c0_11, %c0_12], %12 {strides = array<i32>} : memref<32x128xf32, #tpu.memory_space<vmem>>, vector<32x128xf32>,
    } else {
    }
    %c0 = arith.constant 0 : index
    %c0_1 = arith.constant 0 : index
    %3 = vector.load %arg9[%c0, %c0_1] : memref<32x128xf32, #tpu.memory_space<vmem>>, vector<32x128xf32>
    %c0_2 = arith.constant 0 : index
    %c0_3 = arith.constant 0 : index
    %4 = vector.load %arg3[%c0_2, %c0_3] : memref<32x128xbf16, #tpu.memory_space<vmem>>, vector<32x128xbf16>
    %c0_4 = arith.constant 0 : index
    %c0_5 = arith.constant 0 : index
    %5 = vector.load %arg4[%c0_4, %c0_5] : memref<128x128xbf16, #tpu.memory_space<vmem>>, vector<128x128xbf16>
    %cst = arith.constant dense<0.000000e+00> : vector<32x128xf32>
    %6 = tpu.matmul %4, %5, %cst {dimension_numbers = #tpu.dot_dimension_numbers<[1], [0], [0], [1], [0, 0, 1, 1], [], []>} : vector<32x128xbf16>, vector<128x128xbf16>, vector<32x128xf32> -> vector<32x128xf32>
    %7 = arith.addf %3, %6 : vector<32x128xf32>
    %c0_6 = arith.constant 0 : index
    %c0_7 = arith.constant 0 : index
    %8 = vector.load %arg9[%c0_6, %c0_7] : memref<32x128xf32, #tpu.memory_space<vmem>>, vector<32x128xf32>
    tpu.vector_store %arg9[%c0_6, %c0_7], %7 {strides = array<i32>} : memref<32x128xf32, #tpu.memory_space<vmem>>, vector<32x128xf32>,
    %c0_i32_8 = arith.constant 0 : i32
    %9 = arith.cmpi eq, %arg2, %c0_i32_8 : i32
    %10 = arith.extui %9 : i1 to i32
    %c0_i32_9 = arith.constant 0 : i32
    %11 = arith.cmpi ne, %10, %c0_i32_9 : i32
    scf.if %11 {
      %c0_10 = arith.constant 0 : index
      %c0_11 = arith.constant 0 : index
      %12 = vector.load %arg9[%c0_10, %c0_11] : memref<32x128xf32, #tpu.memory_space<vmem>>, vector<32x128xf32>
      %c0_12 = arith.constant 0 : index
      %c0_13 = arith.constant 0 : index
      %13 = vector.load %arg5[%c0_12, %c0_13] : memref<1x128xf32, #tpu.memory_space<vmem>>, vector<1x128xf32>
      %14 = vector.broadcast %13 : vector<1x128xf32> to vector<32x128xf32>
      %15 = arith.mulf %12, %14 : vector<32x128xf32>
      %c0_14 = arith.constant 0 : index
      %c0_15 = arith.constant 0 : index
      %16 = vector.load %arg6[%c0_14, %c0_15] : memref<1x128xf32, #tpu.memory_space<vmem>>, vector<1x128xf32>
      %17 = vector.broadcast %16 : vector<1x128xf32> to vector<32x128xf32>
      %18 = arith.addf %15, %17 : vector<32x128xf32>
      %c0_16 = arith.constant 0 : index
      %c0_17 = arith.constant 0 : index
      %19 = vector.load %arg7[%c0_16, %c0_17] : memref<32x128xbf16, #tpu.memory_space<vmem>>, vector<32x128xbf16>
      %20 = arith.extf %19 : vector<32x128xbf16> to vector<32x128xf32>
      %21 = arith.addf %18, %20 : vector<32x128xf32>
      %cst_18 = arith.constant 0.000000e+00 : f32
      %22 = vector.broadcast %cst_18 : f32 to vector<32x128xf32>
      %23 = arith.maximumf %21, %22 : vector<32x128xf32>
      %24 = arith.truncf %23 : vector<32x128xf32> to vector<32x128xbf16>
      %c0_19 = arith.constant 0 : index
      %c0_20 = arith.constant 0 : index
      %25 = vector.load %arg8[%c0_19, %c0_20] : memref<32x128xbf16, #tpu.memory_space<vmem>>, vector<32x128xbf16>
      tpu.vector_store %arg8[%c0_19, %c0_20], %24 {strides = array<i32>} : memref<32x128xbf16, #tpu.memory_space<vmem>>, vector<32x128xbf16>,
    } else {
    }
    return
  }
  func.func @transform_0(%arg0: i32, %arg1: i32, %arg2: i32) -> (i32, i32) {
    %c0_i32 = arith.constant 0 : i32
    return %arg0, %arg2 : i32, i32
  }
  func.func @transform_1(%arg0: i32, %arg1: i32, %arg2: i32) -> (i32, i32) {
    %c0_i32 = arith.constant 0 : i32
    return %arg2, %arg1 : i32, i32
  }
  func.func @transform_2(%arg0: i32, %arg1: i32, %arg2: i32) -> (i32, i32) {
    %c0_i32 = arith.constant 0 : i32
    %c0_i32_0 = arith.constant 0 : i32
    return %c0_i32, %arg1 : i32, i32
  }
  func.func @transform_3(%arg0: i32, %arg1: i32, %arg2: i32) -> (i32, i32) {
    %c0_i32 = arith.constant 0 : i32
    %c0_i32_0 = arith.constant 0 : i32
    return %c0_i32, %arg1 : i32, i32
  }
  func.func @transform_4(%arg0: i32, %arg1: i32, %arg2: i32) -> (i32, i32) {
    %c0_i32 = arith.constant 0 : i32
    return %arg0, %arg1 : i32, i32
  }
  func.func @transform_5(%arg0: i32, %arg1: i32, %arg2: i32) -> (i32, i32) {
    %c0_i32 = arith.constant 0 : i32
    return %arg0, %arg1 : i32, i32
  }
}

module attributes {stable_mosaic.version = 11 : i64} {
  func.func @_gemm_bn_kernel(%arg0: i32, %arg1: i32, %arg2: i32, %arg3: memref<32x128xbf16, #tpu.memory_space<vmem>>, %arg4: memref<128x128xbf16, #tpu.memory_space<vmem>>, %arg5: memref<1x128xf32, #tpu.memory_space<vmem>>, %arg6: memref<1x128xf32, #tpu.memory_space<vmem>>, %arg7: memref<32x128xbf16, #tpu.memory_space<vmem>>, %arg8: memref<32x128xf32, #tpu.memory_space<vmem>>) attributes {dimension_semantics = [#tpu.dimension_semantics<parallel>, #tpu.dimension_semantics<parallel>, #tpu.dimension_semantics<arbitrary>], iteration_bounds = array<i64: 1, 1, 1>, scalar_prefetch = 0 : i64, scratch_operands = 1 : i64, tpu.core_type = #tpu.core_type<tc>, window_params = [{transform_indices = @transform_0, window_bounds = array<i64: 32, 128>}, {transform_indices = @transform_1, window_bounds = array<i64: 128, 128>}, {transform_indices = @transform_2, window_bounds = array<i64: 1, 128>}, {transform_indices = @transform_3, window_bounds = array<i64: 1, 128>}, {transform_indices = @transform_4, window_bounds = array<i64: 32, 128>}]} {
    %c0_i32 = arith.constant 0 : i32
    %0 = arith.cmpi eq, %arg2, %c0_i32 : i32
    %1 = arith.extui %0 : i1 to i32
    %c0_i32_0 = arith.constant 0 : i32
    %2 = arith.cmpi ne, %1, %c0_i32_0 : i32
    scf.if %2 {
      %cst_10 = arith.constant 0.000000e+00 : f32
      %12 = vector.broadcast %cst_10 : f32 to vector<32x128xf32>
      %c0_11 = arith.constant 0 : index
      %c0_12 = arith.constant 0 : index
      %13 = vector.load %arg8[%c0_11, %c0_12] : memref<32x128xf32, #tpu.memory_space<vmem>>, vector<32x128xf32>
      tpu.vector_store %arg8[%c0_11, %c0_12], %12 {strides = array<i32>} : memref<32x128xf32, #tpu.memory_space<vmem>>, vector<32x128xf32>,
    } else {
    }
    %c0 = arith.constant 0 : index
    %c0_1 = arith.constant 0 : index
    %3 = vector.load %arg8[%c0, %c0_1] : memref<32x128xf32, #tpu.memory_space<vmem>>, vector<32x128xf32>
    %c0_2 = arith.constant 0 : index
    %c0_3 = arith.constant 0 : index
    %4 = vector.load %arg3[%c0_2, %c0_3] : memref<32x128xbf16, #tpu.memory_space<vmem>>, vector<32x128xbf16>
    %c0_4 = arith.constant 0 : index
    %c0_5 = arith.constant 0 : index
    %5 = vector.load %arg4[%c0_4, %c0_5] : memref<128x128xbf16, #tpu.memory_space<vmem>>, vector<128x128xbf16>
    %cst = arith.constant dense<0.000000e+00> : vector<32x128xf32>
    %6 = tpu.matmul %4, %5, %cst {dimension_numbers = #tpu.dot_dimension_numbers<[1], [0], [0], [1], [0, 0, 1, 1], [], []>} : vector<32x128xbf16>, vector<128x128xbf16>, vector<32x128xf32> -> vector<32x128xf32>
    %7 = arith.addf %3, %6 : vector<32x128xf32>
    %c0_6 = arith.constant 0 : index
    %c0_7 = arith.constant 0 : index
    %8 = vector.load %arg8[%c0_6, %c0_7] : memref<32x128xf32, #tpu.memory_space<vmem>>, vector<32x128xf32>
    tpu.vector_store %arg8[%c0_6, %c0_7], %7 {strides = array<i32>} : memref<32x128xf32, #tpu.memory_space<vmem>>, vector<32x128xf32>,
    %c0_i32_8 = arith.constant 0 : i32
    %9 = arith.cmpi eq, %arg2, %c0_i32_8 : i32
    %10 = arith.extui %9 : i1 to i32
    %c0_i32_9 = arith.constant 0 : i32
    %11 = arith.cmpi ne, %10, %c0_i32_9 : i32
    scf.if %11 {
      %c0_10 = arith.constant 0 : index
      %c0_11 = arith.constant 0 : index
      %12 = vector.load %arg8[%c0_10, %c0_11] : memref<32x128xf32, #tpu.memory_space<vmem>>, vector<32x128xf32>
      %c0_12 = arith.constant 0 : index
      %c0_13 = arith.constant 0 : index
      %13 = vector.load %arg5[%c0_12, %c0_13] : memref<1x128xf32, #tpu.memory_space<vmem>>, vector<1x128xf32>
      %14 = vector.broadcast %13 : vector<1x128xf32> to vector<32x128xf32>
      %15 = arith.mulf %12, %14 : vector<32x128xf32>
      %c0_14 = arith.constant 0 : index
      %c0_15 = arith.constant 0 : index
      %16 = vector.load %arg6[%c0_14, %c0_15] : memref<1x128xf32, #tpu.memory_space<vmem>>, vector<1x128xf32>
      %17 = vector.broadcast %16 : vector<1x128xf32> to vector<32x128xf32>
      %18 = arith.addf %15, %17 : vector<32x128xf32>
      %cst_16 = arith.constant 0.000000e+00 : f32
      %19 = vector.broadcast %cst_16 : f32 to vector<32x128xf32>
      %20 = arith.maximumf %18, %19 : vector<32x128xf32>
      %21 = arith.truncf %20 : vector<32x128xf32> to vector<32x128xbf16>
      %c0_17 = arith.constant 0 : index
      %c0_18 = arith.constant 0 : index
      %22 = vector.load %arg7[%c0_17, %c0_18] : memref<32x128xbf16, #tpu.memory_space<vmem>>, vector<32x128xbf16>
      tpu.vector_store %arg7[%c0_17, %c0_18], %21 {strides = array<i32>} : memref<32x128xbf16, #tpu.memory_space<vmem>>, vector<32x128xbf16>,
    } else {
    }
    return
  }
  func.func @transform_0(%arg0: i32, %arg1: i32, %arg2: i32) -> (i32, i32) {
    %c0_i32 = arith.constant 0 : i32
    return %arg0, %arg2 : i32, i32
  }
  func.func @transform_1(%arg0: i32, %arg1: i32, %arg2: i32) -> (i32, i32) {
    %c0_i32 = arith.constant 0 : i32
    return %arg2, %arg1 : i32, i32
  }
  func.func @transform_2(%arg0: i32, %arg1: i32, %arg2: i32) -> (i32, i32) {
    %c0_i32 = arith.constant 0 : i32
    %c0_i32_0 = arith.constant 0 : i32
    return %c0_i32, %arg1 : i32, i32
  }
  func.func @transform_3(%arg0: i32, %arg1: i32, %arg2: i32) -> (i32, i32) {
    %c0_i32 = arith.constant 0 : i32
    %c0_i32_0 = arith.constant 0 : i32
    return %c0_i32, %arg1 : i32, i32
  }
  func.func @transform_4(%arg0: i32, %arg1: i32, %arg2: i32) -> (i32, i32) {
    %c0_i32 = arith.constant 0 : i32
    return %arg0, %arg1 : i32, i32
  }
}

module attributes {stable_mosaic.version = 11 : i64} {
  func.func @_gemm_bn_kernel(%arg0: i32, %arg1: i32, %arg2: i32, %arg3: memref<8x128xbf16, #tpu.memory_space<vmem>>, %arg4: memref<128x128xbf16, #tpu.memory_space<vmem>>, %arg5: memref<1x128xf32, #tpu.memory_space<vmem>>, %arg6: memref<1x128xf32, #tpu.memory_space<vmem>>, %arg7: memref<8x128xbf16, #tpu.memory_space<vmem>>, %arg8: memref<8x128xf32, #tpu.memory_space<vmem>>) attributes {dimension_semantics = [#tpu.dimension_semantics<parallel>, #tpu.dimension_semantics<parallel>, #tpu.dimension_semantics<arbitrary>], iteration_bounds = array<i64: 1, 1, 9>, scalar_prefetch = 0 : i64, scratch_operands = 1 : i64, tpu.core_type = #tpu.core_type<tc>, window_params = [{transform_indices = @transform_0, window_bounds = array<i64: 8, 128>}, {transform_indices = @transform_1, window_bounds = array<i64: 128, 128>}, {transform_indices = @transform_2, window_bounds = array<i64: 1, 128>}, {transform_indices = @transform_3, window_bounds = array<i64: 1, 128>}, {transform_indices = @transform_4, window_bounds = array<i64: 8, 128>}]} {
    %c0_i32 = arith.constant 0 : i32
    %0 = arith.cmpi eq, %arg2, %c0_i32 : i32
    %1 = arith.extui %0 : i1 to i32
    %c0_i32_0 = arith.constant 0 : i32
    %2 = arith.cmpi ne, %1, %c0_i32_0 : i32
    scf.if %2 {
      %cst_9 = arith.constant 0.000000e+00 : f32
      %12 = vector.broadcast %cst_9 : f32 to vector<8x128xf32>
      %c0_10 = arith.constant 0 : index
      %c0_11 = arith.constant 0 : index
      %13 = vector.load %arg8[%c0_10, %c0_11] : memref<8x128xf32, #tpu.memory_space<vmem>>, vector<8x128xf32>
      tpu.vector_store %arg8[%c0_10, %c0_11], %12 {strides = array<i32>} : memref<8x128xf32, #tpu.memory_space<vmem>>, vector<8x128xf32>,
    } else {
    }
    %c0 = arith.constant 0 : index
    %c0_1 = arith.constant 0 : index
    %3 = vector.load %arg8[%c0, %c0_1] : memref<8x128xf32, #tpu.memory_space<vmem>>, vector<8x128xf32>
    %c0_2 = arith.constant 0 : index
    %c0_3 = arith.constant 0 : index
    %4 = vector.load %arg3[%c0_2, %c0_3] : memref<8x128xbf16, #tpu.memory_space<vmem>>, vector<8x128xbf16>
    %c0_4 = arith.constant 0 : index
    %c0_5 = arith.constant 0 : index
    %5 = vector.load %arg4[%c0_4, %c0_5] : memref<128x128xbf16, #tpu.memory_space<vmem>>, vector<128x128xbf16>
    %cst = arith.constant dense<0.000000e+00> : vector<8x128xf32>
    %6 = tpu.matmul %4, %5, %cst {dimension_numbers = #tpu.dot_dimension_numbers<[1], [0], [0], [1], [0, 0, 1, 1], [], []>} : vector<8x128xbf16>, vector<128x128xbf16>, vector<8x128xf32> -> vector<8x128xf32>
    %7 = arith.addf %3, %6 : vector<8x128xf32>
    %c0_6 = arith.constant 0 : index
    %c0_7 = arith.constant 0 : index
    %8 = vector.load %arg8[%c0_6, %c0_7] : memref<8x128xf32, #tpu.memory_space<vmem>>, vector<8x128xf32>
    tpu.vector_store %arg8[%c0_6, %c0_7], %7 {strides = array<i32>} : memref<8x128xf32, #tpu.memory_space<vmem>>, vector<8x128xf32>,
    %c8_i32 = arith.constant 8 : i32
    %9 = arith.cmpi eq, %arg2, %c8_i32 : i32
    %10 = arith.extui %9 : i1 to i32
    %c0_i32_8 = arith.constant 0 : i32
    %11 = arith.cmpi ne, %10, %c0_i32_8 : i32
    scf.if %11 {
      %c0_9 = arith.constant 0 : index
      %c0_10 = arith.constant 0 : index
      %12 = vector.load %arg8[%c0_9, %c0_10] : memref<8x128xf32, #tpu.memory_space<vmem>>, vector<8x128xf32>
      %c0_11 = arith.constant 0 : index
      %c0_12 = arith.constant 0 : index
      %13 = vector.load %arg5[%c0_11, %c0_12] : memref<1x128xf32, #tpu.memory_space<vmem>>, vector<1x128xf32>
      %14 = vector.broadcast %13 : vector<1x128xf32> to vector<8x128xf32>
      %15 = arith.mulf %12, %14 : vector<8x128xf32>
      %c0_13 = arith.constant 0 : index
      %c0_14 = arith.constant 0 : index
      %16 = vector.load %arg6[%c0_13, %c0_14] : memref<1x128xf32, #tpu.memory_space<vmem>>, vector<1x128xf32>
      %17 = vector.broadcast %16 : vector<1x128xf32> to vector<8x128xf32>
      %18 = arith.addf %15, %17 : vector<8x128xf32>
      %cst_15 = arith.constant 0.000000e+00 : f32
      %19 = vector.broadcast %cst_15 : f32 to vector<8x128xf32>
      %20 = arith.maximumf %18, %19 : vector<8x128xf32>
      %21 = arith.truncf %20 : vector<8x128xf32> to vector<8x128xbf16>
      %c0_16 = arith.constant 0 : index
      %c0_17 = arith.constant 0 : index
      %22 = vector.load %arg7[%c0_16, %c0_17] : memref<8x128xbf16, #tpu.memory_space<vmem>>, vector<8x128xbf16>
      tpu.vector_store %arg7[%c0_16, %c0_17], %21 {strides = array<i32>} : memref<8x128xbf16, #tpu.memory_space<vmem>>, vector<8x128xbf16>,
    } else {
    }
    return
  }
  func.func @transform_0(%arg0: i32, %arg1: i32, %arg2: i32) -> (i32, i32) {
    %c0_i32 = arith.constant 0 : i32
    return %arg0, %arg2 : i32, i32
  }
  func.func @transform_1(%arg0: i32, %arg1: i32, %arg2: i32) -> (i32, i32) {
    %c0_i32 = arith.constant 0 : i32
    return %arg2, %arg1 : i32, i32
  }
  func.func @transform_2(%arg0: i32, %arg1: i32, %arg2: i32) -> (i32, i32) {
    %c0_i32 = arith.constant 0 : i32
    %c0_i32_0 = arith.constant 0 : i32
    return %c0_i32, %arg1 : i32, i32
  }
  func.func @transform_3(%arg0: i32, %arg1: i32, %arg2: i32) -> (i32, i32) {
    %c0_i32 = arith.constant 0 : i32
    %c0_i32_0 = arith.constant 0 : i32
    return %c0_i32, %arg1 : i32, i32
  }
  func.func @transform_4(%arg0: i32, %arg1: i32, %arg2: i32) -> (i32, i32) {
    %c0_i32 = arith.constant 0 : i32
    return %arg0, %arg1 : i32, i32
  }
}

module attributes {stable_mosaic.version = 11 : i64} {
  func.func @_gemm_bn_kernel(%arg0: i32, %arg1: i32, %arg2: i32, %arg3: memref<8x128xbf16, #tpu.memory_space<vmem>>, %arg4: memref<128x128xbf16, #tpu.memory_space<vmem>>, %arg5: memref<1x128xf32, #tpu.memory_space<vmem>>, %arg6: memref<1x128xf32, #tpu.memory_space<vmem>>, %arg7: memref<8x128xbf16, #tpu.memory_space<vmem>>, %arg8: memref<8x128xf32, #tpu.memory_space<vmem>>) attributes {dimension_semantics = [#tpu.dimension_semantics<parallel>, #tpu.dimension_semantics<parallel>, #tpu.dimension_semantics<arbitrary>], iteration_bounds = array<i64: 1, 1, 1>, scalar_prefetch = 0 : i64, scratch_operands = 1 : i64, tpu.core_type = #tpu.core_type<tc>, window_params = [{transform_indices = @transform_0, window_bounds = array<i64: 8, 128>}, {transform_indices = @transform_1, window_bounds = array<i64: 128, 128>}, {transform_indices = @transform_2, window_bounds = array<i64: 1, 128>}, {transform_indices = @transform_3, window_bounds = array<i64: 1, 128>}, {transform_indices = @transform_4, window_bounds = array<i64: 8, 128>}]} {
    %c0_i32 = arith.constant 0 : i32
    %0 = arith.cmpi eq, %arg2, %c0_i32 : i32
    %1 = arith.extui %0 : i1 to i32
    %c0_i32_0 = arith.constant 0 : i32
    %2 = arith.cmpi ne, %1, %c0_i32_0 : i32
    scf.if %2 {
      %cst_10 = arith.constant 0.000000e+00 : f32
      %12 = vector.broadcast %cst_10 : f32 to vector<8x128xf32>
      %c0_11 = arith.constant 0 : index
      %c0_12 = arith.constant 0 : index
      %13 = vector.load %arg8[%c0_11, %c0_12] : memref<8x128xf32, #tpu.memory_space<vmem>>, vector<8x128xf32>
      tpu.vector_store %arg8[%c0_11, %c0_12], %12 {strides = array<i32>} : memref<8x128xf32, #tpu.memory_space<vmem>>, vector<8x128xf32>,
    } else {
    }
    %c0 = arith.constant 0 : index
    %c0_1 = arith.constant 0 : index
    %3 = vector.load %arg8[%c0, %c0_1] : memref<8x128xf32, #tpu.memory_space<vmem>>, vector<8x128xf32>
    %c0_2 = arith.constant 0 : index
    %c0_3 = arith.constant 0 : index
    %4 = vector.load %arg3[%c0_2, %c0_3] : memref<8x128xbf16, #tpu.memory_space<vmem>>, vector<8x128xbf16>
    %c0_4 = arith.constant 0 : index
    %c0_5 = arith.constant 0 : index
    %5 = vector.load %arg4[%c0_4, %c0_5] : memref<128x128xbf16, #tpu.memory_space<vmem>>, vector<128x128xbf16>
    %cst = arith.constant dense<0.000000e+00> : vector<8x128xf32>
    %6 = tpu.matmul %4, %5, %cst {dimension_numbers = #tpu.dot_dimension_numbers<[1], [0], [0], [1], [0, 0, 1, 1], [], []>} : vector<8x128xbf16>, vector<128x128xbf16>, vector<8x128xf32> -> vector<8x128xf32>
    %7 = arith.addf %3, %6 : vector<8x128xf32>
    %c0_6 = arith.constant 0 : index
    %c0_7 = arith.constant 0 : index
    %8 = vector.load %arg8[%c0_6, %c0_7] : memref<8x128xf32, #tpu.memory_space<vmem>>, vector<8x128xf32>
    tpu.vector_store %arg8[%c0_6, %c0_7], %7 {strides = array<i32>} : memref<8x128xf32, #tpu.memory_space<vmem>>, vector<8x128xf32>,
    %c0_i32_8 = arith.constant 0 : i32
    %9 = arith.cmpi eq, %arg2, %c0_i32_8 : i32
    %10 = arith.extui %9 : i1 to i32
    %c0_i32_9 = arith.constant 0 : i32
    %11 = arith.cmpi ne, %10, %c0_i32_9 : i32
    scf.if %11 {
      %c0_10 = arith.constant 0 : index
      %c0_11 = arith.constant 0 : index
      %12 = vector.load %arg8[%c0_10, %c0_11] : memref<8x128xf32, #tpu.memory_space<vmem>>, vector<8x128xf32>
      %c0_12 = arith.constant 0 : index
      %c0_13 = arith.constant 0 : index
      %13 = vector.load %arg5[%c0_12, %c0_13] : memref<1x128xf32, #tpu.memory_space<vmem>>, vector<1x128xf32>
      %14 = vector.broadcast %13 : vector<1x128xf32> to vector<8x128xf32>
      %15 = arith.mulf %12, %14 : vector<8x128xf32>
      %c0_14 = arith.constant 0 : index
      %c0_15 = arith.constant 0 : index
      %16 = vector.load %arg6[%c0_14, %c0_15] : memref<1x128xf32, #tpu.memory_space<vmem>>, vector<1x128xf32>
      %17 = vector.broadcast %16 : vector<1x128xf32> to vector<8x128xf32>
      %18 = arith.addf %15, %17 : vector<8x128xf32>
      %19 = arith.truncf %18 : vector<8x128xf32> to vector<8x128xbf16>
      %c0_16 = arith.constant 0 : index
      %c0_17 = arith.constant 0 : index
      %20 = vector.load %arg7[%c0_16, %c0_17] : memref<8x128xbf16, #tpu.memory_space<vmem>>, vector<8x128xbf16>
      tpu.vector_store %arg7[%c0_16, %c0_17], %19 {strides = array<i32>} : memref<8x128xbf16, #tpu.memory_space<vmem>>, vector<8x128xbf16>,
    } else {
    }
    return
  }
  func.func @transform_0(%arg0: i32, %arg1: i32, %arg2: i32) -> (i32, i32) {
    %c0_i32 = arith.constant 0 : i32
    return %arg0, %arg2 : i32, i32
  }
  func.func @transform_1(%arg0: i32, %arg1: i32, %arg2: i32) -> (i32, i32) {
    %c0_i32 = arith.constant 0 : i32
    return %arg2, %arg1 : i32, i32
  }
  func.func @transform_2(%arg0: i32, %arg1: i32, %arg2: i32) -> (i32, i32) {
    %c0_i32 = arith.constant 0 : i32
    %c0_i32_0 = arith.constant 0 : i32
    return %c0_i32, %arg1 : i32, i32
  }
  func.func @transform_3(%arg0: i32, %arg1: i32, %arg2: i32) -> (i32, i32) {
    %c0_i32 = arith.constant 0 : i32
    %c0_i32_0 = arith.constant 0 : i32
    return %c0_i32, %arg1 : i32, i32
  }
  func.func @transform_4(%arg0: i32, %arg1: i32, %arg2: i32) -> (i32, i32) {
    %c0_i32 = arith.constant 0 : i32
    return %arg0, %arg1 : i32, i32
  }
}

module attributes {stable_mosaic.version = 11 : i64} {
  func.func @_gemm_bn_kernel(%arg0: i32, %arg1: i32, %arg2: i32, %arg3: memref<8x128xbf16, #tpu.memory_space<vmem>>, %arg4: memref<128x128xbf16, #tpu.memory_space<vmem>>, %arg5: memref<1x128xf32, #tpu.memory_space<vmem>>, %arg6: memref<1x128xf32, #tpu.memory_space<vmem>>, %arg7: memref<8x128xbf16, #tpu.memory_space<vmem>>, %arg8: memref<8x128xf32, #tpu.memory_space<vmem>>) attributes {dimension_semantics = [#tpu.dimension_semantics<parallel>, #tpu.dimension_semantics<parallel>, #tpu.dimension_semantics<arbitrary>], iteration_bounds = array<i64: 1, 1, 1>, scalar_prefetch = 0 : i64, scratch_operands = 1 : i64, tpu.core_type = #tpu.core_type<tc>, window_params = [{transform_indices = @transform_0, window_bounds = array<i64: 8, 128>}, {transform_indices = @transform_1, window_bounds = array<i64: 128, 128>}, {transform_indices = @transform_2, window_bounds = array<i64: 1, 128>}, {transform_indices = @transform_3, window_bounds = array<i64: 1, 128>}, {transform_indices = @transform_4, window_bounds = array<i64: 8, 128>}]} {
    %c0_i32 = arith.constant 0 : i32
    %0 = arith.cmpi eq, %arg2, %c0_i32 : i32
    %1 = arith.extui %0 : i1 to i32
    %c0_i32_0 = arith.constant 0 : i32
    %2 = arith.cmpi ne, %1, %c0_i32_0 : i32
    scf.if %2 {
      %cst_10 = arith.constant 0.000000e+00 : f32
      %12 = vector.broadcast %cst_10 : f32 to vector<8x128xf32>
      %c0_11 = arith.constant 0 : index
      %c0_12 = arith.constant 0 : index
      %13 = vector.load %arg8[%c0_11, %c0_12] : memref<8x128xf32, #tpu.memory_space<vmem>>, vector<8x128xf32>
      tpu.vector_store %arg8[%c0_11, %c0_12], %12 {strides = array<i32>} : memref<8x128xf32, #tpu.memory_space<vmem>>, vector<8x128xf32>,
    } else {
    }
    %c0 = arith.constant 0 : index
    %c0_1 = arith.constant 0 : index
    %3 = vector.load %arg8[%c0, %c0_1] : memref<8x128xf32, #tpu.memory_space<vmem>>, vector<8x128xf32>
    %c0_2 = arith.constant 0 : index
    %c0_3 = arith.constant 0 : index
    %4 = vector.load %arg3[%c0_2, %c0_3] : memref<8x128xbf16, #tpu.memory_space<vmem>>, vector<8x128xbf16>
    %c0_4 = arith.constant 0 : index
    %c0_5 = arith.constant 0 : index
    %5 = vector.load %arg4[%c0_4, %c0_5] : memref<128x128xbf16, #tpu.memory_space<vmem>>, vector<128x128xbf16>
    %cst = arith.constant dense<0.000000e+00> : vector<8x128xf32>
    %6 = tpu.matmul %4, %5, %cst {dimension_numbers = #tpu.dot_dimension_numbers<[1], [0], [0], [1], [0, 0, 1, 1], [], []>} : vector<8x128xbf16>, vector<128x128xbf16>, vector<8x128xf32> -> vector<8x128xf32>
    %7 = arith.addf %3, %6 : vector<8x128xf32>
    %c0_6 = arith.constant 0 : index
    %c0_7 = arith.constant 0 : index
    %8 = vector.load %arg8[%c0_6, %c0_7] : memref<8x128xf32, #tpu.memory_space<vmem>>, vector<8x128xf32>
    tpu.vector_store %arg8[%c0_6, %c0_7], %7 {strides = array<i32>} : memref<8x128xf32, #tpu.memory_space<vmem>>, vector<8x128xf32>,
    %c0_i32_8 = arith.constant 0 : i32
    %9 = arith.cmpi eq, %arg2, %c0_i32_8 : i32
    %10 = arith.extui %9 : i1 to i32
    %c0_i32_9 = arith.constant 0 : i32
    %11 = arith.cmpi ne, %10, %c0_i32_9 : i32
    scf.if %11 {
      %c0_10 = arith.constant 0 : index
      %c0_11 = arith.constant 0 : index
      %12 = vector.load %arg8[%c0_10, %c0_11] : memref<8x128xf32, #tpu.memory_space<vmem>>, vector<8x128xf32>
      %c0_12 = arith.constant 0 : index
      %c0_13 = arith.constant 0 : index
      %13 = vector.load %arg5[%c0_12, %c0_13] : memref<1x128xf32, #tpu.memory_space<vmem>>, vector<1x128xf32>
      %14 = vector.broadcast %13 : vector<1x128xf32> to vector<8x128xf32>
      %15 = arith.mulf %12, %14 : vector<8x128xf32>
      %c0_14 = arith.constant 0 : index
      %c0_15 = arith.constant 0 : index
      %16 = vector.load %arg6[%c0_14, %c0_15] : memref<1x128xf32, #tpu.memory_space<vmem>>, vector<1x128xf32>
      %17 = vector.broadcast %16 : vector<1x128xf32> to vector<8x128xf32>
      %18 = arith.addf %15, %17 : vector<8x128xf32>
      %cst_16 = arith.constant 0.000000e+00 : f32
      %19 = vector.broadcast %cst_16 : f32 to vector<8x128xf32>
      %20 = arith.maximumf %18, %19 : vector<8x128xf32>
      %21 = arith.truncf %20 : vector<8x128xf32> to vector<8x128xbf16>
      %c0_17 = arith.constant 0 : index
      %c0_18 = arith.constant 0 : index
      %22 = vector.load %arg7[%c0_17, %c0_18] : memref<8x128xbf16, #tpu.memory_space<vmem>>, vector<8x128xbf16>
      tpu.vector_store %arg7[%c0_17, %c0_18], %21 {strides = array<i32>} : memref<8x128xbf16, #tpu.memory_space<vmem>>, vector<8x128xbf16>,
    } else {
    }
    return
  }
  func.func @transform_0(%arg0: i32, %arg1: i32, %arg2: i32) -> (i32, i32) {
    %c0_i32 = arith.constant 0 : i32
    return %arg0, %arg2 : i32, i32
  }
  func.func @transform_1(%arg0: i32, %arg1: i32, %arg2: i32) -> (i32, i32) {
    %c0_i32 = arith.constant 0 : i32
    return %arg2, %arg1 : i32, i32
  }
  func.func @transform_2(%arg0: i32, %arg1: i32, %arg2: i32) -> (i32, i32) {
    %c0_i32 = arith.constant 0 : i32
    %c0_i32_0 = arith.constant 0 : i32
    return %c0_i32, %arg1 : i32, i32
  }
  func.func @transform_3(%arg0: i32, %arg1: i32, %arg2: i32) -> (i32, i32) {
    %c0_i32 = arith.constant 0 : i32
    %c0_i32_0 = arith.constant 0 : i32
    return %c0_i32, %arg1 : i32, i32
  }
  func.func @transform_4(%arg0: i32, %arg1: i32, %arg2: i32) -> (i32, i32) {
    %c0_i32 = arith.constant 0 : i32
    return %arg0, %arg1 : i32, i32
  }
}

module attributes {stable_mosaic.version = 11 : i64} {
  func.func @_gemm_bn_res_kernel(%arg0: i32, %arg1: i32, %arg2: i32, %arg3: memref<8x128xbf16, #tpu.memory_space<vmem>>, %arg4: memref<128x128xbf16, #tpu.memory_space<vmem>>, %arg5: memref<1x128xf32, #tpu.memory_space<vmem>>, %arg6: memref<1x128xf32, #tpu.memory_space<vmem>>, %arg7: memref<8x128xbf16, #tpu.memory_space<vmem>>, %arg8: memref<8x128xbf16, #tpu.memory_space<vmem>>, %arg9: memref<8x128xf32, #tpu.memory_space<vmem>>) attributes {dimension_semantics = [#tpu.dimension_semantics<parallel>, #tpu.dimension_semantics<parallel>, #tpu.dimension_semantics<arbitrary>], iteration_bounds = array<i64: 1, 1, 1>, scalar_prefetch = 0 : i64, scratch_operands = 1 : i64, tpu.core_type = #tpu.core_type<tc>, window_params = [{transform_indices = @transform_0, window_bounds = array<i64: 8, 128>}, {transform_indices = @transform_1, window_bounds = array<i64: 128, 128>}, {transform_indices = @transform_2, window_bounds = array<i64: 1, 128>}, {transform_indices = @transform_3, window_bounds = array<i64: 1, 128>}, {transform_indices = @transform_4, window_bounds = array<i64: 8, 128>}, {transform_indices = @transform_5, window_bounds = array<i64: 8, 128>}]} {
    %c0_i32 = arith.constant 0 : i32
    %0 = arith.cmpi eq, %arg2, %c0_i32 : i32
    %1 = arith.extui %0 : i1 to i32
    %c0_i32_0 = arith.constant 0 : i32
    %2 = arith.cmpi ne, %1, %c0_i32_0 : i32
    scf.if %2 {
      %cst_10 = arith.constant 0.000000e+00 : f32
      %12 = vector.broadcast %cst_10 : f32 to vector<8x128xf32>
      %c0_11 = arith.constant 0 : index
      %c0_12 = arith.constant 0 : index
      %13 = vector.load %arg9[%c0_11, %c0_12] : memref<8x128xf32, #tpu.memory_space<vmem>>, vector<8x128xf32>
      tpu.vector_store %arg9[%c0_11, %c0_12], %12 {strides = array<i32>} : memref<8x128xf32, #tpu.memory_space<vmem>>, vector<8x128xf32>,
    } else {
    }
    %c0 = arith.constant 0 : index
    %c0_1 = arith.constant 0 : index
    %3 = vector.load %arg9[%c0, %c0_1] : memref<8x128xf32, #tpu.memory_space<vmem>>, vector<8x128xf32>
    %c0_2 = arith.constant 0 : index
    %c0_3 = arith.constant 0 : index
    %4 = vector.load %arg3[%c0_2, %c0_3] : memref<8x128xbf16, #tpu.memory_space<vmem>>, vector<8x128xbf16>
    %c0_4 = arith.constant 0 : index
    %c0_5 = arith.constant 0 : index
    %5 = vector.load %arg4[%c0_4, %c0_5] : memref<128x128xbf16, #tpu.memory_space<vmem>>, vector<128x128xbf16>
    %cst = arith.constant dense<0.000000e+00> : vector<8x128xf32>
    %6 = tpu.matmul %4, %5, %cst {dimension_numbers = #tpu.dot_dimension_numbers<[1], [0], [0], [1], [0, 0, 1, 1], [], []>} : vector<8x128xbf16>, vector<128x128xbf16>, vector<8x128xf32> -> vector<8x128xf32>
    %7 = arith.addf %3, %6 : vector<8x128xf32>
    %c0_6 = arith.constant 0 : index
    %c0_7 = arith.constant 0 : index
    %8 = vector.load %arg9[%c0_6, %c0_7] : memref<8x128xf32, #tpu.memory_space<vmem>>, vector<8x128xf32>
    tpu.vector_store %arg9[%c0_6, %c0_7], %7 {strides = array<i32>} : memref<8x128xf32, #tpu.memory_space<vmem>>, vector<8x128xf32>,
    %c0_i32_8 = arith.constant 0 : i32
    %9 = arith.cmpi eq, %arg2, %c0_i32_8 : i32
    %10 = arith.extui %9 : i1 to i32
    %c0_i32_9 = arith.constant 0 : i32
    %11 = arith.cmpi ne, %10, %c0_i32_9 : i32
    scf.if %11 {
      %c0_10 = arith.constant 0 : index
      %c0_11 = arith.constant 0 : index
      %12 = vector.load %arg9[%c0_10, %c0_11] : memref<8x128xf32, #tpu.memory_space<vmem>>, vector<8x128xf32>
      %c0_12 = arith.constant 0 : index
      %c0_13 = arith.constant 0 : index
      %13 = vector.load %arg5[%c0_12, %c0_13] : memref<1x128xf32, #tpu.memory_space<vmem>>, vector<1x128xf32>
      %14 = vector.broadcast %13 : vector<1x128xf32> to vector<8x128xf32>
      %15 = arith.mulf %12, %14 : vector<8x128xf32>
      %c0_14 = arith.constant 0 : index
      %c0_15 = arith.constant 0 : index
      %16 = vector.load %arg6[%c0_14, %c0_15] : memref<1x128xf32, #tpu.memory_space<vmem>>, vector<1x128xf32>
      %17 = vector.broadcast %16 : vector<1x128xf32> to vector<8x128xf32>
      %18 = arith.addf %15, %17 : vector<8x128xf32>
      %c0_16 = arith.constant 0 : index
      %c0_17 = arith.constant 0 : index
      %19 = vector.load %arg7[%c0_16, %c0_17] : memref<8x128xbf16, #tpu.memory_space<vmem>>, vector<8x128xbf16>
      %20 = arith.extf %19 : vector<8x128xbf16> to vector<8x128xf32>
      %21 = arith.addf %18, %20 : vector<8x128xf32>
      %cst_18 = arith.constant 0.000000e+00 : f32
      %22 = vector.broadcast %cst_18 : f32 to vector<8x128xf32>
      %23 = arith.maximumf %21, %22 : vector<8x128xf32>
      %24 = arith.truncf %23 : vector<8x128xf32> to vector<8x128xbf16>
      %c0_19 = arith.constant 0 : index
      %c0_20 = arith.constant 0 : index
      %25 = vector.load %arg8[%c0_19, %c0_20] : memref<8x128xbf16, #tpu.memory_space<vmem>>, vector<8x128xbf16>
      tpu.vector_store %arg8[%c0_19, %c0_20], %24 {strides = array<i32>} : memref<8x128xbf16, #tpu.memory_space<vmem>>, vector<8x128xbf16>,
    } else {
    }
    return
  }
  func.func @transform_0(%arg0: i32, %arg1: i32, %arg2: i32) -> (i32, i32) {
    %c0_i32 = arith.constant 0 : i32
    return %arg0, %arg2 : i32, i32
  }
  func.func @transform_1(%arg0: i32, %arg1: i32, %arg2: i32) -> (i32, i32) {
    %c0_i32 = arith.constant 0 : i32
    return %arg2, %arg1 : i32, i32
  }
  func.func @transform_2(%arg0: i32, %arg1: i32, %arg2: i32) -> (i32, i32) {
    %c0_i32 = arith.constant 0 : i32
    %c0_i32_0 = arith.constant 0 : i32
    return %c0_i32, %arg1 : i32, i32
  }
  func.func @transform_3(%arg0: i32, %arg1: i32, %arg2: i32) -> (i32, i32) {
    %c0_i32 = arith.constant 0 : i32
    %c0_i32_0 = arith.constant 0 : i32
    return %c0_i32, %arg1 : i32, i32
  }
  func.func @transform_4(%arg0: i32, %arg1: i32, %arg2: i32) -> (i32, i32) {
    %c0_i32 = arith.constant 0 : i32
    return %arg0, %arg1 : i32, i32
  }
  func.func @transform_5(%arg0: i32, %arg1: i32, %arg2: i32) -> (i32, i32) {
    %c0_i32 = arith.constant 0 : i32
    return %arg0, %arg1 : i32, i32
  }
}

module attributes {stable_mosaic.version = 11 : i64} {
  func.func @_gemm_bn_kernel(%arg0: i32, %arg1: i32, %arg2: i32, %arg3: memref<8x128xbf16, #tpu.memory_space<vmem>>, %arg4: memref<128x128xbf16, #tpu.memory_space<vmem>>, %arg5: memref<1x128xf32, #tpu.memory_space<vmem>>, %arg6: memref<1x128xf32, #tpu.memory_space<vmem>>, %arg7: memref<8x128xbf16, #tpu.memory_space<vmem>>, %arg8: memref<8x128xf32, #tpu.memory_space<vmem>>) attributes {dimension_semantics = [#tpu.dimension_semantics<parallel>, #tpu.dimension_semantics<parallel>, #tpu.dimension_semantics<arbitrary>], iteration_bounds = array<i64: 1, 1, 9>, scalar_prefetch = 0 : i64, scratch_operands = 1 : i64, tpu.core_type = #tpu.core_type<tc>, window_params = [{transform_indices = @transform_0, window_bounds = array<i64: 8, 128>}, {transform_indices = @transform_1, window_bounds = array<i64: 128, 128>}, {transform_indices = @transform_2, window_bounds = array<i64: 1, 128>}, {transform_indices = @transform_3, window_bounds = array<i64: 1, 128>}, {transform_indices = @transform_4, window_bounds = array<i64: 8, 128>}]} {
    %c0_i32 = arith.constant 0 : i32
    %0 = arith.cmpi eq, %arg2, %c0_i32 : i32
    %1 = arith.extui %0 : i1 to i32
    %c0_i32_0 = arith.constant 0 : i32
    %2 = arith.cmpi ne, %1, %c0_i32_0 : i32
    scf.if %2 {
      %cst_9 = arith.constant 0.000000e+00 : f32
      %12 = vector.broadcast %cst_9 : f32 to vector<8x128xf32>
      %c0_10 = arith.constant 0 : index
      %c0_11 = arith.constant 0 : index
      %13 = vector.load %arg8[%c0_10, %c0_11] : memref<8x128xf32, #tpu.memory_space<vmem>>, vector<8x128xf32>
      tpu.vector_store %arg8[%c0_10, %c0_11], %12 {strides = array<i32>} : memref<8x128xf32, #tpu.memory_space<vmem>>, vector<8x128xf32>,
    } else {
    }
    %c0 = arith.constant 0 : index
    %c0_1 = arith.constant 0 : index
    %3 = vector.load %arg8[%c0, %c0_1] : memref<8x128xf32, #tpu.memory_space<vmem>>, vector<8x128xf32>
    %c0_2 = arith.constant 0 : index
    %c0_3 = arith.constant 0 : index
    %4 = vector.load %arg3[%c0_2, %c0_3] : memref<8x128xbf16, #tpu.memory_space<vmem>>, vector<8x128xbf16>
    %c0_4 = arith.constant 0 : index
    %c0_5 = arith.constant 0 : index
    %5 = vector.load %arg4[%c0_4, %c0_5] : memref<128x128xbf16, #tpu.memory_space<vmem>>, vector<128x128xbf16>
    %cst = arith.constant dense<0.000000e+00> : vector<8x128xf32>
    %6 = tpu.matmul %4, %5, %cst {dimension_numbers = #tpu.dot_dimension_numbers<[1], [0], [0], [1], [0, 0, 1, 1], [], []>} : vector<8x128xbf16>, vector<128x128xbf16>, vector<8x128xf32> -> vector<8x128xf32>
    %7 = arith.addf %3, %6 : vector<8x128xf32>
    %c0_6 = arith.constant 0 : index
    %c0_7 = arith.constant 0 : index
    %8 = vector.load %arg8[%c0_6, %c0_7] : memref<8x128xf32, #tpu.memory_space<vmem>>, vector<8x128xf32>
    tpu.vector_store %arg8[%c0_6, %c0_7], %7 {strides = array<i32>} : memref<8x128xf32, #tpu.memory_space<vmem>>, vector<8x128xf32>,
    %c8_i32 = arith.constant 8 : i32
    %9 = arith.cmpi eq, %arg2, %c8_i32 : i32
    %10 = arith.extui %9 : i1 to i32
    %c0_i32_8 = arith.constant 0 : i32
    %11 = arith.cmpi ne, %10, %c0_i32_8 : i32
    scf.if %11 {
      %c0_9 = arith.constant 0 : index
      %c0_10 = arith.constant 0 : index
      %12 = vector.load %arg8[%c0_9, %c0_10] : memref<8x128xf32, #tpu.memory_space<vmem>>, vector<8x128xf32>
      %c0_11 = arith.constant 0 : index
      %c0_12 = arith.constant 0 : index
      %13 = vector.load %arg5[%c0_11, %c0_12] : memref<1x128xf32, #tpu.memory_space<vmem>>, vector<1x128xf32>
      %14 = vector.broadcast %13 : vector<1x128xf32> to vector<8x128xf32>
      %15 = arith.mulf %12, %14 : vector<8x128xf32>
      %c0_13 = arith.constant 0 : index
      %c0_14 = arith.constant 0 : index
      %16 = vector.load %arg6[%c0_13, %c0_14] : memref<1x128xf32, #tpu.memory_space<vmem>>, vector<1x128xf32>
      %17 = vector.broadcast %16 : vector<1x128xf32> to vector<8x128xf32>
      %18 = arith.addf %15, %17 : vector<8x128xf32>
      %cst_15 = arith.constant 0.000000e+00 : f32
      %19 = vector.broadcast %cst_15 : f32 to vector<8x128xf32>
      %20 = arith.maximumf %18, %19 : vector<8x128xf32>
      %21 = arith.truncf %20 : vector<8x128xf32> to vector<8x128xbf16>
      %c0_16 = arith.constant 0 : index
      %c0_17 = arith.constant 0 : index
      %22 = vector.load %arg7[%c0_16, %c0_17] : memref<8x128xbf16, #tpu.memory_space<vmem>>, vector<8x128xbf16>
      tpu.vector_store %arg7[%c0_16, %c0_17], %21 {strides = array<i32>} : memref<8x128xbf16, #tpu.memory_space<vmem>>, vector<8x128xbf16>,
    } else {
    }
    return
  }
  func.func @transform_0(%arg0: i32, %arg1: i32, %arg2: i32) -> (i32, i32) {
    %c0_i32 = arith.constant 0 : i32
    return %arg0, %arg2 : i32, i32
  }
  func.func @transform_1(%arg0: i32, %arg1: i32, %arg2: i32) -> (i32, i32) {
    %c0_i32 = arith.constant 0 : i32
    return %arg2, %arg1 : i32, i32
  }
  func.func @transform_2(%arg0: i32, %arg1: i32, %arg2: i32) -> (i32, i32) {
    %c0_i32 = arith.constant 0 : i32
    %c0_i32_0 = arith.constant 0 : i32
    return %c0_i32, %arg1 : i32, i32
  }
  func.func @transform_3(%arg0: i32, %arg1: i32, %arg2: i32) -> (i32, i32) {
    %c0_i32 = arith.constant 0 : i32
    %c0_i32_0 = arith.constant 0 : i32
    return %c0_i32, %arg1 : i32, i32
  }
  func.func @transform_4(%arg0: i32, %arg1: i32, %arg2: i32) -> (i32, i32) {
    %c0_i32 = arith.constant 0 : i32
    return %arg0, %arg1 : i32, i32
  }
}

module attributes {stable_mosaic.version = 11 : i64} {
  func.func @_gemm_bn_res_kernel(%arg0: i32, %arg1: i32, %arg2: i32, %arg3: memref<8x128xbf16, #tpu.memory_space<vmem>>, %arg4: memref<128x128xbf16, #tpu.memory_space<vmem>>, %arg5: memref<1x128xf32, #tpu.memory_space<vmem>>, %arg6: memref<1x128xf32, #tpu.memory_space<vmem>>, %arg7: memref<8x128xbf16, #tpu.memory_space<vmem>>, %arg8: memref<8x128xbf16, #tpu.memory_space<vmem>>, %arg9: memref<8x128xf32, #tpu.memory_space<vmem>>) attributes {dimension_semantics = [#tpu.dimension_semantics<parallel>, #tpu.dimension_semantics<parallel>, #tpu.dimension_semantics<arbitrary>], iteration_bounds = array<i64: 1, 1, 1>, scalar_prefetch = 0 : i64, scratch_operands = 1 : i64, tpu.core_type = #tpu.core_type<tc>, window_params = [{transform_indices = @transform_0, window_bounds = array<i64: 8, 128>}, {transform_indices = @transform_1, window_bounds = array<i64: 128, 128>}, {transform_indices = @transform_2, window_bounds = array<i64: 1, 128>}, {transform_indices = @transform_3, window_bounds = array<i64: 1, 128>}, {transform_indices = @transform_4, window_bounds = array<i64: 8, 128>}, {transform_indices = @transform_5, window_bounds = array<i64: 8, 128>}]} {
    %c0_i32 = arith.constant 0 : i32
    %0 = arith.cmpi eq, %arg2, %c0_i32 : i32
    %1 = arith.extui %0 : i1 to i32
    %c0_i32_0 = arith.constant 0 : i32
    %2 = arith.cmpi ne, %1, %c0_i32_0 : i32
    scf.if %2 {
      %cst_10 = arith.constant 0.000000e+00 : f32
      %12 = vector.broadcast %cst_10 : f32 to vector<8x128xf32>
      %c0_11 = arith.constant 0 : index
      %c0_12 = arith.constant 0 : index
      %13 = vector.load %arg9[%c0_11, %c0_12] : memref<8x128xf32, #tpu.memory_space<vmem>>, vector<8x128xf32>
      tpu.vector_store %arg9[%c0_11, %c0_12], %12 {strides = array<i32>} : memref<8x128xf32, #tpu.memory_space<vmem>>, vector<8x128xf32>,
    } else {
    }
    %c0 = arith.constant 0 : index
    %c0_1 = arith.constant 0 : index
    %3 = vector.load %arg9[%c0, %c0_1] : memref<8x128xf32, #tpu.memory_space<vmem>>, vector<8x128xf32>
    %c0_2 = arith.constant 0 : index
    %c0_3 = arith.constant 0 : index
    %4 = vector.load %arg3[%c0_2, %c0_3] : memref<8x128xbf16, #tpu.memory_space<vmem>>, vector<8x128xbf16>
    %c0_4 = arith.constant 0 : index
    %c0_5 = arith.constant 0 : index
    %5 = vector.load %arg4[%c0_4, %c0_5] : memref<128x128xbf16, #tpu.memory_space<vmem>>, vector<128x128xbf16>
    %cst = arith.constant dense<0.000000e+00> : vector<8x128xf32>
    %6 = tpu.matmul %4, %5, %cst {dimension_numbers = #tpu.dot_dimension_numbers<[1], [0], [0], [1], [0, 0, 1, 1], [], []>} : vector<8x128xbf16>, vector<128x128xbf16>, vector<8x128xf32> -> vector<8x128xf32>
    %7 = arith.addf %3, %6 : vector<8x128xf32>
    %c0_6 = arith.constant 0 : index
    %c0_7 = arith.constant 0 : index
    %8 = vector.load %arg9[%c0_6, %c0_7] : memref<8x128xf32, #tpu.memory_space<vmem>>, vector<8x128xf32>
    tpu.vector_store %arg9[%c0_6, %c0_7], %7 {strides = array<i32>} : memref<8x128xf32, #tpu.memory_space<vmem>>, vector<8x128xf32>,
    %c0_i32_8 = arith.constant 0 : i32
    %9 = arith.cmpi eq, %arg2, %c0_i32_8 : i32
    %10 = arith.extui %9 : i1 to i32
    %c0_i32_9 = arith.constant 0 : i32
    %11 = arith.cmpi ne, %10, %c0_i32_9 : i32
    scf.if %11 {
      %c0_10 = arith.constant 0 : index
      %c0_11 = arith.constant 0 : index
      %12 = vector.load %arg9[%c0_10, %c0_11] : memref<8x128xf32, #tpu.memory_space<vmem>>, vector<8x128xf32>
      %c0_12 = arith.constant 0 : index
      %c0_13 = arith.constant 0 : index
      %13 = vector.load %arg5[%c0_12, %c0_13] : memref<1x128xf32, #tpu.memory_space<vmem>>, vector<1x128xf32>
      %14 = vector.broadcast %13 : vector<1x128xf32> to vector<8x128xf32>
      %15 = arith.mulf %12, %14 : vector<8x128xf32>
      %c0_14 = arith.constant 0 : index
      %c0_15 = arith.constant 0 : index
      %16 = vector.load %arg6[%c0_14, %c0_15] : memref<1x128xf32, #tpu.memory_space<vmem>>, vector<1x128xf32>
      %17 = vector.broadcast %16 : vector<1x128xf32> to vector<8x128xf32>
      %18 = arith.addf %15, %17 : vector<8x128xf32>
      %c0_16 = arith.constant 0 : index
      %c0_17 = arith.constant 0 : index
      %19 = vector.load %arg7[%c0_16, %c0_17] : memref<8x128xbf16, #tpu.memory_space<vmem>>, vector<8x128xbf16>
      %20 = arith.extf %19 : vector<8x128xbf16> to vector<8x128xf32>
      %21 = arith.addf %18, %20 : vector<8x128xf32>
      %cst_18 = arith.constant 0.000000e+00 : f32
      %22 = vector.broadcast %cst_18 : f32 to vector<8x128xf32>
      %23 = arith.maximumf %21, %22 : vector<8x128xf32>
      %24 = arith.truncf %23 : vector<8x128xf32> to vector<8x128xbf16>
      %c0_19 = arith.constant 0 : index
      %c0_20 = arith.constant 0 : index
      %25 = vector.load %arg8[%c0_19, %c0_20] : memref<8x128xbf16, #tpu.memory_space<vmem>>, vector<8x128xbf16>
      tpu.vector_store %arg8[%c0_19, %c0_20], %24 {strides = array<i32>} : memref<8x128xbf16, #tpu.memory_space<vmem>>, vector<8x128xbf16>,
    } else {
    }
    return
  }
  func.func @transform_0(%arg0: i32, %arg1: i32, %arg2: i32) -> (i32, i32) {
    %c0_i32 = arith.constant 0 : i32
    return %arg0, %arg2 : i32, i32
  }
  func.func @transform_1(%arg0: i32, %arg1: i32, %arg2: i32) -> (i32, i32) {
    %c0_i32 = arith.constant 0 : i32
    return %arg2, %arg1 : i32, i32
  }
  func.func @transform_2(%arg0: i32, %arg1: i32, %arg2: i32) -> (i32, i32) {
    %c0_i32 = arith.constant 0 : i32
    %c0_i32_0 = arith.constant 0 : i32
    return %c0_i32, %arg1 : i32, i32
  }
  func.func @transform_3(%arg0: i32, %arg1: i32, %arg2: i32) -> (i32, i32) {
    %c0_i32 = arith.constant 0 : i32
    %c0_i32_0 = arith.constant 0 : i32
    return %c0_i32, %arg1 : i32, i32
  }
  func.func @transform_4(%arg0: i32, %arg1: i32, %arg2: i32) -> (i32, i32) {
    %c0_i32 = arith.constant 0 : i32
    return %arg0, %arg1 : i32, i32
  }
  func.func @transform_5(%arg0: i32, %arg1: i32, %arg2: i32) -> (i32, i32) {
    %c0_i32 = arith.constant 0 : i32
    return %arg0, %arg1 : i32, i32
  }
}

module attributes {stable_mosaic.version = 11 : i64} {
  func.func @_gemm_bn_kernel(%arg0: i32, %arg1: i32, %arg2: i32, %arg3: memref<8x128xbf16, #tpu.memory_space<vmem>>, %arg4: memref<128x128xbf16, #tpu.memory_space<vmem>>, %arg5: memref<1x128xf32, #tpu.memory_space<vmem>>, %arg6: memref<1x128xf32, #tpu.memory_space<vmem>>, %arg7: memref<8x128xbf16, #tpu.memory_space<vmem>>, %arg8: memref<8x128xf32, #tpu.memory_space<vmem>>) attributes {dimension_semantics = [#tpu.dimension_semantics<parallel>, #tpu.dimension_semantics<parallel>, #tpu.dimension_semantics<arbitrary>], iteration_bounds = array<i64: 1, 1, 1>, scalar_prefetch = 0 : i64, scratch_operands = 1 : i64, tpu.core_type = #tpu.core_type<tc>, window_params = [{transform_indices = @transform_0, window_bounds = array<i64: 8, 128>}, {transform_indices = @transform_1, window_bounds = array<i64: 128, 128>}, {transform_indices = @transform_2, window_bounds = array<i64: 1, 128>}, {transform_indices = @transform_3, window_bounds = array<i64: 1, 128>}, {transform_indices = @transform_4, window_bounds = array<i64: 8, 128>}]} {
    %c0_i32 = arith.constant 0 : i32
    %0 = arith.cmpi eq, %arg2, %c0_i32 : i32
    %1 = arith.extui %0 : i1 to i32
    %c0_i32_0 = arith.constant 0 : i32
    %2 = arith.cmpi ne, %1, %c0_i32_0 : i32
    scf.if %2 {
      %cst_10 = arith.constant 0.000000e+00 : f32
      %12 = vector.broadcast %cst_10 : f32 to vector<8x128xf32>
      %c0_11 = arith.constant 0 : index
      %c0_12 = arith.constant 0 : index
      %13 = vector.load %arg8[%c0_11, %c0_12] : memref<8x128xf32, #tpu.memory_space<vmem>>, vector<8x128xf32>
      tpu.vector_store %arg8[%c0_11, %c0_12], %12 {strides = array<i32>} : memref<8x128xf32, #tpu.memory_space<vmem>>, vector<8x128xf32>,
    } else {
    }
    %c0 = arith.constant 0 : index
    %c0_1 = arith.constant 0 : index
    %3 = vector.load %arg8[%c0, %c0_1] : memref<8x128xf32, #tpu.memory_space<vmem>>, vector<8x128xf32>
    %c0_2 = arith.constant 0 : index
    %c0_3 = arith.constant 0 : index
    %4 = vector.load %arg3[%c0_2, %c0_3] : memref<8x128xbf16, #tpu.memory_space<vmem>>, vector<8x128xbf16>
    %c0_4 = arith.constant 0 : index
    %c0_5 = arith.constant 0 : index
    %5 = vector.load %arg4[%c0_4, %c0_5] : memref<128x128xbf16, #tpu.memory_space<vmem>>, vector<128x128xbf16>
    %cst = arith.constant dense<0.000000e+00> : vector<8x128xf32>
    %6 = tpu.matmul %4, %5, %cst {dimension_numbers = #tpu.dot_dimension_numbers<[1], [0], [0], [1], [0, 0, 1, 1], [], []>} : vector<8x128xbf16>, vector<128x128xbf16>, vector<8x128xf32> -> vector<8x128xf32>
    %7 = arith.addf %3, %6 : vector<8x128xf32>
    %c0_6 = arith.constant 0 : index
    %c0_7 = arith.constant 0 : index
    %8 = vector.load %arg8[%c0_6, %c0_7] : memref<8x128xf32, #tpu.memory_space<vmem>>, vector<8x128xf32>
    tpu.vector_store %arg8[%c0_6, %c0_7], %7 {strides = array<i32>} : memref<8x128xf32, #tpu.memory_space<vmem>>, vector<8x128xf32>,
    %c0_i32_8 = arith.constant 0 : i32
    %9 = arith.cmpi eq, %arg2, %c0_i32_8 : i32
    %10 = arith.extui %9 : i1 to i32
    %c0_i32_9 = arith.constant 0 : i32
    %11 = arith.cmpi ne, %10, %c0_i32_9 : i32
    scf.if %11 {
      %c0_10 = arith.constant 0 : index
      %c0_11 = arith.constant 0 : index
      %12 = vector.load %arg8[%c0_10, %c0_11] : memref<8x128xf32, #tpu.memory_space<vmem>>, vector<8x128xf32>
      %c0_12 = arith.constant 0 : index
      %c0_13 = arith.constant 0 : index
      %13 = vector.load %arg5[%c0_12, %c0_13] : memref<1x128xf32, #tpu.memory_space<vmem>>, vector<1x128xf32>
      %14 = vector.broadcast %13 : vector<1x128xf32> to vector<8x128xf32>
      %15 = arith.mulf %12, %14 : vector<8x128xf32>
      %c0_14 = arith.constant 0 : index
      %c0_15 = arith.constant 0 : index
      %16 = vector.load %arg6[%c0_14, %c0_15] : memref<1x128xf32, #tpu.memory_space<vmem>>, vector<1x128xf32>
      %17 = vector.broadcast %16 : vector<1x128xf32> to vector<8x128xf32>
      %18 = arith.addf %15, %17 : vector<8x128xf32>
      %cst_16 = arith.constant 0.000000e+00 : f32
      %19 = vector.broadcast %cst_16 : f32 to vector<8x128xf32>
      %20 = arith.maximumf %18, %19 : vector<8x128xf32>
      %21 = arith.truncf %20 : vector<8x128xf32> to vector<8x128xbf16>
      %c0_17 = arith.constant 0 : index
      %c0_18 = arith.constant 0 : index
      %22 = vector.load %arg7[%c0_17, %c0_18] : memref<8x128xbf16, #tpu.memory_space<vmem>>, vector<8x128xbf16>
      tpu.vector_store %arg7[%c0_17, %c0_18], %21 {strides = array<i32>} : memref<8x128xbf16, #tpu.memory_space<vmem>>, vector<8x128xbf16>,
    } else {
    }
    return
  }
  func.func @transform_0(%arg0: i32, %arg1: i32, %arg2: i32) -> (i32, i32) {
    %c0_i32 = arith.constant 0 : i32
    return %arg0, %arg2 : i32, i32
  }
  func.func @transform_1(%arg0: i32, %arg1: i32, %arg2: i32) -> (i32, i32) {
    %c0_i32 = arith.constant 0 : i32
    return %arg2, %arg1 : i32, i32
  }
  func.func @transform_2(%arg0: i32, %arg1: i32, %arg2: i32) -> (i32, i32) {
    %c0_i32 = arith.constant 0 : i32
    %c0_i32_0 = arith.constant 0 : i32
    return %c0_i32, %arg1 : i32, i32
  }
  func.func @transform_3(%arg0: i32, %arg1: i32, %arg2: i32) -> (i32, i32) {
    %c0_i32 = arith.constant 0 : i32
    %c0_i32_0 = arith.constant 0 : i32
    return %c0_i32, %arg1 : i32, i32
  }
  func.func @transform_4(%arg0: i32, %arg1: i32, %arg2: i32) -> (i32, i32) {
    %c0_i32 = arith.constant 0 : i32
    return %arg0, %arg1 : i32, i32
  }
}

module attributes {stable_mosaic.version = 11 : i64} {
  func.func @_gemm_bn_kernel(%arg0: i32, %arg1: i32, %arg2: i32, %arg3: memref<8x128xbf16, #tpu.memory_space<vmem>>, %arg4: memref<128x128xbf16, #tpu.memory_space<vmem>>, %arg5: memref<1x128xf32, #tpu.memory_space<vmem>>, %arg6: memref<1x128xf32, #tpu.memory_space<vmem>>, %arg7: memref<8x128xbf16, #tpu.memory_space<vmem>>, %arg8: memref<8x128xf32, #tpu.memory_space<vmem>>) attributes {dimension_semantics = [#tpu.dimension_semantics<parallel>, #tpu.dimension_semantics<parallel>, #tpu.dimension_semantics<arbitrary>], iteration_bounds = array<i64: 1, 2, 1>, scalar_prefetch = 0 : i64, scratch_operands = 1 : i64, tpu.core_type = #tpu.core_type<tc>, window_params = [{transform_indices = @transform_0, window_bounds = array<i64: 8, 128>}, {transform_indices = @transform_1, window_bounds = array<i64: 128, 128>}, {transform_indices = @transform_2, window_bounds = array<i64: 1, 128>}, {transform_indices = @transform_3, window_bounds = array<i64: 1, 128>}, {transform_indices = @transform_4, window_bounds = array<i64: 8, 128>}]} {
    %c0_i32 = arith.constant 0 : i32
    %0 = arith.cmpi eq, %arg2, %c0_i32 : i32
    %1 = arith.extui %0 : i1 to i32
    %c0_i32_0 = arith.constant 0 : i32
    %2 = arith.cmpi ne, %1, %c0_i32_0 : i32
    scf.if %2 {
      %cst_10 = arith.constant 0.000000e+00 : f32
      %12 = vector.broadcast %cst_10 : f32 to vector<8x128xf32>
      %c0_11 = arith.constant 0 : index
      %c0_12 = arith.constant 0 : index
      %13 = vector.load %arg8[%c0_11, %c0_12] : memref<8x128xf32, #tpu.memory_space<vmem>>, vector<8x128xf32>
      tpu.vector_store %arg8[%c0_11, %c0_12], %12 {strides = array<i32>} : memref<8x128xf32, #tpu.memory_space<vmem>>, vector<8x128xf32>,
    } else {
    }
    %c0 = arith.constant 0 : index
    %c0_1 = arith.constant 0 : index
    %3 = vector.load %arg8[%c0, %c0_1] : memref<8x128xf32, #tpu.memory_space<vmem>>, vector<8x128xf32>
    %c0_2 = arith.constant 0 : index
    %c0_3 = arith.constant 0 : index
    %4 = vector.load %arg3[%c0_2, %c0_3] : memref<8x128xbf16, #tpu.memory_space<vmem>>, vector<8x128xbf16>
    %c0_4 = arith.constant 0 : index
    %c0_5 = arith.constant 0 : index
    %5 = vector.load %arg4[%c0_4, %c0_5] : memref<128x128xbf16, #tpu.memory_space<vmem>>, vector<128x128xbf16>
    %cst = arith.constant dense<0.000000e+00> : vector<8x128xf32>
    %6 = tpu.matmul %4, %5, %cst {dimension_numbers = #tpu.dot_dimension_numbers<[1], [0], [0], [1], [0, 0, 1, 1], [], []>} : vector<8x128xbf16>, vector<128x128xbf16>, vector<8x128xf32> -> vector<8x128xf32>
    %7 = arith.addf %3, %6 : vector<8x128xf32>
    %c0_6 = arith.constant 0 : index
    %c0_7 = arith.constant 0 : index
    %8 = vector.load %arg8[%c0_6, %c0_7] : memref<8x128xf32, #tpu.memory_space<vmem>>, vector<8x128xf32>
    tpu.vector_store %arg8[%c0_6, %c0_7], %7 {strides = array<i32>} : memref<8x128xf32, #tpu.memory_space<vmem>>, vector<8x128xf32>,
    %c0_i32_8 = arith.constant 0 : i32
    %9 = arith.cmpi eq, %arg2, %c0_i32_8 : i32
    %10 = arith.extui %9 : i1 to i32
    %c0_i32_9 = arith.constant 0 : i32
    %11 = arith.cmpi ne, %10, %c0_i32_9 : i32
    scf.if %11 {
      %c0_10 = arith.constant 0 : index
      %c0_11 = arith.constant 0 : index
      %12 = vector.load %arg8[%c0_10, %c0_11] : memref<8x128xf32, #tpu.memory_space<vmem>>, vector<8x128xf32>
      %c0_12 = arith.constant 0 : index
      %c0_13 = arith.constant 0 : index
      %13 = vector.load %arg5[%c0_12, %c0_13] : memref<1x128xf32, #tpu.memory_space<vmem>>, vector<1x128xf32>
      %14 = vector.broadcast %13 : vector<1x128xf32> to vector<8x128xf32>
      %15 = arith.mulf %12, %14 : vector<8x128xf32>
      %c0_14 = arith.constant 0 : index
      %c0_15 = arith.constant 0 : index
      %16 = vector.load %arg6[%c0_14, %c0_15] : memref<1x128xf32, #tpu.memory_space<vmem>>, vector<1x128xf32>
      %17 = vector.broadcast %16 : vector<1x128xf32> to vector<8x128xf32>
      %18 = arith.addf %15, %17 : vector<8x128xf32>
      %19 = arith.truncf %18 : vector<8x128xf32> to vector<8x128xbf16>
      %c0_16 = arith.constant 0 : index
      %c0_17 = arith.constant 0 : index
      %20 = vector.load %arg7[%c0_16, %c0_17] : memref<8x128xbf16, #tpu.memory_space<vmem>>, vector<8x128xbf16>
      tpu.vector_store %arg7[%c0_16, %c0_17], %19 {strides = array<i32>} : memref<8x128xbf16, #tpu.memory_space<vmem>>, vector<8x128xbf16>,
    } else {
    }
    return
  }
  func.func @transform_0(%arg0: i32, %arg1: i32, %arg2: i32) -> (i32, i32) {
    %c0_i32 = arith.constant 0 : i32
    return %arg0, %arg2 : i32, i32
  }
  func.func @transform_1(%arg0: i32, %arg1: i32, %arg2: i32) -> (i32, i32) {
    %c0_i32 = arith.constant 0 : i32
    return %arg2, %arg1 : i32, i32
  }
  func.func @transform_2(%arg0: i32, %arg1: i32, %arg2: i32) -> (i32, i32) {
    %c0_i32 = arith.constant 0 : i32
    %c0_i32_0 = arith.constant 0 : i32
    return %c0_i32, %arg1 : i32, i32
  }
  func.func @transform_3(%arg0: i32, %arg1: i32, %arg2: i32) -> (i32, i32) {
    %c0_i32 = arith.constant 0 : i32
    %c0_i32_0 = arith.constant 0 : i32
    return %c0_i32, %arg1 : i32, i32
  }
  func.func @transform_4(%arg0: i32, %arg1: i32, %arg2: i32) -> (i32, i32) {
    %c0_i32 = arith.constant 0 : i32
    return %arg0, %arg1 : i32, i32
  }
}

module attributes {stable_mosaic.version = 11 : i64} {
  func.func @_gemm_bn_res_kernel(%arg0: i32, %arg1: i32, %arg2: i32, %arg3: memref<8x128xbf16, #tpu.memory_space<vmem>>, %arg4: memref<128x128xbf16, #tpu.memory_space<vmem>>, %arg5: memref<1x128xf32, #tpu.memory_space<vmem>>, %arg6: memref<1x128xf32, #tpu.memory_space<vmem>>, %arg7: memref<8x128xbf16, #tpu.memory_space<vmem>>, %arg8: memref<8x128xbf16, #tpu.memory_space<vmem>>, %arg9: memref<8x128xf32, #tpu.memory_space<vmem>>) attributes {dimension_semantics = [#tpu.dimension_semantics<parallel>, #tpu.dimension_semantics<parallel>, #tpu.dimension_semantics<arbitrary>], iteration_bounds = array<i64: 1, 2, 1>, scalar_prefetch = 0 : i64, scratch_operands = 1 : i64, tpu.core_type = #tpu.core_type<tc>, window_params = [{transform_indices = @transform_0, window_bounds = array<i64: 8, 128>}, {transform_indices = @transform_1, window_bounds = array<i64: 128, 128>}, {transform_indices = @transform_2, window_bounds = array<i64: 1, 128>}, {transform_indices = @transform_3, window_bounds = array<i64: 1, 128>}, {transform_indices = @transform_4, window_bounds = array<i64: 8, 128>}, {transform_indices = @transform_5, window_bounds = array<i64: 8, 128>}]} {
    %c0_i32 = arith.constant 0 : i32
    %0 = arith.cmpi eq, %arg2, %c0_i32 : i32
    %1 = arith.extui %0 : i1 to i32
    %c0_i32_0 = arith.constant 0 : i32
    %2 = arith.cmpi ne, %1, %c0_i32_0 : i32
    scf.if %2 {
      %cst_10 = arith.constant 0.000000e+00 : f32
      %12 = vector.broadcast %cst_10 : f32 to vector<8x128xf32>
      %c0_11 = arith.constant 0 : index
      %c0_12 = arith.constant 0 : index
      %13 = vector.load %arg9[%c0_11, %c0_12] : memref<8x128xf32, #tpu.memory_space<vmem>>, vector<8x128xf32>
      tpu.vector_store %arg9[%c0_11, %c0_12], %12 {strides = array<i32>} : memref<8x128xf32, #tpu.memory_space<vmem>>, vector<8x128xf32>,
    } else {
    }
    %c0 = arith.constant 0 : index
    %c0_1 = arith.constant 0 : index
    %3 = vector.load %arg9[%c0, %c0_1] : memref<8x128xf32, #tpu.memory_space<vmem>>, vector<8x128xf32>
    %c0_2 = arith.constant 0 : index
    %c0_3 = arith.constant 0 : index
    %4 = vector.load %arg3[%c0_2, %c0_3] : memref<8x128xbf16, #tpu.memory_space<vmem>>, vector<8x128xbf16>
    %c0_4 = arith.constant 0 : index
    %c0_5 = arith.constant 0 : index
    %5 = vector.load %arg4[%c0_4, %c0_5] : memref<128x128xbf16, #tpu.memory_space<vmem>>, vector<128x128xbf16>
    %cst = arith.constant dense<0.000000e+00> : vector<8x128xf32>
    %6 = tpu.matmul %4, %5, %cst {dimension_numbers = #tpu.dot_dimension_numbers<[1], [0], [0], [1], [0, 0, 1, 1], [], []>} : vector<8x128xbf16>, vector<128x128xbf16>, vector<8x128xf32> -> vector<8x128xf32>
    %7 = arith.addf %3, %6 : vector<8x128xf32>
    %c0_6 = arith.constant 0 : index
    %c0_7 = arith.constant 0 : index
    %8 = vector.load %arg9[%c0_6, %c0_7] : memref<8x128xf32, #tpu.memory_space<vmem>>, vector<8x128xf32>
    tpu.vector_store %arg9[%c0_6, %c0_7], %7 {strides = array<i32>} : memref<8x128xf32, #tpu.memory_space<vmem>>, vector<8x128xf32>,
    %c0_i32_8 = arith.constant 0 : i32
    %9 = arith.cmpi eq, %arg2, %c0_i32_8 : i32
    %10 = arith.extui %9 : i1 to i32
    %c0_i32_9 = arith.constant 0 : i32
    %11 = arith.cmpi ne, %10, %c0_i32_9 : i32
    scf.if %11 {
      %c0_10 = arith.constant 0 : index
      %c0_11 = arith.constant 0 : index
      %12 = vector.load %arg9[%c0_10, %c0_11] : memref<8x128xf32, #tpu.memory_space<vmem>>, vector<8x128xf32>
      %c0_12 = arith.constant 0 : index
      %c0_13 = arith.constant 0 : index
      %13 = vector.load %arg5[%c0_12, %c0_13] : memref<1x128xf32, #tpu.memory_space<vmem>>, vector<1x128xf32>
      %14 = vector.broadcast %13 : vector<1x128xf32> to vector<8x128xf32>
      %15 = arith.mulf %12, %14 : vector<8x128xf32>
      %c0_14 = arith.constant 0 : index
      %c0_15 = arith.constant 0 : index
      %16 = vector.load %arg6[%c0_14, %c0_15] : memref<1x128xf32, #tpu.memory_space<vmem>>, vector<1x128xf32>
      %17 = vector.broadcast %16 : vector<1x128xf32> to vector<8x128xf32>
      %18 = arith.addf %15, %17 : vector<8x128xf32>
      %c0_16 = arith.constant 0 : index
      %c0_17 = arith.constant 0 : index
      %19 = vector.load %arg7[%c0_16, %c0_17] : memref<8x128xbf16, #tpu.memory_space<vmem>>, vector<8x128xbf16>
      %20 = arith.extf %19 : vector<8x128xbf16> to vector<8x128xf32>
      %21 = arith.addf %18, %20 : vector<8x128xf32>
      %cst_18 = arith.constant 0.000000e+00 : f32
      %22 = vector.broadcast %cst_18 : f32 to vector<8x128xf32>
      %23 = arith.maximumf %21, %22 : vector<8x128xf32>
      %24 = arith.truncf %23 : vector<8x128xf32> to vector<8x128xbf16>
      %c0_19 = arith.constant 0 : index
      %c0_20 = arith.constant 0 : index
      %25 = vector.load %arg8[%c0_19, %c0_20] : memref<8x128xbf16, #tpu.memory_space<vmem>>, vector<8x128xbf16>
      tpu.vector_store %arg8[%c0_19, %c0_20], %24 {strides = array<i32>} : memref<8x128xbf16, #tpu.memory_space<vmem>>, vector<8x128xbf16>,
    } else {
    }
    return
  }
  func.func @transform_0(%arg0: i32, %arg1: i32, %arg2: i32) -> (i32, i32) {
    %c0_i32 = arith.constant 0 : i32
    return %arg0, %arg2 : i32, i32
  }
  func.func @transform_1(%arg0: i32, %arg1: i32, %arg2: i32) -> (i32, i32) {
    %c0_i32 = arith.constant 0 : i32
    return %arg2, %arg1 : i32, i32
  }
  func.func @transform_2(%arg0: i32, %arg1: i32, %arg2: i32) -> (i32, i32) {
    %c0_i32 = arith.constant 0 : i32
    %c0_i32_0 = arith.constant 0 : i32
    return %c0_i32, %arg1 : i32, i32
  }
  func.func @transform_3(%arg0: i32, %arg1: i32, %arg2: i32) -> (i32, i32) {
    %c0_i32 = arith.constant 0 : i32
    %c0_i32_0 = arith.constant 0 : i32
    return %c0_i32, %arg1 : i32, i32
  }
  func.func @transform_4(%arg0: i32, %arg1: i32, %arg2: i32) -> (i32, i32) {
    %c0_i32 = arith.constant 0 : i32
    return %arg0, %arg1 : i32, i32
  }
  func.func @transform_5(%arg0: i32, %arg1: i32, %arg2: i32) -> (i32, i32) {
    %c0_i32 = arith.constant 0 : i32
    return %arg0, %arg1 : i32, i32
  }
}

module attributes {stable_mosaic.version = 11 : i64} {
  func.func @_gemm_bn_kernel(%arg0: i32, %arg1: i32, %arg2: i32, %arg3: memref<8x256xbf16, #tpu.memory_space<vmem>>, %arg4: memref<256x128xbf16, #tpu.memory_space<vmem>>, %arg5: memref<1x128xf32, #tpu.memory_space<vmem>>, %arg6: memref<1x128xf32, #tpu.memory_space<vmem>>, %arg7: memref<8x128xbf16, #tpu.memory_space<vmem>>, %arg8: memref<8x128xf32, #tpu.memory_space<vmem>>) attributes {dimension_semantics = [#tpu.dimension_semantics<parallel>, #tpu.dimension_semantics<parallel>, #tpu.dimension_semantics<arbitrary>], iteration_bounds = array<i64: 1, 1, 1>, scalar_prefetch = 0 : i64, scratch_operands = 1 : i64, tpu.core_type = #tpu.core_type<tc>, window_params = [{transform_indices = @transform_0, window_bounds = array<i64: 8, 256>}, {transform_indices = @transform_1, window_bounds = array<i64: 256, 128>}, {transform_indices = @transform_2, window_bounds = array<i64: 1, 128>}, {transform_indices = @transform_3, window_bounds = array<i64: 1, 128>}, {transform_indices = @transform_4, window_bounds = array<i64: 8, 128>}]} {
    %c0_i32 = arith.constant 0 : i32
    %0 = arith.cmpi eq, %arg2, %c0_i32 : i32
    %1 = arith.extui %0 : i1 to i32
    %c0_i32_0 = arith.constant 0 : i32
    %2 = arith.cmpi ne, %1, %c0_i32_0 : i32
    scf.if %2 {
      %cst_10 = arith.constant 0.000000e+00 : f32
      %12 = vector.broadcast %cst_10 : f32 to vector<8x128xf32>
      %c0_11 = arith.constant 0 : index
      %c0_12 = arith.constant 0 : index
      %13 = vector.load %arg8[%c0_11, %c0_12] : memref<8x128xf32, #tpu.memory_space<vmem>>, vector<8x128xf32>
      tpu.vector_store %arg8[%c0_11, %c0_12], %12 {strides = array<i32>} : memref<8x128xf32, #tpu.memory_space<vmem>>, vector<8x128xf32>,
    } else {
    }
    %c0 = arith.constant 0 : index
    %c0_1 = arith.constant 0 : index
    %3 = vector.load %arg8[%c0, %c0_1] : memref<8x128xf32, #tpu.memory_space<vmem>>, vector<8x128xf32>
    %c0_2 = arith.constant 0 : index
    %c0_3 = arith.constant 0 : index
    %4 = vector.load %arg3[%c0_2, %c0_3] : memref<8x256xbf16, #tpu.memory_space<vmem>>, vector<8x256xbf16>
    %c0_4 = arith.constant 0 : index
    %c0_5 = arith.constant 0 : index
    %5 = vector.load %arg4[%c0_4, %c0_5] : memref<256x128xbf16, #tpu.memory_space<vmem>>, vector<256x128xbf16>
    %cst = arith.constant dense<0.000000e+00> : vector<8x128xf32>
    %6 = tpu.matmul %4, %5, %cst {dimension_numbers = #tpu.dot_dimension_numbers<[1], [0], [0], [1], [0, 0, 1, 1], [], []>} : vector<8x256xbf16>, vector<256x128xbf16>, vector<8x128xf32> -> vector<8x128xf32>
    %7 = arith.addf %3, %6 : vector<8x128xf32>
    %c0_6 = arith.constant 0 : index
    %c0_7 = arith.constant 0 : index
    %8 = vector.load %arg8[%c0_6, %c0_7] : memref<8x128xf32, #tpu.memory_space<vmem>>, vector<8x128xf32>
    tpu.vector_store %arg8[%c0_6, %c0_7], %7 {strides = array<i32>} : memref<8x128xf32, #tpu.memory_space<vmem>>, vector<8x128xf32>,
    %c0_i32_8 = arith.constant 0 : i32
    %9 = arith.cmpi eq, %arg2, %c0_i32_8 : i32
    %10 = arith.extui %9 : i1 to i32
    %c0_i32_9 = arith.constant 0 : i32
    %11 = arith.cmpi ne, %10, %c0_i32_9 : i32
    scf.if %11 {
      %c0_10 = arith.constant 0 : index
      %c0_11 = arith.constant 0 : index
      %12 = vector.load %arg8[%c0_10, %c0_11] : memref<8x128xf32, #tpu.memory_space<vmem>>, vector<8x128xf32>
      %c0_12 = arith.constant 0 : index
      %c0_13 = arith.constant 0 : index
      %13 = vector.load %arg5[%c0_12, %c0_13] : memref<1x128xf32, #tpu.memory_space<vmem>>, vector<1x128xf32>
      %14 = vector.broadcast %13 : vector<1x128xf32> to vector<8x128xf32>
      %15 = arith.mulf %12, %14 : vector<8x128xf32>
      %c0_14 = arith.constant 0 : index
      %c0_15 = arith.constant 0 : index
      %16 = vector.load %arg6[%c0_14, %c0_15] : memref<1x128xf32, #tpu.memory_space<vmem>>, vector<1x128xf32>
      %17 = vector.broadcast %16 : vector<1x128xf32> to vector<8x128xf32>
      %18 = arith.addf %15, %17 : vector<8x128xf32>
      %cst_16 = arith.constant 0.000000e+00 : f32
      %19 = vector.broadcast %cst_16 : f32 to vector<8x128xf32>
      %20 = arith.maximumf %18, %19 : vector<8x128xf32>
      %21 = arith.truncf %20 : vector<8x128xf32> to vector<8x128xbf16>
      %c0_17 = arith.constant 0 : index
      %c0_18 = arith.constant 0 : index
      %22 = vector.load %arg7[%c0_17, %c0_18] : memref<8x128xbf16, #tpu.memory_space<vmem>>, vector<8x128xbf16>
      tpu.vector_store %arg7[%c0_17, %c0_18], %21 {strides = array<i32>} : memref<8x128xbf16, #tpu.memory_space<vmem>>, vector<8x128xbf16>,
    } else {
    }
    return
  }
  func.func @transform_0(%arg0: i32, %arg1: i32, %arg2: i32) -> (i32, i32) {
    %c0_i32 = arith.constant 0 : i32
    return %arg0, %arg2 : i32, i32
  }
  func.func @transform_1(%arg0: i32, %arg1: i32, %arg2: i32) -> (i32, i32) {
    %c0_i32 = arith.constant 0 : i32
    return %arg2, %arg1 : i32, i32
  }
  func.func @transform_2(%arg0: i32, %arg1: i32, %arg2: i32) -> (i32, i32) {
    %c0_i32 = arith.constant 0 : i32
    %c0_i32_0 = arith.constant 0 : i32
    return %c0_i32, %arg1 : i32, i32
  }
  func.func @transform_3(%arg0: i32, %arg1: i32, %arg2: i32) -> (i32, i32) {
    %c0_i32 = arith.constant 0 : i32
    %c0_i32_0 = arith.constant 0 : i32
    return %c0_i32, %arg1 : i32, i32
  }
  func.func @transform_4(%arg0: i32, %arg1: i32, %arg2: i32) -> (i32, i32) {
    %c0_i32 = arith.constant 0 : i32
    return %arg0, %arg1 : i32, i32
  }
}

module attributes {stable_mosaic.version = 11 : i64} {
  func.func @_gap_bn_l2_kernel(%arg0: i32, %arg1: memref<2x4x256xbf16, #tpu.memory_space<vmem>>, %arg2: memref<1x256xf32, #tpu.memory_space<vmem>>, %arg3: memref<1x256xf32, #tpu.memory_space<vmem>>, %arg4: memref<2x256xf32, #tpu.memory_space<vmem>>) attributes {dimension_semantics = [#tpu.dimension_semantics<arbitrary>], iteration_bounds = array<i64: 1>, scalar_prefetch = 0 : i64, scratch_operands = 0 : i64, tpu.core_type = #tpu.core_type<tc>, window_params = [{pipeline_mode = #tpu.pipeline_mode<synchronous>, transform_indices = @transform_0, window_bounds = array<i64: 2, 4, 256>}, {pipeline_mode = #tpu.pipeline_mode<synchronous>, transform_indices = @transform_1, window_bounds = array<i64: 1, 256>}, {pipeline_mode = #tpu.pipeline_mode<synchronous>, transform_indices = @transform_2, window_bounds = array<i64: 1, 256>}, {pipeline_mode = #tpu.pipeline_mode<synchronous>, transform_indices = @transform_3, window_bounds = array<i64: 2, 256>}]} {
    %c0 = arith.constant 0 : index
    %c0_0 = arith.constant 0 : index
    %c0_1 = arith.constant 0 : index
    %0 = vector.load %arg1[%c0, %c0_0, %c0_1] : memref<2x4x256xbf16, #tpu.memory_space<vmem>>, vector<2x4x256xbf16>
    %1 = arith.extf %0 : vector<2x4x256xbf16> to vector<2x4x256xf32>
    %cst = arith.constant dense<0.000000e+00> : vector<2x256xf32>
    %2 = vector.multi_reduction <add>, %1, %cst [1] : vector<2x4x256xf32> to vector<2x256xf32>
    %cst_2 = arith.constant 2.500000e-01 : f32
    %3 = vector.broadcast %cst_2 : f32 to vector<2x256xf32>
    %4 = arith.mulf %2, %3 : vector<2x256xf32>
    %c0_3 = arith.constant 0 : index
    %c0_4 = arith.constant 0 : index
    %5 = vector.load %arg2[%c0_3, %c0_4] : memref<1x256xf32, #tpu.memory_space<vmem>>, vector<1x256xf32>
    %6 = vector.broadcast %5 : vector<1x256xf32> to vector<2x256xf32>
    %7 = arith.mulf %4, %6 : vector<2x256xf32>
    %c0_5 = arith.constant 0 : index
    %c0_6 = arith.constant 0 : index
    %8 = vector.load %arg3[%c0_5, %c0_6] : memref<1x256xf32, #tpu.memory_space<vmem>>, vector<1x256xf32>
    %9 = vector.broadcast %8 : vector<1x256xf32> to vector<2x256xf32>
    %10 = arith.addf %7, %9 : vector<2x256xf32>
    %11 = arith.mulf %10, %10 : vector<2x256xf32>
    %cst_7 = arith.constant dense<0.000000e+00> : vector<2xf32>
    %12 = vector.multi_reduction <add>, %11, %cst_7 [1] : vector<2x256xf32> to vector<2xf32>
    %13 = vector.shape_cast %12 : vector<2xf32> to vector<2x1xf32>
    %cst_8 = arith.constant 1.000000e-24 : f32
    %14 = vector.broadcast %cst_8 : f32 to vector<2x1xf32>
    %15 = arith.maximumf %13, %14 : vector<2x1xf32>
    %16 = math.rsqrt %15 : vector<2x1xf32>
    %17 = vector.broadcast %16 : vector<2x1xf32> to vector<2x256xf32>
    %18 = arith.mulf %10, %17 : vector<2x256xf32>
    %c0_9 = arith.constant 0 : index
    %c0_10 = arith.constant 0 : index
    %19 = vector.load %arg4[%c0_9, %c0_10] : memref<2x256xf32, #tpu.memory_space<vmem>>, vector<2x256xf32>
    tpu.vector_store %arg4[%c0_9, %c0_10], %18 {strides = array<i32>} : memref<2x256xf32, #tpu.memory_space<vmem>>, vector<2x256xf32>,
    return
  }
  func.func @transform_0(%arg0: i32) -> (i32, i32, i32) {
    %c0_i32 = arith.constant 0 : i32
    %c0_i32_0 = arith.constant 0 : i32
    %c0_i32_1 = arith.constant 0 : i32
    %c0_i32_2 = arith.constant 0 : i32
    return %c0_i32, %c0_i32_0, %c0_i32_1 : i32, i32, i32
  }
  func.func @transform_1(%arg0: i32) -> (i32, i32) {
    %c0_i32 = arith.constant 0 : i32
    %c0_i32_0 = arith.constant 0 : i32
    %c0_i32_1 = arith.constant 0 : i32
    return %c0_i32, %c0_i32_0 : i32, i32
  }
  func.func @transform_2(%arg0: i32) -> (i32, i32) {
    %c0_i32 = arith.constant 0 : i32
    %c0_i32_0 = arith.constant 0 : i32
    %c0_i32_1 = arith.constant 0 : i32
    return %c0_i32, %c0_i32_0 : i32, i32
  }
  func.func @transform_3(%arg0: i32) -> (i32, i32) {
    %c0_i32 = arith.constant 0 : i32
    %c0_i32_0 = arith.constant 0 : i32
    %c0_i32_1 = arith.constant 0 : i32
    return %c0_i32, %c0_i32_0 : i32, i32
  }
}

</mosaic_0001>

<bundles_post_ra>
// kernel: resnet_forward.55
= control target key start
LH: loop header
LB: loop body
LE: loop exit
PB: predicated region body
PF: predicated region fallthrough
CT: control target
= control target key end

     0   :  { %s1843_s15 = smov 0   ;;  %s1845_s16 = smov 0   ;;  %s2054_s0 = inlined_call_operand.vmem [shape: bf16[512,256], index: 0, kind: input, shape index: {}]   ;;  %s2055_s1 = inlined_call_operand.vmem [shape: bf16[256,128], index: 1, kind: input, shape index: {}]   ;;  %s2056_s2 = inlined_call_operand.vmem [shape: f32[1,128], index: 2, kind: input, shape index: {}]   ;;  %s2057_s3 = inlined_call_operand.vmem [shape: f32[1,128], index: 3, kind: input, shape index: {}]   ;;  %s2058_s4 = inlined_call_operand.vmem [shape: bf16[512,128], index: 4, kind: output, shape index: {}]  }
   0x1   :  { %s1847_s17 = smov 0  }
   0x2 LB: > { %s33_s18 = sadd.s32 1, %s1812_s16  ;;  %p1360_p0 = scmp.ge.s32.totalorder %s1816_s17, 1  ;;  %s1816_s17 = sphi %s1847_s17, %s14_s17   ;;  %s1812_s16 = sphi %s1845_s16, %s2060_s16   ;;  %s1808_s15 = sphi %s1843_s15, %s2059_s15  }
   0x3   : > { %p35_p1 = scmp.ge.s32.totalorder %s33_s18, 2  ;;  %p224_p2 = scmp.lt.s32.totalorder %s1816_s17, 3 }
   0x5   : > { %s2062_s18 = smov (%p35_p1, %s33_s18), 0  ;;  %p225_p3 = pnand %p1360_p0, %p224_p2 }
   0x6   : > { %v1730_v0 = vld [vmem:[%s2055_s1 + $0x40] sm:$0xff] (!%p225_p3)   ;;  %s1361_s21 = sshll.u32 (!%p225_p3), %s1808_s15, 5  ;;  %v1732_v2 = vld [vmem:[%s2055_s1 + $0x48] sm:$0xff] (!%p225_p3)   ;;  %v1734_v4 = vld [vmem:[%s2055_s1 + $0x50] sm:$0xff] (!%p225_p3)  }
   0x7   : > { %228 = sbr.rel (%p225_p3) target bundleno = 322 (0x142), region = 36  ;;  %v1731_v1 = vld [vmem:[%s2055_s1] sm:$0xff] (!%p225_p3)   ;;  %1578 = vmatprep.subr.bf16.mxu0 (!%p225_p3), %v1730_v0  ;;  %1690 = vmatprep.subr.bf16.mxu1 (!%p225_p3), %v1730_v0  ;;  %v1733_v3 = vld [vmem:[%s2055_s1 + $0x8] sm:$0xff] (!%p225_p3)   ;;  %p274_p4 = scmp.lt.s32.totalorder (!%p225_p3), %s1361_s21, 63  ;;  %v1735_v5 = vld [vmem:[%s2055_s1 + $0x10] sm:$0xff] (!%p225_p3)  }
   0x8   : > { %1579 = vmatpush3.bf16.msra.mxu0 (!%p225_p3), %v1731_v1  ;;  %1698 = vmatpush3.bf16.msra.mxu1 (!%p225_p3), %v1731_v1  ;;  %v1736_v6 = vld [vmem:[%s2055_s1 + $0x58] sm:$0xff] (!%p225_p3)   ;;  %v1738_v8 = vld [vmem:[%s2055_s1 + $0x60] sm:$0xff] (!%p225_p3)   ;;  %v1740_v10 = vld [vmem:[%s2055_s1 + $0x68] sm:$0xff] (!%p225_p3)  }
   0x9   : > { %1580 = vmatprep.subr.bf16.mxu0 (!%p225_p3), %v1732_v2  ;;  %1691 = vmatprep.subr.bf16.mxu1 (!%p225_p3), %v1732_v2  ;;  %v1737_v7 = vld [vmem:[%s2055_s1 + $0x18] sm:$0xff] (!%p225_p3)   ;;  %v1739_v9 = vld [vmem:[%s2055_s1 + $0x20] sm:$0xff] (!%p225_p3)   ;;  %v1741_v13 = vld [vmem:[%s2055_s1 + $0x28] sm:$0xff] (!%p225_p3)  }
   0xa   : > { %v1742_v14 = vld [vmem:[%s2055_s1 + $0x70] sm:$0xff] (!%p225_p3)   ;;  %v1744_v16 = vld [vmem:[%s2055_s1 + $0x78] sm:$0xff] (!%p225_p3)   ;;  %v1952_v51 = vld [vmem:[%s2056_s2] ss:$0 sm:$0xff] (!%p225_p3) }
   0xb   : > { %v1743_v15 = vld [vmem:[%s2055_s1 + $0x30] sm:$0xff] (!%p225_p3)   ;;  %v1745_v17 = vld [vmem:[%s2055_s1 + $0x38] sm:$0xff] (!%p225_p3)   ;;  %v1957_v57 = vld [vmem:[%s2057_s3] ss:$0 sm:$0xff] (!%p225_p3) }
   0xc   : > { %1581 = vmatpush3.bf16.msra.mxu0 (!%p225_p3), %v1733_v3  ;;  %1699 = vmatpush3.bf16.msra.mxu1 (!%p225_p3), %v1733_v3 }
   0xd   : > { %1582 = vmatprep.subr.bf16.mxu0 (!%p225_p3), %v1734_v4  ;;  %1692 = vmatprep.subr.bf16.mxu1 (!%p225_p3), %v1734_v4 }
   0xe   : > { %s2064_s21 = smov (!%p274_p4, %s1361_s21), 63 }
   0xf   : > { %s1450_s10 = sshll.u32 %s2064_s21, 3  ;;  %s1365_s12 = sshll.u32 %s2064_s21, 2 }
  0x10   : > { %1583 = vmatpush3.bf16.msra.mxu0 %v1735_v5  ;;  %1700 = vmatpush3.bf16.msra.mxu1 %v1735_v5  ;;  %s1894_s15 = scalar_lea.vmem %s2054_s0, %s1450_s10  ;;  %s1971_s21 = scalar_lea.vmem %s2058_s4, %s1365_s12 }
  0x11   : > { %1584 = vmatprep.subr.bf16.mxu0 %v1736_v6  ;;  %1693 = vmatprep.subr.bf16.mxu1 %v1736_v6  ;;  %v1748_v11 = vld [vmem:[%s1894_s15 + $0x4] ss:$8 sps:$4 sm:$0xff]   ;;  %v1746_v18 = vld [vmem:[%s1894_s15] ss:$8 sps:$4 sm:$0xff]   ;;  %v1752_v20 = vld [vmem:[%s1894_s15 + $0x14] ss:$8 sps:$4 sm:$0xff]  }
  0x12   : > { %v1751_v12 = vld [vmem:[%s1894_s15 + $0x84] ss:$8 sps:$4 sm:$0xff]   ;;  %729 = vmatprep.mubr.bf16.mxu0 %v1748_v11  ;;  %v1749_v19 = vld [vmem:[%s1894_s15 + $0x80] ss:$8 sps:$4 sm:$0xff]   ;;  %v1754_v21 = vld [vmem:[%s1894_s15 + $0x94] ss:$8 sps:$4 sm:$0xff]  }
  0x13   : > { %793 = vmatprep.mubr.bf16.mxu1 %v1751_v12  ;;  %v1756_v22 = vld [vmem:[%s1894_s15 + $0x10] ss:$8 sps:$4 sm:$0xff]   ;;  %v1758_v24 = vld [vmem:[%s1894_s15 + $0x24] ss:$8 sps:$4 sm:$0xff]   ;;  %v1762_v26 = vld [vmem:[%s1894_s15 + $0x20] ss:$8 sps:$4 sm:$0xff]  }
  0x14   : > { %1585 = vmatpush3.bf16.msra.mxu0 %v1737_v7  ;;  %1701 = vmatpush3.bf16.msra.mxu1 %v1737_v7  ;;  %v1757_v23 = vld [vmem:[%s1894_s15 + $0x90] ss:$8 sps:$4 sm:$0xff]   ;;  %v1760_v25 = vld [vmem:[%s1894_s15 + $0xa4] ss:$8 sps:$4 sm:$0xff]   ;;  %v1763_v27 = vld [vmem:[%s1894_s15 + $0xa0] ss:$8 sps:$4 sm:$0xff]  }
  0x15   : > { %1586 = vmatprep.subr.bf16.mxu0 %v1738_v8  ;;  %1694 = vmatprep.subr.bf16.mxu1 %v1738_v8  ;;  %v1764_v28 = vld [vmem:[%s1894_s15 + $0x34] ss:$8 sps:$4 sm:$0xff]   ;;  %v1768_v30 = vld [vmem:[%s1894_s15 + $0x30] ss:$8 sps:$4 sm:$0xff]   ;;  %v1770_v32 = vld [vmem:[%s1894_s15 + $0x44] ss:$8 sps:$4 sm:$0xff]  }
  0x16   : > { %v1766_v29 = vld [vmem:[%s1894_s15 + $0xb4] ss:$8 sps:$4 sm:$0xff]   ;;  %v1769_v31 = vld [vmem:[%s1894_s15 + $0xb0] ss:$8 sps:$4 sm:$0xff]   ;;  %v1772_v33 = vld [vmem:[%s1894_s15 + $0xc4] ss:$8 sps:$4 sm:$0xff]  }
  0x17   : > { %v1774_v34 = vld [vmem:[%s1894_s15 + $0x40] ss:$8 sps:$4 sm:$0xff]   ;;  %v1776_v36 = vld [vmem:[%s1894_s15 + $0x54] ss:$8 sps:$4 sm:$0xff]   ;;  %v1780_v38 = vld [vmem:[%s1894_s15 + $0x50] ss:$8 sps:$4 sm:$0xff]  }
  0x18   : > { %1587 = vmatpush3.bf16.msra.mxu0 %v1739_v9  ;;  %1702 = vmatpush3.bf16.msra.mxu1 %v1739_v9  ;;  %v1775_v35 = vld [vmem:[%s1894_s15 + $0xc0] ss:$8 sps:$4 sm:$0xff]   ;;  %v1778_v37 = vld [vmem:[%s1894_s15 + $0xd4] ss:$8 sps:$4 sm:$0xff]   ;;  %v1781_v39 = vld [vmem:[%s1894_s15 + $0xd0] ss:$8 sps:$4 sm:$0xff]  }
  0x19   : > { %1588 = vmatprep.subr.bf16.mxu0 %v1740_v10  ;;  %1695 = vmatprep.subr.bf16.mxu1 %v1740_v10  ;;  %v1782_v40 = vld [vmem:[%s1894_s15 + $0x64] ss:$8 sps:$4 sm:$0xff]   ;;  %v1786_v42 = vld [vmem:[%s1894_s15 + $0x60] ss:$8 sps:$4 sm:$0xff]   ;;  %v1788_v44 = vld [vmem:[%s1894_s15 + $0x74] ss:$8 sps:$4 sm:$0xff]  }
  0x1a   : > { %v1784_v41 = vld [vmem:[%s1894_s15 + $0xe4] ss:$8 sps:$4 sm:$0xff]   ;;  %v1787_v43 = vld [vmem:[%s1894_s15 + $0xe0] ss:$8 sps:$4 sm:$0xff]   ;;  %v1790_v45 = vld [vmem:[%s1894_s15 + $0xf4] ss:$8 sps:$4 sm:$0xff]  }
  0x1b   : > { %v1792_v46 = vld [vmem:[%s1894_s15 + $0x70] ss:$8 sps:$4 sm:$0xff]  }
  0x1c   : > { %1589 = vmatpush3.bf16.msra.mxu0 %v1741_v13  ;;  %1703 = vmatpush3.bf16.msra.mxu1 %v1741_v13  ;;  %v1793_v47 = vld [vmem:[%s1894_s15 + $0xf0] ss:$8 sps:$4 sm:$0xff]  }
  0x1d   : > { %1590 = vmatprep.subr.bf16.mxu0 %v1742_v14  ;;  %1696 = vmatprep.subr.bf16.mxu1 %v1742_v14 }
  0x20   : > { %1591 = vmatpush3.bf16.msra.mxu0 %v1743_v15  ;;  %1704 = vmatpush3.bf16.msra.mxu1 %v1743_v15 }
  0x21   : > { %1592 = vmatprep.subr.bf16.mxu0 %v1744_v16  ;;  %1697 = vmatprep.subr.bf16.mxu1 %v1744_v16 }
  0x24   : > { %1593 = vmatpush3.bf16.msra.mxu0 %v1745_v17  ;;  %1705 = vmatpush3.bf16.msra.mxu1 %v1745_v17 }
  0x27   : > { %730 = vmatmul.mubr.bf16.vlgmr.msra.gmra.mrb[0].mxu0 %v1746_v18  ;;  %794 = vmatmul.mubr.bf16.vlgmr.msra.gmra.mrb[0].mxu1 %v1749_v19 }
  0x28   : > { %737 = vmatprep.mubr.bf16.mxu0 %v1752_v20  ;;  %801 = vmatprep.mubr.bf16.mxu1 %v1754_v21 }
  0x2f   : > { %738 = vmatmul.mubr.bf16.gmra.mrb[4].mxu0 %v1756_v22  ;;  %802 = vmatmul.mubr.bf16.gmra.mrb[4].mxu1 %v1757_v23 }
  0x30   : > { %745 = vmatprep.mubr.bf16.mxu0 %v1758_v24  ;;  %809 = vmatprep.mubr.bf16.mxu1 %v1760_v25 }
  0x37   : > { %746 = vmatmul.mubr.bf16.gmra.mrb[8].mxu0 %v1762_v26  ;;  %810 = vmatmul.mubr.bf16.gmra.mrb[8].mxu1 %v1763_v27 }
  0x38   : > { %753 = vmatprep.mubr.bf16.mxu0 %v1764_v28  ;;  %817 = vmatprep.mubr.bf16.mxu1 %v1766_v29 }
  0x3f   : > { %754 = vmatmul.mubr.bf16.gmra.mrb[12].mxu0 %v1768_v30  ;;  %818 = vmatmul.mubr.bf16.gmra.mrb[12].mxu1 %v1769_v31 }
  0x40   : > { %761 = vmatprep.mubr.bf16.mxu0 %v1770_v32  ;;  %825 = vmatprep.mubr.bf16.mxu1 %v1772_v33 }
  0x47   : > { %762 = vmatmul.mubr.bf16.gmra.mrb[16].mxu0 %v1774_v34  ;;  %826 = vmatmul.mubr.bf16.gmra.mrb[16].mxu1 %v1775_v35 }
  0x48   : > { %769 = vmatprep.mubr.bf16.mxu0 %v1776_v36  ;;  %833 = vmatprep.mubr.bf16.mxu1 %v1778_v37 }
  0x4f   : > { %770 = vmatmul.mubr.bf16.gmra.mrb[20].mxu0 %v1780_v38  ;;  %834 = vmatmul.mubr.bf16.gmra.mrb[20].mxu1 %v1781_v39 }
  0x50   : > { %777 = vmatprep.mubr.bf16.mxu0 %v1782_v40  ;;  %841 = vmatprep.mubr.bf16.mxu1 %v1784_v41 }
  0x57   : > { %778 = vmatmul.mubr.bf16.gmra.mrb[24].mxu0 %v1786_v42  ;;  %842 = vmatmul.mubr.bf16.gmra.mrb[24].mxu1 %v1787_v43 }
  0x58   : > { %785 = vmatprep.mubr.bf16.mxu0 %v1788_v44  ;;  %849 = vmatprep.mubr.bf16.mxu1 %v1790_v45 }
  0x5f   : > { %786 = vmatmul.mubr.bf16.gmra.mrb[28].mxu0 %v1792_v46  ;;  %850 = vmatmul.mubr.bf16.gmra.mrb[28].mxu1 %v1793_v47 }
  0xfa   : > { %v1594_v48 = vpop.f32.mrb[0].mxu0  ;;  %v1642_v49 = vpop.f32.mrb[0].mxu1 }
  0xfb   : > { %v1595_v50 = vpop.f32.mrb[1].mxu0  ;;  %v1643_v52 = vpop.f32.mrb[1].mxu1 }
  0xfc   : > { %v1596_v53 = vadd.f32 %v1595_v50, %v1594_v48  ;;  %v1644_v54 = vadd.f32 %v1643_v52, %v1642_v49  ;;  %v1597_v55 = vpop.f32.mrb[2].mxu0  ;;  %v1645_v56 = vpop.f32.mrb[2].mxu1 }
  0xfd   : > { %v1598_v58 = vpop.f32.mrb[3].mxu0  ;;  %v1646_v59 = vpop.f32.mrb[3].mxu1 }
  0xfe   : > { %v964_v60 = vmul.f32 %v1596_v53, %v1952_v51  ;;  %v980_v61 = vmul.f32 %v1644_v54, %v1952_v51  ;;  %v1599_v62 = vadd.f32 %v1598_v58, %v1597_v55  ;;  %v1647_v63 = vadd.f32 %v1646_v59, %v1645_v56 }
 0x100   : > { %v1003_v0 = vadd.f32 %v1957_v57, %v964_v60  ;;  %v1019_v1 = vadd.f32 %v1957_v57, %v980_v61  ;;  %v965_v2 = vmul.f32 %v1599_v62, %v1952_v51  ;;  %v981_v3 = vmul.f32 %v1647_v63, %v1952_v51 }
 0x102   : > { %v1004_v4 = vadd.f32 %v1957_v57, %v965_v2  ;;  %v1020_v5 = vadd.f32 %v1957_v57, %v981_v3  ;;  %v1600_v6 = vpop.f32.mrb[4].mxu0  ;;  %v1648_v7 = vpop.f32.mrb[4].mxu1  ;;  %v1035_v8 = vmax.f32 %v1003_v0, 0.0  ;;  %v1051_v9 = vmax.f32 %v1019_v1, 0.0 }
 0x103   : > { %v1601_v10 = vpop.f32.mrb[5].mxu0  ;;  %v1649_v11 = vpop.f32.mrb[5].mxu1 }
 0x104   : > { %v1036_v12 = vmax.f32 %v1004_v4, 0.0  ;;  %v1052_v13 = vmax.f32 %v1020_v5, 0.0  ;;  %v1602_v14 = vadd.f32 %v1601_v10, %v1600_v6  ;;  %v1650_v15 = vadd.f32 %v1649_v11, %v1648_v7  ;;  %v1603_v16 = vpop.f32.mrb[6].mxu0  ;;  %v1651_v17 = vpop.f32.mrb[6].mxu1 }
 0x105   : > { %v1604_v18 = vpop.f32.mrb[7].mxu0  ;;  %v1652_v19 = vpop.f32.mrb[7].mxu1 }
 0x106   : > { %v1486_v20 = vpack.c.bf16 %v1036_v12, %v1035_v8  ;;  %v1526_v21 = vpack.c.bf16 %v1052_v13, %v1051_v9  ;;  %v966_v22 = vmul.f32 %v1602_v14, %v1952_v51  ;;  %v982_v23 = vmul.f32 %v1650_v15, %v1952_v51 }
 0x107   : > { %v1605_v24 = vadd.f32 %v1604_v18, %v1603_v16  ;;  %v1653_v25 = vadd.f32 %v1652_v19, %v1651_v17 }
 0x108   : > { %1487 = vst [vmem:[%s1971_s21] sm:$0xff] %v1486_v20   ;;  %1570 = vst [vmem:[%s1971_s21 + $0x40] sm:$0xff] %v1526_v21   ;;  %v1005_v26 = vadd.f32 %v1957_v57, %v966_v22  ;;  %v1021_v27 = vadd.f32 %v1957_v57, %v982_v23 }
 0x109   : > { %v967_v28 = vmul.f32 %v1605_v24, %v1952_v51  ;;  %v983_v29 = vmul.f32 %v1653_v25, %v1952_v51 }
 0x10a   : > { %v1606_v30 = vpop.f32.mrb[8].mxu0  ;;  %v1654_v31 = vpop.f32.mrb[8].mxu1  ;;  %v1037_v40 = vmax.f32 %v1005_v26, 0.0  ;;  %v1053_v41 = vmax.f32 %v1021_v27, 0.0 }
 0x10b   : > { %v1006_v32 = vadd.f32 %v1957_v57, %v967_v28  ;;  %v1022_v33 = vadd.f32 %v1957_v57, %v983_v29  ;;  %v1607_v34 = vpop.f32.mrb[9].mxu0  ;;  %v1655_v35 = vpop.f32.mrb[9].mxu1 }
 0x10c   : > { %v1608_v36 = vadd.f32 %v1607_v34, %v1606_v30  ;;  %v1656_v37 = vadd.f32 %v1655_v35, %v1654_v31  ;;  %v1609_v38 = vpop.f32.mrb[10].mxu0  ;;  %v1657_v39 = vpop.f32.mrb[10].mxu1 }
 0x10d   : > { %v1038_v42 = vmax.f32 %v1006_v32, 0.0  ;;  %v1054_v43 = vmax.f32 %v1022_v33, 0.0  ;;  %v1610_v44 = vpop.f32.mrb[11].mxu0  ;;  %v1658_v45 = vpop.f32.mrb[11].mxu1 }
 0x10e   : > { %v968_v46 = vmul.f32 %v1608_v36, %v1952_v51  ;;  %v984_v47 = vmul.f32 %v1656_v37, %v1952_v51  ;;  %v1611_v48 = vadd.f32 %v1610_v44, %v1609_v38  ;;  %v1659_v49 = vadd.f32 %v1658_v45, %v1657_v39 }
 0x10f   : > { %v1491_v50 = vpack.c.bf16 %v1038_v42, %v1037_v40  ;;  %v1531_v52 = vpack.c.bf16 %v1054_v43, %v1053_v41 }
 0x110   : > { %v1007_v53 = vadd.f32 %v1957_v57, %v968_v46  ;;  %v1023_v54 = vadd.f32 %v1957_v57, %v984_v47  ;;  %v969_v55 = vmul.f32 %v1611_v48, %v1952_v51  ;;  %v985_v56 = vmul.f32 %v1659_v49, %v1952_v51 }
 0x111   : > { %1563 = vst [vmem:[%s1971_s21 + $0x8] sm:$0xff] %v1491_v50   ;;  %1571 = vst [vmem:[%s1971_s21 + $0x48] sm:$0xff] %v1531_v52  }
 0x112   : > { %v1008_v58 = vadd.f32 %v1957_v57, %v969_v55  ;;  %v1024_v59 = vadd.f32 %v1957_v57, %v985_v56  ;;  %v1612_v60 = vpop.f32.mrb[12].mxu0  ;;  %v1660_v61 = vpop.f32.mrb[12].mxu1  ;;  %v1039_v62 = vmax.f32 %v1007_v53, 0.0  ;;  %v1055_v63 = vmax.f32 %v1023_v54, 0.0 }
 0x113   : > { %v1613_v0 = vpop.f32.mrb[13].mxu0  ;;  %v1661_v1 = vpop.f32.mrb[13].mxu1 }
 0x114   : > { %v1040_v2 = vmax.f32 %v1008_v58, 0.0  ;;  %v1056_v3 = vmax.f32 %v1024_v59, 0.0  ;;  %v1614_v4 = vadd.f32 %v1613_v0, %v1612_v60  ;;  %v1662_v5 = vadd.f32 %v1661_v1, %v1660_v61  ;;  %v1615_v6 = vpop.f32.mrb[14].mxu0  ;;  %v1663_v7 = vpop.f32.mrb[14].mxu1 }
 0x115   : > { %v1616_v8 = vpop.f32.mrb[15].mxu0  ;;  %v1664_v9 = vpop.f32.mrb[15].mxu1 }
 0x116   : > { %v1496_v10 = vpack.c.bf16 %v1040_v2, %v1039_v62  ;;  %v1536_v11 = vpack.c.bf16 %v1056_v3, %v1055_v63  ;;  %v970_v12 = vmul.f32 %v1614_v4, %v1952_v51  ;;  %v986_v13 = vmul.f32 %v1662_v5, %v1952_v51 }
 0x117   : > { %v1617_v14 = vadd.f32 %v1616_v8, %v1615_v6  ;;  %v1665_v15 = vadd.f32 %v1664_v9, %v1663_v7 }
 0x118   : > { %1564 = vst [vmem:[%s1971_s21 + $0x10] sm:$0xff] %v1496_v10   ;;  %1572 = vst [vmem:[%s1971_s21 + $0x50] sm:$0xff] %v1536_v11   ;;  %v1009_v16 = vadd.f32 %v1957_v57, %v970_v12  ;;  %v1025_v17 = vadd.f32 %v1957_v57, %v986_v13 }
 0x119   : > { %v971_v18 = vmul.f32 %v1617_v14, %v1952_v51  ;;  %v987_v19 = vmul.f32 %v1665_v15, %v1952_v51 }
 0x11a   : > { %v1618_v20 = vpop.f32.mrb[16].mxu0  ;;  %v1666_v21 = vpop.f32.mrb[16].mxu1  ;;  %v1041_v30 = vmax.f32 %v1009_v16, 0.0  ;;  %v1057_v31 = vmax.f32 %v1025_v17, 0.0 }
 0x11b   : > { %v1010_v22 = vadd.f32 %v1957_v57, %v971_v18  ;;  %v1026_v23 = vadd.f32 %v1957_v57, %v987_v19  ;;  %v1619_v24 = vpop.f32.mrb[17].mxu0  ;;  %v1667_v25 = vpop.f32.mrb[17].mxu1 }
 0x11c   : > { %v1620_v26 = vadd.f32 %v1619_v24, %v1618_v20  ;;  %v1668_v27 = vadd.f32 %v1667_v25, %v1666_v21  ;;  %v1621_v28 = vpop.f32.mrb[18].mxu0  ;;  %v1669_v29 = vpop.f32.mrb[18].mxu1 }
 0x11d   : > { %v1042_v32 = vmax.f32 %v1010_v22, 0.0  ;;  %v1058_v33 = vmax.f32 %v1026_v23, 0.0  ;;  %v1622_v34 = vpop.f32.mrb[19].mxu0  ;;  %v1670_v35 = vpop.f32.mrb[19].mxu1 }
 0x11e   : > { %v972_v36 = vmul.f32 %v1620_v26, %v1952_v51  ;;  %v988_v37 = vmul.f32 %v1668_v27, %v1952_v51  ;;  %v1623_v38 = vadd.f32 %v1622_v34, %v1621_v28  ;;  %v1671_v39 = vadd.f32 %v1670_v35, %v1669_v29 }
 0x11f   : > { %v1501_v40 = vpack.c.bf16 %v1042_v32, %v1041_v30  ;;  %v1541_v41 = vpack.c.bf16 %v1058_v33, %v1057_v31 }
 0x120   : > { %v1011_v42 = vadd.f32 %v1957_v57, %v972_v36  ;;  %v1027_v43 = vadd.f32 %v1957_v57, %v988_v37  ;;  %v973_v44 = vmul.f32 %v1623_v38, %v1952_v51  ;;  %v989_v45 = vmul.f32 %v1671_v39, %v1952_v51 }
 0x121   : > { %1565 = vst [vmem:[%s1971_s21 + $0x18] sm:$0xff] %v1501_v40   ;;  %1573 = vst [vmem:[%s1971_s21 + $0x58] sm:$0xff] %v1541_v41  }
 0x122   : > { %v1012_v46 = vadd.f32 %v1957_v57, %v973_v44  ;;  %v1028_v47 = vadd.f32 %v1957_v57, %v989_v45  ;;  %v1624_v48 = vpop.f32.mrb[20].mxu0  ;;  %v1672_v49 = vpop.f32.mrb[20].mxu1  ;;  %v1043_v50 = vmax.f32 %v1011_v42, 0.0  ;;  %v1059_v52 = vmax.f32 %v1027_v43, 0.0 }
 0x123   : > { %v1625_v53 = vpop.f32.mrb[21].mxu0  ;;  %v1673_v54 = vpop.f32.mrb[21].mxu1 }
 0x124   : > { %v1044_v55 = vmax.f32 %v1012_v46, 0.0  ;;  %v1060_v56 = vmax.f32 %v1028_v47, 0.0  ;;  %v1626_v58 = vadd.f32 %v1625_v53, %v1624_v48  ;;  %v1674_v59 = vadd.f32 %v1673_v54, %v1672_v49  ;;  %v1627_v60 = vpop.f32.mrb[22].mxu0  ;;  %v1675_v61 = vpop.f32.mrb[22].mxu1 }
 0x125   : > { %v1628_v62 = vpop.f32.mrb[23].mxu0  ;;  %v1676_v63 = vpop.f32.mrb[23].mxu1 }
 0x126   : > { %v1506_v0 = vpack.c.bf16 %v1044_v55, %v1043_v50  ;;  %v1546_v1 = vpack.c.bf16 %v1060_v56, %v1059_v52  ;;  %v974_v2 = vmul.f32 %v1626_v58, %v1952_v51  ;;  %v990_v3 = vmul.f32 %v1674_v59, %v1952_v51 }
 0x127   : > { %v1629_v4 = vadd.f32 %v1628_v62, %v1627_v60  ;;  %v1677_v5 = vadd.f32 %v1676_v63, %v1675_v61 }
 0x128   : > { %1566 = vst [vmem:[%s1971_s21 + $0x20] sm:$0xff] %v1506_v0   ;;  %1574 = vst [vmem:[%s1971_s21 + $0x60] sm:$0xff] %v1546_v1   ;;  %v1013_v6 = vadd.f32 %v1957_v57, %v974_v2  ;;  %v1029_v7 = vadd.f32 %v1957_v57, %v990_v3 }
 0x129   : > { %v975_v8 = vmul.f32 %v1629_v4, %v1952_v51  ;;  %v991_v9 = vmul.f32 %v1677_v5, %v1952_v51 }
 0x12a   : > { %v1630_v10 = vpop.f32.mrb[24].mxu0  ;;  %v1678_v11 = vpop.f32.mrb[24].mxu1  ;;  %v1045_v20 = vmax.f32 %v1013_v6, 0.0  ;;  %v1061_v21 = vmax.f32 %v1029_v7, 0.0 }
 0x12b   : > { %v1014_v12 = vadd.f32 %v1957_v57, %v975_v8  ;;  %v1030_v13 = vadd.f32 %v1957_v57, %v991_v9  ;;  %v1631_v14 = vpop.f32.mrb[25].mxu0  ;;  %v1679_v15 = vpop.f32.mrb[25].mxu1 }
 0x12c   : > { %v1632_v16 = vadd.f32 %v1631_v14, %v1630_v10  ;;  %v1680_v17 = vadd.f32 %v1679_v15, %v1678_v11  ;;  %v1633_v18 = vpop.f32.mrb[26].mxu0  ;;  %v1681_v19 = vpop.f32.mrb[26].mxu1 }
 0x12d   : > { %v1046_v22 = vmax.f32 %v1014_v12, 0.0  ;;  %v1062_v23 = vmax.f32 %v1030_v13, 0.0  ;;  %v1634_v24 = vpop.f32.mrb[27].mxu0  ;;  %v1682_v25 = vpop.f32.mrb[27].mxu1 }
 0x12e   : > { %v976_v26 = vmul.f32 %v1632_v16, %v1952_v51  ;;  %v992_v27 = vmul.f32 %v1680_v17, %v1952_v51  ;;  %v1635_v28 = vadd.f32 %v1634_v24, %v1633_v18  ;;  %v1683_v29 = vadd.f32 %v1682_v25, %v1681_v19 }
 0x12f   : > { %v1511_v30 = vpack.c.bf16 %v1046_v22, %v1045_v20  ;;  %v1551_v31 = vpack.c.bf16 %v1062_v23, %v1061_v21 }
 0x130   : > { %v1015_v32 = vadd.f32 %v1957_v57, %v976_v26  ;;  %v1031_v33 = vadd.f32 %v1957_v57, %v992_v27  ;;  %v977_v34 = vmul.f32 %v1635_v28, %v1952_v51  ;;  %v993_v35 = vmul.f32 %v1683_v29, %v1952_v51 }
 0x131   : > { %1567 = vst [vmem:[%s1971_s21 + $0x28] sm:$0xff] %v1511_v30   ;;  %1575 = vst [vmem:[%s1971_s21 + $0x68] sm:$0xff] %v1551_v31  }
 0x132   : > { %v1016_v36 = vadd.f32 %v1957_v57, %v977_v34  ;;  %v1032_v37 = vadd.f32 %v1957_v57, %v993_v35  ;;  %v1636_v38 = vpop.f32.mrb[28].mxu0  ;;  %v1684_v39 = vpop.f32.mrb[28].mxu1  ;;  %v1047_v40 = vmax.f32 %v1015_v32, 0.0  ;;  %v1063_v41 = vmax.f32 %v1031_v33, 0.0 }
 0x133   : > { %v1637_v42 = vpop.f32.mrb[29].mxu0  ;;  %v1685_v43 = vpop.f32.mrb[29].mxu1 }
 0x134   : > { %v1048_v44 = vmax.f32 %v1016_v36, 0.0  ;;  %v1064_v45 = vmax.f32 %v1032_v37, 0.0  ;;  %v1638_v46 = vadd.f32 %v1637_v42, %v1636_v38  ;;  %v1686_v47 = vadd.f32 %v1685_v43, %v1684_v39  ;;  %v1639_v48 = vpop.f32.mrb[30].mxu0  ;;  %v1687_v49 = vpop.f32.mrb[30].mxu1 }
 0x135   : > { %v1640_v50 = vpop.f32.mrb[31].mxu0  ;;  %v1688_v52 = vpop.f32.mrb[31].mxu1 }
 0x136   : > { %v1516_v53 = vpack.c.bf16 %v1048_v44, %v1047_v40  ;;  %v1556_v54 = vpack.c.bf16 %v1064_v45, %v1063_v41  ;;  %v978_v55 = vmul.f32 %v1638_v46, %v1952_v51  ;;  %v994_v56 = vmul.f32 %v1686_v47, %v1952_v51 }
 0x137   : > { %v1641_v58 = vadd.f32 %v1640_v50, %v1639_v48  ;;  %v1689_v59 = vadd.f32 %v1688_v52, %v1687_v49 }
 0x138   : > { %1568 = vst [vmem:[%s1971_s21 + $0x30] sm:$0xff] %v1516_v53   ;;  %1576 = vst [vmem:[%s1971_s21 + $0x70] sm:$0xff] %v1556_v54   ;;  %v1017_v60 = vadd.f32 %v1957_v57, %v978_v55  ;;  %v1033_v61 = vadd.f32 %v1957_v57, %v994_v56 }
 0x139   : > { %v979_v62 = vmul.f32 %v1641_v58, %v1952_v51  ;;  %v995_v63 = vmul.f32 %v1689_v59, %v1952_v51 }
 0x13a   : > { %v1049_v2 = vmax.f32 %v1017_v60, 0.0  ;;  %v1065_v3 = vmax.f32 %v1033_v61, 0.0 }
 0x13b   : > { %v1018_v0 = vadd.f32 %v1957_v57, %v979_v62  ;;  %v1034_v1 = vadd.f32 %v1957_v57, %v995_v63 }
 0x13d   : > { %v1050_v4 = vmax.f32 %v1018_v0, 0.0  ;;  %v1066_v5 = vmax.f32 %v1034_v1, 0.0 }
 0x13f   : > { %v1521_v6 = vpack.c.bf16 %v1050_v4, %v1049_v2  ;;  %v1561_v7 = vpack.c.bf16 %v1066_v5, %v1065_v3 }
 0x141   : > { %1569 = vst [vmem:[%s1971_s21 + $0x38] sm:$0xff] %v1521_v6   ;;  %1577 = vst [vmem:[%s1971_s21 + $0x78] sm:$0xff] %v1561_v7  }
 0x142 PF: > { %s14_s17 = sadd.s32 1, %s1816_s17   ;;  %s2059_s15 = smov %s1812_s16 }
 0x143   : > { %p11_p5 = scmp.ge.s32.totalorder %s14_s17, 4   ;;  %s2060_s16 = smov %s2062_s18 }
 0x145   :  { %13 = sbr.rel (!%p11_p5) target bundleno = 2 (0x2), region = 83 }

// kernel: resnet_forward.57
= control target key start
LH: loop header
LB: loop body
LE: loop exit
PB: predicated region body
PF: predicated region fallthrough
CT: control target
= control target key end

     0   :  { %s774_s1 = inlined_call_operand.vmem [shape: bf16[128,128], index: 1, kind: input, shape index: {}]   ;;  %s775_s0 = inlined_call_operand.vmem [shape: bf16[128,128], index: 0, kind: input, shape index: {}]   ;;  %s776_s2 = inlined_call_operand.vmem [shape: f32[1,128], index: 2, kind: input, shape index: {}]   ;;  %s777_s3 = inlined_call_operand.vmem [shape: f32[1,128], index: 3, kind: input, shape index: {}]   ;;  %s778_s4 = inlined_call_operand.vmem [shape: bf16[128,128], index: 4, kind: output, shape index: {}]  }
   0x1   :  { %v637_v0 = vld [vmem:[%s774_s1] sm:$0xff]   ;;  %v638_v1 = vld [vmem:[%s774_s1 + $0x8] sm:$0xff]   ;;  %v639_v2 = vld [vmem:[%s774_s1 + $0x10] sm:$0xff]  }
   0x2   :  { %589 = vmatprep.subr.bf16.mxu0 %v637_v0  ;;  %621 = vmatprep.subr.bf16.mxu1 %v637_v0  ;;  %v640_v3 = vld [vmem:[%s774_s1 + $0x18] sm:$0xff]   ;;  %v645_v4 = vld [vmem:[%s775_s0] sm:$0xff]   ;;  %v642_v7 = vld [vmem:[%s774_s1 + $0x28] sm:$0xff]  }
   0x3   :  { %590 = vmatpush3.bf16.msra.mxu0 %v637_v0  ;;  %629 = vmatpush3.bf16.msra.mxu1 %v637_v0  ;;  %v646_v5 = vld [vmem:[%s775_s0 + $0x20] sm:$0xff]   ;;  %v643_v8 = vld [vmem:[%s774_s1 + $0x30] sm:$0xff]   ;;  %v644_v9 = vld [vmem:[%s774_s1 + $0x38] sm:$0xff]  }
   0x4   :  { %591 = vmatprep.subr.bf16.mxu0 %v638_v1  ;;  %622 = vmatprep.subr.bf16.mxu1 %v638_v1  ;;  %v641_v6 = vld [vmem:[%s774_s1 + $0x20] sm:$0xff]   ;;  %v647_v10 = vld [vmem:[%s775_s0 + $0x8] sm:$0xff]   ;;  %v649_v12 = vld [vmem:[%s775_s0 + $0x10] sm:$0xff]  }
   0x5   :  { %605 = vmatprep.mubr.bf16.mxu0 %v645_v4  ;;  %613 = vmatprep.mubr.bf16.mxu1 %v646_v5  ;;  %v648_v11 = vld [vmem:[%s775_s0 + $0x28] sm:$0xff]   ;;  %v650_v13 = vld [vmem:[%s775_s0 + $0x30] sm:$0xff]   ;;  %v651_v14 = vld [vmem:[%s775_s0 + $0x18] sm:$0xff]  }
   0x6   :  { %v652_v15 = vld [vmem:[%s775_s0 + $0x38] sm:$0xff]   ;;  %v492_v16 = vld [vmem:[%s776_s2] ss:$0 sm:$0xff] }
   0x7   :  { %592 = vmatpush3.bf16.msra.mxu0 %v638_v1  ;;  %630 = vmatpush3.bf16.msra.mxu1 %v638_v1  ;;  %v732_v18 = vld [vmem:[%s777_s3] ss:$0 sm:$0xff] }
   0x8   :  { %593 = vmatprep.subr.bf16.mxu0 %v639_v2  ;;  %623 = vmatprep.subr.bf16.mxu1 %v639_v2 }
   0xb   :  { %594 = vmatpush3.bf16.msra.mxu0 %v639_v2  ;;  %631 = vmatpush3.bf16.msra.mxu1 %v639_v2 }
   0xc   :  { %595 = vmatprep.subr.bf16.mxu0 %v640_v3  ;;  %624 = vmatprep.subr.bf16.mxu1 %v640_v3 }
   0xf   :  { %596 = vmatpush3.bf16.msra.mxu0 %v640_v3  ;;  %632 = vmatpush3.bf16.msra.mxu1 %v640_v3 }
  0x10   :  { %597 = vmatprep.subr.bf16.mxu0 %v641_v6  ;;  %625 = vmatprep.subr.bf16.mxu1 %v641_v6 }
  0x13   :  { %598 = vmatpush3.bf16.msra.mxu0 %v641_v6  ;;  %633 = vmatpush3.bf16.msra.mxu1 %v641_v6 }
  0x14   :  { %599 = vmatprep.subr.bf16.mxu0 %v642_v7  ;;  %626 = vmatprep.subr.bf16.mxu1 %v642_v7 }
  0x17   :  { %600 = vmatpush3.bf16.msra.mxu0 %v642_v7  ;;  %634 = vmatpush3.bf16.msra.mxu1 %v642_v7 }
  0x18   :  { %601 = vmatprep.subr.bf16.mxu0 %v643_v8  ;;  %627 = vmatprep.subr.bf16.mxu1 %v643_v8 }
  0x1b   :  { %602 = vmatpush3.bf16.msra.mxu0 %v643_v8  ;;  %635 = vmatpush3.bf16.msra.mxu1 %v643_v8 }
  0x1c   :  { %603 = vmatprep.subr.bf16.mxu0 %v644_v9  ;;  %628 = vmatprep.subr.bf16.mxu1 %v644_v9 }
  0x1f   :  { %604 = vmatpush3.bf16.msra.mxu0 %v644_v9  ;;  %636 = vmatpush3.bf16.msra.mxu1 %v644_v9 }
  0x22   :  { %606 = vmatmul.mubr.bf16.vlgmr.msra.gmra.mrb[0].mxu0 %v647_v10  ;;  %614 = vmatmul.mubr.bf16.vlgmr.msra.gmra.mrb[0].mxu1 %v648_v11 }
  0x23   :  { %609 = vmatprep.mubr.bf16.mxu0 %v649_v12  ;;  %617 = vmatprep.mubr.bf16.mxu1 %v650_v13 }
  0x2a   :  { %610 = vmatmul.mubr.bf16.gmra.mrb[4].mxu0 %v651_v14  ;;  %618 = vmatmul.mubr.bf16.gmra.mrb[4].mxu1 %v652_v15 }
  0xf5   :  { %v607_v17 = vpop.f32.mrb[0].mxu0  ;;  %v615_v19 = vpop.f32.mrb[0].mxu1 }
  0xf6   :  { %v339_v20 = vmul.f32 %v607_v17, %v492_v16  ;;  %v347_v21 = vmul.f32 %v615_v19, %v492_v16  ;;  %v216_v22 = vpop.f32.mrb[1].mxu0  ;;  %v248_v23 = vpop.f32.mrb[1].mxu1 }
  0xf7   :  { %v337_v24 = vmul.f32 %v492_v16, %v216_v22  ;;  %v345_v25 = vmul.f32 %v492_v16, %v248_v23  ;;  %v608_v26 = vpop.f32.mrb[2].mxu0  ;;  %v616_v27 = vpop.f32.mrb[2].mxu1 }
  0xf8   :  { %v362_v28 = vadd.f32 %v732_v18, %v339_v20  ;;  %v370_v29 = vadd.f32 %v732_v18, %v347_v21  ;;  %v340_v30 = vmul.f32 %v608_v26, %v492_v16  ;;  %v348_v31 = vmul.f32 %v616_v27, %v492_v16  ;;  %v219_v32 = vpop.f32.mrb[3].mxu0  ;;  %v251_v33 = vpop.f32.mrb[3].mxu1 }
  0xf9   :  { %v360_v34 = vadd.f32 %v732_v18, %v337_v24  ;;  %v368_v35 = vadd.f32 %v732_v18, %v345_v25  ;;  %v338_v36 = vmul.f32 %v492_v16, %v219_v32  ;;  %v346_v37 = vmul.f32 %v492_v16, %v251_v33 }
  0xfa   :  { %v363_v38 = vadd.f32 %v732_v18, %v340_v30  ;;  %v371_v39 = vadd.f32 %v732_v18, %v348_v31  ;;  %v378_v42 = vmax.f32 %v362_v28, 0.0  ;;  %v386_v43 = vmax.f32 %v370_v29, 0.0 }
  0xfb   :  { %v361_v40 = vadd.f32 %v732_v18, %v338_v36  ;;  %v369_v41 = vadd.f32 %v732_v18, %v346_v37  ;;  %v376_v46 = vmax.f32 %v360_v34, 0.0  ;;  %v384_v47 = vmax.f32 %v368_v35, 0.0 }
  0xfc   :  { %v379_v44 = vmax.f32 %v363_v38, 0.0  ;;  %v387_v45 = vmax.f32 %v371_v39, 0.0 }
  0xfd   :  { %v377_v48 = vmax.f32 %v361_v40, 0.0  ;;  %v385_v49 = vmax.f32 %v369_v41, 0.0  ;;  %v611_v50 = vpop.f32.mrb[4].mxu0  ;;  %v619_v51 = vpop.f32.mrb[4].mxu1 }
  0xfe   :  { %v534_v52 = vpack.c.bf16 %v379_v44, %v378_v42  ;;  %v554_v53 = vpack.c.bf16 %v387_v45, %v386_v43  ;;  %v343_v54 = vmul.f32 %v611_v50, %v492_v16  ;;  %v351_v55 = vmul.f32 %v619_v51, %v492_v16  ;;  %v232_v56 = vpop.f32.mrb[5].mxu0  ;;  %v264_v57 = vpop.f32.mrb[5].mxu1 }
  0xff   :  { %v529_v58 = vpack.c.bf16 %v377_v48, %v376_v46  ;;  %v549_v59 = vpack.c.bf16 %v385_v49, %v384_v47  ;;  %v341_v60 = vmul.f32 %v492_v16, %v232_v56  ;;  %v349_v61 = vmul.f32 %v492_v16, %v264_v57  ;;  %v612_v62 = vpop.f32.mrb[6].mxu0  ;;  %v620_v63 = vpop.f32.mrb[6].mxu1 }
 0x100   :  { %566 = vst [vmem:[%s778_s4 + $0x8] sm:$0xff] %v534_v52   ;;  %570 = vst [vmem:[%s778_s4 + $0x28] sm:$0xff] %v554_v53   ;;  %v366_v0 = vadd.f32 %v732_v18, %v343_v54  ;;  %v374_v1 = vadd.f32 %v732_v18, %v351_v55  ;;  %v344_v2 = vmul.f32 %v612_v62, %v492_v16  ;;  %v235_v4 = vpop.f32.mrb[7].mxu0  ;;  %v267_v5 = vpop.f32.mrb[7].mxu1 }
 0x101   :  { %v352_v3 = vmul.f32 %v620_v63, %v492_v16  ;;  %530 = vst [vmem:[%s778_s4] sm:$0xff] %v529_v58   ;;  %569 = vst [vmem:[%s778_s4 + $0x20] sm:$0xff] %v549_v59   ;;  %v364_v6 = vadd.f32 %v732_v18, %v341_v60  ;;  %v372_v7 = vadd.f32 %v732_v18, %v349_v61 }
 0x102   :  { %v342_v8 = vmul.f32 %v492_v16, %v235_v4  ;;  %v350_v9 = vmul.f32 %v492_v16, %v267_v5  ;;  %v367_v10 = vadd.f32 %v732_v18, %v344_v2  ;;  %v382_v14 = vmax.f32 %v366_v0, 0.0 }
 0x103   :  { %v375_v11 = vadd.f32 %v732_v18, %v352_v3  ;;  %v390_v15 = vmax.f32 %v374_v1, 0.0  ;;  %v380_v20 = vmax.f32 %v364_v6, 0.0  ;;  %v388_v21 = vmax.f32 %v372_v7, 0.0 }
 0x104   :  { %v365_v12 = vadd.f32 %v732_v18, %v342_v8  ;;  %v373_v13 = vadd.f32 %v732_v18, %v350_v9  ;;  %v383_v17 = vmax.f32 %v367_v10, 0.0 }
 0x105   :  { %v391_v19 = vmax.f32 %v375_v11, 0.0 }
 0x106   :  { %v381_v22 = vmax.f32 %v365_v12, 0.0  ;;  %v389_v23 = vmax.f32 %v373_v13, 0.0  ;;  %v544_v24 = vpack.c.bf16 %v383_v17, %v382_v14 }
 0x107   :  { %v564_v25 = vpack.c.bf16 %v391_v19, %v390_v15 }
 0x108   :  { %v539_v26 = vpack.c.bf16 %v381_v22, %v380_v20  ;;  %v559_v16 = vpack.c.bf16 %v389_v23, %v388_v21  ;;  %568 = vst [vmem:[%s778_s4 + $0x18] sm:$0xff] %v544_v24  }
 0x109   :  { %572 = vst [vmem:[%s778_s4 + $0x38] sm:$0xff] %v564_v25  }
 0x10a   :  { %567 = vst [vmem:[%s778_s4 + $0x10] sm:$0xff] %v539_v26   ;;  %571 = vst [vmem:[%s778_s4 + $0x30] sm:$0xff] %v559_v16  }

// kernel: resnet_forward.56
= control target key start
LH: loop header
LB: loop body
LE: loop exit
PB: predicated region body
PF: predicated region fallthrough
CT: control target
= control target key end

     0   :  { %s885_s0 = inlined_call_operand.vmem [shape: bf16[128,128], index: 0, kind: input, shape index: {}]   ;;  %s886_s1 = inlined_call_operand.vmem [shape: bf16[128,128], index: 1, kind: input, shape index: {}]   ;;  %s887_s2 = inlined_call_operand.vmem [shape: bf16[128,128], index: 2, kind: input, shape index: {}]   ;;  %s888_s3 = inlined_call_operand.vmem [shape: bf16[128,128], index: 3, kind: input, shape index: {}]   ;;  %s889_s4 = inlined_call_operand.vmem [shape: bf16[128,128], index: 4, kind: input, shape index: {}]   ;;  %s890_s5 = inlined_call_operand.vmem [shape: bf16[128,128], index: 5, kind: input, shape index: {}]   ;;  %s891_s6 = inlined_call_operand.vmem [shape: bf16[128,128], index: 6, kind: input, shape index: {}]   ;;  %s892_s7 = inlined_call_operand.vmem [shape: bf16[128,128], index: 7, kind: input, shape index: {}]   ;;  %s893_s8 = inlined_call_operand.vmem [shape: bf16[128,128], index: 8, kind: input, shape index: {}]   ;;  %s894_s9 = inlined_call_operand.vmem [shape: bf16[128,128], index: 9, kind: output, shape index: {}]  }
   0x1   :  { %v32_v0 = vld [vmem:[%s885_s0] sm:$0xf]  ;;  %v33_v1 = vld [vmem:[%s885_s0 + $0x4] sm:$0xf]  ;;  %v34_v18 = vld [vmem:[%s885_s0 + $0x8] sm:$0xf] }
   0x2   :  { %v48_v2 = vld [vmem:[%s886_s1] sm:$0xf]  ;;  %v49_v3 = vld [vmem:[%s886_s1 + $0x4] sm:$0xf]  ;;  %v35_v19 = vld [vmem:[%s885_s0 + $0xc] sm:$0xf] }
   0x3   :  { %v64_v4 = vmax.bf16 %v48_v2, %v32_v0  ;;  %v80_v5 = vld [vmem:[%s887_s2] sm:$0xf]  ;;  %v81_v6 = vld [vmem:[%s887_s2 + $0x4] sm:$0xf]  ;;  %v65_v7 = vmax.bf16 %v49_v3, %v33_v1  ;;  %v50_v20 = vld [vmem:[%s886_s1 + $0x8] sm:$0xf] }
   0x4   :  { %v112_v8 = vld [vmem:[%s888_s3] sm:$0xf]  ;;  %v113_v10 = vld [vmem:[%s888_s3 + $0x4] sm:$0xf]  ;;  %v51_v22 = vld [vmem:[%s886_s1 + $0xc] sm:$0xf]  ;;  %v66_v23 = vmax.bf16 %v50_v20, %v34_v18 }
   0x5   :  { %v96_v9 = vmax.bf16 %v80_v5, %v64_v4  ;;  %v97_v11 = vmax.bf16 %v81_v6, %v65_v7  ;;  %v144_v12 = vld [vmem:[%s889_s4] sm:$0xf]  ;;  %v145_v14 = vld [vmem:[%s889_s4 + $0x4] sm:$0xf]  ;;  %v82_v24 = vld [vmem:[%s887_s2 + $0x8] sm:$0xf]  ;;  %v67_v28 = vmax.bf16 %v51_v22, %v35_v19 }
   0x6   :  { %v176_v15 = vld [vmem:[%s890_s5] sm:$0xf]  ;;  %v177_v16 = vld [vmem:[%s890_s5 + $0x4] sm:$0xf]  ;;  %v83_v25 = vld [vmem:[%s887_s2 + $0xc] sm:$0xf]  ;;  %v98_v33 = vmax.bf16 %v82_v24, %v66_v23 }
   0x7   :  { %v128_v13 = vmax.bf16 %v112_v8, %v96_v9  ;;  %v129_v17 = vmax.bf16 %v113_v10, %v97_v11  ;;  %v208_v27 = vld [vmem:[%s891_s6] sm:$0xf]  ;;  %v114_v29 = vld [vmem:[%s888_s3 + $0x8] sm:$0xf]  ;;  %v209_v31 = vld [vmem:[%s891_s6 + $0x4] sm:$0xf]  ;;  %v99_v38 = vmax.bf16 %v83_v25, %v67_v28 }
   0x8   :  { %v240_v32 = vld [vmem:[%s892_s7] sm:$0xf]  ;;  %v115_v34 = vld [vmem:[%s888_s3 + $0xc] sm:$0xf]  ;;  %v241_v36 = vld [vmem:[%s892_s7 + $0x4] sm:$0xf]  ;;  %v130_v42 = vmax.bf16 %v114_v29, %v98_v33 }
   0x9   :  { %v160_v21 = vmax.bf16 %v144_v12, %v128_v13  ;;  %v161_v26 = vmax.bf16 %v145_v14, %v129_v17  ;;  %v272_v37 = vld [vmem:[%s893_s8] sm:$0xf]  ;;  %v146_v39 = vld [vmem:[%s889_s4 + $0x8] sm:$0xf]  ;;  %v273_v41 = vld [vmem:[%s893_s8 + $0x4] sm:$0xf]  ;;  %v131_v47 = vmax.bf16 %v115_v34, %v99_v38 }
   0xa   :  { %v147_v43 = vld [vmem:[%s889_s4 + $0xc] sm:$0xf]  ;;  %v178_v44 = vld [vmem:[%s890_s5 + $0x8] sm:$0xf]  ;;  %v36_v48 = vld [vmem:[%s885_s0 + $0x10] sm:$0xf]  ;;  %v162_v52 = vmax.bf16 %v146_v39, %v130_v42 }
   0xb   :  { %v192_v30 = vmax.bf16 %v176_v15, %v160_v21  ;;  %v193_v35 = vmax.bf16 %v177_v16, %v161_v26  ;;  %v179_v45 = vld [vmem:[%s890_s5 + $0xc] sm:$0xf]  ;;  %v37_v49 = vld [vmem:[%s885_s0 + $0x14] sm:$0xf]  ;;  %v52_v50 = vld [vmem:[%s886_s1 + $0x10] sm:$0xf]  ;;  %v163_v58 = vmax.bf16 %v147_v43, %v131_v47 }
   0xc   :  { %v53_v53 = vld [vmem:[%s886_s1 + $0x14] sm:$0xf]  ;;  %v68_v54 = vmax.bf16 %v52_v50, %v36_v48  ;;  %v84_v55 = vld [vmem:[%s887_s2 + $0x10] sm:$0xf]  ;;  %v210_v59 = vld [vmem:[%s891_s6 + $0x8] sm:$0xf]  ;;  %v194_v63 = vmax.bf16 %v178_v44, %v162_v52 }
   0xd   :  { %v224_v40 = vmax.bf16 %v208_v27, %v192_v30  ;;  %v225_v46 = vmax.bf16 %v209_v31, %v193_v35  ;;  %v85_v56 = vld [vmem:[%s887_s2 + $0x14] sm:$0xf]  ;;  %v69_v60 = vmax.bf16 %v53_v53, %v37_v49  ;;  %v116_v61 = vld [vmem:[%s888_s3 + $0x10] sm:$0xf]  ;;  %v211_v0 = vld [vmem:[%s891_s6 + $0xc] sm:$0xf]  ;;  %v195_v5 = vmax.bf16 %v179_v45, %v163_v58 }
   0xe   :  { %v242_v1 = vld [vmem:[%s892_s7 + $0x8] sm:$0xf]  ;;  %v100_v2 = vmax.bf16 %v84_v55, %v68_v54  ;;  %v117_v3 = vld [vmem:[%s888_s3 + $0x14] sm:$0xf]  ;;  %v243_v6 = vld [vmem:[%s892_s7 + $0xc] sm:$0xf]  ;;  %v226_v10 = vmax.bf16 %v210_v59, %v194_v63 }
   0xf   :  { %v256_v51 = vmax.bf16 %v240_v32, %v224_v40  ;;  %v257_v57 = vmax.bf16 %v241_v36, %v225_v46  ;;  %v274_v7 = vld [vmem:[%s893_s8 + $0x8] sm:$0xf]  ;;  %v101_v8 = vmax.bf16 %v85_v56, %v69_v60  ;;  %v148_v9 = vld [vmem:[%s889_s4 + $0x10] sm:$0xf]  ;;  %v275_v11 = vld [vmem:[%s893_s8 + $0xc] sm:$0xf]  ;;  %v227_v17 = vmax.bf16 %v211_v0, %v195_v5 }
  0x10   :  { %v132_v12 = vmax.bf16 %v116_v61, %v100_v2  ;;  %v149_v13 = vld [vmem:[%s889_s4 + $0x14] sm:$0xf]  ;;  %v180_v14 = vld [vmem:[%s890_s5 + $0x10] sm:$0xf]  ;;  %v38_v19 = vld [vmem:[%s885_s0 + $0x18] sm:$0xf]  ;;  %v258_v22 = vmax.bf16 %v242_v1, %v226_v10 }
  0x11   :  { %v288_v62 = vmax.bf16 %v272_v37, %v256_v51  ;;  %v289_v4 = vmax.bf16 %v273_v41, %v257_v57  ;;  %v181_v15 = vld [vmem:[%s890_s5 + $0x14] sm:$0xf]  ;;  %v133_v18 = vmax.bf16 %v117_v3, %v101_v8  ;;  %v39_v20 = vld [vmem:[%s885_s0 + $0x1c] sm:$0xf]  ;;  %v54_v21 = vld [vmem:[%s886_s1 + $0x18] sm:$0xf]  ;;  %v259_v28 = vmax.bf16 %v243_v6, %v227_v17 }
  0x12   :  { %v164_v23 = vmax.bf16 %v148_v9, %v132_v12  ;;  %v55_v24 = vld [vmem:[%s886_s1 + $0x1c] sm:$0xf]  ;;  %v70_v25 = vmax.bf16 %v54_v21, %v38_v19  ;;  %v86_v26 = vld [vmem:[%s887_s2 + $0x18] sm:$0xf]  ;;  %v212_v30 = vld [vmem:[%s891_s6 + $0x10] sm:$0xf]  ;;  %v290_v33 = vmax.bf16 %v274_v7, %v258_v22 }
  0x13   :  { %v364_v16 = vcombine.low %v288_v62, %v289_v4  ;;  %v87_v27 = vld [vmem:[%s887_s2 + $0x1c] sm:$0xf]  ;;  %v165_v29 = vmax.bf16 %v149_v13, %v133_v18  ;;  %v71_v31 = vmax.bf16 %v55_v24, %v39_v20  ;;  %v118_v32 = vld [vmem:[%s888_s3 + $0x18] sm:$0xf]  ;;  %v213_v35 = vld [vmem:[%s891_s6 + $0x14] sm:$0xf]  ;;  %v291_v39 = vmax.bf16 %v275_v11, %v259_v28 }
  0x14   :  { %v196_v34 = vmax.bf16 %v180_v14, %v164_v23  ;;  %v244_v36 = vld [vmem:[%s892_s7 + $0x10] sm:$0xf]  ;;  %v102_v37 = vmax.bf16 %v86_v26, %v70_v25  ;;  %v119_v38 = vld [vmem:[%s888_s3 + $0x1c] sm:$0xf]  ;;  %v245_v41 = vld [vmem:[%s892_s7 + $0x14] sm:$0xf] }
  0x15   :  { %328 = vst [vmem:[%s894_s9] sm:$0xff] %v364_v16   ;;  %v197_v40 = vmax.bf16 %v181_v15, %v165_v29  ;;  %v276_v42 = vld [vmem:[%s893_s8 + $0x10] sm:$0xf]  ;;  %v103_v43 = vmax.bf16 %v87_v27, %v71_v31  ;;  %v150_v44 = vld [vmem:[%s889_s4 + $0x18] sm:$0xf]  ;;  %v277_v46 = vld [vmem:[%s893_s8 + $0x14] sm:$0xf]  ;;  %v365_v51 = vcombine.low %v290_v33, %v291_v39 }
  0x16   :  { %v228_v45 = vmax.bf16 %v212_v30, %v196_v34  ;;  %v134_v47 = vmax.bf16 %v118_v32, %v102_v37  ;;  %v151_v48 = vld [vmem:[%s889_s4 + $0x1c] sm:$0xf]  ;;  %v182_v49 = vld [vmem:[%s890_s5 + $0x18] sm:$0xf]  ;;  %v40_v54 = vld [vmem:[%s885_s0 + $0x20] sm:$0xf] }
  0x17   :  { %v183_v50 = vld [vmem:[%s890_s5 + $0x1c] sm:$0xf]  ;;  %v229_v52 = vmax.bf16 %v213_v35, %v197_v40  ;;  %v135_v53 = vmax.bf16 %v119_v38, %v103_v43  ;;  %v41_v55 = vld [vmem:[%s885_s0 + $0x24] sm:$0xf]  ;;  %v56_v56 = vld [vmem:[%s886_s1 + $0x20] sm:$0xf] }
  0x18   :  { %v260_v57 = vmax.bf16 %v244_v36, %v228_v45  ;;  %v166_v58 = vmax.bf16 %v150_v44, %v134_v47  ;;  %v57_v59 = vld [vmem:[%s886_s1 + $0x24] sm:$0xf]  ;;  %v72_v60 = vmax.bf16 %v56_v56, %v40_v54  ;;  %v88_v61 = vld [vmem:[%s887_s2 + $0x20] sm:$0xf]  ;;  %366 = vst [vmem:[%s894_s9 + $0x8] sm:$0xff] %v365_v51  }
  0x19   :  { %v89_v62 = vld [vmem:[%s887_s2 + $0x24] sm:$0xf]  ;;  %v261_v63 = vmax.bf16 %v245_v41, %v229_v52  ;;  %v167_v0 = vmax.bf16 %v151_v48, %v135_v53  ;;  %v214_v1 = vld [vmem:[%s891_s6 + $0x18] sm:$0xf]  ;;  %v73_v2 = vmax.bf16 %v57_v59, %v41_v55  ;;  %v120_v3 = vld [vmem:[%s888_s3 + $0x20] sm:$0xf] }
  0x1a   :  { %v292_v4 = vmax.bf16 %v276_v42, %v260_v57  ;;  %v198_v5 = vmax.bf16 %v182_v49, %v166_v58  ;;  %v215_v6 = vld [vmem:[%s891_s6 + $0x1c] sm:$0xf]  ;;  %v246_v7 = vld [vmem:[%s892_s7 + $0x18] sm:$0xf]  ;;  %v104_v8 = vmax.bf16 %v88_v61, %v72_v60  ;;  %v121_v9 = vld [vmem:[%s888_s3 + $0x24] sm:$0xf] }
  0x1b   :  { %v293_v10 = vmax.bf16 %v277_v46, %v261_v63  ;;  %v199_v11 = vmax.bf16 %v183_v50, %v167_v0  ;;  %v247_v12 = vld [vmem:[%s892_s7 + $0x1c] sm:$0xf]  ;;  %v278_v13 = vld [vmem:[%s893_s8 + $0x18] sm:$0xf]  ;;  %v105_v14 = vmax.bf16 %v89_v62, %v73_v2  ;;  %v152_v15 = vld [vmem:[%s889_s4 + $0x20] sm:$0xf] }
  0x1c   :  { %v230_v16 = vmax.bf16 %v214_v1, %v198_v5  ;;  %v279_v17 = vld [vmem:[%s893_s8 + $0x1c] sm:$0xf]  ;;  %v136_v18 = vmax.bf16 %v120_v3, %v104_v8  ;;  %v153_v19 = vld [vmem:[%s889_s4 + $0x24] sm:$0xf]  ;;  %v184_v20 = vld [vmem:[%s890_s5 + $0x20] sm:$0xf] }
  0x1d   :  { %v185_v21 = vld [vmem:[%s890_s5 + $0x24] sm:$0xf]  ;;  %v367_v22 = vcombine.low %v292_v4, %v293_v10  ;;  %v231_v23 = vmax.bf16 %v215_v6, %v199_v11  ;;  %v137_v24 = vmax.bf16 %v121_v9, %v105_v14  ;;  %v42_v25 = vld [vmem:[%s885_s0 + $0x28] sm:$0xf]  ;;  %v43_v26 = vld [vmem:[%s885_s0 + $0x2c] sm:$0xf] }
  0x1e   :  { %v58_v27 = vld [vmem:[%s886_s1 + $0x28] sm:$0xf]  ;;  %v262_v28 = vmax.bf16 %v246_v7, %v230_v16  ;;  %v168_v29 = vmax.bf16 %v152_v15, %v136_v18  ;;  %v59_v30 = vld [vmem:[%s886_s1 + $0x2c] sm:$0xf]  ;;  %v216_v36 = vld [vmem:[%s891_s6 + $0x20] sm:$0xf] }
  0x1f   :  { %v74_v31 = vmax.bf16 %v58_v27, %v42_v25  ;;  %v90_v32 = vld [vmem:[%s887_s2 + $0x28] sm:$0xf]  ;;  %v91_v33 = vld [vmem:[%s887_s2 + $0x2c] sm:$0xf]  ;;  %368 = vst [vmem:[%s894_s9 + $0x10] sm:$0xff] %v367_v22   ;;  %v263_v34 = vmax.bf16 %v247_v12, %v231_v23  ;;  %v169_v35 = vmax.bf16 %v153_v19, %v137_v24  ;;  %v75_v37 = vmax.bf16 %v59_v30, %v43_v26 }
  0x20   :  { %v122_v38 = vld [vmem:[%s888_s3 + $0x28] sm:$0xf]  ;;  %v294_v39 = vmax.bf16 %v278_v13, %v262_v28  ;;  %v200_v40 = vmax.bf16 %v184_v20, %v168_v29  ;;  %v217_v41 = vld [vmem:[%s891_s6 + $0x24] sm:$0xf]  ;;  %v248_v42 = vld [vmem:[%s892_s7 + $0x20] sm:$0xf] }
  0x21   :  { %v106_v43 = vmax.bf16 %v90_v32, %v74_v31  ;;  %v123_v44 = vld [vmem:[%s888_s3 + $0x2c] sm:$0xf]  ;;  %v295_v45 = vmax.bf16 %v279_v17, %v263_v34  ;;  %v201_v46 = vmax.bf16 %v185_v21, %v169_v35  ;;  %v249_v47 = vld [vmem:[%s892_s7 + $0x24] sm:$0xf]  ;;  %v280_v48 = vld [vmem:[%s893_s8 + $0x20] sm:$0xf]  ;;  %v107_v49 = vmax.bf16 %v91_v33, %v75_v37 }
  0x22   :  { %v154_v50 = vld [vmem:[%s889_s4 + $0x28] sm:$0xf]  ;;  %v232_v51 = vmax.bf16 %v216_v36, %v200_v40  ;;  %v281_v52 = vld [vmem:[%s893_s8 + $0x24] sm:$0xf]  ;;  %v155_v54 = vld [vmem:[%s889_s4 + $0x2c] sm:$0xf] }
  0x23   :  { %v138_v53 = vmax.bf16 %v122_v38, %v106_v43  ;;  %v186_v55 = vld [vmem:[%s890_s5 + $0x28] sm:$0xf]  ;;  %v187_v56 = vld [vmem:[%s890_s5 + $0x2c] sm:$0xf]  ;;  %v369_v57 = vcombine.low %v294_v39, %v295_v45  ;;  %v233_v58 = vmax.bf16 %v217_v41, %v201_v46  ;;  %v139_v59 = vmax.bf16 %v123_v44, %v107_v49  ;;  %v44_v60 = vld [vmem:[%s885_s0 + $0x30] sm:$0xf] }
  0x24   :  { %v45_v61 = vld [vmem:[%s885_s0 + $0x34] sm:$0xf]  ;;  %v60_v62 = vld [vmem:[%s886_s1 + $0x30] sm:$0xf]  ;;  %v264_v63 = vmax.bf16 %v248_v42, %v232_v51  ;;  %v218_v7 = vld [vmem:[%s891_s6 + $0x28] sm:$0xf] }
  0x25   :  { %v170_v0 = vmax.bf16 %v154_v50, %v138_v53  ;;  %v61_v1 = vld [vmem:[%s886_s1 + $0x34] sm:$0xf]  ;;  %v76_v2 = vmax.bf16 %v60_v62, %v44_v60  ;;  %v92_v3 = vld [vmem:[%s887_s2 + $0x30] sm:$0xf]  ;;  %370 = vst [vmem:[%s894_s9 + $0x18] sm:$0xff] %v369_v57   ;;  %v265_v5 = vmax.bf16 %v249_v47, %v233_v58  ;;  %v171_v6 = vmax.bf16 %v155_v54, %v139_v59 }
  0x26   :  { %v93_v4 = vld [vmem:[%s887_s2 + $0x34] sm:$0xf]  ;;  %v77_v8 = vmax.bf16 %v61_v1, %v45_v61  ;;  %v124_v9 = vld [vmem:[%s888_s3 + $0x30] sm:$0xf]  ;;  %v296_v10 = vmax.bf16 %v280_v48, %v264_v63  ;;  %v219_v12 = vld [vmem:[%s891_s6 + $0x2c] sm:$0xf] }
  0x27   :  { %v202_v11 = vmax.bf16 %v186_v55, %v170_v0  ;;  %v250_v13 = vld [vmem:[%s892_s7 + $0x28] sm:$0xf]  ;;  %v108_v14 = vmax.bf16 %v92_v3, %v76_v2  ;;  %v125_v15 = vld [vmem:[%s888_s3 + $0x34] sm:$0xf]  ;;  %v297_v16 = vmax.bf16 %v281_v52, %v265_v5  ;;  %v203_v17 = vmax.bf16 %v187_v56, %v171_v6  ;;  %v251_v18 = vld [vmem:[%s892_s7 + $0x2c] sm:$0xf] }
  0x28   :  { %v282_v19 = vld [vmem:[%s893_s8 + $0x28] sm:$0xf]  ;;  %v109_v20 = vmax.bf16 %v93_v4, %v77_v8  ;;  %v156_v21 = vld [vmem:[%s889_s4 + $0x30] sm:$0xf]  ;;  %v283_v23 = vld [vmem:[%s893_s8 + $0x2c] sm:$0xf] }
  0x29   :  { %v234_v22 = vmax.bf16 %v218_v7, %v202_v11  ;;  %v140_v24 = vmax.bf16 %v124_v9, %v108_v14  ;;  %v157_v25 = vld [vmem:[%s889_s4 + $0x34] sm:$0xf]  ;;  %v188_v26 = vld [vmem:[%s890_s5 + $0x30] sm:$0xf]  ;;  %v371_v28 = vcombine.low %v296_v10, %v297_v16  ;;  %v235_v29 = vmax.bf16 %v219_v12, %v203_v17  ;;  %v46_v31 = vld [vmem:[%s885_s0 + $0x38] sm:$0xf] }
  0x2a   :  { %v189_v27 = vld [vmem:[%s890_s5 + $0x34] sm:$0xf]  ;;  %v141_v30 = vmax.bf16 %v125_v15, %v109_v20  ;;  %v47_v32 = vld [vmem:[%s885_s0 + $0x3c] sm:$0xf]  ;;  %v62_v33 = vld [vmem:[%s886_s1 + $0x38] sm:$0xf] }
  0x2b   :  { %v266_v34 = vmax.bf16 %v250_v13, %v234_v22  ;;  %v172_v35 = vmax.bf16 %v156_v21, %v140_v24  ;;  %v63_v36 = vld [vmem:[%s886_s1 + $0x3c] sm:$0xf]  ;;  %v78_v37 = vmax.bf16 %v62_v33, %v46_v31  ;;  %v94_v38 = vld [vmem:[%s887_s2 + $0x38] sm:$0xf]  ;;  %372 = vst [vmem:[%s894_s9 + $0x20] sm:$0xff] %v371_v28   ;;  %v267_v40 = vmax.bf16 %v251_v18, %v235_v29 }
  0x2c   :  { %v95_v39 = vld [vmem:[%s887_s2 + $0x3c] sm:$0xf]  ;;  %v173_v41 = vmax.bf16 %v157_v25, %v141_v30  ;;  %v220_v42 = vld [vmem:[%s891_s6 + $0x30] sm:$0xf]  ;;  %v79_v43 = vmax.bf16 %v63_v36, %v47_v32  ;;  %v126_v44 = vld [vmem:[%s888_s3 + $0x38] sm:$0xf] }
  0x2d   :  { %v298_v45 = vmax.bf16 %v282_v19, %v266_v34  ;;  %v204_v46 = vmax.bf16 %v188_v26, %v172_v35  ;;  %v221_v47 = vld [vmem:[%s891_s6 + $0x34] sm:$0xf]  ;;  %v110_v48 = vmax.bf16 %v94_v38, %v78_v37  ;;  %v127_v49 = vld [vmem:[%s888_s3 + $0x3c] sm:$0xf]  ;;  %v299_v50 = vmax.bf16 %v283_v23, %v267_v40  ;;  %v252_v52 = vld [vmem:[%s892_s7 + $0x30] sm:$0xf] }
  0x2e   :  { %v205_v51 = vmax.bf16 %v189_v27, %v173_v41  ;;  %v111_v53 = vmax.bf16 %v95_v39, %v79_v43  ;;  %v158_v54 = vld [vmem:[%s889_s4 + $0x38] sm:$0xf]  ;;  %v253_v56 = vld [vmem:[%s892_s7 + $0x34] sm:$0xf]  ;;  %v159_v58 = vld [vmem:[%s889_s4 + $0x3c] sm:$0xf] }
  0x2f   :  { %v236_v55 = vmax.bf16 %v220_v42, %v204_v46  ;;  %v142_v57 = vmax.bf16 %v126_v44, %v110_v48  ;;  %v373_v59 = vcombine.low %v298_v45, %v299_v50  ;;  %v284_v61 = vld [vmem:[%s893_s8 + $0x30] sm:$0xf]  ;;  %v190_v63 = vld [vmem:[%s890_s5 + $0x38] sm:$0xf]  ;;  %v285_v1 = vld [vmem:[%s893_s8 + $0x34] sm:$0xf] }
  0x30   :  { %v237_v60 = vmax.bf16 %v221_v47, %v205_v51  ;;  %v143_v62 = vmax.bf16 %v127_v49, %v111_v53  ;;  %v191_v3 = vld [vmem:[%s890_s5 + $0x3c] sm:$0xf]  ;;  %v222_v6 = vld [vmem:[%s891_s6 + $0x38] sm:$0xf] }
  0x31   :  { %v268_v0 = vmax.bf16 %v252_v52, %v236_v55  ;;  %v174_v2 = vmax.bf16 %v158_v54, %v142_v57  ;;  %374 = vst [vmem:[%s894_s9 + $0x28] sm:$0xff] %v373_v59   ;;  %v223_v9 = vld [vmem:[%s891_s6 + $0x3c] sm:$0xf]  ;;  %v254_v12 = vld [vmem:[%s892_s7 + $0x38] sm:$0xf] }
  0x32   :  { %v269_v4 = vmax.bf16 %v253_v56, %v237_v60  ;;  %v175_v5 = vmax.bf16 %v159_v58, %v143_v62  ;;  %v255_v14 = vld [vmem:[%s892_s7 + $0x3c] sm:$0xf]  ;;  %v286_v17 = vld [vmem:[%s893_s8 + $0x38] sm:$0xf] }
  0x33   :  { %v300_v7 = vmax.bf16 %v284_v61, %v268_v0  ;;  %v206_v8 = vmax.bf16 %v190_v63, %v174_v2  ;;  %v287_v19 = vld [vmem:[%s893_s8 + $0x3c] sm:$0xf] }
  0x34   :  { %v301_v10 = vmax.bf16 %v285_v1, %v269_v4  ;;  %v207_v11 = vmax.bf16 %v191_v3, %v175_v5 }
  0x35   :  { %v238_v13 = vmax.bf16 %v222_v6, %v206_v8 }
  0x36   :  { %v375_v15 = vcombine.low %v300_v7, %v301_v10  ;;  %v239_v16 = vmax.bf16 %v223_v9, %v207_v11 }
  0x37   :  { %v270_v18 = vmax.bf16 %v254_v12, %v238_v13 }
  0x38   :  { %376 = vst [vmem:[%s894_s9 + $0x30] sm:$0xff] %v375_v15   ;;  %v271_v20 = vmax.bf16 %v255_v14, %v239_v16 }
  0x39   :  { %v302_v21 = vmax.bf16 %v286_v17, %v270_v18 }
  0x3a   :  { %v303_v22 = vmax.bf16 %v287_v19, %v271_v20 }
  0x3c   :  { %v377_v23 = vcombine.low %v302_v21, %v303_v22 }
  0x3e   :  { %378 = vst [vmem:[%s894_s9 + $0x38] sm:$0xff] %v377_v23  }

// kernel: resnet_forward.58
= control target key start
LH: loop header
LB: loop body
LE: loop exit
PB: predicated region body
PF: predicated region fallthrough
CT: control target
= control target key end

     0   :  { %s1273_s15 = smov 0   ;;  %s1275_s16 = smov 0   ;;  %s1444_s0 = inlined_call_operand.vmem [shape: bf16[128,1152], index: 0, kind: input, shape index: {}]   ;;  %s1445_s1 = inlined_call_operand.vmem [shape: bf16[1152,128], index: 1, kind: input, shape index: {}]   ;;  %s1446_s2 = inlined_call_operand.vmem [shape: f32[1,128], index: 2, kind: input, shape index: {}]   ;;  %s1447_s3 = inlined_call_operand.vmem [shape: f32[1,128], index: 3, kind: input, shape index: {}]   ;;  %s1448_s4 = inlined_call_operand.vmem [shape: bf16[128,128], index: 4, kind: output, shape index: {}]  }
   0x1   :  { %s1277_s17 = smov 0   ;;  %s1279_s18 = smov 0  }
   0x2   :  { %s1281_s19 = smov 0  }
   0x3 LB: > { %s26_s20 = sadd.s32 1, %s1241_s18  ;;  %p49_p1 = scmp.ne.s32.totalorder %s1233_s16, %s1229_s15  ;;  %s1245_s19 = sphi %s1281_s19, %s14_s19   ;;  %s1241_s18 = sphi %s1279_s18, %s1452_s18   ;;  %s1237_s17 = sphi %s1277_s17, %s1451_s17   ;;  %s1233_s16 = sphi %s1275_s16, %s1450_s16   ;;  %s1229_s15 = sphi %s1273_s15, %s1449_s15  }
   0x4   : > { %p27_p0 = scmp.ge.s32.totalorder %s26_s20, 9  ;;  %p50_p2 = scmp.eq.s32.totalorder %s1245_s19, 0 }
   0x5   : > { %s42_s22 = sadd.s32 1, %s1233_s16  ;;  %p976_p5 = scmp.ge.s32.totalorder %s1245_s19, 9 }
   0x6   : > { %s1454_s20 = smov (%p27_p0, %s26_s20), 0  ;;  %p51_p3 = por %p50_p2, %p49_p1 }
   0x7   : > { %s38_s21 = ssub.s32 %s1241_s18, %s1454_s20  ;;  %195 = sbr.rel (%p976_p5) target bundleno = 28 (0x1c), region = 24 }
   0x8   : > { %p40_p4 = scmp.eq.s32.totalorder %s38_s21, 0 }
   0xa   : > { %s1308_s23 = scalar_select %p40_p4, %s1233_s16, %s42_s22  }
   0xe   : > { %198 = sbr.rel (!%p51_p3) target bundleno = 28 (0x1c), region = 28  ;;  %s200_s24 = sand.u32 (%p51_p3), 1, %s1233_s16  }
   0xf   : > { %s978_s25 = sshll.u32 (%p51_p3), %s1241_s18, 2  ;;  %s977_s26 = sshll.u32 (%p51_p3), %s200_s24, 6 }
  0x10   : > { %s1316_s29 = scalar_lea.vmem (%p51_p3), %s1444_s0, %s978_s25  ;;  %s202_s30 = scalar_lea.vmem (%p51_p3), [#allocation3], %s977_s26 }
  0x11   : > { %v223_v0 = vld [vmem:[%s1316_s29] sm:$0xf] (%p51_p3)  ;;  %v225_v1 = vld [vmem:[%s1316_s29 + $0x24] sm:$0xf] (%p51_p3)  ;;  %v227_v2 = vld [vmem:[%s1316_s29 + $0x48] sm:$0xf] (%p51_p3) }
  0x12   : > { %224 = vst [vmem:[%s202_s30] sm:$0xf] (%p51_p3), %v223_v0  ;;  %226 = vst [vmem:[%s202_s30 + $0x4] sm:$0xf] (%p51_p3), %v225_v1  ;;  %v229_v3 = vld [vmem:[%s1316_s29 + $0x6c] sm:$0xf] (%p51_p3) }
  0x13   : > { %v231_v4 = vld [vmem:[%s1316_s29 + $0x90] sm:$0xf] (%p51_p3)  ;;  %228 = vst [vmem:[%s202_s30 + $0x8] sm:$0xf] (%p51_p3), %v227_v2  ;;  %230 = vst [vmem:[%s202_s30 + $0xc] sm:$0xf] (%p51_p3), %v229_v3 }
  0x14   : > { %232 = vst [vmem:[%s202_s30 + $0x10] sm:$0xf] (%p51_p3), %v231_v4  ;;  %v233_v5 = vld [vmem:[%s1316_s29 + $0xb4] sm:$0xf] (%p51_p3)  ;;  %v235_v6 = vld [vmem:[%s1316_s29 + $0xd8] sm:$0xf] (%p51_p3) }
  0x15   : > { %v237_v7 = vld [vmem:[%s1316_s29 + $0xfc] sm:$0xf]  ;;  %234 = vst [vmem:[%s202_s30 + $0x14] sm:$0xf] %v233_v5  ;;  %236 = vst [vmem:[%s202_s30 + $0x18] sm:$0xf] %v235_v6 }
  0x16   : > { %238 = vst [vmem:[%s202_s30 + $0x1c] sm:$0xf] %v237_v7  ;;  %v239_v8 = vld [vmem:[%s1316_s29 + $0x120] sm:$0xf]  ;;  %v241_v9 = vld [vmem:[%s1316_s29 + $0x144] sm:$0xf] }
  0x17   : > { %v243_v10 = vld [vmem:[%s1316_s29 + $0x168] sm:$0xf]  ;;  %240 = vst [vmem:[%s202_s30 + $0x20] sm:$0xf] %v239_v8  ;;  %242 = vst [vmem:[%s202_s30 + $0x24] sm:$0xf] %v241_v9 }
  0x18   : > { %244 = vst [vmem:[%s202_s30 + $0x28] sm:$0xf] %v243_v10  ;;  %v245_v11 = vld [vmem:[%s1316_s29 + $0x18c] sm:$0xf]  ;;  %v247_v12 = vld [vmem:[%s1316_s29 + $0x1b0] sm:$0xf] }
  0x19   : > { %v249_v13 = vld [vmem:[%s1316_s29 + $0x1d4] sm:$0xf]  ;;  %246 = vst [vmem:[%s202_s30 + $0x2c] sm:$0xf] %v245_v11  ;;  %248 = vst [vmem:[%s202_s30 + $0x30] sm:$0xf] %v247_v12 }
  0x1a   : > { %250 = vst [vmem:[%s202_s30 + $0x34] sm:$0xf] %v249_v13  ;;  %v251_v14 = vld [vmem:[%s1316_s29 + $0x1f8] sm:$0xf]  ;;  %v253_v15 = vld [vmem:[%s1316_s29 + $0x21c] sm:$0xf] }
  0x1b   : > { %252 = vst [vmem:[%s202_s30 + $0x38] sm:$0xf] %v251_v14  ;;  %254 = vst [vmem:[%s202_s30 + $0x3c] sm:$0xf] %v253_v15 }
  0x1c PF: > { %p979_p6 = scmp.ge.s32.totalorder %s1245_s19, 1  ;;  %p320_p7 = scmp.lt.s32.totalorder %s1245_s19, 10 }
  0x1e   : > { %p321_p8 = pnand %p979_p6, %p320_p7 }
  0x1f   : > { %s327_s5 = sand.u32 (!%p321_p8), 1, %s1229_s15   ;;  %s981_s6 = sshll.u32 (!%p321_p8), %s1237_s17, 4 }
  0x20   : > { %324 = sbr.rel (%p321_p8) target bundleno = 325 (0x145), region = 73  ;;  %s980_s7 = sshll.u32 (!%p321_p8), %s327_s5, 6 }
  0x21   : > { %p371_p9 = scmp.lt.s32.totalorder (!%p321_p8), %s981_s6, 143  ;;  %s1343_s12 = scalar_lea.vmem (!%p321_p8), [#allocation3], %s980_s7 }
  0x22   : > { %p983_p10 = scmp.ne.s32.totalorder (!%p321_p8), %s1237_s17, 0 }
  0x27   : > { %s1456_s6 = smov (!%p371_p9, %s981_s6), 143  ;;  %398 = sbr.rel (%p983_p10) target bundleno = 49 (0x31), region = 81 }
  0x28   : > { %s982_s8 = sshll.u32 %s1456_s6, 2  ;;  %v1247_v16 = vmov (!%p983_p10), 0.0  }
  0x29   : > { %s1341_s11 = scalar_lea.vmem %s1445_s1, %s982_s8  ;;  %399 = vst [vmem:[#allocation2] sm:$0xff] (!%p983_p10), %v1247_v16  ;;  %400 = vst [vmem:[#allocation2 + $0x8] sm:$0xff] (!%p983_p10), %v1247_v16 }
  0x2a   : > { %401 = vst [vmem:[#allocation2 + $0x10] sm:$0xff] (!%p983_p10), %v1247_v16  ;;  %402 = vst [vmem:[#allocation2 + $0x18] sm:$0xff] (!%p983_p10), %v1247_v16 }
  0x2b   : > { %403 = vst [vmem:[#allocation2 + $0x20] sm:$0xff] (!%p983_p10), %v1247_v16  ;;  %404 = vst [vmem:[#allocation2 + $0x28] sm:$0xff] (!%p983_p10), %v1247_v16 }
  0x2c   : > { %405 = vst [vmem:[#allocation2 + $0x30] sm:$0xff] (!%p983_p10), %v1247_v16  ;;  %406 = vst [vmem:[#allocation2 + $0x38] sm:$0xff] (!%p983_p10), %v1247_v16 }
  0x2d   : > { %407 = vst [vmem:[#allocation2 + $0x40] sm:$0xff] (!%p983_p10), %v1247_v16  ;;  %408 = vst [vmem:[#allocation2 + $0x48] sm:$0xff] (!%p983_p10), %v1247_v16 }
  0x2e   : > { %409 = vst [vmem:[#allocation2 + $0x50] sm:$0xff] %v1247_v16  ;;  %410 = vst [vmem:[#allocation2 + $0x58] sm:$0xff] %v1247_v16 }
  0x2f   : > { %411 = vst [vmem:[#allocation2 + $0x60] sm:$0xff] %v1247_v16  ;;  %412 = vst [vmem:[#allocation2 + $0x68] sm:$0xff] %v1247_v16 }
  0x30   : > { %413 = vst [vmem:[#allocation2 + $0x70] sm:$0xff] %v1247_v16  ;;  %414 = vst [vmem:[#allocation2 + $0x78] sm:$0xff] %v1247_v16 }
  0x31 PF: > { %v1191_v17 = vld [vmem:[%s1341_s11] sm:$0xff]   ;;  %v1192_v18 = vld [vmem:[%s1341_s11 + $0x8] sm:$0xff]   ;;  %v1193_v19 = vld [vmem:[%s1341_s11 + $0x10] sm:$0xff]   ;;  %p1000_p11 = scmp.ne.s32.totalorder %s1237_s17, 8 }
  0x32   : > { %1102 = vmatprep.subr.bf16.mxu0 %v1191_v17  ;;  %1134 = vmatprep.subr.bf16.mxu1 %v1191_v17  ;;  %v1194_v20 = vld [vmem:[%s1341_s11 + $0x18] sm:$0xff]   ;;  %v1199_v21 = vld [vmem:[%s1343_s12] sm:$0xff]   ;;  %v1196_v24 = vld [vmem:[%s1341_s11 + $0x28] sm:$0xff]  }
  0x33   : > { %1103 = vmatpush3.bf16.msra.mxu0 %v1191_v17  ;;  %1142 = vmatpush3.bf16.msra.mxu1 %v1191_v17  ;;  %v1200_v22 = vld [vmem:[%s1343_s12 + $0x20] sm:$0xff]   ;;  %v1197_v25 = vld [vmem:[%s1341_s11 + $0x30] sm:$0xff]   ;;  %v1198_v26 = vld [vmem:[%s1341_s11 + $0x38] sm:$0xff]  }
  0x34   : > { %1104 = vmatprep.subr.bf16.mxu0 %v1192_v18  ;;  %1135 = vmatprep.subr.bf16.mxu1 %v1192_v18  ;;  %v1195_v23 = vld [vmem:[%s1341_s11 + $0x20] sm:$0xff]   ;;  %v1201_v27 = vld [vmem:[%s1343_s12 + $0x8] sm:$0xff]   ;;  %v1203_v29 = vld [vmem:[%s1343_s12 + $0x10] sm:$0xff]  }
  0x35   : > { %1118 = vmatprep.mubr.bf16.mxu0 %v1199_v21  ;;  %1126 = vmatprep.mubr.bf16.mxu1 %v1200_v22  ;;  %v1202_v28 = vld [vmem:[%s1343_s12 + $0x28] sm:$0xff]   ;;  %v1204_v30 = vld [vmem:[%s1343_s12 + $0x30] sm:$0xff]   ;;  %v1205_v31 = vld [vmem:[%s1343_s12 + $0x18] sm:$0xff]  }
  0x36   : > { %v1206_v32 = vld [vmem:[%s1343_s12 + $0x38] sm:$0xff]   ;;  %v417_v33 = vld [vmem:[#allocation2 + $0x10] sm:$0xff]  ;;  %v415_v35 = vld [vmem:[#allocation2] sm:$0xff] }
  0x37   : > { %1105 = vmatpush3.bf16.msra.mxu0 %v1192_v18  ;;  %1143 = vmatpush3.bf16.msra.mxu1 %v1192_v18  ;;  %v425_v34 = vld [vmem:[#allocation2 + $0x50] sm:$0xff]  ;;  %v423_v36 = vld [vmem:[#allocation2 + $0x40] sm:$0xff]  ;;  %v418_v39 = vld [vmem:[#allocation2 + $0x18] sm:$0xff] }
  0x38   : > { %1106 = vmatprep.subr.bf16.mxu0 %v1193_v19  ;;  %1136 = vmatprep.subr.bf16.mxu1 %v1193_v19  ;;  %v426_v40 = vld [vmem:[#allocation2 + $0x58] sm:$0xff]  ;;  %v416_v45 = vld [vmem:[#allocation2 + $0x8] sm:$0xff]  ;;  %v421_v57 = vld [vmem:[#allocation2 + $0x30] sm:$0xff] }
  0x39   : > { %v424_v46 = vld [vmem:[#allocation2 + $0x48] sm:$0xff]  ;;  %v429_v58 = vld [vmem:[#allocation2 + $0x70] sm:$0xff]  ;;  %v419_v59 = vld [vmem:[#allocation2 + $0x20] sm:$0xff] }
  0x3a   : > { %v427_v60 = vld [vmem:[#allocation2 + $0x60] sm:$0xff]  ;;  %v422_v63 = vld [vmem:[#allocation2 + $0x38] sm:$0xff]  ;;  %v420_v5 = vld [vmem:[#allocation2 + $0x28] sm:$0xff] }
  0x3b   : > { %1107 = vmatpush3.bf16.msra.mxu0 %v1193_v19  ;;  %1144 = vmatpush3.bf16.msra.mxu1 %v1193_v19  ;;  %v430_v0 = vld [vmem:[#allocation2 + $0x78] sm:$0xff]  ;;  %v428_v6 = vld [vmem:[#allocation2 + $0x68] sm:$0xff]  ;;  %v1366_v19 = vld [vmem:[%s1446_s2] ss:$0 sm:$0xff] (!%p1000_p11) }
  0x3c   : > { %1108 = vmatprep.subr.bf16.mxu0 %v1194_v20  ;;  %1137 = vmatprep.subr.bf16.mxu1 %v1194_v20  ;;  %v1373_v22 = vld [vmem:[%s1447_s3] ss:$0 sm:$0xff] (!%p1000_p11) }
  0x3f   : > { %1109 = vmatpush3.bf16.msra.mxu0 %v1194_v20  ;;  %1145 = vmatpush3.bf16.msra.mxu1 %v1194_v20 }
  0x40   : > { %1110 = vmatprep.subr.bf16.mxu0 %v1195_v23  ;;  %1138 = vmatprep.subr.bf16.mxu1 %v1195_v23 }
  0x43   : > { %1111 = vmatpush3.bf16.msra.mxu0 %v1195_v23  ;;  %1146 = vmatpush3.bf16.msra.mxu1 %v1195_v23 }
  0x44   : > { %1112 = vmatprep.subr.bf16.mxu0 %v1196_v24  ;;  %1139 = vmatprep.subr.bf16.mxu1 %v1196_v24 }
  0x47   : > { %1113 = vmatpush3.bf16.msra.mxu0 %v1196_v24  ;;  %1147 = vmatpush3.bf16.msra.mxu1 %v1196_v24 }
  0x48   : > { %1114 = vmatprep.subr.bf16.mxu0 %v1197_v25  ;;  %1140 = vmatprep.subr.bf16.mxu1 %v1197_v25 }
  0x4b   : > { %1115 = vmatpush3.bf16.msra.mxu0 %v1197_v25  ;;  %1148 = vmatpush3.bf16.msra.mxu1 %v1197_v25 }
  0x4c   : > { %1116 = vmatprep.subr.bf16.mxu0 %v1198_v26  ;;  %1141 = vmatprep.subr.bf16.mxu1 %v1198_v26 }
  0x4f   : > { %1117 = vmatpush3.bf16.msra.mxu0 %v1198_v26  ;;  %1149 = vmatpush3.bf16.msra.mxu1 %v1198_v26 }
  0x52   : > { %1119 = vmatmul.mubr.bf16.vlgmr.msra.gmra.mrb[0].mxu0 %v1201_v27  ;;  %1127 = vmatmul.mubr.bf16.vlgmr.msra.gmra.mrb[0].mxu1 %v1202_v28 }
  0x53   : > { %1122 = vmatprep.mubr.bf16.mxu0 %v1203_v29  ;;  %1130 = vmatprep.mubr.bf16.mxu1 %v1204_v30 }
  0x5a   : > { %1123 = vmatmul.mubr.bf16.gmra.mrb[4].mxu0 %v1205_v31  ;;  %1131 = vmatmul.mubr.bf16.gmra.mrb[4].mxu1 %v1206_v32 }
 0x125   : > { %v1120_v37 = vpop.f32.mrb[0].mxu0  ;;  %v1128_v38 = vpop.f32.mrb[0].mxu1 }
 0x126   : > { %v658_v41 = vadd.f32 %v1120_v37, %v417_v33  ;;  %v666_v42 = vadd.f32 %v1128_v38, %v425_v34  ;;  %v593_v43 = vpop.f32.mrb[1].mxu0  ;;  %v625_v44 = vpop.f32.mrb[1].mxu1 }
 0x127   : > { %v656_v47 = vadd.f32 %v593_v43, %v415_v35  ;;  %v664_v48 = vadd.f32 %v625_v44, %v423_v36  ;;  %v1121_v49 = vpop.f32.mrb[2].mxu0  ;;  %v1129_v50 = vpop.f32.mrb[2].mxu1 }
 0x128   : > { %674 = vst [vmem:[#allocation2 + $0x10] sm:$0xff] %v658_v41  ;;  %682 = vst [vmem:[#allocation2 + $0x50] sm:$0xff] %v666_v42  ;;  %v659_v51 = vadd.f32 %v1121_v49, %v418_v39  ;;  %v667_v52 = vadd.f32 %v1129_v50, %v426_v40  ;;  %v596_v53 = vpop.f32.mrb[3].mxu0  ;;  %v628_v54 = vpop.f32.mrb[3].mxu1 }
 0x129   : > { %672 = vst [vmem:[#allocation2] sm:$0xff] %v656_v47  ;;  %680 = vst [vmem:[#allocation2 + $0x40] sm:$0xff] %v664_v48  ;;  %v657_v55 = vadd.f32 %v596_v53, %v416_v45  ;;  %v665_v56 = vadd.f32 %v628_v54, %v424_v46 }
 0x12a   : > { %675 = vst [vmem:[#allocation2 + $0x18] sm:$0xff] %v659_v51  ;;  %683 = vst [vmem:[#allocation2 + $0x58] sm:$0xff] %v667_v52 }
 0x12b   : > { %673 = vst [vmem:[#allocation2 + $0x8] sm:$0xff] %v657_v55  ;;  %681 = vst [vmem:[#allocation2 + $0x48] sm:$0xff] %v665_v56 }
 0x12d   : > { %v1124_v61 = vpop.f32.mrb[4].mxu0  ;;  %v1132_v62 = vpop.f32.mrb[4].mxu1  ;;  %691 = sbr.rel (%p1000_p11) target bundleno = 325 (0x145), region = 85 }
 0x12e   : > { %v662_v1 = vadd.f32 %v1124_v61, %v421_v57  ;;  %v670_v2 = vadd.f32 %v1132_v62, %v429_v58  ;;  %v609_v3 = vpop.f32.mrb[5].mxu0  ;;  %v641_v4 = vpop.f32.mrb[5].mxu1 }
 0x12f   : > { %v660_v7 = vadd.f32 %v609_v3, %v419_v59  ;;  %v668_v8 = vadd.f32 %v641_v4, %v427_v60  ;;  %v1125_v9 = vpop.f32.mrb[6].mxu0  ;;  %v1133_v10 = vpop.f32.mrb[6].mxu1  ;;  %v694_v23 = vld [vmem:[#allocation2 + $0x10] sm:$0xff] (!%p1000_p11) }
 0x130   : > { %678 = vst [vmem:[#allocation2 + $0x30] sm:$0xff] %v662_v1  ;;  %686 = vst [vmem:[#allocation2 + $0x70] sm:$0xff] %v670_v2  ;;  %v663_v11 = vadd.f32 %v1125_v9, %v422_v63  ;;  %v671_v12 = vadd.f32 %v1133_v10, %v430_v0  ;;  %v612_v13 = vpop.f32.mrb[7].mxu0  ;;  %v644_v14 = vpop.f32.mrb[7].mxu1  ;;  %v692_v17 = vld [vmem:[#allocation2] sm:$0xff] (!%p1000_p11)  ;;  %v717_v25 = vmul.f32 (!%p1000_p11), %v1366_v19, %v694_v23  ;;  %v702_v49 = vld [vmem:[#allocation2 + $0x50] sm:$0xff] (!%p1000_p11) }
 0x131   : > { %676 = vst [vmem:[#allocation2 + $0x20] sm:$0xff] %v660_v7  ;;  %684 = vst [vmem:[#allocation2 + $0x60] sm:$0xff] %v668_v8  ;;  %v661_v15 = vadd.f32 %v612_v13, %v420_v5  ;;  %v669_v16 = vadd.f32 %v644_v14, %v428_v6  ;;  %v715_v20 = vmul.f32 (!%p1000_p11), %v1366_v19, %v692_v17  ;;  %v695_v24 = vld [vmem:[#allocation2 + $0x18] sm:$0xff] (!%p1000_p11)  ;;  %v700_v39 = vld [vmem:[#allocation2 + $0x40] sm:$0xff] (!%p1000_p11) }
 0x132   : > { %679 = vst [vmem:[#allocation2 + $0x38] sm:$0xff] %v663_v11  ;;  %687 = vst [vmem:[#allocation2 + $0x78] sm:$0xff] %v671_v12  ;;  %v693_v18 = vld [vmem:[#allocation2 + $0x8] sm:$0xff] (!%p1000_p11)  ;;  %v718_v26 = vmul.f32 (!%p1000_p11), %v1366_v19, %v695_v24  ;;  %v740_v35 = vadd.f32 (!%p1000_p11), %v1373_v22, %v717_v25  ;;  %v703_v50 = vld [vmem:[#allocation2 + $0x58] sm:$0xff] (!%p1000_p11)  ;;  %v723_v54 = vmul.f32 (!%p1000_p11), %v1366_v19, %v700_v39 }
 0x133   : > { %677 = vst [vmem:[#allocation2 + $0x28] sm:$0xff] %v661_v15  ;;  %685 = vst [vmem:[#allocation2 + $0x68] sm:$0xff] %v669_v16  ;;  %v716_v21 = vmul.f32 (!%p1000_p11), %v1366_v19, %v693_v18  ;;  %v738_v30 = vadd.f32 (!%p1000_p11), %v1373_v22, %v715_v20  ;;  %v701_v44 = vld [vmem:[#allocation2 + $0x48] sm:$0xff] (!%p1000_p11)  ;;  %v725_v0 = vmul.f32 (!%p1000_p11), %v1366_v19, %v702_v49 }
 0x134   : > { %v741_v36 = vadd.f32 %v1373_v22, %v718_v26  ;;  %v756_v45 = vmax.f32 %v740_v35, 0.0  ;;  %v724_v60 = vmul.f32 %v1366_v19, %v701_v44  ;;  %v746_v63 = vadd.f32 %v1373_v22, %v723_v54 }
 0x135   : > { %v739_v31 = vadd.f32 %v1373_v22, %v716_v21  ;;  %v754_v40 = vmax.f32 %v738_v30, 0.0  ;;  %v726_v1 = vmul.f32 %v1366_v19, %v703_v50  ;;  %v748_v8 = vadd.f32 %v1373_v22, %v725_v0 }
 0x136   : > { %v757_v46 = vmax.f32 %v741_v36, 0.0  ;;  %v747_v4 = vadd.f32 %v1373_v22, %v724_v60  ;;  %v762_v7 = vmax.f32 %v746_v63, 0.0 }
 0x137   : > { %v698_v29 = vld [vmem:[#allocation2 + $0x30] sm:$0xff]  ;;  %v755_v41 = vmax.f32 %v739_v31, 0.0  ;;  %v749_v9 = vadd.f32 %v1373_v22, %v726_v1  ;;  %v764_v15 = vmax.f32 %v748_v8, 0.0 }
 0x138   : > { %v696_v27 = vld [vmem:[#allocation2 + $0x20] sm:$0xff]  ;;  %v721_v37 = vmul.f32 %v1366_v19, %v698_v29  ;;  %v1047_v57 = vpack.c.bf16 %v757_v46, %v756_v45  ;;  %v706_v61 = vld [vmem:[#allocation2 + $0x70] sm:$0xff]  ;;  %v763_v11 = vmax.f32 %v747_v4, 0.0 }
 0x139   : > { %v719_v32 = vmul.f32 %v1366_v19, %v696_v27  ;;  %v699_v34 = vld [vmem:[#allocation2 + $0x38] sm:$0xff]  ;;  %v1042_v51 = vpack.c.bf16 %v755_v41, %v754_v40  ;;  %v704_v55 = vld [vmem:[#allocation2 + $0x60] sm:$0xff]  ;;  %v729_v10 = vmul.f32 %v1366_v19, %v706_v61  ;;  %v765_v16 = vmax.f32 %v749_v9, 0.0 }
 0x13a   : > { %v697_v28 = vld [vmem:[#allocation2 + $0x28] sm:$0xff]  ;;  %v722_v38 = vmul.f32 %v1366_v19, %v699_v34  ;;  %v744_v47 = vadd.f32 %v1373_v22, %v721_v37  ;;  %v707_v2 = vld [vmem:[#allocation2 + $0x78] sm:$0xff]  ;;  %1079 = vst [vmem:[%s1448_s4 + $0x8] sm:$0xff] %v1047_v57   ;;  %v727_v5 = vmul.f32 %v1366_v19, %v704_v55  ;;  %v1062_v18 = vpack.c.bf16 %v763_v11, %v762_v7 }
 0x13b   : > { %v720_v33 = vmul.f32 %v1366_v19, %v697_v28  ;;  %v742_v42 = vadd.f32 %v1373_v22, %v719_v32  ;;  %v705_v56 = vld [vmem:[#allocation2 + $0x68] sm:$0xff]  ;;  %1043 = vst [vmem:[%s1448_s4] sm:$0xff] %v1042_v51   ;;  %v730_v14 = vmul.f32 %v1366_v19, %v707_v2  ;;  %v752_v17 = vadd.f32 %v1373_v22, %v729_v10 }
 0x13c   : > { %v745_v48 = vadd.f32 %v1373_v22, %v722_v38  ;;  %v760_v58 = vmax.f32 %v744_v47, 0.0  ;;  %v728_v6 = vmul.f32 %v1366_v19, %v705_v56  ;;  %v750_v12 = vadd.f32 %v1373_v22, %v727_v5  ;;  %1082 = vst [vmem:[%s1448_s4 + $0x20] sm:$0xff] %v1062_v18  }
 0x13d   : > { %v743_v43 = vadd.f32 %v1373_v22, %v720_v33  ;;  %v758_v52 = vmax.f32 %v742_v42, 0.0  ;;  %v753_v23 = vadd.f32 %v1373_v22, %v730_v14  ;;  %v1067_v24 = vpack.c.bf16 %v765_v16, %v764_v15 }
 0x13e   : > { %v761_v59 = vmax.f32 %v745_v48, 0.0  ;;  %v751_v13 = vadd.f32 %v1373_v22, %v728_v6  ;;  %v766_v20 = vmax.f32 %v750_v12, 0.0  ;;  %v768_v25 = vmax.f32 %v752_v17, 0.0 }
 0x13f   : > { %v759_v53 = vmax.f32 %v743_v43, 0.0  ;;  %v769_v27 = vmax.f32 %v753_v23, 0.0  ;;  %1083 = vst [vmem:[%s1448_s4 + $0x28] sm:$0xff] %v1067_v24  }
 0x140   : > { %v1057_v3 = vpack.c.bf16 %v761_v59, %v760_v58  ;;  %v767_v21 = vmax.f32 %v751_v13, 0.0 }
 0x141   : > { %v1052_v62 = vpack.c.bf16 %v759_v53, %v758_v52  ;;  %v1077_v19 = vpack.c.bf16 %v769_v27, %v768_v25 }
 0x142   : > { %1081 = vst [vmem:[%s1448_s4 + $0x18] sm:$0xff] %v1057_v3   ;;  %v1072_v26 = vpack.c.bf16 %v767_v21, %v766_v20 }
 0x143   : > { %1080 = vst [vmem:[%s1448_s4 + $0x10] sm:$0xff] %v1052_v62   ;;  %1085 = vst [vmem:[%s1448_s4 + $0x38] sm:$0xff] %v1077_v19  }
 0x144   : > { %1084 = vst [vmem:[%s1448_s4 + $0x30] sm:$0xff] %v1072_v26  }
 0x145 PF: > { %s14_s19 = sadd.s32 1, %s1245_s19   ;;  %s1449_s15 = smov %s1233_s16 }
 0x146   : > { %p11_p12 = scmp.ge.s32.totalorder %s14_s19, 11   ;;  %s1450_s16 = smov %s1308_s23 }
 0x147   : > { %s1451_s17 = smov %s1241_s18  ;;  %s1452_s18 = smov %s1454_s20 }
 0x148   :  { %13 = sbr.rel (!%p11_p12) target bundleno = 3 (0x3), region = 129 }

// kernel: resnet_forward.59
= control target key start
LH: loop header
LB: loop body
LE: loop exit
PB: predicated region body
PF: predicated region fallthrough
CT: control target
= control target key end

     0   :  { %s740_s1 = inlined_call_operand.vmem [shape: bf16[128,128], index: 1, kind: input, shape index: {}]   ;;  %s741_s0 = inlined_call_operand.vmem [shape: bf16[128,128], index: 0, kind: input, shape index: {}]   ;;  %s742_s2 = inlined_call_operand.vmem [shape: f32[1,128], index: 2, kind: input, shape index: {}]   ;;  %s743_s3 = inlined_call_operand.vmem [shape: f32[1,128], index: 3, kind: input, shape index: {}]   ;;  %s744_s4 = inlined_call_operand.vmem [shape: bf16[128,128], index: 4, kind: output, shape index: {}]  }
   0x1   :  { %v621_v0 = vld [vmem:[%s740_s1] sm:$0xff]   ;;  %v622_v1 = vld [vmem:[%s740_s1 + $0x8] sm:$0xff]   ;;  %v623_v2 = vld [vmem:[%s740_s1 + $0x10] sm:$0xff]  }
   0x2   :  { %573 = vmatprep.subr.bf16.mxu0 %v621_v0  ;;  %605 = vmatprep.subr.bf16.mxu1 %v621_v0  ;;  %v624_v3 = vld [vmem:[%s740_s1 + $0x18] sm:$0xff]   ;;  %v629_v4 = vld [vmem:[%s741_s0] sm:$0xff]   ;;  %v626_v7 = vld [vmem:[%s740_s1 + $0x28] sm:$0xff]  }
   0x3   :  { %574 = vmatpush3.bf16.msra.mxu0 %v621_v0  ;;  %613 = vmatpush3.bf16.msra.mxu1 %v621_v0  ;;  %v630_v5 = vld [vmem:[%s741_s0 + $0x20] sm:$0xff]   ;;  %v627_v8 = vld [vmem:[%s740_s1 + $0x30] sm:$0xff]   ;;  %v628_v9 = vld [vmem:[%s740_s1 + $0x38] sm:$0xff]  }
   0x4   :  { %575 = vmatprep.subr.bf16.mxu0 %v622_v1  ;;  %606 = vmatprep.subr.bf16.mxu1 %v622_v1  ;;  %v625_v6 = vld [vmem:[%s740_s1 + $0x20] sm:$0xff]   ;;  %v631_v10 = vld [vmem:[%s741_s0 + $0x8] sm:$0xff]   ;;  %v633_v12 = vld [vmem:[%s741_s0 + $0x10] sm:$0xff]  }
   0x5   :  { %589 = vmatprep.mubr.bf16.mxu0 %v629_v4  ;;  %597 = vmatprep.mubr.bf16.mxu1 %v630_v5  ;;  %v632_v11 = vld [vmem:[%s741_s0 + $0x28] sm:$0xff]   ;;  %v634_v13 = vld [vmem:[%s741_s0 + $0x30] sm:$0xff]   ;;  %v635_v14 = vld [vmem:[%s741_s0 + $0x18] sm:$0xff]  }
   0x6   :  { %v636_v15 = vld [vmem:[%s741_s0 + $0x38] sm:$0xff]   ;;  %v476_v16 = vld [vmem:[%s742_s2] ss:$0 sm:$0xff] }
   0x7   :  { %576 = vmatpush3.bf16.msra.mxu0 %v622_v1  ;;  %614 = vmatpush3.bf16.msra.mxu1 %v622_v1  ;;  %v477_v23 = vld [vmem:[%s743_s3] ss:$0 sm:$0xff] }
   0x8   :  { %577 = vmatprep.subr.bf16.mxu0 %v623_v2  ;;  %607 = vmatprep.subr.bf16.mxu1 %v623_v2 }
   0xb   :  { %578 = vmatpush3.bf16.msra.mxu0 %v623_v2  ;;  %615 = vmatpush3.bf16.msra.mxu1 %v623_v2 }
   0xc   :  { %579 = vmatprep.subr.bf16.mxu0 %v624_v3  ;;  %608 = vmatprep.subr.bf16.mxu1 %v624_v3 }
   0xf   :  { %580 = vmatpush3.bf16.msra.mxu0 %v624_v3  ;;  %616 = vmatpush3.bf16.msra.mxu1 %v624_v3 }
  0x10   :  { %581 = vmatprep.subr.bf16.mxu0 %v625_v6  ;;  %609 = vmatprep.subr.bf16.mxu1 %v625_v6 }
  0x13   :  { %582 = vmatpush3.bf16.msra.mxu0 %v625_v6  ;;  %617 = vmatpush3.bf16.msra.mxu1 %v625_v6 }
  0x14   :  { %583 = vmatprep.subr.bf16.mxu0 %v626_v7  ;;  %610 = vmatprep.subr.bf16.mxu1 %v626_v7 }
  0x17   :  { %584 = vmatpush3.bf16.msra.mxu0 %v626_v7  ;;  %618 = vmatpush3.bf16.msra.mxu1 %v626_v7 }
  0x18   :  { %585 = vmatprep.subr.bf16.mxu0 %v627_v8  ;;  %611 = vmatprep.subr.bf16.mxu1 %v627_v8 }
  0x1b   :  { %586 = vmatpush3.bf16.msra.mxu0 %v627_v8  ;;  %619 = vmatpush3.bf16.msra.mxu1 %v627_v8 }
  0x1c   :  { %587 = vmatprep.subr.bf16.mxu0 %v628_v9  ;;  %612 = vmatprep.subr.bf16.mxu1 %v628_v9 }
  0x1f   :  { %588 = vmatpush3.bf16.msra.mxu0 %v628_v9  ;;  %620 = vmatpush3.bf16.msra.mxu1 %v628_v9 }
  0x22   :  { %590 = vmatmul.mubr.bf16.vlgmr.msra.gmra.mrb[0].mxu0 %v631_v10  ;;  %598 = vmatmul.mubr.bf16.vlgmr.msra.gmra.mrb[0].mxu1 %v632_v11 }
  0x23   :  { %593 = vmatprep.mubr.bf16.mxu0 %v633_v12  ;;  %601 = vmatprep.mubr.bf16.mxu1 %v634_v13 }
  0x2a   :  { %594 = vmatmul.mubr.bf16.gmra.mrb[4].mxu0 %v635_v14  ;;  %602 = vmatmul.mubr.bf16.gmra.mrb[4].mxu1 %v636_v15 }
  0xf5   :  { %v591_v17 = vpop.f32.mrb[0].mxu0  ;;  %v599_v18 = vpop.f32.mrb[0].mxu1 }
  0xf6   :  { %v339_v19 = vmul.f32 %v591_v17, %v476_v16  ;;  %v347_v20 = vmul.f32 %v599_v18, %v476_v16  ;;  %v216_v21 = vpop.f32.mrb[1].mxu0  ;;  %v248_v22 = vpop.f32.mrb[1].mxu1 }
  0xf7   :  { %v337_v24 = vmul.f32 %v476_v16, %v216_v21  ;;  %v345_v25 = vmul.f32 %v476_v16, %v248_v22  ;;  %v592_v26 = vpop.f32.mrb[2].mxu0  ;;  %v600_v27 = vpop.f32.mrb[2].mxu1 }
  0xf8   :  { %v340_v28 = vmul.f32 %v592_v26, %v476_v16  ;;  %v348_v29 = vmul.f32 %v600_v27, %v476_v16  ;;  %v219_v30 = vpop.f32.mrb[3].mxu0  ;;  %v251_v31 = vpop.f32.mrb[3].mxu1  ;;  %v362_v34 = vadd.f32 %v477_v23, %v339_v19  ;;  %v370_v35 = vadd.f32 %v477_v23, %v347_v20 }
  0xf9   :  { %v338_v32 = vmul.f32 %v476_v16, %v219_v30  ;;  %v346_v33 = vmul.f32 %v476_v16, %v251_v31  ;;  %v360_v38 = vadd.f32 %v477_v23, %v337_v24  ;;  %v368_v39 = vadd.f32 %v477_v23, %v345_v25 }
  0xfa   :  { %v363_v36 = vadd.f32 %v477_v23, %v340_v28  ;;  %v371_v37 = vadd.f32 %v477_v23, %v348_v29 }
  0xfb   :  { %v361_v40 = vadd.f32 %v477_v23, %v338_v32  ;;  %v369_v41 = vadd.f32 %v477_v23, %v346_v33 }
  0xfc   :  { %v518_v42 = vpack.c.bf16 %v363_v36, %v362_v34  ;;  %v538_v43 = vpack.c.bf16 %v371_v37, %v370_v35 }
  0xfd   :  { %v513_v44 = vpack.c.bf16 %v361_v40, %v360_v38  ;;  %v533_v45 = vpack.c.bf16 %v369_v41, %v368_v39  ;;  %v595_v46 = vpop.f32.mrb[4].mxu0  ;;  %v603_v47 = vpop.f32.mrb[4].mxu1 }
  0xfe   :  { %550 = vst [vmem:[%s744_s4 + $0x8] sm:$0xff] %v518_v42   ;;  %554 = vst [vmem:[%s744_s4 + $0x28] sm:$0xff] %v538_v43   ;;  %v343_v48 = vmul.f32 %v595_v46, %v476_v16  ;;  %v351_v49 = vmul.f32 %v603_v47, %v476_v16  ;;  %v232_v50 = vpop.f32.mrb[5].mxu0  ;;  %v264_v51 = vpop.f32.mrb[5].mxu1 }
  0xff   :  { %514 = vst [vmem:[%s744_s4] sm:$0xff] %v513_v44   ;;  %553 = vst [vmem:[%s744_s4 + $0x20] sm:$0xff] %v533_v45   ;;  %v341_v52 = vmul.f32 %v476_v16, %v232_v50  ;;  %v349_v53 = vmul.f32 %v476_v16, %v264_v51  ;;  %v596_v54 = vpop.f32.mrb[6].mxu0  ;;  %v604_v55 = vpop.f32.mrb[6].mxu1 }
 0x100   :  { %v344_v56 = vmul.f32 %v596_v54, %v476_v16  ;;  %v352_v57 = vmul.f32 %v604_v55, %v476_v16  ;;  %v235_v58 = vpop.f32.mrb[7].mxu0  ;;  %v267_v59 = vpop.f32.mrb[7].mxu1  ;;  %v366_v62 = vadd.f32 %v477_v23, %v343_v48  ;;  %v374_v63 = vadd.f32 %v477_v23, %v351_v49 }
 0x101   :  { %v342_v60 = vmul.f32 %v476_v16, %v235_v58  ;;  %v350_v61 = vmul.f32 %v476_v16, %v267_v59  ;;  %v364_v2 = vadd.f32 %v477_v23, %v341_v52  ;;  %v372_v3 = vadd.f32 %v477_v23, %v349_v53 }
 0x102   :  { %v367_v0 = vadd.f32 %v477_v23, %v344_v56  ;;  %v375_v1 = vadd.f32 %v477_v23, %v352_v57 }
 0x103   :  { %v365_v4 = vadd.f32 %v477_v23, %v342_v60  ;;  %v373_v5 = vadd.f32 %v477_v23, %v350_v61 }
 0x104   :  { %v528_v6 = vpack.c.bf16 %v367_v0, %v366_v62  ;;  %v548_v7 = vpack.c.bf16 %v375_v1, %v374_v63 }
 0x105   :  { %v523_v8 = vpack.c.bf16 %v365_v4, %v364_v2  ;;  %v543_v9 = vpack.c.bf16 %v373_v5, %v372_v3 }
 0x106   :  { %552 = vst [vmem:[%s744_s4 + $0x18] sm:$0xff] %v528_v6   ;;  %556 = vst [vmem:[%s744_s4 + $0x38] sm:$0xff] %v548_v7  }
 0x107   :  { %551 = vst [vmem:[%s744_s4 + $0x10] sm:$0xff] %v523_v8   ;;  %555 = vst [vmem:[%s744_s4 + $0x30] sm:$0xff] %v543_v9  }

// kernel: resnet_forward.60
= control target key start
LH: loop header
LB: loop body
LE: loop exit
PB: predicated region body
PF: predicated region fallthrough
CT: control target
= control target key end

     0   :  { %s935_s1 = inlined_call_operand.vmem [shape: bf16[128,128], index: 1, kind: input, shape index: {}]   ;;  %s936_s0 = inlined_call_operand.vmem [shape: bf16[128,128], index: 0, kind: input, shape index: {}]   ;;  %s937_s4 = inlined_call_operand.vmem [shape: bf16[128,128], index: 4, kind: input, shape index: {}]   ;;  %s938_s2 = inlined_call_operand.vmem [shape: f32[1,128], index: 2, kind: input, shape index: {}]   ;;  %s939_s3 = inlined_call_operand.vmem [shape: f32[1,128], index: 3, kind: input, shape index: {}]   ;;  %s940_s5 = inlined_call_operand.vmem [shape: bf16[128,128], index: 5, kind: output, shape index: {}]  }
   0x1   :  { %v727_v0 = vld [vmem:[%s935_s1] sm:$0xff]   ;;  %v728_v1 = vld [vmem:[%s935_s1 + $0x8] sm:$0xff]   ;;  %v729_v2 = vld [vmem:[%s935_s1 + $0x10] sm:$0xff]  }
   0x2   :  { %679 = vmatprep.subr.bf16.mxu0 %v727_v0  ;;  %711 = vmatprep.subr.bf16.mxu1 %v727_v0  ;;  %v730_v3 = vld [vmem:[%s935_s1 + $0x18] sm:$0xff]   ;;  %v735_v4 = vld [vmem:[%s936_s0] sm:$0xff]   ;;  %v732_v7 = vld [vmem:[%s935_s1 + $0x28] sm:$0xff]  }
   0x3   :  { %680 = vmatpush3.bf16.msra.mxu0 %v727_v0  ;;  %719 = vmatpush3.bf16.msra.mxu1 %v727_v0  ;;  %v736_v5 = vld [vmem:[%s936_s0 + $0x20] sm:$0xff]   ;;  %v733_v8 = vld [vmem:[%s935_s1 + $0x30] sm:$0xff]   ;;  %v734_v9 = vld [vmem:[%s935_s1 + $0x38] sm:$0xff]  }
   0x4   :  { %681 = vmatprep.subr.bf16.mxu0 %v728_v1  ;;  %712 = vmatprep.subr.bf16.mxu1 %v728_v1  ;;  %v731_v6 = vld [vmem:[%s935_s1 + $0x20] sm:$0xff]   ;;  %v737_v10 = vld [vmem:[%s936_s0 + $0x8] sm:$0xff]   ;;  %v739_v12 = vld [vmem:[%s936_s0 + $0x10] sm:$0xff]  }
   0x5   :  { %695 = vmatprep.mubr.bf16.mxu0 %v735_v4  ;;  %703 = vmatprep.mubr.bf16.mxu1 %v736_v5  ;;  %v738_v11 = vld [vmem:[%s936_s0 + $0x28] sm:$0xff]   ;;  %v740_v13 = vld [vmem:[%s936_s0 + $0x30] sm:$0xff]   ;;  %v741_v14 = vld [vmem:[%s936_s0 + $0x18] sm:$0xff]  }
   0x6   :  { %v742_v15 = vld [vmem:[%s936_s0 + $0x38] sm:$0xff]   ;;  %v649_v16 = vld [vmem:[%s937_s4 + $0x8] sm:$0xff]   ;;  %v578_v18 = vld [vmem:[%s937_s4] sm:$0xff]  }
   0x7   :  { %682 = vmatpush3.bf16.msra.mxu0 %v728_v1  ;;  %720 = vmatpush3.bf16.msra.mxu1 %v728_v1  ;;  %v653_v17 = vld [vmem:[%s937_s4 + $0x28] sm:$0xff]   ;;  %v652_v19 = vld [vmem:[%s937_s4 + $0x20] sm:$0xff]   ;;  %v841_v21 = vld [vmem:[%s937_s4 + $0x18] sm:$0xff]   ;;  %v583_v23 = vunpack.c.l.bf16 %v649_v16  ;;  %v579_v25 = vunpack.c.l.bf16 %v578_v18  ;;  %v584_v32 = vunpack.c.h.bf16 %v649_v16  ;;  %v580_v34 = vunpack.c.h.bf16 %v578_v18 }
   0x8   :  { %683 = vmatprep.subr.bf16.mxu0 %v729_v2  ;;  %713 = vmatprep.subr.bf16.mxu1 %v729_v2  ;;  %v836_v20 = vld [vmem:[%s938_s2] ss:$0 sm:$0xff]  ;;  %v846_v22 = vld [vmem:[%s937_s4 + $0x38] sm:$0xff]   ;;  %v599_v24 = vunpack.c.l.bf16 %v653_v17  ;;  %v595_v26 = vunpack.c.l.bf16 %v652_v19  ;;  %v851_v27 = vld [vmem:[%s937_s4 + $0x10] sm:$0xff]   ;;  %v600_v33 = vunpack.c.h.bf16 %v653_v17  ;;  %v596_v35 = vunpack.c.h.bf16 %v652_v19 }
   0x9   :  { %v856_v28 = vld [vmem:[%s937_s4 + $0x30] sm:$0xff]   ;;  %v861_v30 = vld [vmem:[%s939_s3] ss:$0 sm:$0xff]  ;;  %v591_v40 = vunpack.c.l.bf16 %v841_v21  ;;  %v607_v41 = vunpack.c.l.bf16 %v846_v22  ;;  %v587_v46 = vunpack.c.l.bf16 %v851_v27 }
   0xa   :  { %v603_v47 = vunpack.c.l.bf16 %v856_v28 }
   0xb   :  { %684 = vmatpush3.bf16.msra.mxu0 %v729_v2  ;;  %721 = vmatpush3.bf16.msra.mxu1 %v729_v2 }
   0xc   :  { %685 = vmatprep.subr.bf16.mxu0 %v730_v3  ;;  %714 = vmatprep.subr.bf16.mxu1 %v730_v3 }
   0xf   :  { %686 = vmatpush3.bf16.msra.mxu0 %v730_v3  ;;  %722 = vmatpush3.bf16.msra.mxu1 %v730_v3 }
  0x10   :  { %687 = vmatprep.subr.bf16.mxu0 %v731_v6  ;;  %715 = vmatprep.subr.bf16.mxu1 %v731_v6 }
  0x13   :  { %688 = vmatpush3.bf16.msra.mxu0 %v731_v6  ;;  %723 = vmatpush3.bf16.msra.mxu1 %v731_v6 }
  0x14   :  { %689 = vmatprep.subr.bf16.mxu0 %v732_v7  ;;  %716 = vmatprep.subr.bf16.mxu1 %v732_v7 }
  0x17   :  { %690 = vmatpush3.bf16.msra.mxu0 %v732_v7  ;;  %724 = vmatpush3.bf16.msra.mxu1 %v732_v7 }
  0x18   :  { %691 = vmatprep.subr.bf16.mxu0 %v733_v8  ;;  %717 = vmatprep.subr.bf16.mxu1 %v733_v8 }
  0x1b   :  { %692 = vmatpush3.bf16.msra.mxu0 %v733_v8  ;;  %725 = vmatpush3.bf16.msra.mxu1 %v733_v8 }
  0x1c   :  { %693 = vmatprep.subr.bf16.mxu0 %v734_v9  ;;  %718 = vmatprep.subr.bf16.mxu1 %v734_v9 }
  0x1f   :  { %694 = vmatpush3.bf16.msra.mxu0 %v734_v9  ;;  %726 = vmatpush3.bf16.msra.mxu1 %v734_v9 }
  0x22   :  { %696 = vmatmul.mubr.bf16.vlgmr.msra.gmra.mrb[0].mxu0 %v737_v10  ;;  %704 = vmatmul.mubr.bf16.vlgmr.msra.gmra.mrb[0].mxu1 %v738_v11 }
  0x23   :  { %699 = vmatprep.mubr.bf16.mxu0 %v739_v12  ;;  %707 = vmatprep.mubr.bf16.mxu1 %v740_v13 }
  0x2a   :  { %700 = vmatmul.mubr.bf16.gmra.mrb[4].mxu0 %v741_v14  ;;  %708 = vmatmul.mubr.bf16.gmra.mrb[4].mxu1 %v742_v15 }
  0xf5   :  { %v697_v29 = vpop.f32.mrb[0].mxu0  ;;  %v705_v31 = vpop.f32.mrb[0].mxu1 }
  0xf6   :  { %v342_v36 = vmul.f32 %v697_v29, %v836_v20  ;;  %v350_v37 = vmul.f32 %v705_v31, %v836_v20  ;;  %v219_v38 = vpop.f32.mrb[1].mxu0  ;;  %v251_v39 = vpop.f32.mrb[1].mxu1 }
  0xf7   :  { %v340_v42 = vmul.f32 %v836_v20, %v219_v38  ;;  %v348_v43 = vmul.f32 %v836_v20, %v251_v39  ;;  %v698_v44 = vpop.f32.mrb[2].mxu0  ;;  %v706_v45 = vpop.f32.mrb[2].mxu1 }
  0xf8   :  { %v365_v48 = vadd.f32 %v861_v30, %v342_v36  ;;  %v373_v49 = vadd.f32 %v861_v30, %v350_v37  ;;  %v343_v50 = vmul.f32 %v698_v44, %v836_v20  ;;  %v351_v51 = vmul.f32 %v706_v45, %v836_v20  ;;  %v222_v52 = vpop.f32.mrb[3].mxu0  ;;  %v254_v53 = vpop.f32.mrb[3].mxu1 }
  0xf9   :  { %v363_v54 = vadd.f32 %v861_v30, %v340_v42  ;;  %v371_v55 = vadd.f32 %v861_v30, %v348_v43  ;;  %v341_v56 = vmul.f32 %v836_v20, %v222_v52  ;;  %v349_v57 = vmul.f32 %v836_v20, %v254_v53 }
  0xfa   :  { %v413_v58 = vadd.f32 %v583_v23, %v365_v48  ;;  %v421_v59 = vadd.f32 %v599_v24, %v373_v49  ;;  %v366_v60 = vadd.f32 %v861_v30, %v343_v50  ;;  %v374_v61 = vadd.f32 %v861_v30, %v351_v51 }
  0xfb   :  { %v411_v62 = vadd.f32 %v579_v25, %v363_v54  ;;  %v419_v63 = vadd.f32 %v595_v26, %v371_v55  ;;  %v364_v0 = vadd.f32 %v861_v30, %v341_v56  ;;  %v372_v1 = vadd.f32 %v861_v30, %v349_v57 }
  0xfc   :  { %v429_v2 = vmax.f32 %v413_v58, 0.0  ;;  %v437_v3 = vmax.f32 %v421_v59, 0.0  ;;  %v414_v4 = vadd.f32 %v584_v32, %v366_v60  ;;  %v422_v5 = vadd.f32 %v600_v33, %v374_v61 }
  0xfd   :  { %v427_v6 = vmax.f32 %v411_v62, 0.0  ;;  %v435_v7 = vmax.f32 %v419_v63, 0.0  ;;  %v412_v8 = vadd.f32 %v580_v34, %v364_v0  ;;  %v420_v9 = vadd.f32 %v596_v35, %v372_v1  ;;  %v701_v10 = vpop.f32.mrb[4].mxu0  ;;  %v709_v11 = vpop.f32.mrb[4].mxu1 }
  0xfe   :  { %v430_v12 = vmax.f32 %v414_v4, 0.0  ;;  %v438_v13 = vmax.f32 %v422_v5, 0.0  ;;  %v346_v14 = vmul.f32 %v701_v10, %v836_v20  ;;  %v354_v15 = vmul.f32 %v709_v11, %v836_v20  ;;  %v235_v16 = vpop.f32.mrb[5].mxu0  ;;  %v267_v17 = vpop.f32.mrb[5].mxu1 }
  0xff   :  { %v428_v18 = vmax.f32 %v412_v8, 0.0  ;;  %v436_v19 = vmax.f32 %v420_v9, 0.0  ;;  %v344_v23 = vmul.f32 %v836_v20, %v235_v16  ;;  %v352_v24 = vmul.f32 %v836_v20, %v267_v17  ;;  %v702_v25 = vpop.f32.mrb[6].mxu0  ;;  %v710_v26 = vpop.f32.mrb[6].mxu1 }
 0x100   :  { %v617_v29 = vpack.c.bf16 %v430_v12, %v429_v2  ;;  %v637_v31 = vpack.c.bf16 %v438_v13, %v437_v3  ;;  %v369_v32 = vadd.f32 %v861_v30, %v346_v14  ;;  %v377_v33 = vadd.f32 %v861_v30, %v354_v15  ;;  %v238_v34 = vpop.f32.mrb[7].mxu0  ;;  %v270_v35 = vpop.f32.mrb[7].mxu1 }
 0x101   :  { %v612_v36 = vpack.c.bf16 %v428_v18, %v427_v6  ;;  %v632_v37 = vpack.c.bf16 %v436_v19, %v435_v7  ;;  %v367_v38 = vadd.f32 %v861_v30, %v344_v23  ;;  %v375_v39 = vadd.f32 %v861_v30, %v352_v24 }
 0x102   :  { %656 = vst [vmem:[%s940_s5 + $0x8] sm:$0xff] %v617_v29   ;;  %660 = vst [vmem:[%s940_s5 + $0x28] sm:$0xff] %v637_v31   ;;  %v347_v42 = vmul.f32 %v702_v25, %v836_v20  ;;  %v592_v43 = vunpack.c.h.bf16 %v841_v21  ;;  %v355_v44 = vmul.f32 %v710_v26, %v836_v20  ;;  %v608_v45 = vunpack.c.h.bf16 %v846_v22 }
 0x103   :  { %613 = vst [vmem:[%s940_s5] sm:$0xff] %v612_v36   ;;  %659 = vst [vmem:[%s940_s5 + $0x20] sm:$0xff] %v632_v37   ;;  %v345_v48 = vmul.f32 %v836_v20, %v238_v34  ;;  %v588_v49 = vunpack.c.h.bf16 %v851_v27  ;;  %v353_v50 = vmul.f32 %v836_v20, %v270_v35  ;;  %v604_v51 = vunpack.c.h.bf16 %v856_v28 }
 0x104   :  { %v417_v52 = vadd.f32 %v591_v40, %v369_v32  ;;  %v425_v53 = vadd.f32 %v607_v41, %v377_v33  ;;  %v370_v54 = vadd.f32 %v861_v30, %v347_v42  ;;  %v378_v55 = vadd.f32 %v861_v30, %v355_v44 }
 0x105   :  { %v415_v56 = vadd.f32 %v587_v46, %v367_v38  ;;  %v423_v57 = vadd.f32 %v603_v47, %v375_v39  ;;  %v368_v20 = vadd.f32 %v861_v30, %v345_v48  ;;  %v376_v58 = vadd.f32 %v861_v30, %v353_v50 }
 0x106   :  { %v418_v59 = vadd.f32 %v592_v43, %v370_v54  ;;  %v426_v21 = vadd.f32 %v608_v45, %v378_v55  ;;  %v433_v22 = vmax.f32 %v417_v52, 0.0  ;;  %v441_v41 = vmax.f32 %v425_v53, 0.0 }
 0x107   :  { %v416_v40 = vadd.f32 %v588_v49, %v368_v20  ;;  %v424_v60 = vadd.f32 %v604_v51, %v376_v58  ;;  %v431_v63 = vmax.f32 %v415_v56, 0.0  ;;  %v439_v0 = vmax.f32 %v423_v57, 0.0 }
 0x108   :  { %v434_v61 = vmax.f32 %v418_v59, 0.0  ;;  %v442_v62 = vmax.f32 %v426_v21, 0.0 }
 0x109   :  { %v432_v1 = vmax.f32 %v416_v40, 0.0  ;;  %v440_v27 = vmax.f32 %v424_v60, 0.0 }
 0x10a   :  { %v627_v46 = vpack.c.bf16 %v434_v61, %v433_v22  ;;  %v647_v2 = vpack.c.bf16 %v442_v62, %v441_v41 }
 0x10b   :  { %v622_v28 = vpack.c.bf16 %v432_v1, %v431_v63  ;;  %v642_v47 = vpack.c.bf16 %v440_v27, %v439_v0 }
 0x10c   :  { %658 = vst [vmem:[%s940_s5 + $0x18] sm:$0xff] %v627_v46   ;;  %662 = vst [vmem:[%s940_s5 + $0x38] sm:$0xff] %v647_v2  }
 0x10d   :  { %657 = vst [vmem:[%s940_s5 + $0x10] sm:$0xff] %v622_v28   ;;  %661 = vst [vmem:[%s940_s5 + $0x30] sm:$0xff] %v642_v47  }

// kernel: resnet_forward.68
= control target key start
LH: loop header
LB: loop body
LE: loop exit
PB: predicated region body
PF: predicated region fallthrough
CT: control target
= control target key end

     0   :  { %s867_s15 = smov 0   ;;  %s869_s16 = smov 0   ;;  %s963_s0 = inlined_call_operand.vmem [shape: bf16[32,1152], index: 0, kind: input, shape index: {}]   ;;  %s964_s1 = inlined_call_operand.vmem [shape: bf16[1152,128], index: 1, kind: input, shape index: {}]   ;;  %s965_s2 = inlined_call_operand.vmem [shape: f32[1,128], index: 2, kind: input, shape index: {}]   ;;  %s966_s3 = inlined_call_operand.vmem [shape: f32[1,128], index: 3, kind: input, shape index: {}]   ;;  %s967_s4 = inlined_call_operand.vmem [shape: bf16[32,128], index: 4, kind: output, shape index: {}]  }
   0x1   :  { %s871_s17 = smov 0   ;;  %s873_s18 = smov 0  }
   0x2   :  { %s875_s19 = smov 0  }
   0x3 LB: > { %s26_s20 = sadd.s32 1, %s835_s18  ;;  %p49_p1 = scmp.ne.s32.totalorder %s827_s16, %s823_s15  ;;  %s839_s19 = sphi %s875_s19, %s14_s19   ;;  %s835_s18 = sphi %s873_s18, %s971_s18   ;;  %s831_s17 = sphi %s871_s17, %s970_s17   ;;  %s827_s16 = sphi %s869_s16, %s969_s16   ;;  %s823_s15 = sphi %s867_s15, %s968_s15  }
   0x4   : > { %p27_p0 = scmp.ge.s32.totalorder %s26_s20, 9  ;;  %p50_p2 = scmp.eq.s32.totalorder %s839_s19, 0 }
   0x5   : > { %s42_s22 = sadd.s32 1, %s827_s16  ;;  %p676_p5 = scmp.ge.s32.totalorder %s839_s19, 9 }
   0x6   : > { %s973_s20 = smov (%p27_p0, %s26_s20), 0  ;;  %p51_p3 = por %p50_p2, %p49_p1 }
   0x7   : > { %s38_s21 = ssub.s32 %s835_s18, %s973_s20  ;;  %195 = sbr.rel (%p676_p5) target bundleno = 21 (0x15), region = 24 }
   0x8   : > { %p40_p4 = scmp.eq.s32.totalorder %s38_s21, 0 }
   0xa   : > { %s902_s23 = scalar_select %p40_p4, %s827_s16, %s42_s22  }
   0xe   : > { %198 = sbr.rel (!%p51_p3) target bundleno = 21 (0x15), region = 28  ;;  %s200_s24 = sand.u32 (%p51_p3), 1, %s827_s16  }
   0xf   : > { %s678_s25 = sshll.u32 (%p51_p3), %s835_s18, 2  ;;  %s677_s26 = sshll.u32 (%p51_p3), %s200_s24, 4 }
  0x10   : > { %s207_s29 = scalar_lea.vmem (%p51_p3), %s963_s0, %s678_s25  ;;  %s202_s30 = scalar_lea.vmem (%p51_p3), [#allocation3], %s677_s26 }
  0x11   : > { %v223_v0 = vld [vmem:[%s207_s29] sm:$0xf] (%p51_p3)  ;;  %v225_v1 = vld [vmem:[%s207_s29 + $0x24] sm:$0xf] (%p51_p3)  ;;  %v227_v2 = vld [vmem:[%s207_s29 + $0x48] sm:$0xf] (%p51_p3) }
  0x12   : > { %224 = vst [vmem:[%s202_s30] sm:$0xf] (%p51_p3), %v223_v0  ;;  %226 = vst [vmem:[%s202_s30 + $0x4] sm:$0xf] (%p51_p3), %v225_v1  ;;  %v229_v3 = vld [vmem:[%s207_s29 + $0x6c] sm:$0xf] (%p51_p3) }
  0x13   : > { %228 = vst [vmem:[%s202_s30 + $0x8] sm:$0xf] (%p51_p3), %v227_v2  ;;  %230 = vst [vmem:[%s202_s30 + $0xc] sm:$0xf] (%p51_p3), %v229_v3 }
  0x15 PF: > { %p679_p6 = scmp.ge.s32.totalorder %s839_s19, 1  ;;  %p272_p7 = scmp.lt.s32.totalorder %s839_s19, 10 }
  0x17   : > { %p273_p8 = pnand %p679_p6, %p272_p7 }
  0x18   : > { %s279_s5 = sand.u32 (!%p273_p8), 1, %s823_s15   ;;  %s681_s6 = sshll.u32 (!%p273_p8), %s831_s17, 4 }
  0x19   : > { %276 = sbr.rel (%p273_p8) target bundleno = 306 (0x132), region = 73  ;;  %s914_s7 = sshll.u32 (!%p273_p8), %s279_s5, 4 }
  0x1a   : > { %p323_p9 = scmp.lt.s32.totalorder (!%p273_p8), %s681_s6, 143  ;;  %s281_s12 = scalar_lea.vmem (!%p273_p8), [#allocation3], %s914_s7 }
  0x1b   : > { %p683_p10 = scmp.ne.s32.totalorder (!%p273_p8), %s831_s17, 0 }
  0x20   : > { %s975_s6 = smov (!%p323_p9, %s681_s6), 143  ;;  %350 = sbr.rel (%p683_p10) target bundleno = 39 (0x27), region = 81 }
  0x21   : > { %s682_s8 = sshll.u32 %s975_s6, 2  ;;  %v841_v4 = vmov (!%p683_p10), 0.0  }
  0x22   : > { %s919_s11 = scalar_lea.vmem %s964_s1, %s682_s8  ;;  %351 = vst [vmem:[#allocation2] sm:$0xff] (!%p683_p10), %v841_v4  ;;  %352 = vst [vmem:[#allocation2 + $0x8] sm:$0xff] (!%p683_p10), %v841_v4 }
  0x23   : > { %353 = vst [vmem:[#allocation2 + $0x10] sm:$0xff] (!%p683_p10), %v841_v4  ;;  %354 = vst [vmem:[#allocation2 + $0x18] sm:$0xff] (!%p683_p10), %v841_v4 }
  0x27 PF: > { %v791_v5 = vld [vmem:[%s919_s11] sm:$0xff]   ;;  %v792_v6 = vld [vmem:[%s919_s11 + $0x8] sm:$0xff]   ;;  %v793_v7 = vld [vmem:[%s919_s11 + $0x10] sm:$0xff]   ;;  %p694_p11 = scmp.ne.s32.totalorder %s831_s17, 8 }
  0x28   : > { %730 = vmatprep.subr.bf16.mxu0 %v791_v5  ;;  %v794_v8 = vld [vmem:[%s919_s11 + $0x18] sm:$0xff]   ;;  %v799_v9 = vld [vmem:[%s281_s12] sm:$0xff]   ;;  %v796_v11 = vld [vmem:[%s919_s11 + $0x28] sm:$0xff]  }
  0x29   : > { %731 = vmatpush3.bf16.msra.mxu0 %v791_v5  ;;  %746 = vmatprep.mubr.bf16.mxu0 %v799_v9  ;;  %v795_v10 = vld [vmem:[%s919_s11 + $0x20] sm:$0xff]   ;;  %v797_v12 = vld [vmem:[%s919_s11 + $0x30] sm:$0xff]   ;;  %v798_v13 = vld [vmem:[%s919_s11 + $0x38] sm:$0xff]  }
  0x2a   : > { %732 = vmatprep.subr.bf16.mxu0 %v792_v6  ;;  %v800_v14 = vld [vmem:[%s281_s12 + $0x8] sm:$0xff]   ;;  %v357_v15 = vld [vmem:[#allocation2 + $0x10] sm:$0xff]  ;;  %v355_v16 = vld [vmem:[#allocation2] sm:$0xff] }
  0x2b   : > { %v358_v18 = vld [vmem:[#allocation2 + $0x18] sm:$0xff]  ;;  %v356_v21 = vld [vmem:[#allocation2 + $0x8] sm:$0xff]  ;;  %v695_v29 = vld [vmem:[%s965_s2] ss:$0 sm:$0xff] (!%p694_p11) }
  0x2c   : > { %v696_v32 = vld [vmem:[%s966_s3] ss:$0 sm:$0xff] (!%p694_p11) }
  0x2d   : > { %733 = vmatpush3.bf16.msra.mxu0 %v792_v6 }
  0x2e   : > { %734 = vmatprep.subr.bf16.mxu0 %v793_v7 }
  0x31   : > { %735 = vmatpush3.bf16.msra.mxu0 %v793_v7 }
  0x32   : > { %736 = vmatprep.subr.bf16.mxu0 %v794_v8 }
  0x35   : > { %737 = vmatpush3.bf16.msra.mxu0 %v794_v8 }
  0x36   : > { %738 = vmatprep.subr.bf16.mxu0 %v795_v10 }
  0x39   : > { %739 = vmatpush3.bf16.msra.mxu0 %v795_v10 }
  0x3a   : > { %740 = vmatprep.subr.bf16.mxu0 %v796_v11 }
  0x3d   : > { %741 = vmatpush3.bf16.msra.mxu0 %v796_v11 }
  0x3e   : > { %742 = vmatprep.subr.bf16.mxu0 %v797_v12 }
  0x41   : > { %743 = vmatpush3.bf16.msra.mxu0 %v797_v12 }
  0x42   : > { %744 = vmatprep.subr.bf16.mxu0 %v798_v13 }
  0x45   : > { %745 = vmatpush3.bf16.msra.mxu0 %v798_v13 }
  0x48   : > { %747 = vmatmul.mubr.bf16.vlgmr.msra.gmra.mrb[0].mxu0 %v800_v14 }
 0x11b   : > { %v748_v17 = vpop.f32.mrb[0].mxu0  ;;  %499 = sbr.rel (%p694_p11) target bundleno = 306 (0x132), region = 85 }
 0x11c   : > { %v490_v19 = vadd.f32 %v748_v17, %v357_v15  ;;  %v473_v20 = vpop.f32.mrb[1].mxu0 }
 0x11d   : > { %v488_v22 = vadd.f32 %v473_v20, %v355_v16  ;;  %v749_v23 = vpop.f32.mrb[2].mxu0 }
 0x11e   : > { %494 = vst [vmem:[#allocation2 + $0x10] sm:$0xff] %v490_v19  ;;  %v491_v24 = vadd.f32 %v749_v23, %v358_v18  ;;  %v476_v25 = vpop.f32.mrb[3].mxu0 }
 0x11f   : > { %492 = vst [vmem:[#allocation2] sm:$0xff] %v488_v22  ;;  %v489_v26 = vadd.f32 %v476_v25, %v356_v21 }
 0x120   : > { %495 = vst [vmem:[#allocation2 + $0x18] sm:$0xff] %v491_v24 }
 0x121   : > { %493 = vst [vmem:[#allocation2 + $0x8] sm:$0xff] %v489_v26 }
 0x125   : > { %v502_v33 = vld [vmem:[#allocation2 + $0x10] sm:$0xff] }
 0x126   : > { %v500_v27 = vld [vmem:[#allocation2] sm:$0xff]  ;;  %v513_v35 = vmul.f32 %v695_v29, %v502_v33 }
 0x127   : > { %v511_v30 = vmul.f32 %v695_v29, %v500_v27  ;;  %v503_v34 = vld [vmem:[#allocation2 + $0x18] sm:$0xff] }
 0x128   : > { %v501_v28 = vld [vmem:[#allocation2 + $0x8] sm:$0xff]  ;;  %v514_v36 = vmul.f32 %v695_v29, %v503_v34  ;;  %v524_v39 = vadd.f32 %v696_v32, %v513_v35 }
 0x129   : > { %v512_v31 = vmul.f32 %v695_v29, %v501_v28  ;;  %v522_v37 = vadd.f32 %v696_v32, %v511_v30 }
 0x12a   : > { %v525_v40 = vadd.f32 %v696_v32, %v514_v36  ;;  %v528_v43 = vmax.f32 %v524_v39, 0.0 }
 0x12b   : > { %v523_v38 = vadd.f32 %v696_v32, %v512_v31  ;;  %v526_v41 = vmax.f32 %v522_v37, 0.0 }
 0x12c   : > { %v529_v44 = vmax.f32 %v525_v40, 0.0 }
 0x12d   : > { %v527_v42 = vmax.f32 %v523_v38, 0.0 }
 0x12e   : > { %v717_v46 = vpack.c.bf16 %v529_v44, %v528_v43 }
 0x12f   : > { %v712_v45 = vpack.c.bf16 %v527_v42, %v526_v41 }
 0x130   : > { %719 = vst [vmem:[%s967_s4 + $0x8] sm:$0xff] %v717_v46  }
 0x131   : > { %713 = vst [vmem:[%s967_s4] sm:$0xff] %v712_v45  }
 0x132 PF: > { %s14_s19 = sadd.s32 1, %s839_s19   ;;  %s968_s15 = smov %s827_s16 }
 0x133   : > { %p11_p12 = scmp.ge.s32.totalorder %s14_s19, 11   ;;  %s969_s16 = smov %s902_s23 }
 0x134   : > { %s970_s17 = smov %s835_s18  ;;  %s971_s18 = smov %s973_s20 }
 0x135   :  { %13 = sbr.rel (!%p11_p12) target bundleno = 3 (0x3), region = 129 }

// kernel: resnet_forward.69
= control target key start
LH: loop header
LB: loop body
LE: loop exit
PB: predicated region body
PF: predicated region fallthrough
CT: control target
= control target key end

     0   :  { %s358_s1 = inlined_call_operand.vmem [shape: bf16[128,128], index: 1, kind: input, shape index: {}]   ;;  %s359_s0 = inlined_call_operand.vmem [shape: bf16[32,128], index: 0, kind: input, shape index: {}]   ;;  %s360_s2 = inlined_call_operand.vmem [shape: f32[1,128], index: 2, kind: input, shape index: {}]   ;;  %s361_s3 = inlined_call_operand.vmem [shape: f32[1,128], index: 3, kind: input, shape index: {}]   ;;  %s362_s4 = inlined_call_operand.vmem [shape: bf16[32,128], index: 4, kind: output, shape index: {}]  }
   0x1   :  { %v281_v0 = vld [vmem:[%s358_s1] sm:$0xff]   ;;  %v282_v1 = vld [vmem:[%s358_s1 + $0x8] sm:$0xff]   ;;  %v283_v2 = vld [vmem:[%s358_s1 + $0x10] sm:$0xff]  }
   0x2   :  { %261 = vmatprep.subr.bf16.mxu0 %v281_v0  ;;  %v284_v3 = vld [vmem:[%s358_s1 + $0x18] sm:$0xff]   ;;  %v289_v4 = vld [vmem:[%s359_s0] sm:$0xff]   ;;  %v286_v6 = vld [vmem:[%s358_s1 + $0x28] sm:$0xff]  }
   0x3   :  { %262 = vmatpush3.bf16.msra.mxu0 %v281_v0  ;;  %277 = vmatprep.mubr.bf16.mxu0 %v289_v4  ;;  %v285_v5 = vld [vmem:[%s358_s1 + $0x20] sm:$0xff]   ;;  %v287_v7 = vld [vmem:[%s358_s1 + $0x30] sm:$0xff]   ;;  %v288_v8 = vld [vmem:[%s358_s1 + $0x38] sm:$0xff]  }
   0x4   :  { %263 = vmatprep.subr.bf16.mxu0 %v282_v1  ;;  %v290_v9 = vld [vmem:[%s359_s0 + $0x8] sm:$0xff]   ;;  %v230_v10 = vld [vmem:[%s360_s2] ss:$0 sm:$0xff] }
   0x5   :  { %v231_v14 = vld [vmem:[%s361_s3] ss:$0 sm:$0xff] }
   0x7   :  { %264 = vmatpush3.bf16.msra.mxu0 %v282_v1 }
   0x8   :  { %265 = vmatprep.subr.bf16.mxu0 %v283_v2 }
   0xb   :  { %266 = vmatpush3.bf16.msra.mxu0 %v283_v2 }
   0xc   :  { %267 = vmatprep.subr.bf16.mxu0 %v284_v3 }
   0xf   :  { %268 = vmatpush3.bf16.msra.mxu0 %v284_v3 }
  0x10   :  { %269 = vmatprep.subr.bf16.mxu0 %v285_v5 }
  0x13   :  { %270 = vmatpush3.bf16.msra.mxu0 %v285_v5 }
  0x14   :  { %271 = vmatprep.subr.bf16.mxu0 %v286_v6 }
  0x17   :  { %272 = vmatpush3.bf16.msra.mxu0 %v286_v6 }
  0x18   :  { %273 = vmatprep.subr.bf16.mxu0 %v287_v7 }
  0x1b   :  { %274 = vmatpush3.bf16.msra.mxu0 %v287_v7 }
  0x1c   :  { %275 = vmatprep.subr.bf16.mxu0 %v288_v8 }
  0x1f   :  { %276 = vmatpush3.bf16.msra.mxu0 %v288_v8 }
  0x22   :  { %278 = vmatmul.mubr.bf16.vlgmr.msra.gmra.mrb[0].mxu0 %v290_v9 }
  0xf5   :  { %v279_v11 = vpop.f32.mrb[0].mxu0 }
  0xf6   :  { %v183_v12 = vmul.f32 %v279_v11, %v230_v10  ;;  %v144_v13 = vpop.f32.mrb[1].mxu0 }
  0xf7   :  { %v181_v15 = vmul.f32 %v230_v10, %v144_v13  ;;  %v280_v16 = vpop.f32.mrb[2].mxu0 }
  0xf8   :  { %v184_v17 = vmul.f32 %v280_v16, %v230_v10  ;;  %v147_v18 = vpop.f32.mrb[3].mxu0  ;;  %v194_v20 = vadd.f32 %v231_v14, %v183_v12 }
  0xf9   :  { %v182_v19 = vmul.f32 %v230_v10, %v147_v18  ;;  %v192_v22 = vadd.f32 %v231_v14, %v181_v15 }
  0xfa   :  { %v195_v21 = vadd.f32 %v231_v14, %v184_v17 }
  0xfb   :  { %v193_v23 = vadd.f32 %v231_v14, %v182_v19 }
  0xfc   :  { %v248_v24 = vpack.c.bf16 %v195_v21, %v194_v20 }
  0xfd   :  { %v243_v25 = vpack.c.bf16 %v193_v23, %v192_v22 }
  0xfe   :  { %250 = vst [vmem:[%s362_s4 + $0x8] sm:$0xff] %v248_v24  }
  0xff   :  { %244 = vst [vmem:[%s362_s4] sm:$0xff] %v243_v25  }

// kernel: resnet_forward.70
= control target key start
LH: loop header
LB: loop body
LE: loop exit
PB: predicated region body
PF: predicated region fallthrough
CT: control target
= control target key end

     0   :  { %s397_s1 = inlined_call_operand.vmem [shape: bf16[128,128], index: 1, kind: input, shape index: {}]   ;;  %s398_s0 = inlined_call_operand.vmem [shape: bf16[32,128], index: 0, kind: input, shape index: {}]   ;;  %s399_s2 = inlined_call_operand.vmem [shape: f32[1,128], index: 2, kind: input, shape index: {}]   ;;  %s400_s4 = inlined_call_operand.vmem [shape: bf16[32,128], index: 4, kind: input, shape index: {}]   ;;  %s401_s3 = inlined_call_operand.vmem [shape: f32[1,128], index: 3, kind: input, shape index: {}]   ;;  %s402_s5 = inlined_call_operand.vmem [shape: bf16[32,128], index: 5, kind: output, shape index: {}]  }
   0x1   :  { %v309_v0 = vld [vmem:[%s397_s1] sm:$0xff]   ;;  %v310_v1 = vld [vmem:[%s397_s1 + $0x8] sm:$0xff]   ;;  %v311_v2 = vld [vmem:[%s397_s1 + $0x10] sm:$0xff]  }
   0x2   :  { %289 = vmatprep.subr.bf16.mxu0 %v309_v0  ;;  %v312_v3 = vld [vmem:[%s397_s1 + $0x18] sm:$0xff]   ;;  %v317_v4 = vld [vmem:[%s398_s0] sm:$0xff]   ;;  %v314_v6 = vld [vmem:[%s397_s1 + $0x28] sm:$0xff]  }
   0x3   :  { %290 = vmatpush3.bf16.msra.mxu0 %v309_v0  ;;  %305 = vmatprep.mubr.bf16.mxu0 %v317_v4  ;;  %v313_v5 = vld [vmem:[%s397_s1 + $0x20] sm:$0xff]   ;;  %v315_v7 = vld [vmem:[%s397_s1 + $0x30] sm:$0xff]   ;;  %v316_v8 = vld [vmem:[%s397_s1 + $0x38] sm:$0xff]  }
   0x4   :  { %291 = vmatprep.subr.bf16.mxu0 %v310_v1  ;;  %v318_v9 = vld [vmem:[%s398_s0 + $0x8] sm:$0xff]   ;;  %v249_v10 = vld [vmem:[%s399_s2] ss:$0 sm:$0xff] }
   0x5   :  { %v277_v11 = vld [vmem:[%s400_s4 + $0x8] sm:$0xff]   ;;  %v260_v12 = vld [vmem:[%s400_s4] sm:$0xff]  }
   0x6   :  { %v250_v14 = vld [vmem:[%s401_s3] ss:$0 sm:$0xff]  ;;  %v265_v16 = vunpack.c.l.bf16 %v277_v11  ;;  %v261_v19 = vunpack.c.l.bf16 %v260_v12  ;;  %v266_v23 = vunpack.c.h.bf16 %v277_v11  ;;  %v262_v27 = vunpack.c.h.bf16 %v260_v12 }
   0x7   :  { %292 = vmatpush3.bf16.msra.mxu0 %v310_v1 }
   0x8   :  { %293 = vmatprep.subr.bf16.mxu0 %v311_v2 }
   0xb   :  { %294 = vmatpush3.bf16.msra.mxu0 %v311_v2 }
   0xc   :  { %295 = vmatprep.subr.bf16.mxu0 %v312_v3 }
   0xf   :  { %296 = vmatpush3.bf16.msra.mxu0 %v312_v3 }
  0x10   :  { %297 = vmatprep.subr.bf16.mxu0 %v313_v5 }
  0x13   :  { %298 = vmatpush3.bf16.msra.mxu0 %v313_v5 }
  0x14   :  { %299 = vmatprep.subr.bf16.mxu0 %v314_v6 }
  0x17   :  { %300 = vmatpush3.bf16.msra.mxu0 %v314_v6 }
  0x18   :  { %301 = vmatprep.subr.bf16.mxu0 %v315_v7 }
  0x1b   :  { %302 = vmatpush3.bf16.msra.mxu0 %v315_v7 }
  0x1c   :  { %303 = vmatprep.subr.bf16.mxu0 %v316_v8 }
  0x1f   :  { %304 = vmatpush3.bf16.msra.mxu0 %v316_v8 }
  0x22   :  { %306 = vmatmul.mubr.bf16.vlgmr.msra.gmra.mrb[0].mxu0 %v318_v9 }
  0xf5   :  { %v307_v13 = vpop.f32.mrb[0].mxu0 }
  0xf6   :  { %v186_v15 = vmul.f32 %v307_v13, %v249_v10  ;;  %v147_v17 = vpop.f32.mrb[1].mxu0 }
  0xf7   :  { %v184_v18 = vmul.f32 %v249_v10, %v147_v17  ;;  %v308_v20 = vpop.f32.mrb[2].mxu0 }
  0xf8   :  { %v197_v21 = vadd.f32 %v250_v14, %v186_v15  ;;  %v187_v22 = vmul.f32 %v308_v20, %v249_v10  ;;  %v150_v24 = vpop.f32.mrb[3].mxu0 }
  0xf9   :  { %v195_v25 = vadd.f32 %v250_v14, %v184_v18  ;;  %v185_v26 = vmul.f32 %v249_v10, %v150_v24 }
  0xfa   :  { %v209_v28 = vadd.f32 %v265_v16, %v197_v21  ;;  %v198_v29 = vadd.f32 %v250_v14, %v187_v22 }
  0xfb   :  { %v207_v30 = vadd.f32 %v261_v19, %v195_v25  ;;  %v196_v31 = vadd.f32 %v250_v14, %v185_v26 }
  0xfc   :  { %v210_v32 = vadd.f32 %v266_v23, %v198_v29  ;;  %v213_v34 = vmax.f32 %v209_v28, 0.0 }
  0xfd   :  { %v208_v33 = vadd.f32 %v262_v27, %v196_v31  ;;  %v211_v36 = vmax.f32 %v207_v30, 0.0 }
  0xfe   :  { %v214_v35 = vmax.f32 %v210_v32, 0.0 }
  0xff   :  { %v212_v37 = vmax.f32 %v208_v33, 0.0 }
 0x100   :  { %v275_v38 = vpack.c.bf16 %v214_v35, %v213_v34 }
 0x101   :  { %v270_v39 = vpack.c.bf16 %v212_v37, %v211_v36 }
 0x102   :  { %278 = vst [vmem:[%s402_s5 + $0x8] sm:$0xff] %v275_v38  }
 0x103   :  { %271 = vst [vmem:[%s402_s5] sm:$0xff] %v270_v39  }

// kernel: resnet_forward.71
= control target key start
LH: loop header
LB: loop body
LE: loop exit
PB: predicated region body
PF: predicated region fallthrough
CT: control target
= control target key end

     0   :  { %s362_s1 = inlined_call_operand.vmem [shape: bf16[128,128], index: 1, kind: input, shape index: {}]   ;;  %s363_s0 = inlined_call_operand.vmem [shape: bf16[32,128], index: 0, kind: input, shape index: {}]   ;;  %s364_s2 = inlined_call_operand.vmem [shape: f32[1,128], index: 2, kind: input, shape index: {}]   ;;  %s365_s3 = inlined_call_operand.vmem [shape: f32[1,128], index: 3, kind: input, shape index: {}]   ;;  %s366_s4 = inlined_call_operand.vmem [shape: bf16[32,128], index: 4, kind: output, shape index: {}]  }
   0x1   :  { %v285_v0 = vld [vmem:[%s362_s1] sm:$0xff]   ;;  %v286_v1 = vld [vmem:[%s362_s1 + $0x8] sm:$0xff]   ;;  %v287_v2 = vld [vmem:[%s362_s1 + $0x10] sm:$0xff]  }
   0x2   :  { %265 = vmatprep.subr.bf16.mxu0 %v285_v0  ;;  %v288_v3 = vld [vmem:[%s362_s1 + $0x18] sm:$0xff]   ;;  %v293_v4 = vld [vmem:[%s363_s0] sm:$0xff]   ;;  %v290_v6 = vld [vmem:[%s362_s1 + $0x28] sm:$0xff]  }
   0x3   :  { %266 = vmatpush3.bf16.msra.mxu0 %v285_v0  ;;  %281 = vmatprep.mubr.bf16.mxu0 %v293_v4  ;;  %v289_v5 = vld [vmem:[%s362_s1 + $0x20] sm:$0xff]   ;;  %v291_v7 = vld [vmem:[%s362_s1 + $0x30] sm:$0xff]   ;;  %v292_v8 = vld [vmem:[%s362_s1 + $0x38] sm:$0xff]  }
   0x4   :  { %267 = vmatprep.subr.bf16.mxu0 %v286_v1  ;;  %v294_v9 = vld [vmem:[%s363_s0 + $0x8] sm:$0xff]   ;;  %v234_v10 = vld [vmem:[%s364_s2] ss:$0 sm:$0xff] }
   0x5   :  { %v235_v12 = vld [vmem:[%s365_s3] ss:$0 sm:$0xff] }
   0x7   :  { %268 = vmatpush3.bf16.msra.mxu0 %v286_v1 }
   0x8   :  { %269 = vmatprep.subr.bf16.mxu0 %v287_v2 }
   0xb   :  { %270 = vmatpush3.bf16.msra.mxu0 %v287_v2 }
   0xc   :  { %271 = vmatprep.subr.bf16.mxu0 %v288_v3 }
   0xf   :  { %272 = vmatpush3.bf16.msra.mxu0 %v288_v3 }
  0x10   :  { %273 = vmatprep.subr.bf16.mxu0 %v289_v5 }
  0x13   :  { %274 = vmatpush3.bf16.msra.mxu0 %v289_v5 }
  0x14   :  { %275 = vmatprep.subr.bf16.mxu0 %v290_v6 }
  0x17   :  { %276 = vmatpush3.bf16.msra.mxu0 %v290_v6 }
  0x18   :  { %277 = vmatprep.subr.bf16.mxu0 %v291_v7 }
  0x1b   :  { %278 = vmatpush3.bf16.msra.mxu0 %v291_v7 }
  0x1c   :  { %279 = vmatprep.subr.bf16.mxu0 %v292_v8 }
  0x1f   :  { %280 = vmatpush3.bf16.msra.mxu0 %v292_v8 }
  0x22   :  { %282 = vmatmul.mubr.bf16.vlgmr.msra.gmra.mrb[0].mxu0 %v294_v9 }
  0xf5   :  { %v283_v11 = vpop.f32.mrb[0].mxu0 }
  0xf6   :  { %v183_v13 = vmul.f32 %v283_v11, %v234_v10  ;;  %v144_v14 = vpop.f32.mrb[1].mxu0 }
  0xf7   :  { %v181_v15 = vmul.f32 %v234_v10, %v144_v14  ;;  %v284_v16 = vpop.f32.mrb[2].mxu0 }
  0xf8   :  { %v194_v17 = vadd.f32 %v235_v12, %v183_v13  ;;  %v184_v18 = vmul.f32 %v284_v16, %v234_v10  ;;  %v147_v19 = vpop.f32.mrb[3].mxu0 }
  0xf9   :  { %v192_v20 = vadd.f32 %v235_v12, %v181_v15  ;;  %v182_v21 = vmul.f32 %v234_v10, %v147_v19 }
  0xfa   :  { %v195_v22 = vadd.f32 %v235_v12, %v184_v18  ;;  %v198_v24 = vmax.f32 %v194_v17, 0.0 }
  0xfb   :  { %v193_v23 = vadd.f32 %v235_v12, %v182_v21  ;;  %v196_v26 = vmax.f32 %v192_v20, 0.0 }
  0xfc   :  { %v199_v25 = vmax.f32 %v195_v22, 0.0 }
  0xfd   :  { %v197_v27 = vmax.f32 %v193_v23, 0.0 }
  0xfe   :  { %v252_v28 = vpack.c.bf16 %v199_v25, %v198_v24 }
  0xff   :  { %v247_v29 = vpack.c.bf16 %v197_v27, %v196_v26 }
 0x100   :  { %254 = vst [vmem:[%s366_s4 + $0x8] sm:$0xff] %v252_v28  }
 0x101   :  { %248 = vst [vmem:[%s366_s4] sm:$0xff] %v247_v29  }

// kernel: resnet_forward.79
= control target key start
LH: loop header
LB: loop body
LE: loop exit
PB: predicated region body
PF: predicated region fallthrough
CT: control target
= control target key end

     0   :  { %10 = vsyncpa [#allocation4], 0  ;;  %s493_s0 = inlined_call_operand.vmem [shape: bf16[32,128], index: 0, kind: input, shape index: {}]   ;;  %s494_s1 = inlined_call_operand.vmem [shape: bf16[128,128], index: 1, kind: input, shape index: {}]   ;;  %s495_s2 = inlined_call_operand.hbm [shape: f32[1,128], index: 2, kind: input, shape index: {}]   ;;  %s496_s3 = inlined_call_operand.hbm [shape: f32[1,128], index: 3, kind: input, shape index: {}]   ;;  %s497_s4 = inlined_call_operand.vmem [shape: bf16[32,128], index: 4, kind: input, shape index: {}]   ;;  %s498_s5 = inlined_call_operand.vmem [shape: bf16[32,128], index: 5, kind: output, shape index: {}]  }
   0x1   :  { %11 = vsyncpa [#allocation6], 0  ;;  %s395_s18 = smov [#allocation3]   ;;  %s396_s20 = smov [#allocation5]  }
   0x2   :  { %s22_s19 = sshll.u32 %s395_s18, 4  ;;  %s32_s21 = sshll.u32 %s396_s20, 4  ;;  %s23_s19 = int_to_ptr.vmem [resolvable:$true] %s22_s19  ;;  %s33_s21 = int_to_ptr.vmem [resolvable:$true] %s32_s21 }
   0x3   :  { %s347_s24 = scalar_lea.hbm %s495_s2, 16 }
   0x4   :  { %p348_p0 = scmp.ne.s32.totalorder %s495_s2, %s347_s24  ;;  %p351_p1 = scmp.lt.u32.totalorder %s347_s24, %s495_s2 }
   0x6   :  { %p353_p2 = pnand %p351_p1, %p348_p0 }
   0x8   :  { %356 = shalt.err (!%p353_p2)
}
   0x9   :  { %s357_s29 = scalar_lea.vmem %s23_s19, 16  ;;  %s361_s30 = scalar_lea.vmem %s23_s19, 32 }
   0xa   :  { %p358_p3 = scmp.ne.s32.totalorder %s23_s19, %s357_s29  ;;  %p362_p4 = scmp.lt.s32.totalorder %s23_s19, %s23_s19 }
   0xb   :  { %p363_p5 = scmp.lt.s32.totalorder %s361_s30, %s357_s29 }
   0xd   :  { %p364_p6 = por %p363_p5, %p362_p4 }
   0xf   :  { %p365_p7 = pnand %p364_p6, %p358_p3 }
  0x11   :  { %368 = shalt.err (!%p365_p7)
}
  0x12   :  { %25 = dma.hbm_to_vmem [thread:$0]  %s495_s2, 16, %s23_s19, [#allocation4]  }
  0x13   :  { %s369_s10 = scalar_lea.hbm %s496_s3, 16 }
  0x14   :  { %p370_p8 = scmp.ne.s32.totalorder %s496_s3, %s369_s10  ;;  %p373_p9 = scmp.lt.u32.totalorder %s369_s10, %s496_s3 }
  0x16   :  { %p375_p10 = pnand %p373_p9, %p370_p8 }
  0x18   :  { %378 = shalt.err (!%p375_p10)
}
  0x19   :  { %s379_s15 = scalar_lea.vmem %s33_s21, 16  ;;  %s383_s16 = scalar_lea.vmem %s33_s21, 32 }
  0x1a   :  { %p380_p11 = scmp.ne.s32.totalorder %s33_s21, %s379_s15  ;;  %p384_p12 = scmp.lt.s32.totalorder %s33_s21, %s33_s21 }
  0x1b   :  { %p385_p13 = scmp.lt.s32.totalorder %s383_s16, %s379_s15 }
  0x1d   :  { %p386_p0 = por %p385_p13, %p384_p12 }
  0x1f   :  { %p387_p1 = pnand %p386_p0, %p380_p11 }
  0x21   :  { %390 = shalt.err (!%p387_p1)
}
  0x22   :  { %35 = dma.hbm_to_vmem [thread:$0]  %s496_s3, 16, %s33_s21, [#allocation6]  }
  0x23   :  { %391 = dma.done.wait [#allocation4], 16  }
  0x24   :  { %392 = vsyncadd [#allocation4], 4294967280 }
  0x25   :  { %393 = dma.done.wait [#allocation6], 16  }
  0x26   :  { %394 = vsyncadd [#allocation6], 4294967280  ;;  %v337_v0 = vld [vmem:[%s494_s1] sm:$0xff]   ;;  %v338_v1 = vld [vmem:[%s494_s1 + $0x8] sm:$0xff]  }
  0x27   :  { %315 = vmatprep.subr.bf16.mxu0 %v337_v0  ;;  %v339_v2 = vld [vmem:[%s494_s1 + $0x10] sm:$0xff]   ;;  %v340_v3 = vld [vmem:[%s494_s1 + $0x18] sm:$0xff]   ;;  %v345_v4 = vld [vmem:[%s493_s0] sm:$0xff]  }
  0x28   :  { %316 = vmatpush3.bf16.msra.mxu0 %v337_v0  ;;  %331 = vmatprep.mubr.bf16.mxu0 %v345_v4  ;;  %v341_v5 = vld [vmem:[%s494_s1 + $0x20] sm:$0xff]   ;;  %v342_v6 = vld [vmem:[%s494_s1 + $0x28] sm:$0xff]   ;;  %v343_v7 = vld [vmem:[%s494_s1 + $0x30] sm:$0xff]  }
  0x29   :  { %317 = vmatprep.subr.bf16.mxu0 %v338_v1  ;;  %v344_v8 = vld [vmem:[%s494_s1 + $0x38] sm:$0xff]   ;;  %v346_v9 = vld [vmem:[%s493_s0 + $0x8] sm:$0xff]   ;;  %v275_v10 = vld [vmem:[#allocation3] ss:$0 sm:$0xff] }
  0x2a   :  { %v303_v11 = vld [vmem:[%s497_s4 + $0x8] sm:$0xff]   ;;  %v286_v12 = vld [vmem:[%s497_s4] sm:$0xff]  }
  0x2b   :  { %v276_v14 = vld [vmem:[#allocation5] ss:$0 sm:$0xff]  ;;  %v291_v16 = vunpack.c.l.bf16 %v303_v11  ;;  %v287_v19 = vunpack.c.l.bf16 %v286_v12  ;;  %v292_v23 = vunpack.c.h.bf16 %v303_v11  ;;  %v288_v27 = vunpack.c.h.bf16 %v286_v12 }
  0x2c   :  { %318 = vmatpush3.bf16.msra.mxu0 %v338_v1 }
  0x2d   :  { %319 = vmatprep.subr.bf16.mxu0 %v339_v2 }
  0x30   :  { %320 = vmatpush3.bf16.msra.mxu0 %v339_v2 }
  0x31   :  { %321 = vmatprep.subr.bf16.mxu0 %v340_v3 }
  0x34   :  { %322 = vmatpush3.bf16.msra.mxu0 %v340_v3 }
  0x35   :  { %323 = vmatprep.subr.bf16.mxu0 %v341_v5 }
  0x38   :  { %324 = vmatpush3.bf16.msra.mxu0 %v341_v5 }
  0x39   :  { %325 = vmatprep.subr.bf16.mxu0 %v342_v6 }
  0x3c   :  { %326 = vmatpush3.bf16.msra.mxu0 %v342_v6 }
  0x3d   :  { %327 = vmatprep.subr.bf16.mxu0 %v343_v7 }
  0x40   :  { %328 = vmatpush3.bf16.msra.mxu0 %v343_v7 }
  0x41   :  { %329 = vmatprep.subr.bf16.mxu0 %v344_v8 }
  0x44   :  { %330 = vmatpush3.bf16.msra.mxu0 %v344_v8 }
  0x47   :  { %332 = vmatmul.mubr.bf16.vlgmr.msra.gmra.mrb[0].mxu0 %v346_v9 }
 0x11a   :  { %v333_v13 = vpop.f32.mrb[0].mxu0 }
 0x11b   :  { %v210_v15 = vmul.f32 %v333_v13, %v275_v10  ;;  %v171_v17 = vpop.f32.mrb[1].mxu0 }
 0x11c   :  { %v208_v18 = vmul.f32 %v275_v10, %v171_v17  ;;  %v334_v20 = vpop.f32.mrb[2].mxu0 }
 0x11d   :  { %v221_v21 = vadd.f32 %v276_v14, %v210_v15  ;;  %v211_v22 = vmul.f32 %v334_v20, %v275_v10  ;;  %v174_v24 = vpop.f32.mrb[3].mxu0 }
 0x11e   :  { %v219_v25 = vadd.f32 %v276_v14, %v208_v18  ;;  %v209_v26 = vmul.f32 %v275_v10, %v174_v24 }
 0x11f   :  { %v233_v28 = vadd.f32 %v291_v16, %v221_v21  ;;  %v222_v29 = vadd.f32 %v276_v14, %v211_v22 }
 0x120   :  { %v231_v30 = vadd.f32 %v287_v19, %v219_v25  ;;  %v220_v31 = vadd.f32 %v276_v14, %v209_v26 }
 0x121   :  { %v234_v32 = vadd.f32 %v292_v23, %v222_v29  ;;  %v237_v34 = vmax.f32 %v233_v28, 0.0 }
 0x122   :  { %v232_v33 = vadd.f32 %v288_v27, %v220_v31  ;;  %v235_v36 = vmax.f32 %v231_v30, 0.0 }
 0x123   :  { %v238_v35 = vmax.f32 %v234_v32, 0.0 }
 0x124   :  { %v236_v37 = vmax.f32 %v232_v33, 0.0 }
 0x125   :  { %v301_v38 = vpack.c.bf16 %v238_v35, %v237_v34 }
 0x126   :  { %v296_v39 = vpack.c.bf16 %v236_v37, %v235_v36 }
 0x127   :  { %304 = vst [vmem:[%s498_s5 + $0x8] sm:$0xff] %v301_v38  }
 0x128   :  { %297 = vst [vmem:[%s498_s5] sm:$0xff] %v296_v39  }
 0x129   :  { %263 = vsyncpa [#allocation4], 1 }
 0x12a   :  { %264 = vsyncpa [#allocation6], 1 }

// kernel: resnet_forward.80
= control target key start
LH: loop header
LB: loop body
LE: loop exit
PB: predicated region body
PF: predicated region fallthrough
CT: control target
= control target key end

     0   :  { %9 = vsyncpa [#allocation4], 0  ;;  %s333_s15 = smov [#allocation3]   ;;  %s410_s0 = inlined_call_operand.vmem [shape: bf16[32,128], index: 0, kind: input, shape index: {}]   ;;  %s411_s1 = inlined_call_operand.vmem [shape: bf16[128,128], index: 1, kind: input, shape index: {}]   ;;  %s412_s2 = inlined_call_operand.vmem [shape: f32[1,128], index: 2, kind: input, shape index: {}]   ;;  %s413_s3 = inlined_call_operand.hbm [shape: f32[1,128], index: 3, kind: input, shape index: {}]   ;;  %s414_s4 = inlined_call_operand.vmem [shape: bf16[32,128], index: 4, kind: output, shape index: {}]  }
   0x1   :  { %s22_s16 = sshll.u32 %s333_s15, 4  ;;  %s309_s19 = scalar_lea.hbm %s413_s3, 16  ;;  %s23_s16 = int_to_ptr.vmem [resolvable:$true] %s22_s16 }
   0x2   :  { %p310_p0 = scmp.ne.s32.totalorder %s413_s3, %s309_s19  ;;  %p313_p1 = scmp.lt.u32.totalorder %s309_s19, %s413_s3 }
   0x4   :  { %p315_p2 = pnand %p313_p1, %p310_p0 }
   0x6   :  { %318 = shalt.err (!%p315_p2)
}
   0x7   :  { %s319_s24 = scalar_lea.vmem %s23_s16, 16  ;;  %s323_s25 = scalar_lea.vmem %s23_s16, 32 }
   0x8   :  { %p320_p3 = scmp.ne.s32.totalorder %s23_s16, %s319_s24  ;;  %p324_p4 = scmp.lt.s32.totalorder %s23_s16, %s23_s16 }
   0x9   :  { %p325_p5 = scmp.lt.s32.totalorder %s323_s25, %s319_s24 }
   0xb   :  { %p326_p6 = por %p325_p5, %p324_p4 }
   0xd   :  { %p327_p7 = pnand %p326_p6, %p320_p3 }
   0xf   :  { %330 = shalt.err (!%p327_p7)
}
  0x10   :  { %25 = dma.hbm_to_vmem [thread:$0]  %s413_s3, 16, %s23_s16, [#allocation4]  }
  0x11   :  { %331 = dma.done.wait [#allocation4], 16  }
  0x12   :  { %332 = vsyncadd [#allocation4], 4294967280  ;;  %v299_v0 = vld [vmem:[%s411_s1] sm:$0xff]   ;;  %v300_v1 = vld [vmem:[%s411_s1 + $0x8] sm:$0xff]  }
  0x13   :  { %278 = vmatprep.subr.bf16.mxu0 %v299_v0  ;;  %v301_v2 = vld [vmem:[%s411_s1 + $0x10] sm:$0xff]   ;;  %v302_v3 = vld [vmem:[%s411_s1 + $0x18] sm:$0xff]   ;;  %v307_v4 = vld [vmem:[%s410_s0] sm:$0xff]  }
  0x14   :  { %279 = vmatpush3.bf16.msra.mxu0 %v299_v0  ;;  %294 = vmatprep.mubr.bf16.mxu0 %v307_v4  ;;  %v303_v5 = vld [vmem:[%s411_s1 + $0x20] sm:$0xff]   ;;  %v304_v6 = vld [vmem:[%s411_s1 + $0x28] sm:$0xff]   ;;  %v305_v7 = vld [vmem:[%s411_s1 + $0x30] sm:$0xff]  }
  0x15   :  { %280 = vmatprep.subr.bf16.mxu0 %v300_v1  ;;  %v306_v8 = vld [vmem:[%s411_s1 + $0x38] sm:$0xff]   ;;  %v308_v9 = vld [vmem:[%s410_s0 + $0x8] sm:$0xff]   ;;  %v247_v10 = vld [vmem:[%s412_s2] ss:$0 sm:$0xff] }
  0x16   :  { %v248_v12 = vld [vmem:[#allocation3] ss:$0 sm:$0xff] }
  0x18   :  { %281 = vmatpush3.bf16.msra.mxu0 %v300_v1 }
  0x19   :  { %282 = vmatprep.subr.bf16.mxu0 %v301_v2 }
  0x1c   :  { %283 = vmatpush3.bf16.msra.mxu0 %v301_v2 }
  0x1d   :  { %284 = vmatprep.subr.bf16.mxu0 %v302_v3 }
  0x20   :  { %285 = vmatpush3.bf16.msra.mxu0 %v302_v3 }
  0x21   :  { %286 = vmatprep.subr.bf16.mxu0 %v303_v5 }
  0x24   :  { %287 = vmatpush3.bf16.msra.mxu0 %v303_v5 }
  0x25   :  { %288 = vmatprep.subr.bf16.mxu0 %v304_v6 }
  0x28   :  { %289 = vmatpush3.bf16.msra.mxu0 %v304_v6 }
  0x29   :  { %290 = vmatprep.subr.bf16.mxu0 %v305_v7 }
  0x2c   :  { %291 = vmatpush3.bf16.msra.mxu0 %v305_v7 }
  0x2d   :  { %292 = vmatprep.subr.bf16.mxu0 %v306_v8 }
  0x30   :  { %293 = vmatpush3.bf16.msra.mxu0 %v306_v8 }
  0x33   :  { %295 = vmatmul.mubr.bf16.vlgmr.msra.gmra.mrb[0].mxu0 %v308_v9 }
 0x106   :  { %v296_v11 = vpop.f32.mrb[0].mxu0 }
 0x107   :  { %v195_v13 = vmul.f32 %v296_v11, %v247_v10  ;;  %v156_v14 = vpop.f32.mrb[1].mxu0 }
 0x108   :  { %v193_v15 = vmul.f32 %v247_v10, %v156_v14  ;;  %v297_v16 = vpop.f32.mrb[2].mxu0 }
 0x109   :  { %v206_v17 = vadd.f32 %v248_v12, %v195_v13  ;;  %v196_v18 = vmul.f32 %v297_v16, %v247_v10  ;;  %v159_v19 = vpop.f32.mrb[3].mxu0 }
 0x10a   :  { %v204_v20 = vadd.f32 %v248_v12, %v193_v15  ;;  %v194_v21 = vmul.f32 %v247_v10, %v159_v19 }
 0x10b   :  { %v207_v22 = vadd.f32 %v248_v12, %v196_v18  ;;  %v210_v24 = vmax.f32 %v206_v17, 0.0 }
 0x10c   :  { %v205_v23 = vadd.f32 %v248_v12, %v194_v21  ;;  %v208_v26 = vmax.f32 %v204_v20, 0.0 }
 0x10d   :  { %v211_v25 = vmax.f32 %v207_v22, 0.0 }
 0x10e   :  { %v209_v27 = vmax.f32 %v205_v23, 0.0 }
 0x10f   :  { %v265_v28 = vpack.c.bf16 %v211_v25, %v210_v24 }
 0x110   :  { %v260_v29 = vpack.c.bf16 %v209_v27, %v208_v26 }
 0x111   :  { %267 = vst [vmem:[%s414_s4 + $0x8] sm:$0xff] %v265_v28  }
 0x112   :  { %261 = vst [vmem:[%s414_s4] sm:$0xff] %v260_v29  }
 0x113   :  { %236 = vsyncpa [#allocation4], 1 }

// kernel: resnet_forward.81
= control target key start
LH: loop header
LB: loop body
LE: loop exit
PB: predicated region body
PF: predicated region fallthrough
CT: control target
= control target key end

     0   :  { %s690_s15 = smov 0   ;;  %s692_s16 = smov 0   ;;  %s742_s0 = inlined_call_operand.vmem [shape: bf16[8,1152], index: 0, kind: input, shape index: {}]   ;;  %s743_s1 = inlined_call_operand.vmem [shape: bf16[1152,128], index: 1, kind: input, shape index: {}]   ;;  %s744_s2 = inlined_call_operand.vmem [shape: f32[1,128], index: 2, kind: input, shape index: {}]   ;;  %s745_s3 = inlined_call_operand.vmem [shape: f32[1,128], index: 3, kind: input, shape index: {}]   ;;  %s746_s4 = inlined_call_operand.vmem [shape: bf16[8,128], index: 4, kind: output, shape index: {}]  }
   0x1   :  { %s694_s17 = smov 0  }
   0x2 LB: > { %s26_s18 = sadd.s32 1, %s656_s16  ;;  %p555_p0 = scmp.ge.s32.totalorder %s660_s17, 1  ;;  %s660_s17 = sphi %s694_s17, %s14_s17   ;;  %s656_s16 = sphi %s692_s16, %s748_s16   ;;  %s652_s15 = sphi %s690_s15, %s747_s15  }
   0x3   : > { %p27_p1 = scmp.ge.s32.totalorder %s26_s18, 9  ;;  %p220_p2 = scmp.lt.s32.totalorder %s660_s17, 10 }
   0x5   : > { %s750_s18 = smov (%p27_p1, %s26_s18), 0  ;;  %p221_p3 = pnand %p555_p0, %p220_p2 }
   0x6   : > { %p267_p4 = scmp.lt.s32.totalorder (!%p221_p3), %s652_s15, 8  ;;  %s557_s19 = sshll.u32 (!%p221_p3), %s652_s15, 4 }
   0x7   : > { %224 = sbr.rel (%p221_p3) target bundleno = 286 (0x11e), region = 36  ;;  %p274_p5 = scmp.lt.s32.totalorder (!%p221_p3), %s557_s19, 143 }
   0x8   : > { %p559_p6 = scmp.ne.s32.totalorder (!%p221_p3), %s652_s15, 0 }
   0xe   : > { %s268_s20 = scalar_select %p267_p4, %s652_s15, 8 }
   0xf   : > { %s752_s19 = smov (!%p274_p5, %s557_s19), 143  ;;  %299 = sbr.rel (%p559_p6) target bundleno = 22 (0x16), region = 40 }
  0x10   : > { %s556_s21 = sshll.u32 %s268_s20, 2  ;;  %s558_s25 = sshll.u32 %s752_s19, 2  ;;  %v662_v0 = vmov (!%p559_p6), 0.0  }
  0x11   : > { %s716_s24 = scalar_lea.vmem %s742_s0, %s556_s21  ;;  %s280_s28 = scalar_lea.vmem %s743_s1, %s558_s25  ;;  %300 = vst [vmem:[#allocation2] sm:$0xff] (!%p559_p6), %v662_v0 }
  0x16 PF: > { %v630_v1 = vld [vmem:[%s280_s28] sm:$0xff]   ;;  %v663_v2 = vmov 0.0   ;;  %v631_v3 = vld [vmem:[%s280_s28 + $0x8] sm:$0xff]   ;;  %vm664_vm0 = vmmov 0   ;;  %v632_v4 = vld [vmem:[%s280_s28 + $0x10] sm:$0xff]   ;;  %p568_p7 = scmp.ne.s32.totalorder %s652_s15, 8 }
  0x17   : > { %583 = vmatprep.subr.bf16.mxu0 %v663_v2  ;;  %599 = vmatprep.mubr.msk.bf16.mxu0 %vm664_vm0, %v663_v2  ;;  %v633_v5 = vld [vmem:[%s280_s28 + $0x18] sm:$0xff]   ;;  %v634_v6 = vld [vmem:[%s280_s28 + $0x20] sm:$0xff]   ;;  %v635_v7 = vld [vmem:[%s280_s28 + $0x28] sm:$0xff]  }
  0x18   : > { %584 = vmatpush3.bf16.msra.mxu0 %v630_v1  ;;  %v636_v8 = vld [vmem:[%s280_s28 + $0x30] sm:$0xff]   ;;  %v637_v9 = vld [vmem:[%s280_s28 + $0x38] sm:$0xff]   ;;  %v302_v10 = vld [vmem:[%s716_s24] sm:$0xf] }
  0x19   : > { %585 = vmatprep.subr.bf16.mxu0 %v663_v2  ;;  %v301_v11 = vld [vmem:[#allocation2] sm:$0xff] }
  0x1a   : > { %v569_v18 = vld [vmem:[%s744_s2] ss:$0 sm:$0xff] (!%p568_p7) }
  0x1b   : > { %v570_v19 = vld [vmem:[%s745_s3] ss:$0 sm:$0xff] (!%p568_p7) }
  0x1c   : > { %586 = vmatpush3.bf16.msra.mxu0 %v631_v3 }
  0x1d   : > { %587 = vmatprep.subr.bf16.mxu0 %v663_v2 }
  0x20   : > { %588 = vmatpush3.bf16.msra.mxu0 %v632_v4 }
  0x21   : > { %589 = vmatprep.subr.bf16.mxu0 %v663_v2 }
  0x24   : > { %590 = vmatpush3.bf16.msra.mxu0 %v633_v5 }
  0x25   : > { %591 = vmatprep.subr.bf16.mxu0 %v663_v2 }
  0x28   : > { %592 = vmatpush3.bf16.msra.mxu0 %v634_v6 }
  0x29   : > { %593 = vmatprep.subr.bf16.mxu0 %v663_v2 }
  0x2c   : > { %594 = vmatpush3.bf16.msra.mxu0 %v635_v7 }
  0x2d   : > { %595 = vmatprep.subr.bf16.mxu0 %v663_v2 }
  0x30   : > { %596 = vmatpush3.bf16.msra.mxu0 %v636_v8 }
  0x31   : > { %597 = vmatprep.subr.bf16.mxu0 %v663_v2 }
  0x34   : > { %598 = vmatpush3.bf16.msra.mxu0 %v637_v9 }
  0x37   : > { %600 = vmatmul.mubr.bf16.vlgmr.msra.gmra.mrb[0].mxu0 %v302_v10 }
 0x107   : > { %412 = sbr.rel (%p568_p7) target bundleno = 286 (0x11e), region = 44 }
 0x10a   : > { %v401_v12 = vpop.f32.mrb[0].mxu0 }
 0x10b   : > { %v407_v13 = vadd.f32 %v401_v12, %v301_v11  ;;  %v601_v14 = vpop.f32.mrb[1].mxu0 }
 0x10c   : > { %v404_v15 = vpop.f32.mrb[2].mxu0 }
 0x10d   : > { %408 = vst [vmem:[#allocation2] sm:$0xff] %v407_v13  ;;  %v602_v16 = vpop.f32.mrb[3].mxu0 }
 0x114   : > { %v413_v17 = vld [vmem:[#allocation2] sm:$0xff] }
 0x115   : > { %v421_v20 = vmul.f32 %v569_v18, %v413_v17 }
 0x117   : > { %v429_v21 = vadd.f32 %v570_v19, %v421_v20 }
 0x119   : > { %v430_v22 = vmax.f32 %v429_v21, 0.0 }
 0x11b   : > { %v431_v23 = vpack.c.bf16 %v430_v22, %v430_v22 }
 0x11d   : > { %432 = vst [vmem:[%s746_s4] sm:$0xf] %v431_v23 }
 0x11e PF: > { %s14_s17 = sadd.s32 1, %s660_s17   ;;  %s747_s15 = smov %s656_s16 }
 0x11f   : > { %p11_p8 = scmp.ge.s32.totalorder %s14_s17, 11   ;;  %s748_s16 = smov %s750_s18 }
 0x121   :  { %13 = sbr.rel (!%p11_p8) target bundleno = 2 (0x2), region = 83 }

// kernel: resnet_forward.82
= control target key start
LH: loop header
LB: loop body
LE: loop exit
PB: predicated region body
PF: predicated region fallthrough
CT: control target
= control target key end

     0   :  { %9 = vsyncpa [#allocation4], 0  ;;  %s244_s15 = smov [#allocation3]   ;;  %s317_s0 = inlined_call_operand.vmem [shape: bf16[8,128], index: 0, kind: input, shape index: {}]   ;;  %s318_s1 = inlined_call_operand.vmem [shape: bf16[128,128], index: 1, kind: input, shape index: {}]   ;;  %s319_s2 = inlined_call_operand.vmem [shape: f32[1,128], index: 2, kind: input, shape index: {}]   ;;  %s320_s3 = inlined_call_operand.hbm [shape: f32[1,128], index: 3, kind: input, shape index: {}]   ;;  %s321_s4 = inlined_call_operand.vmem [shape: bf16[8,128], index: 4, kind: output, shape index: {}]  }
   0x1   :  { %s22_s16 = sshll.u32 %s244_s15, 4  ;;  %s220_s19 = scalar_lea.hbm %s320_s3, 16  ;;  %s23_s16 = int_to_ptr.vmem [resolvable:$true] %s22_s16 }
   0x2   :  { %p221_p0 = scmp.ne.s32.totalorder %s320_s3, %s220_s19  ;;  %p224_p1 = scmp.lt.u32.totalorder %s220_s19, %s320_s3 }
   0x4   :  { %p226_p2 = pnand %p224_p1, %p221_p0 }
   0x6   :  { %229 = shalt.err (!%p226_p2)
}
   0x7   :  { %s230_s24 = scalar_lea.vmem %s23_s16, 16  ;;  %s234_s25 = scalar_lea.vmem %s23_s16, 32 }
   0x8   :  { %p231_p3 = scmp.ne.s32.totalorder %s23_s16, %s230_s24  ;;  %p235_p4 = scmp.lt.s32.totalorder %s23_s16, %s23_s16 }
   0x9   :  { %p236_p5 = scmp.lt.s32.totalorder %s234_s25, %s230_s24 }
   0xb   :  { %p237_p6 = por %p236_p5, %p235_p4 }
   0xd   :  { %p238_p7 = pnand %p237_p6, %p231_p3 }
   0xf   :  { %241 = shalt.err (!%p238_p7)
}
  0x10   :  { %25 = dma.hbm_to_vmem [thread:$0]  %s320_s3, 16, %s23_s16, [#allocation4]  }
  0x11   :  { %242 = dma.done.wait [#allocation4], 16  }
  0x12   :  { %243 = vsyncadd [#allocation4], 4294967280  ;;  %v245_v0 = vmov 0.0   ;;  %vm246_vm0 = vmmov 0   ;;  %v212_v1 = vld [vmem:[%s318_s1] sm:$0xff]   ;;  %v213_v2 = vld [vmem:[%s318_s1 + $0x8] sm:$0xff]  }
  0x13   :  { %189 = vmatprep.subr.bf16.mxu0 %v245_v0  ;;  %205 = vmatprep.mubr.msk.bf16.mxu0 %vm246_vm0, %v245_v0  ;;  %v214_v3 = vld [vmem:[%s318_s1 + $0x10] sm:$0xff]   ;;  %v215_v4 = vld [vmem:[%s318_s1 + $0x18] sm:$0xff]   ;;  %v216_v5 = vld [vmem:[%s318_s1 + $0x20] sm:$0xff]  }
  0x14   :  { %190 = vmatpush3.bf16.msra.mxu0 %v212_v1  ;;  %v217_v6 = vld [vmem:[%s318_s1 + $0x28] sm:$0xff]   ;;  %v218_v7 = vld [vmem:[%s318_s1 + $0x30] sm:$0xff]   ;;  %v219_v8 = vld [vmem:[%s318_s1 + $0x38] sm:$0xff]  }
  0x15   :  { %191 = vmatprep.subr.bf16.mxu0 %v245_v0  ;;  %v36_v9 = vld [vmem:[%s317_s0] sm:$0xf] }
  0x16   :  { %v178_v10 = vld [vmem:[%s319_s2] ss:$0 sm:$0xff] }
  0x17   :  { %v179_v12 = vld [vmem:[#allocation3] ss:$0 sm:$0xff] }
  0x18   :  { %192 = vmatpush3.bf16.msra.mxu0 %v213_v2 }
  0x19   :  { %193 = vmatprep.subr.bf16.mxu0 %v245_v0 }
  0x1c   :  { %194 = vmatpush3.bf16.msra.mxu0 %v214_v3 }
  0x1d   :  { %195 = vmatprep.subr.bf16.mxu0 %v245_v0 }
  0x20   :  { %196 = vmatpush3.bf16.msra.mxu0 %v215_v4 }
  0x21   :  { %197 = vmatprep.subr.bf16.mxu0 %v245_v0 }
  0x24   :  { %198 = vmatpush3.bf16.msra.mxu0 %v216_v5 }
  0x25   :  { %199 = vmatprep.subr.bf16.mxu0 %v245_v0 }
  0x28   :  { %200 = vmatpush3.bf16.msra.mxu0 %v217_v6 }
  0x29   :  { %201 = vmatprep.subr.bf16.mxu0 %v245_v0 }
  0x2c   :  { %202 = vmatpush3.bf16.msra.mxu0 %v218_v7 }
  0x2d   :  { %203 = vmatprep.subr.bf16.mxu0 %v245_v0 }
  0x30   :  { %204 = vmatpush3.bf16.msra.mxu0 %v219_v8 }
  0x33   :  { %206 = vmatmul.mubr.bf16.vlgmr.msra.gmra.mrb[0].mxu0 %v36_v9 }
 0x106   :  { %v135_v11 = vpop.f32.mrb[0].mxu0 }
 0x107   :  { %v154_v13 = vmul.f32 %v178_v10, %v135_v11  ;;  %v207_v14 = vpop.f32.mrb[1].mxu0 }
 0x108   :  { %v138_v15 = vpop.f32.mrb[2].mxu0 }
 0x109   :  { %v162_v16 = vadd.f32 %v179_v12, %v154_v13  ;;  %v208_v17 = vpop.f32.mrb[3].mxu0 }
 0x10b   :  { %v163_v18 = vpack.c.bf16 %v162_v16, %v162_v16 }
 0x10d   :  { %164 = vst [vmem:[%s321_s4] sm:$0xf] %v163_v18 }
 0x10e   :  { %169 = vsyncpa [#allocation4], 1 }

// kernel: resnet_forward.84
= control target key start
LH: loop header
LB: loop body
LE: loop exit
PB: predicated region body
PF: predicated region fallthrough
CT: control target
= control target key end

     0   :  { %9 = vsyncpa [#allocation4], 0  ;;  %s245_s15 = smov [#allocation3]   ;;  %s318_s0 = inlined_call_operand.vmem [shape: bf16[8,128], index: 0, kind: input, shape index: {}]   ;;  %s319_s1 = inlined_call_operand.vmem [shape: bf16[128,128], index: 1, kind: input, shape index: {}]   ;;  %s320_s2 = inlined_call_operand.vmem [shape: f32[1,128], index: 2, kind: input, shape index: {}]   ;;  %s321_s3 = inlined_call_operand.hbm [shape: f32[1,128], index: 3, kind: input, shape index: {}]   ;;  %s322_s4 = inlined_call_operand.vmem [shape: bf16[8,128], index: 4, kind: output, shape index: {}]  }
   0x1   :  { %s22_s16 = sshll.u32 %s245_s15, 4  ;;  %s221_s19 = scalar_lea.hbm %s321_s3, 16  ;;  %s23_s16 = int_to_ptr.vmem [resolvable:$true] %s22_s16 }
   0x2   :  { %p222_p0 = scmp.ne.s32.totalorder %s321_s3, %s221_s19  ;;  %p225_p1 = scmp.lt.u32.totalorder %s221_s19, %s321_s3 }
   0x4   :  { %p227_p2 = pnand %p225_p1, %p222_p0 }
   0x6   :  { %230 = shalt.err (!%p227_p2)
}
   0x7   :  { %s231_s24 = scalar_lea.vmem %s23_s16, 16  ;;  %s235_s25 = scalar_lea.vmem %s23_s16, 32 }
   0x8   :  { %p232_p3 = scmp.ne.s32.totalorder %s23_s16, %s231_s24  ;;  %p236_p4 = scmp.lt.s32.totalorder %s23_s16, %s23_s16 }
   0x9   :  { %p237_p5 = scmp.lt.s32.totalorder %s235_s25, %s231_s24 }
   0xb   :  { %p238_p6 = por %p237_p5, %p236_p4 }
   0xd   :  { %p239_p7 = pnand %p238_p6, %p232_p3 }
   0xf   :  { %242 = shalt.err (!%p239_p7)
}
  0x10   :  { %25 = dma.hbm_to_vmem [thread:$0]  %s321_s3, 16, %s23_s16, [#allocation4]  }
  0x11   :  { %243 = dma.done.wait [#allocation4], 16  }
  0x12   :  { %244 = vsyncadd [#allocation4], 4294967280  ;;  %v246_v0 = vmov 0.0   ;;  %vm247_vm0 = vmmov 0   ;;  %v213_v1 = vld [vmem:[%s319_s1] sm:$0xff]   ;;  %v214_v2 = vld [vmem:[%s319_s1 + $0x8] sm:$0xff]  }
  0x13   :  { %190 = vmatprep.subr.bf16.mxu0 %v246_v0  ;;  %206 = vmatprep.mubr.msk.bf16.mxu0 %vm247_vm0, %v246_v0  ;;  %v215_v3 = vld [vmem:[%s319_s1 + $0x10] sm:$0xff]   ;;  %v216_v4 = vld [vmem:[%s319_s1 + $0x18] sm:$0xff]   ;;  %v217_v5 = vld [vmem:[%s319_s1 + $0x20] sm:$0xff]  }
  0x14   :  { %191 = vmatpush3.bf16.msra.mxu0 %v213_v1  ;;  %v218_v6 = vld [vmem:[%s319_s1 + $0x28] sm:$0xff]   ;;  %v219_v7 = vld [vmem:[%s319_s1 + $0x30] sm:$0xff]   ;;  %v220_v8 = vld [vmem:[%s319_s1 + $0x38] sm:$0xff]  }
  0x15   :  { %192 = vmatprep.subr.bf16.mxu0 %v246_v0  ;;  %v36_v9 = vld [vmem:[%s318_s0] sm:$0xf] }
  0x16   :  { %v179_v10 = vld [vmem:[%s320_s2] ss:$0 sm:$0xff] }
  0x17   :  { %v180_v12 = vld [vmem:[#allocation3] ss:$0 sm:$0xff] }
  0x18   :  { %193 = vmatpush3.bf16.msra.mxu0 %v214_v2 }
  0x19   :  { %194 = vmatprep.subr.bf16.mxu0 %v246_v0 }
  0x1c   :  { %195 = vmatpush3.bf16.msra.mxu0 %v215_v3 }
  0x1d   :  { %196 = vmatprep.subr.bf16.mxu0 %v246_v0 }
  0x20   :  { %197 = vmatpush3.bf16.msra.mxu0 %v216_v4 }
  0x21   :  { %198 = vmatprep.subr.bf16.mxu0 %v246_v0 }
  0x24   :  { %199 = vmatpush3.bf16.msra.mxu0 %v217_v5 }
  0x25   :  { %200 = vmatprep.subr.bf16.mxu0 %v246_v0 }
  0x28   :  { %201 = vmatpush3.bf16.msra.mxu0 %v218_v6 }
  0x29   :  { %202 = vmatprep.subr.bf16.mxu0 %v246_v0 }
  0x2c   :  { %203 = vmatpush3.bf16.msra.mxu0 %v219_v7 }
  0x2d   :  { %204 = vmatprep.subr.bf16.mxu0 %v246_v0 }
  0x30   :  { %205 = vmatpush3.bf16.msra.mxu0 %v220_v8 }
  0x33   :  { %207 = vmatmul.mubr.bf16.vlgmr.msra.gmra.mrb[0].mxu0 %v36_v9 }
 0x106   :  { %v135_v11 = vpop.f32.mrb[0].mxu0 }
 0x107   :  { %v154_v13 = vmul.f32 %v179_v10, %v135_v11  ;;  %v208_v14 = vpop.f32.mrb[1].mxu0 }
 0x108   :  { %v138_v15 = vpop.f32.mrb[2].mxu0 }
 0x109   :  { %v162_v16 = vadd.f32 %v180_v12, %v154_v13  ;;  %v209_v17 = vpop.f32.mrb[3].mxu0 }
 0x10b   :  { %v163_v18 = vmax.f32 %v162_v16, 0.0 }
 0x10d   :  { %v164_v19 = vpack.c.bf16 %v163_v18, %v163_v18 }
 0x10f   :  { %165 = vst [vmem:[%s322_s4] sm:$0xf] %v164_v19 }
 0x110   :  { %170 = vsyncpa [#allocation4], 1 }

// kernel: resnet_forward.83
= control target key start
LH: loop header
LB: loop body
LE: loop exit
PB: predicated region body
PF: predicated region fallthrough
CT: control target
= control target key end

     0   :  { %v213_v0 = vmov 0.0   ;;  %vm214_vm0 = vmmov 0   ;;  %s284_s1 = inlined_call_operand.vmem [shape: bf16[128,128], index: 1, kind: input, shape index: {}]   ;;  %s285_s0 = inlined_call_operand.vmem [shape: bf16[8,128], index: 0, kind: input, shape index: {}]   ;;  %s286_s2 = inlined_call_operand.vmem [shape: f32[1,128], index: 2, kind: input, shape index: {}]   ;;  %s287_s4 = inlined_call_operand.vmem [shape: bf16[8,128], index: 4, kind: input, shape index: {}]   ;;  %s288_s3 = inlined_call_operand.vmem [shape: f32[1,128], index: 3, kind: input, shape index: {}]   ;;  %s289_s5 = inlined_call_operand.vmem [shape: bf16[8,128], index: 5, kind: output, shape index: {}]  }
   0x1   :  { %183 = vmatprep.subr.bf16.mxu0 %v213_v0  ;;  %v205_v1 = vld [vmem:[%s284_s1] sm:$0xff]   ;;  %199 = vmatprep.mubr.msk.bf16.mxu0 %vm214_vm0, %v213_v0  ;;  %v206_v2 = vld [vmem:[%s284_s1 + $0x8] sm:$0xff]   ;;  %v207_v3 = vld [vmem:[%s284_s1 + $0x10] sm:$0xff]  }
   0x2   :  { %184 = vmatpush3.bf16.msra.mxu0 %v205_v1  ;;  %v208_v4 = vld [vmem:[%s284_s1 + $0x18] sm:$0xff]   ;;  %v209_v5 = vld [vmem:[%s284_s1 + $0x20] sm:$0xff]   ;;  %v210_v6 = vld [vmem:[%s284_s1 + $0x28] sm:$0xff]  }
   0x3   :  { %185 = vmatprep.subr.bf16.mxu0 %v213_v0  ;;  %v211_v7 = vld [vmem:[%s284_s1 + $0x30] sm:$0xff]   ;;  %v212_v8 = vld [vmem:[%s284_s1 + $0x38] sm:$0xff]   ;;  %v27_v9 = vld [vmem:[%s285_s0] sm:$0xf] }
   0x4   :  { %v172_v10 = vld [vmem:[%s286_s2] ss:$0 sm:$0xff] }
   0x5   :  { %v154_v11 = vld [vmem:[%s287_s4] sm:$0xf] }
   0x6   :  { %186 = vmatpush3.bf16.msra.mxu0 %v206_v2  ;;  %v173_v13 = vld [vmem:[%s288_s3] ss:$0 sm:$0xff]  ;;  %v155_v15 = vunpack.c.l.bf16 %v154_v11 }
   0x7   :  { %187 = vmatprep.subr.bf16.mxu0 %v213_v0 }
   0xa   :  { %188 = vmatpush3.bf16.msra.mxu0 %v207_v3 }
   0xb   :  { %189 = vmatprep.subr.bf16.mxu0 %v213_v0 }
   0xe   :  { %190 = vmatpush3.bf16.msra.mxu0 %v208_v4 }
   0xf   :  { %191 = vmatprep.subr.bf16.mxu0 %v213_v0 }
  0x12   :  { %192 = vmatpush3.bf16.msra.mxu0 %v209_v5 }
  0x13   :  { %193 = vmatprep.subr.bf16.mxu0 %v213_v0 }
  0x16   :  { %194 = vmatpush3.bf16.msra.mxu0 %v210_v6 }
  0x17   :  { %195 = vmatprep.subr.bf16.mxu0 %v213_v0 }
  0x1a   :  { %196 = vmatpush3.bf16.msra.mxu0 %v211_v7 }
  0x1b   :  { %197 = vmatprep.subr.bf16.mxu0 %v213_v0 }
  0x1e   :  { %198 = vmatpush3.bf16.msra.mxu0 %v212_v8 }
  0x21   :  { %200 = vmatmul.mubr.bf16.vlgmr.msra.gmra.mrb[0].mxu0 %v27_v9 }
  0xf4   :  { %v126_v12 = vpop.f32.mrb[0].mxu0 }
  0xf5   :  { %v145_v14 = vmul.f32 %v172_v10, %v126_v12  ;;  %v201_v16 = vpop.f32.mrb[1].mxu0 }
  0xf6   :  { %v129_v17 = vpop.f32.mrb[2].mxu0 }
  0xf7   :  { %v153_v18 = vadd.f32 %v173_v13, %v145_v14  ;;  %v202_v19 = vpop.f32.mrb[3].mxu0 }
  0xf9   :  { %v156_v20 = vadd.f32 %v155_v15, %v153_v18 }
  0xfb   :  { %v157_v21 = vmax.f32 %v156_v20, 0.0 }
  0xfd   :  { %v158_v22 = vpack.c.bf16 %v157_v21, %v157_v21 }
  0xff   :  { %159 = vst [vmem:[%s289_s5] sm:$0xf] %v158_v22 }

// kernel: resnet_forward.85
= control target key start
LH: loop header
LB: loop body
LE: loop exit
PB: predicated region body
PF: predicated region fallthrough
CT: control target
= control target key end

     0   :  { %9 = vsyncpa [#allocation4], 0  ;;  %s916_s0 = inlined_call_operand.vmem [shape: bf16[8,1152], index: 0, kind: input, shape index: {}]   ;;  %s917_s1 = inlined_call_operand.vmem [shape: bf16[1152,128], index: 1, kind: input, shape index: {}]   ;;  %s918_s2 = inlined_call_operand.hbm [shape: f32[1,128], index: 2, kind: input, shape index: {}]   ;;  %s919_s3 = inlined_call_operand.hbm [shape: f32[1,128], index: 3, kind: input, shape index: {}]   ;;  %s920_s4 = inlined_call_operand.vmem [shape: bf16[8,128], index: 4, kind: output, shape index: {}]  }
   0x1   :  { %10 = vsyncpa [#allocation6], 0  ;;  %s793_s15 = smov 0   ;;  %s795_s16 = smov 0  }
   0x2   :  { %s797_s17 = smov 0  }
   0x3 LB: > { %s564_s18 = sadd.s32 4294967295, %s761_s17   ;;  %s28_s19 = sadd.s32 1, %s757_s16  ;;  %s761_s17 = sphi %s797_s17, %s16_s17   ;;  %s757_s16 = sphi %s795_s16, %s930_s16   ;;  %s753_s15 = sphi %s793_s15, %s929_s15  }
   0x4   : > { %p29_p0 = scmp.ge.s32.totalorder %s28_s19, 9  ;;  %p565_p1 = scmp.ge.s32.totalorder %s761_s17, 1 }
   0x5   : > { %p176_p2 = scmp.lt.s32.totalorder %s761_s17, 10  ;;  %p818_p4 = scmp.eq.s32.totalorder %s564_s18, 0 }
   0x6   : > { %s932_s19 = smov (%p29_p0, %s28_s19), 0  ;;  %s763_s22 = smov [#allocation3]  }
   0x7   : > { %p814_p3 = pnand %p565_p1, %p176_p2  ;;  %s191_s23 = sshll.u32 %s763_s22, 4  ;;  %s192_s23 = int_to_ptr.vmem [resolvable:$true] %s191_s23 }
   0x8   : > { %s925_s21 = scalar_select %p818_p4, 1, 0 }
   0x9   : > { %s924_s20 = scalar_select %p814_p3, 1, 0 }
   0xa   : > { %p627_p5 = pneg %p814_p3  ;;  %s764_s24 = smov [#allocation5]  }
   0xb   : > { %s204_s25 = sshll.u32 %s764_s24, 4  ;;  %s675_s29 = scalar_lea.hbm %s918_s2, 16  ;;  %s830_s25 = int_to_ptr.vmem [resolvable:$true] %s204_s25 }
   0xc   : > { %p826_p6 = pnand %p818_p4, %p627_p5  ;;  %p676_p7 = scmp.ne.s32.totalorder %s918_s2, %s675_s29 }
   0xd   : > { %p682_p11 = scmp.lt.u32.totalorder %s675_s29, %s918_s2 }
   0xe   : > { %p677_p8 = pneg %p826_p6 }
  0x10   : > { %p678_p9 = pnand %p677_p8, %p676_p7 }
  0x12   : > { %p679_p10 = pneg %p678_p9 }
  0x14   : > { %p684_p12 = pnand %p682_p11, %p679_p10 }
  0x16   : > { %687 = shalt.err (!%p684_p12)
}
  0x17   : > { %s688_s8 = scalar_lea.vmem %s192_s23, 16  ;;  %s695_s9 = scalar_lea.vmem %s192_s23, 32 }
  0x18   : > { %p689_p13 = scmp.ne.s32.totalorder %s192_s23, %s688_s8  ;;  %p696_p2 = scmp.lt.s32.totalorder %s192_s23, %s192_s23 }
  0x19   : > { %p697_p5 = scmp.lt.s32.totalorder %s695_s9, %s688_s8 }
  0x1a   : > { %p691_p0 = pnand %p689_p13, %p677_p8 }
  0x1b   : > { %p698_p4 = por %p697_p5, %p696_p2 }
  0x1c   : > { %p692_p1 = pneg %p691_p0 }
  0x1e   : > { %p699_p3 = pnand %p698_p4, %p692_p1 }
  0x20   : > { %702 = shalt.err (!%p699_p3)
}
  0x21   : > { %630 = dma.hbm_to_vmem [thread:$0]  (!%p826_p6), %s918_s2, 16, %s192_s23, [#allocation4]  }
  0x22   : > { %s703_s14 = scalar_lea.hbm %s919_s3, 16 }
  0x23   : > { %p704_p7 = scmp.ne.s32.totalorder %s919_s3, %s703_s14  ;;  %p710_p3 = scmp.lt.u32.totalorder %s703_s14, %s919_s3 }
  0x25   : > { %p706_p9 = pnand %p704_p7, %p677_p8 }
  0x27   : > { %p707_p4 = pneg %p706_p9 }
  0x29   : > { %p712_p10 = pnand %p710_p3, %p707_p4 }
  0x2b   : > { %715 = shalt.err (!%p712_p10)
}
  0x2c   : > { %s716_s23 = scalar_lea.vmem %s830_s25, 16  ;;  %s723_s28 = scalar_lea.vmem %s830_s25, 32 }
  0x2d   : > { %p717_p11 = scmp.ne.s32.totalorder %s830_s25, %s716_s23  ;;  %p724_p0 = scmp.lt.s32.totalorder %s830_s25, %s830_s25 }
  0x2e   : > { %p725_p1 = scmp.lt.s32.totalorder %s723_s28, %s716_s23 }
  0x2f   : > { %p719_p12 = pnand %p717_p11, %p677_p8 }
  0x30   : > { %p726_p2 = por %p725_p1, %p724_p0 }
  0x31   : > { %p720_p13 = pneg %p719_p12 }
  0x33   : > { %p727_p5 = pnand %p726_p2, %p720_p13 }
  0x35   : > { %730 = shalt.err (!%p727_p5)
}
  0x36   : > { %633 = dma.hbm_to_vmem [thread:$0]  (!%p826_p6), %s919_s3, 16, %s830_s25, [#allocation6]  }
  0x37   : > { %p927_p7 = scmp.ne.s32.totalorder %s924_s20, 0 }
  0x38   : > { %p928_p8 = scmp.ne.s32.totalorder (!%p927_p7), %s925_s21, 0 }
  0x39   : > { %240 = sbr.rel (%p927_p7) target bundleno = 341 (0x155), region = 36 }
  0x40   : > { %744 = dma.done.wait (%p928_p8), [#allocation4], 16  }
  0x41   : > { %746 = vsyncadd (%p928_p8), [#allocation4], 4294967280 }
  0x42   : > { %748 = dma.done.wait (%p928_p8), [#allocation6], 16  }
  0x43   : > { %750 = vsyncadd (%p928_p8), [#allocation6], 4294967280  ;;  %p285_p9 = scmp.lt.s32.totalorder %s753_s15, 8  ;;  %s573_s25 = sshll.u32 %s753_s15, 4 }
  0x44   : > { %p292_p6 = scmp.lt.s32.totalorder %s573_s25, 143  ;;  %p575_p4 = scmp.ne.s32.totalorder %s753_s15, 0 }
  0x45   : > { %s286_s20 = scalar_select %p285_p9, %s753_s15, 8 }
  0x46   : > { %s934_s25 = smov (!%p292_p6, %s573_s25), 143  ;;  %311 = sbr.rel (%p575_p4) target bundleno = 77 (0x4d), region = 48 }
  0x47   : > { %s572_s26 = sshll.u32 %s286_s20, 2  ;;  %s574_s8 = sshll.u32 %s934_s25, 2  ;;  %v765_v0 = vmov (!%p575_p4), 0.0  }
  0x48   : > { %s896_s7 = scalar_lea.vmem %s916_s0, %s572_s26  ;;  %s298_s21 = scalar_lea.vmem %s917_s1, %s574_s8  ;;  %312 = vst [vmem:[#allocation2] sm:$0xff] (!%p575_p4), %v765_v0 }
  0x4d PF: > { %v667_v1 = vld [vmem:[%s298_s21] sm:$0xff]   ;;  %v766_v2 = vmov 0.0   ;;  %v668_v3 = vld [vmem:[%s298_s21 + $0x8] sm:$0xff]   ;;  %vm767_vm0 = vmmov 0   ;;  %v669_v4 = vld [vmem:[%s298_s21 + $0x10] sm:$0xff]   ;;  %p584_p3 = scmp.ne.s32.totalorder %s753_s15, 8 }
  0x4e   : > { %599 = vmatprep.subr.bf16.mxu0 %v766_v2  ;;  %615 = vmatprep.mubr.msk.bf16.mxu0 %vm767_vm0, %v766_v2  ;;  %v670_v5 = vld [vmem:[%s298_s21 + $0x18] sm:$0xff]   ;;  %v671_v6 = vld [vmem:[%s298_s21 + $0x20] sm:$0xff]   ;;  %v672_v7 = vld [vmem:[%s298_s21 + $0x28] sm:$0xff]  }
  0x4f   : > { %600 = vmatpush3.bf16.msra.mxu0 %v667_v1  ;;  %v673_v8 = vld [vmem:[%s298_s21 + $0x30] sm:$0xff]   ;;  %v674_v9 = vld [vmem:[%s298_s21 + $0x38] sm:$0xff]   ;;  %v314_v10 = vld [vmem:[%s896_s7] sm:$0xf] }
  0x50   : > { %601 = vmatprep.subr.bf16.mxu0 %v766_v2  ;;  %v313_v11 = vld [vmem:[#allocation2] sm:$0xff]  ;;  %v585_v18 = vld [vmem:[#allocation3] ss:$0 sm:$0xff] (!%p584_p3)  ;;  %v586_v19 = vld [vmem:[#allocation5] ss:$0 sm:$0xff] (!%p584_p3) }
  0x53   : > { %602 = vmatpush3.bf16.msra.mxu0 %v668_v3 }
  0x54   : > { %603 = vmatprep.subr.bf16.mxu0 %v766_v2 }
  0x57   : > { %604 = vmatpush3.bf16.msra.mxu0 %v669_v4 }
  0x58   : > { %605 = vmatprep.subr.bf16.mxu0 %v766_v2 }
  0x5b   : > { %606 = vmatpush3.bf16.msra.mxu0 %v670_v5 }
  0x5c   : > { %607 = vmatprep.subr.bf16.mxu0 %v766_v2 }
  0x5f   : > { %608 = vmatpush3.bf16.msra.mxu0 %v671_v6 }
  0x60   : > { %609 = vmatprep.subr.bf16.mxu0 %v766_v2 }
  0x63   : > { %610 = vmatpush3.bf16.msra.mxu0 %v672_v7 }
  0x64   : > { %611 = vmatprep.subr.bf16.mxu0 %v766_v2 }
  0x67   : > { %612 = vmatpush3.bf16.msra.mxu0 %v673_v8 }
  0x68   : > { %613 = vmatprep.subr.bf16.mxu0 %v766_v2 }
  0x6b   : > { %614 = vmatpush3.bf16.msra.mxu0 %v674_v9 }
  0x6e   : > { %616 = vmatmul.mubr.bf16.vlgmr.msra.gmra.mrb[0].mxu0 %v314_v10 }
 0x13e   : > { %424 = sbr.rel (%p584_p3) target bundleno = 341 (0x155), region = 52 }
 0x141   : > { %v413_v12 = vpop.f32.mrb[0].mxu0 }
 0x142   : > { %v419_v13 = vadd.f32 %v413_v12, %v313_v11  ;;  %v617_v14 = vpop.f32.mrb[1].mxu0 }
 0x143   : > { %v416_v15 = vpop.f32.mrb[2].mxu0 }
 0x144   : > { %420 = vst [vmem:[#allocation2] sm:$0xff] %v419_v13  ;;  %v618_v16 = vpop.f32.mrb[3].mxu0 }
 0x14b   : > { %v425_v17 = vld [vmem:[#allocation2] sm:$0xff] }
 0x14c   : > { %v433_v20 = vmul.f32 %v585_v18, %v425_v17 }
 0x14e   : > { %v441_v21 = vadd.f32 %v586_v19, %v433_v20 }
 0x150   : > { %v442_v22 = vmax.f32 %v441_v21, 0.0 }
 0x152   : > { %v443_v23 = vpack.c.bf16 %v442_v22, %v442_v22 }
 0x154   : > { %444 = vst [vmem:[%s920_s4] sm:$0xf] %v443_v23 }
 0x155 PF: > { %s16_s17 = sadd.s32 1, %s761_s17   ;;  %s929_s15 = smov %s757_s16 }
 0x156   : > { %p13_p10 = scmp.ge.s32.totalorder %s16_s17, 11   ;;  %s930_s16 = smov %s932_s19 }
 0x158   :  { %15 = sbr.rel (!%p13_p10) target bundleno = 3 (0x3), region = 88 }
 0x15f   :  { %470 = vsyncpa [#allocation4], 1 }
 0x160   :  { %472 = vsyncpa [#allocation4 + $0x1], 1 }
 0x161   :  { %473 = vsyncpa [#allocation6], 1 }

// kernel: resnet_forward.86
= control target key start
LH: loop header
LB: loop body
LE: loop exit
PB: predicated region body
PF: predicated region fallthrough
CT: control target
= control target key end

     0   :  { %10 = vsyncpa [#allocation4], 0  ;;  %s380_s0 = inlined_call_operand.vmem [shape: bf16[8,128], index: 0, kind: input, shape index: {}]   ;;  %s381_s1 = inlined_call_operand.vmem [shape: bf16[128,128], index: 1, kind: input, shape index: {}]   ;;  %s382_s2 = inlined_call_operand.hbm [shape: f32[1,128], index: 2, kind: input, shape index: {}]   ;;  %s383_s3 = inlined_call_operand.hbm [shape: f32[1,128], index: 3, kind: input, shape index: {}]   ;;  %s384_s4 = inlined_call_operand.vmem [shape: bf16[8,128], index: 4, kind: input, shape index: {}]   ;;  %s385_s5 = inlined_call_operand.vmem [shape: bf16[8,128], index: 5, kind: output, shape index: {}]  }
   0x1   :  { %11 = vsyncpa [#allocation6], 0  ;;  %s289_s18 = smov [#allocation3]   ;;  %s290_s20 = smov [#allocation5]  }
   0x2   :  { %s22_s19 = sshll.u32 %s289_s18, 4  ;;  %s32_s21 = sshll.u32 %s290_s20, 4  ;;  %s23_s19 = int_to_ptr.vmem [resolvable:$true] %s22_s19  ;;  %s33_s21 = int_to_ptr.vmem [resolvable:$true] %s32_s21 }
   0x3   :  { %s241_s24 = scalar_lea.hbm %s382_s2, 16 }
   0x4   :  { %p242_p0 = scmp.ne.s32.totalorder %s382_s2, %s241_s24  ;;  %p245_p1 = scmp.lt.u32.totalorder %s241_s24, %s382_s2 }
   0x6   :  { %p247_p2 = pnand %p245_p1, %p242_p0 }
   0x8   :  { %250 = shalt.err (!%p247_p2)
}
   0x9   :  { %s251_s29 = scalar_lea.vmem %s23_s19, 16  ;;  %s255_s30 = scalar_lea.vmem %s23_s19, 32 }
   0xa   :  { %p252_p3 = scmp.ne.s32.totalorder %s23_s19, %s251_s29  ;;  %p256_p4 = scmp.lt.s32.totalorder %s23_s19, %s23_s19 }
   0xb   :  { %p257_p5 = scmp.lt.s32.totalorder %s255_s30, %s251_s29 }
   0xd   :  { %p258_p6 = por %p257_p5, %p256_p4 }
   0xf   :  { %p259_p7 = pnand %p258_p6, %p252_p3 }
  0x11   :  { %262 = shalt.err (!%p259_p7)
}
  0x12   :  { %25 = dma.hbm_to_vmem [thread:$0]  %s382_s2, 16, %s23_s19, [#allocation4]  }
  0x13   :  { %s263_s10 = scalar_lea.hbm %s383_s3, 16 }
  0x14   :  { %p264_p8 = scmp.ne.s32.totalorder %s383_s3, %s263_s10  ;;  %p267_p9 = scmp.lt.u32.totalorder %s263_s10, %s383_s3 }
  0x16   :  { %p269_p10 = pnand %p267_p9, %p264_p8 }
  0x18   :  { %272 = shalt.err (!%p269_p10)
}
  0x19   :  { %s273_s15 = scalar_lea.vmem %s33_s21, 16  ;;  %s277_s16 = scalar_lea.vmem %s33_s21, 32 }
  0x1a   :  { %p274_p11 = scmp.ne.s32.totalorder %s33_s21, %s273_s15  ;;  %p278_p12 = scmp.lt.s32.totalorder %s33_s21, %s33_s21 }
  0x1b   :  { %p279_p13 = scmp.lt.s32.totalorder %s277_s16, %s273_s15 }
  0x1d   :  { %p280_p0 = por %p279_p13, %p278_p12 }
  0x1f   :  { %p281_p1 = pnand %p280_p0, %p274_p11 }
  0x21   :  { %284 = shalt.err (!%p281_p1)
}
  0x22   :  { %35 = dma.hbm_to_vmem [thread:$0]  %s383_s3, 16, %s33_s21, [#allocation6]  }
  0x23   :  { %285 = dma.done.wait [#allocation4], 16  }
  0x24   :  { %286 = vsyncadd [#allocation4], 4294967280 }
  0x25   :  { %287 = dma.done.wait [#allocation6], 16  }
  0x26   :  { %288 = vsyncadd [#allocation6], 4294967280  ;;  %v291_v0 = vmov 0.0   ;;  %vm292_vm0 = vmmov 0   ;;  %v233_v1 = vld [vmem:[%s381_s1] sm:$0xff]   ;;  %v234_v2 = vld [vmem:[%s381_s1 + $0x8] sm:$0xff]  }
  0x27   :  { %209 = vmatprep.subr.bf16.mxu0 %v291_v0  ;;  %225 = vmatprep.mubr.msk.bf16.mxu0 %vm292_vm0, %v291_v0  ;;  %v235_v3 = vld [vmem:[%s381_s1 + $0x10] sm:$0xff]   ;;  %v236_v4 = vld [vmem:[%s381_s1 + $0x18] sm:$0xff]   ;;  %v237_v5 = vld [vmem:[%s381_s1 + $0x20] sm:$0xff]  }
  0x28   :  { %210 = vmatpush3.bf16.msra.mxu0 %v233_v1  ;;  %v238_v6 = vld [vmem:[%s381_s1 + $0x28] sm:$0xff]   ;;  %v239_v7 = vld [vmem:[%s381_s1 + $0x30] sm:$0xff]   ;;  %v240_v8 = vld [vmem:[%s381_s1 + $0x38] sm:$0xff]  }
  0x29   :  { %211 = vmatprep.subr.bf16.mxu0 %v291_v0  ;;  %v51_v9 = vld [vmem:[%s380_s0] sm:$0xf] }
  0x2a   :  { %v198_v10 = vld [vmem:[#allocation3] ss:$0 sm:$0xff]  ;;  %v199_v13 = vld [vmem:[#allocation5] ss:$0 sm:$0xff] }
  0x2b   :  { %v178_v11 = vld [vmem:[%s384_s4] sm:$0xf] }
  0x2c   :  { %212 = vmatpush3.bf16.msra.mxu0 %v234_v2  ;;  %v179_v15 = vunpack.c.l.bf16 %v178_v11 }
  0x2d   :  { %213 = vmatprep.subr.bf16.mxu0 %v291_v0 }
  0x30   :  { %214 = vmatpush3.bf16.msra.mxu0 %v235_v3 }
  0x31   :  { %215 = vmatprep.subr.bf16.mxu0 %v291_v0 }
  0x34   :  { %216 = vmatpush3.bf16.msra.mxu0 %v236_v4 }
  0x35   :  { %217 = vmatprep.subr.bf16.mxu0 %v291_v0 }
  0x38   :  { %218 = vmatpush3.bf16.msra.mxu0 %v237_v5 }
  0x39   :  { %219 = vmatprep.subr.bf16.mxu0 %v291_v0 }
  0x3c   :  { %220 = vmatpush3.bf16.msra.mxu0 %v238_v6 }
  0x3d   :  { %221 = vmatprep.subr.bf16.mxu0 %v291_v0 }
  0x40   :  { %222 = vmatpush3.bf16.msra.mxu0 %v239_v7 }
  0x41   :  { %223 = vmatprep.subr.bf16.mxu0 %v291_v0 }
  0x44   :  { %224 = vmatpush3.bf16.msra.mxu0 %v240_v8 }
  0x47   :  { %226 = vmatmul.mubr.bf16.vlgmr.msra.gmra.mrb[0].mxu0 %v51_v9 }
 0x11a   :  { %v150_v12 = vpop.f32.mrb[0].mxu0 }
 0x11b   :  { %v169_v14 = vmul.f32 %v198_v10, %v150_v12  ;;  %v227_v16 = vpop.f32.mrb[1].mxu0 }
 0x11c   :  { %v153_v17 = vpop.f32.mrb[2].mxu0 }
 0x11d   :  { %v177_v18 = vadd.f32 %v199_v13, %v169_v14  ;;  %v228_v19 = vpop.f32.mrb[3].mxu0 }
 0x11f   :  { %v180_v20 = vadd.f32 %v179_v15, %v177_v18 }
 0x121   :  { %v181_v21 = vmax.f32 %v180_v20, 0.0 }
 0x123   :  { %v182_v22 = vpack.c.bf16 %v181_v21, %v181_v21 }
 0x125   :  { %183 = vst [vmem:[%s385_s5] sm:$0xf] %v182_v22 }
 0x126   :  { %188 = vsyncpa [#allocation4], 1 }
 0x127   :  { %189 = vsyncpa [#allocation6], 1 }

// kernel: resnet_forward.87
= control target key start
LH: loop header
LB: loop body
LE: loop exit
PB: predicated region body
PF: predicated region fallthrough
CT: control target
= control target key end

     0   :  { %9 = vsyncpa [#allocation4], 0  ;;  %s366_s0 = inlined_call_operand.vmem [shape: bf16[8,128], index: 0, kind: input, shape index: {}]   ;;  %s367_s1 = inlined_call_operand.vmem [shape: bf16[128,128], index: 1, kind: input, shape index: {}]   ;;  %s368_s2 = inlined_call_operand.hbm [shape: f32[1,128], index: 2, kind: input, shape index: {}]   ;;  %s369_s3 = inlined_call_operand.hbm [shape: f32[1,128], index: 3, kind: input, shape index: {}]   ;;  %s370_s4 = inlined_call_operand.vmem [shape: bf16[8,128], index: 4, kind: output, shape index: {}]  }
   0x1   :  { %10 = vsyncpa [#allocation6], 0  ;;  %s283_s15 = smov [#allocation3]   ;;  %s284_s17 = smov [#allocation5]  }
   0x2   :  { %s21_s16 = sshll.u32 %s283_s15, 4  ;;  %s31_s18 = sshll.u32 %s284_s17, 4  ;;  %s22_s16 = int_to_ptr.vmem [resolvable:$true] %s21_s16  ;;  %s32_s18 = int_to_ptr.vmem [resolvable:$true] %s31_s18 }
   0x3   :  { %s235_s21 = scalar_lea.hbm %s368_s2, 16 }
   0x4   :  { %p236_p0 = scmp.ne.s32.totalorder %s368_s2, %s235_s21  ;;  %p239_p1 = scmp.lt.u32.totalorder %s235_s21, %s368_s2 }
   0x6   :  { %p241_p2 = pnand %p239_p1, %p236_p0 }
   0x8   :  { %244 = shalt.err (!%p241_p2)
}
   0x9   :  { %s245_s26 = scalar_lea.vmem %s22_s16, 16  ;;  %s249_s27 = scalar_lea.vmem %s22_s16, 32 }
   0xa   :  { %p246_p3 = scmp.ne.s32.totalorder %s22_s16, %s245_s26  ;;  %p250_p4 = scmp.lt.s32.totalorder %s22_s16, %s22_s16 }
   0xb   :  { %p251_p5 = scmp.lt.s32.totalorder %s249_s27, %s245_s26 }
   0xd   :  { %p252_p6 = por %p251_p5, %p250_p4 }
   0xf   :  { %p253_p7 = pnand %p252_p6, %p246_p3 }
  0x11   :  { %256 = shalt.err (!%p253_p7)
}
  0x12   :  { %24 = dma.hbm_to_vmem [thread:$0]  %s368_s2, 16, %s22_s16, [#allocation4]  }
  0x13   :  { %s257_s6 = scalar_lea.hbm %s369_s3, 16 }
  0x14   :  { %p258_p8 = scmp.ne.s32.totalorder %s369_s3, %s257_s6  ;;  %p261_p9 = scmp.lt.u32.totalorder %s257_s6, %s369_s3 }
  0x16   :  { %p263_p10 = pnand %p261_p9, %p258_p8 }
  0x18   :  { %266 = shalt.err (!%p263_p10)
}
  0x19   :  { %s267_s11 = scalar_lea.vmem %s32_s18, 16  ;;  %s271_s12 = scalar_lea.vmem %s32_s18, 32 }
  0x1a   :  { %p268_p11 = scmp.ne.s32.totalorder %s32_s18, %s267_s11  ;;  %p272_p12 = scmp.lt.s32.totalorder %s32_s18, %s32_s18 }
  0x1b   :  { %p273_p13 = scmp.lt.s32.totalorder %s271_s12, %s267_s11 }
  0x1d   :  { %p274_p0 = por %p273_p13, %p272_p12 }
  0x1f   :  { %p275_p1 = pnand %p274_p0, %p268_p11 }
  0x21   :  { %278 = shalt.err (!%p275_p1)
}
  0x22   :  { %34 = dma.hbm_to_vmem [thread:$0]  %s369_s3, 16, %s32_s18, [#allocation6]  }
  0x23   :  { %279 = dma.done.wait [#allocation4], 16  }
  0x24   :  { %280 = vsyncadd [#allocation4], 4294967280 }
  0x25   :  { %281 = dma.done.wait [#allocation6], 16  }
  0x26   :  { %282 = vsyncadd [#allocation6], 4294967280  ;;  %v285_v0 = vmov 0.0   ;;  %vm286_vm0 = vmmov 0   ;;  %v227_v1 = vld [vmem:[%s367_s1] sm:$0xff]   ;;  %v228_v2 = vld [vmem:[%s367_s1 + $0x8] sm:$0xff]  }
  0x27   :  { %203 = vmatprep.subr.bf16.mxu0 %v285_v0  ;;  %219 = vmatprep.mubr.msk.bf16.mxu0 %vm286_vm0, %v285_v0  ;;  %v229_v3 = vld [vmem:[%s367_s1 + $0x10] sm:$0xff]   ;;  %v230_v4 = vld [vmem:[%s367_s1 + $0x18] sm:$0xff]   ;;  %v231_v5 = vld [vmem:[%s367_s1 + $0x20] sm:$0xff]  }
  0x28   :  { %204 = vmatpush3.bf16.msra.mxu0 %v227_v1  ;;  %v232_v6 = vld [vmem:[%s367_s1 + $0x28] sm:$0xff]   ;;  %v233_v7 = vld [vmem:[%s367_s1 + $0x30] sm:$0xff]   ;;  %v234_v8 = vld [vmem:[%s367_s1 + $0x38] sm:$0xff]  }
  0x29   :  { %205 = vmatprep.subr.bf16.mxu0 %v285_v0  ;;  %v48_v9 = vld [vmem:[%s366_s0] sm:$0xf] }
  0x2a   :  { %v192_v10 = vld [vmem:[#allocation3] ss:$0 sm:$0xff]  ;;  %v193_v12 = vld [vmem:[#allocation5] ss:$0 sm:$0xff] }
  0x2c   :  { %206 = vmatpush3.bf16.msra.mxu0 %v228_v2 }
  0x2d   :  { %207 = vmatprep.subr.bf16.mxu0 %v285_v0 }
  0x30   :  { %208 = vmatpush3.bf16.msra.mxu0 %v229_v3 }
  0x31   :  { %209 = vmatprep.subr.bf16.mxu0 %v285_v0 }
  0x34   :  { %210 = vmatpush3.bf16.msra.mxu0 %v230_v4 }
  0x35   :  { %211 = vmatprep.subr.bf16.mxu0 %v285_v0 }
  0x38   :  { %212 = vmatpush3.bf16.msra.mxu0 %v231_v5 }
  0x39   :  { %213 = vmatprep.subr.bf16.mxu0 %v285_v0 }
  0x3c   :  { %214 = vmatpush3.bf16.msra.mxu0 %v232_v6 }
  0x3d   :  { %215 = vmatprep.subr.bf16.mxu0 %v285_v0 }
  0x40   :  { %216 = vmatpush3.bf16.msra.mxu0 %v233_v7 }
  0x41   :  { %217 = vmatprep.subr.bf16.mxu0 %v285_v0 }
  0x44   :  { %218 = vmatpush3.bf16.msra.mxu0 %v234_v8 }
  0x47   :  { %220 = vmatmul.mubr.bf16.vlgmr.msra.gmra.mrb[0].mxu0 %v48_v9 }
 0x11a   :  { %v147_v11 = vpop.f32.mrb[0].mxu0 }
 0x11b   :  { %v166_v13 = vmul.f32 %v192_v10, %v147_v11  ;;  %v221_v14 = vpop.f32.mrb[1].mxu0 }
 0x11c   :  { %v150_v15 = vpop.f32.mrb[2].mxu0 }
 0x11d   :  { %v174_v16 = vadd.f32 %v193_v12, %v166_v13  ;;  %v222_v17 = vpop.f32.mrb[3].mxu0 }
 0x11f   :  { %v175_v18 = vmax.f32 %v174_v16, 0.0 }
 0x121   :  { %v176_v19 = vpack.c.bf16 %v175_v18, %v175_v18 }
 0x123   :  { %177 = vst [vmem:[%s370_s4] sm:$0xf] %v176_v19 }
 0x124   :  { %182 = vsyncpa [#allocation4], 1 }
 0x125   :  { %183 = vsyncpa [#allocation6], 1 }

// kernel: resnet_forward.101
= control target key start
LH: loop header
LB: loop body
LE: loop exit
PB: predicated region body
PF: predicated region fallthrough
CT: control target
= control target key end

     0   :  { %s817_s15 = smov 0   ;;  %s819_s16 = smov 0   ;;  %s910_s0 = inlined_call_operand.vmem [shape: bf16[8,128], index: 0, kind: input, shape index: {}]   ;;  %s911_s1 = inlined_call_operand.vmem [shape: bf16[128,256], index: 1, kind: input, shape index: {}]   ;;  %s912_s2 = inlined_call_operand.vmem [shape: f32[1,256], index: 2, kind: input, shape index: {}]   ;;  %s913_s3 = inlined_call_operand.vmem [shape: f32[1,256], index: 3, kind: input, shape index: {}]   ;;  %s914_s4 = inlined_call_operand.vmem [shape: bf16[8,256], index: 4, kind: output, shape index: {}]  }
   0x1   :  { %s821_s17 = smov 0   ;;  %s823_s18 = smov 0  }
   0x2   :  { %s825_s19 = smov 0  }
   0x3 LB: > { %s29_s20 = sadd.s32 1, %s784_s18  ;;  %p77_p1 = scmp.ne.s32.totalorder %s776_s16, %s772_s15  ;;  %s788_s19 = sphi %s825_s19, %s14_s19   ;;  %s784_s18 = sphi %s823_s18, %s918_s18   ;;  %s780_s17 = sphi %s821_s17, %s917_s17   ;;  %s776_s16 = sphi %s819_s16, %s916_s16   ;;  %s772_s15 = sphi %s817_s15, %s915_s15  }
   0x4   : > { %p31_p0 = scmp.ge.s32.totalorder %s29_s20, 2  ;;  %p78_p2 = scmp.eq.s32.totalorder %s788_s19, 0 }
   0x5   : > { %s70_s22 = sadd.s32 1, %s776_s16  ;;  %p653_p5 = scmp.ge.s32.totalorder %s788_s19, 2 }
   0x6   : > { %s920_s20 = smov (%p31_p0, %s29_s20), 0  ;;  %p79_p3 = por %p78_p2, %p77_p1 }
   0x7   : > { %s66_s21 = ssub.s32 %s784_s18, %s920_s20  ;;  %193 = sbr.rel (%p653_p5) target bundleno = 28 (0x1c), region = 20 }
   0x8   : > { %p68_p4 = scmp.eq.s32.totalorder %s66_s21, 0 }
   0xa   : > { %s852_s23 = scalar_select %p68_p4, %s776_s16, %s70_s22  }
   0xe   : > { %196 = sbr.rel (!%p79_p3) target bundleno = 28 (0x1c), region = 24  ;;  %s198_s24 = sand.u32 (%p79_p3), 1, %s776_s16  }
   0xf   : > { %s655_s25 = sshll.u32 (%p79_p3), %s784_s18, 2  ;;  %s654_s26 = sshll.u32 (%p79_p3), %s198_s24, 6 }
  0x10   : > { %s860_s29 = scalar_lea.vmem (%p79_p3), %s911_s1, %s655_s25  ;;  %s200_s30 = scalar_lea.vmem (%p79_p3), [#allocation3], %s654_s26 }
  0x11   : > { %v221_v0 = vld [vmem:[%s860_s29] sm:$0xf] (%p79_p3)  ;;  %v223_v1 = vld [vmem:[%s860_s29 + $0x8] sm:$0xf] (%p79_p3)  ;;  %v225_v2 = vld [vmem:[%s860_s29 + $0x10] sm:$0xf] (%p79_p3) }
  0x12   : > { %222 = vst [vmem:[%s200_s30] sm:$0xf] (%p79_p3), %v221_v0  ;;  %224 = vst [vmem:[%s200_s30 + $0x4] sm:$0xf] (%p79_p3), %v223_v1  ;;  %v227_v3 = vld [vmem:[%s860_s29 + $0x18] sm:$0xf] (%p79_p3) }
  0x13   : > { %v229_v4 = vld [vmem:[%s860_s29 + $0x20] sm:$0xf] (%p79_p3)  ;;  %226 = vst [vmem:[%s200_s30 + $0x8] sm:$0xf] (%p79_p3), %v225_v2  ;;  %228 = vst [vmem:[%s200_s30 + $0xc] sm:$0xf] (%p79_p3), %v227_v3 }
  0x14   : > { %230 = vst [vmem:[%s200_s30 + $0x10] sm:$0xf] (%p79_p3), %v229_v4  ;;  %v231_v5 = vld [vmem:[%s860_s29 + $0x28] sm:$0xf] (%p79_p3)  ;;  %v233_v6 = vld [vmem:[%s860_s29 + $0x30] sm:$0xf] (%p79_p3) }
  0x15   : > { %v235_v7 = vld [vmem:[%s860_s29 + $0x38] sm:$0xf]  ;;  %232 = vst [vmem:[%s200_s30 + $0x14] sm:$0xf] %v231_v5  ;;  %234 = vst [vmem:[%s200_s30 + $0x18] sm:$0xf] %v233_v6 }
  0x16   : > { %236 = vst [vmem:[%s200_s30 + $0x1c] sm:$0xf] %v235_v7  ;;  %v237_v8 = vld [vmem:[%s860_s29 + $0x40] sm:$0xf]  ;;  %v239_v9 = vld [vmem:[%s860_s29 + $0x48] sm:$0xf] }
  0x17   : > { %v241_v10 = vld [vmem:[%s860_s29 + $0x50] sm:$0xf]  ;;  %238 = vst [vmem:[%s200_s30 + $0x20] sm:$0xf] %v237_v8  ;;  %240 = vst [vmem:[%s200_s30 + $0x24] sm:$0xf] %v239_v9 }
  0x18   : > { %242 = vst [vmem:[%s200_s30 + $0x28] sm:$0xf] %v241_v10  ;;  %v243_v11 = vld [vmem:[%s860_s29 + $0x58] sm:$0xf]  ;;  %v245_v12 = vld [vmem:[%s860_s29 + $0x60] sm:$0xf] }
  0x19   : > { %v247_v13 = vld [vmem:[%s860_s29 + $0x68] sm:$0xf]  ;;  %244 = vst [vmem:[%s200_s30 + $0x2c] sm:$0xf] %v243_v11  ;;  %246 = vst [vmem:[%s200_s30 + $0x30] sm:$0xf] %v245_v12 }
  0x1a   : > { %248 = vst [vmem:[%s200_s30 + $0x34] sm:$0xf] %v247_v13  ;;  %v249_v14 = vld [vmem:[%s860_s29 + $0x70] sm:$0xf]  ;;  %v251_v15 = vld [vmem:[%s860_s29 + $0x78] sm:$0xf] }
  0x1b   : > { %250 = vst [vmem:[%s200_s30 + $0x38] sm:$0xf] %v249_v14  ;;  %252 = vst [vmem:[%s200_s30 + $0x3c] sm:$0xf] %v251_v15 }
  0x1c PF: > { %p656_p6 = scmp.ge.s32.totalorder %s788_s19, 1  ;;  %p318_p7 = scmp.lt.s32.totalorder %s788_s19, 3 }
  0x1e   : > { %p319_p8 = pnand %p656_p6, %p318_p7 }
  0x1f   : > { %s325_s5 = sand.u32 (!%p319_p8), 1, %s772_s15   ;;  %v790_v16 = vmov (!%p319_p8), 0.0   ;;  %vm791_vm0 = vmmov (!%p319_p8), 0   ;;  %v395_v25 = vld [vmem:[%s910_s0] sm:$0xf] (!%p319_p8)  ;;  %p374_p9 = scmp.lt.s32.totalorder (!%p319_p8), %s780_s17, 1 }
  0x20   : > { %322 = sbr.rel (%p319_p8) target bundleno = 285 (0x11d), region = 73  ;;  %680 = vmatprep.subr.bf16.mxu0 (!%p319_p8), %v790_v16  ;;  %s657_s6 = sshll.u32 (!%p319_p8), %s325_s5, 6  ;;  %696 = vmatprep.mubr.msk.bf16.mxu0 (!%p319_p8), %vm791_vm0, %v790_v16 }
  0x21   : > { %s327_s7 = scalar_lea.vmem (!%p319_p8), [#allocation3], %s657_s6 }
  0x22   : > { %v742_v17 = vld [vmem:[%s327_s7] sm:$0xff] (!%p319_p8)   ;;  %v743_v18 = vld [vmem:[%s327_s7 + $0x8] sm:$0xff] (!%p319_p8)   ;;  %v744_v19 = vld [vmem:[%s327_s7 + $0x10] sm:$0xff] (!%p319_p8)  }
  0x23   : > { %681 = vmatpush3.bf16.msra.mxu0 (!%p319_p8), %v742_v17  ;;  %v745_v20 = vld [vmem:[%s327_s7 + $0x18] sm:$0xff] (!%p319_p8)   ;;  %v746_v21 = vld [vmem:[%s327_s7 + $0x20] sm:$0xff] (!%p319_p8)   ;;  %v747_v22 = vld [vmem:[%s327_s7 + $0x28] sm:$0xff] (!%p319_p8)  }
  0x24   : > { %682 = vmatprep.subr.bf16.mxu0 (!%p319_p8), %v790_v16  ;;  %v748_v23 = vld [vmem:[%s327_s7 + $0x30] sm:$0xff] (!%p319_p8)   ;;  %v749_v24 = vld [vmem:[%s327_s7 + $0x38] sm:$0xff] (!%p319_p8)  }
  0x27   : > { %683 = vmatpush3.bf16.msra.mxu0 %v743_v18  ;;  %s922_s17 = smov (!%p374_p9, %s780_s17), 1 }
  0x28   : > { %684 = vmatprep.subr.bf16.mxu0 %v790_v16  ;;  %s376_s12 = scalar_lea.vmem %s912_s2, %s922_s17  ;;  %s379_s15 = scalar_lea.vmem %s913_s3, %s922_s17 }
  0x29   : > { %v667_v26 = vld [vmem:[%s376_s12] ss:$0 sm:$0xff]  ;;  %s658_s21 = sshll.u32 %s922_s17, 2 }
  0x2a   : > { %v668_v28 = vld [vmem:[%s379_s15] ss:$0 sm:$0xff]  ;;  %s387_s25 = scalar_lea.vmem %s914_s4, %s658_s21 }
  0x2b   : > { %685 = vmatpush3.bf16.msra.mxu0 %v744_v19 }
  0x2c   : > { %686 = vmatprep.subr.bf16.mxu0 %v790_v16 }
  0x2f   : > { %687 = vmatpush3.bf16.msra.mxu0 %v745_v20 }
  0x30   : > { %688 = vmatprep.subr.bf16.mxu0 %v790_v16 }
  0x33   : > { %689 = vmatpush3.bf16.msra.mxu0 %v746_v21 }
  0x34   : > { %690 = vmatprep.subr.bf16.mxu0 %v790_v16 }
  0x37   : > { %691 = vmatpush3.bf16.msra.mxu0 %v747_v22 }
  0x38   : > { %692 = vmatprep.subr.bf16.mxu0 %v790_v16 }
  0x3b   : > { %693 = vmatpush3.bf16.msra.mxu0 %v748_v23 }
  0x3c   : > { %694 = vmatprep.subr.bf16.mxu0 %v790_v16 }
  0x3f   : > { %695 = vmatpush3.bf16.msra.mxu0 %v749_v24 }
  0x42   : > { %697 = vmatmul.mubr.bf16.vlgmr.msra.gmra.mrb[0].mxu0 %v395_v25 }
 0x115   : > { %v494_v27 = vpop.f32.mrb[0].mxu0 }
 0x116   : > { %v513_v29 = vmul.f32 %v667_v26, %v494_v27  ;;  %v698_v30 = vpop.f32.mrb[1].mxu0 }
 0x117   : > { %v497_v31 = vpop.f32.mrb[2].mxu0 }
 0x118   : > { %v521_v32 = vadd.f32 %v668_v28, %v513_v29  ;;  %v699_v33 = vpop.f32.mrb[3].mxu0 }
 0x11a   : > { %v522_v34 = vpack.c.bf16 %v521_v32, %v521_v32 }
 0x11c   : > { %523 = vst [vmem:[%s387_s25] sm:$0xf] %v522_v34 }
 0x11d PF: > { %s14_s19 = sadd.s32 1, %s788_s19   ;;  %s915_s15 = smov %s776_s16 }
 0x11e   : > { %p11_p10 = scmp.ge.s32.totalorder %s14_s19, 4   ;;  %s916_s16 = smov %s852_s23 }
 0x11f   : > { %s917_s17 = smov %s784_s18  ;;  %s918_s18 = smov %s920_s20 }
 0x120   :  { %13 = sbr.rel (!%p11_p10) target bundleno = 3 (0x3), region = 129 }

// kernel: resnet_forward.102
= control target key start
LH: loop header
LB: loop body
LE: loop exit
PB: predicated region body
PF: predicated region fallthrough
CT: control target
= control target key end

     0   :  { %s903_s18 = smov 0   ;;  %s905_s19 = smov 0   ;;  %s999_s0 = inlined_call_operand.vmem [shape: bf16[8,128], index: 0, kind: input, shape index: {}]   ;;  %s1000_s1 = inlined_call_operand.vmem [shape: bf16[128,256], index: 1, kind: input, shape index: {}]   ;;  %s1001_s2 = inlined_call_operand.vmem [shape: f32[1,256], index: 2, kind: input, shape index: {}]   ;;  %s1002_s3 = inlined_call_operand.vmem [shape: f32[1,256], index: 3, kind: input, shape index: {}]   ;;  %s1003_s4 = inlined_call_operand.vmem [shape: bf16[8,256], index: 4, kind: input, shape index: {}]   ;;  %s1004_s5 = inlined_call_operand.vmem [shape: bf16[8,256], index: 5, kind: output, shape index: {}]  }
   0x1   :  { %s907_s20 = smov 0   ;;  %s909_s21 = smov 0  }
   0x2   :  { %s911_s22 = smov 0  }
   0x3 LB: > { %s30_s23 = sadd.s32 1, %s865_s21  ;;  %p78_p1 = scmp.ne.s32.totalorder %s857_s19, %s853_s18  ;;  %s869_s22 = sphi %s911_s22, %s15_s22   ;;  %s865_s21 = sphi %s909_s21, %s1008_s21   ;;  %s861_s20 = sphi %s907_s20, %s1007_s20   ;;  %s857_s19 = sphi %s905_s19, %s1006_s19   ;;  %s853_s18 = sphi %s903_s18, %s1005_s18  }
   0x4   : > { %p32_p0 = scmp.ge.s32.totalorder %s30_s23, 2  ;;  %p79_p2 = scmp.eq.s32.totalorder %s869_s22, 0 }
   0x5   : > { %s71_s25 = sadd.s32 1, %s857_s19  ;;  %p733_p5 = scmp.ge.s32.totalorder %s869_s22, 2 }
   0x6   : > { %s1010_s23 = smov (%p32_p0, %s30_s23), 0  ;;  %p80_p3 = por %p79_p2, %p78_p1 }
   0x7   : > { %s67_s24 = ssub.s32 %s865_s21, %s1010_s23  ;;  %222 = sbr.rel (%p733_p5) target bundleno = 28 (0x1c), region = 20 }
   0x8   : > { %p69_p4 = scmp.eq.s32.totalorder %s67_s24, 0 }
   0xa   : > { %s938_s26 = scalar_select %p69_p4, %s857_s19, %s71_s25  }
   0xe   : > { %225 = sbr.rel (!%p80_p3) target bundleno = 28 (0x1c), region = 24  ;;  %s227_s27 = sand.u32 (%p80_p3), 1, %s857_s19  }
   0xf   : > { %s735_s28 = sshll.u32 (%p80_p3), %s865_s21, 2  ;;  %s734_s29 = sshll.u32 (%p80_p3), %s227_s27, 6 }
  0x10   : > { %s946_s7 = scalar_lea.vmem (%p80_p3), %s1000_s1, %s735_s28  ;;  %s229_s8 = scalar_lea.vmem (%p80_p3), [#allocation3], %s734_s29 }
  0x11   : > { %v250_v0 = vld [vmem:[%s946_s7] sm:$0xf] (%p80_p3)  ;;  %v252_v1 = vld [vmem:[%s946_s7 + $0x8] sm:$0xf] (%p80_p3)  ;;  %v254_v2 = vld [vmem:[%s946_s7 + $0x10] sm:$0xf] (%p80_p3) }
  0x12   : > { %251 = vst [vmem:[%s229_s8] sm:$0xf] (%p80_p3), %v250_v0  ;;  %253 = vst [vmem:[%s229_s8 + $0x4] sm:$0xf] (%p80_p3), %v252_v1  ;;  %v256_v3 = vld [vmem:[%s946_s7 + $0x18] sm:$0xf] (%p80_p3) }
  0x13   : > { %v258_v4 = vld [vmem:[%s946_s7 + $0x20] sm:$0xf] (%p80_p3)  ;;  %255 = vst [vmem:[%s229_s8 + $0x8] sm:$0xf] (%p80_p3), %v254_v2  ;;  %257 = vst [vmem:[%s229_s8 + $0xc] sm:$0xf] (%p80_p3), %v256_v3 }
  0x14   : > { %259 = vst [vmem:[%s229_s8 + $0x10] sm:$0xf] (%p80_p3), %v258_v4  ;;  %v260_v5 = vld [vmem:[%s946_s7 + $0x28] sm:$0xf] (%p80_p3)  ;;  %v262_v6 = vld [vmem:[%s946_s7 + $0x30] sm:$0xf] (%p80_p3) }
  0x15   : > { %v264_v7 = vld [vmem:[%s946_s7 + $0x38] sm:$0xf]  ;;  %261 = vst [vmem:[%s229_s8 + $0x14] sm:$0xf] %v260_v5  ;;  %263 = vst [vmem:[%s229_s8 + $0x18] sm:$0xf] %v262_v6 }
  0x16   : > { %265 = vst [vmem:[%s229_s8 + $0x1c] sm:$0xf] %v264_v7  ;;  %v266_v8 = vld [vmem:[%s946_s7 + $0x40] sm:$0xf]  ;;  %v268_v9 = vld [vmem:[%s946_s7 + $0x48] sm:$0xf] }
  0x17   : > { %v270_v10 = vld [vmem:[%s946_s7 + $0x50] sm:$0xf]  ;;  %267 = vst [vmem:[%s229_s8 + $0x20] sm:$0xf] %v266_v8  ;;  %269 = vst [vmem:[%s229_s8 + $0x24] sm:$0xf] %v268_v9 }
  0x18   : > { %271 = vst [vmem:[%s229_s8 + $0x28] sm:$0xf] %v270_v10  ;;  %v272_v11 = vld [vmem:[%s946_s7 + $0x58] sm:$0xf]  ;;  %v274_v12 = vld [vmem:[%s946_s7 + $0x60] sm:$0xf] }
  0x19   : > { %v276_v13 = vld [vmem:[%s946_s7 + $0x68] sm:$0xf]  ;;  %273 = vst [vmem:[%s229_s8 + $0x2c] sm:$0xf] %v272_v11  ;;  %275 = vst [vmem:[%s229_s8 + $0x30] sm:$0xf] %v274_v12 }
  0x1a   : > { %277 = vst [vmem:[%s229_s8 + $0x34] sm:$0xf] %v276_v13  ;;  %v278_v14 = vld [vmem:[%s946_s7 + $0x70] sm:$0xf]  ;;  %v280_v15 = vld [vmem:[%s946_s7 + $0x78] sm:$0xf] }
  0x1b   : > { %279 = vst [vmem:[%s229_s8 + $0x38] sm:$0xf] %v278_v14  ;;  %281 = vst [vmem:[%s229_s8 + $0x3c] sm:$0xf] %v280_v15 }
  0x1c PF: > { %p736_p6 = scmp.ge.s32.totalorder %s869_s22, 1  ;;  %p358_p7 = scmp.lt.s32.totalorder %s869_s22, 3 }
  0x1e   : > { %p359_p8 = pnand %p736_p6, %p358_p7 }
  0x1f   : > { %s365_s9 = sand.u32 (!%p359_p8), 1, %s853_s18   ;;  %v871_v16 = vmov (!%p359_p8), 0.0   ;;  %vm872_vm0 = vmmov (!%p359_p8), 0   ;;  %v453_v25 = vld [vmem:[%s999_s0] sm:$0xf] (!%p359_p8)  ;;  %p424_p9 = scmp.lt.s32.totalorder (!%p359_p8), %s861_s20, 1 }
  0x20   : > { %362 = sbr.rel (%p359_p8) target bundleno = 289 (0x121), region = 77  ;;  %761 = vmatprep.subr.bf16.mxu0 (!%p359_p8), %v871_v16  ;;  %s737_s10 = sshll.u32 (!%p359_p8), %s365_s9, 6  ;;  %777 = vmatprep.mubr.msk.bf16.mxu0 (!%p359_p8), %vm872_vm0, %v871_v16 }
  0x21   : > { %s367_s11 = scalar_lea.vmem (!%p359_p8), [#allocation3], %s737_s10 }
  0x22   : > { %v823_v17 = vld [vmem:[%s367_s11] sm:$0xff] (!%p359_p8)   ;;  %v824_v18 = vld [vmem:[%s367_s11 + $0x8] sm:$0xff] (!%p359_p8)   ;;  %v825_v19 = vld [vmem:[%s367_s11 + $0x10] sm:$0xff] (!%p359_p8)  }
  0x23   : > { %762 = vmatpush3.bf16.msra.mxu0 (!%p359_p8), %v823_v17  ;;  %v826_v20 = vld [vmem:[%s367_s11 + $0x18] sm:$0xff] (!%p359_p8)   ;;  %v827_v21 = vld [vmem:[%s367_s11 + $0x20] sm:$0xff] (!%p359_p8)   ;;  %v828_v22 = vld [vmem:[%s367_s11 + $0x28] sm:$0xff] (!%p359_p8)  }
  0x24   : > { %763 = vmatprep.subr.bf16.mxu0 (!%p359_p8), %v871_v16  ;;  %v829_v23 = vld [vmem:[%s367_s11 + $0x30] sm:$0xff] (!%p359_p8)   ;;  %v830_v24 = vld [vmem:[%s367_s11 + $0x38] sm:$0xff] (!%p359_p8)  }
  0x27   : > { %764 = vmatpush3.bf16.msra.mxu0 %v824_v18  ;;  %s1012_s20 = smov (!%p424_p9, %s861_s20), 1 }
  0x28   : > { %765 = vmatprep.subr.bf16.mxu0 %v871_v16  ;;  %s738_s14 = sshll.u32 %s1012_s20, 2  ;;  %s426_s17 = scalar_lea.vmem %s1001_s2, %s1012_s20 }
  0x29   : > { %s437_s25 = scalar_lea.vmem %s1003_s4, %s738_s14  ;;  %s429_s29 = scalar_lea.vmem %s1002_s3, %s1012_s20  ;;  %v748_v26 = vld [vmem:[%s426_s17] ss:$0 sm:$0xff] }
  0x2a   : > { %v580_v27 = vld [vmem:[%s437_s25] sm:$0xf]  ;;  %s445_s7 = scalar_lea.vmem %s1004_s5, %s738_s14 }
  0x2b   : > { %766 = vmatpush3.bf16.msra.mxu0 %v825_v19  ;;  %v749_v29 = vld [vmem:[%s429_s29] ss:$0 sm:$0xff]  ;;  %v581_v31 = vunpack.c.l.bf16 %v580_v27 }
  0x2c   : > { %767 = vmatprep.subr.bf16.mxu0 %v871_v16 }
  0x2f   : > { %768 = vmatpush3.bf16.msra.mxu0 %v826_v20 }
  0x30   : > { %769 = vmatprep.subr.bf16.mxu0 %v871_v16 }
  0x33   : > { %770 = vmatpush3.bf16.msra.mxu0 %v827_v21 }
  0x34   : > { %771 = vmatprep.subr.bf16.mxu0 %v871_v16 }
  0x37   : > { %772 = vmatpush3.bf16.msra.mxu0 %v828_v22 }
  0x38   : > { %773 = vmatprep.subr.bf16.mxu0 %v871_v16 }
  0x3b   : > { %774 = vmatpush3.bf16.msra.mxu0 %v829_v23 }
  0x3c   : > { %775 = vmatprep.subr.bf16.mxu0 %v871_v16 }
  0x3f   : > { %776 = vmatpush3.bf16.msra.mxu0 %v830_v24 }
  0x42   : > { %778 = vmatmul.mubr.bf16.vlgmr.msra.gmra.mrb[0].mxu0 %v453_v25 }
 0x115   : > { %v552_v28 = vpop.f32.mrb[0].mxu0 }
 0x116   : > { %v571_v30 = vmul.f32 %v748_v26, %v552_v28  ;;  %v779_v32 = vpop.f32.mrb[1].mxu0 }
 0x117   : > { %v555_v33 = vpop.f32.mrb[2].mxu0 }
 0x118   : > { %v579_v34 = vadd.f32 %v749_v29, %v571_v30  ;;  %v780_v35 = vpop.f32.mrb[3].mxu0 }
 0x11a   : > { %v582_v36 = vadd.f32 %v581_v31, %v579_v34 }
 0x11c   : > { %v583_v37 = vmax.f32 %v582_v36, 0.0 }
 0x11e   : > { %v584_v38 = vpack.c.bf16 %v583_v37, %v583_v37 }
 0x120   : > { %585 = vst [vmem:[%s445_s7] sm:$0xf] %v584_v38 }
 0x121 PF: > { %s15_s22 = sadd.s32 1, %s869_s22   ;;  %s1005_s18 = smov %s857_s19 }
 0x122   : > { %p12_p10 = scmp.ge.s32.totalorder %s15_s22, 4   ;;  %s1006_s19 = smov %s938_s26 }
 0x123   : > { %s1007_s20 = smov %s865_s21  ;;  %s1008_s21 = smov %s1010_s23 }
 0x124   :  { %14 = sbr.rel (!%p12_p10) target bundleno = 3 (0x3), region = 136 }

// kernel: resnet_forward.103
= control target key start
LH: loop header
LB: loop body
LE: loop exit
PB: predicated region body
PF: predicated region fallthrough
CT: control target
= control target key end

     0   :  { %s374_s1 = inlined_call_operand.vmem [shape: bf16[256,128], index: 1, kind: input, shape index: {}]   ;;  %s375_s0 = inlined_call_operand.vmem [shape: bf16[8,256], index: 0, kind: input, shape index: {}]   ;;  %s376_s2 = inlined_call_operand.vmem [shape: f32[1,128], index: 2, kind: input, shape index: {}]   ;;  %s377_s3 = inlined_call_operand.vmem [shape: f32[1,128], index: 3, kind: input, shape index: {}]   ;;  %s378_s4 = inlined_call_operand.vmem [shape: bf16[8,128], index: 4, kind: output, shape index: {}]  }
   0x1   :  { %v271_v0 = vld [vmem:[%s374_s1 + $0x40] sm:$0xff]   ;;  %v273_v2 = vld [vmem:[%s374_s1 + $0x48] sm:$0xff]   ;;  %v275_v4 = vld [vmem:[%s374_s1 + $0x50] sm:$0xff]  }
   0x2   :  { %v272_v1 = vld [vmem:[%s374_s1] sm:$0xff]   ;;  %249 = vmatprep.subr.bf16.mxu0 %v271_v0  ;;  %v274_v3 = vld [vmem:[%s374_s1 + $0x8] sm:$0xff]   ;;  %v276_v5 = vld [vmem:[%s374_s1 + $0x10] sm:$0xff]  }
   0x3   :  { %250 = vmatpush3.bf16.msra.mxu0 %v272_v1  ;;  %v277_v6 = vld [vmem:[%s374_s1 + $0x58] sm:$0xff]   ;;  %v279_v8 = vld [vmem:[%s374_s1 + $0x60] sm:$0xff]   ;;  %v281_v10 = vld [vmem:[%s374_s1 + $0x68] sm:$0xff]  }
   0x4   :  { %251 = vmatprep.subr.bf16.mxu0 %v273_v2  ;;  %v278_v7 = vld [vmem:[%s374_s1 + $0x18] sm:$0xff]   ;;  %v280_v9 = vld [vmem:[%s374_s1 + $0x20] sm:$0xff]   ;;  %v282_v13 = vld [vmem:[%s374_s1 + $0x28] sm:$0xff]  }
   0x5   :  { %v24_v11 = vld [vmem:[%s375_s0] sm:$0xff]  ;;  %v283_v14 = vld [vmem:[%s374_s1 + $0x70] sm:$0xff]   ;;  %v285_v16 = vld [vmem:[%s374_s1 + $0x78] sm:$0xff]  }
   0x6   :  { %v230_v12 = vcombine.high %v24_v11, %v24_v11  ;;  %v284_v15 = vld [vmem:[%s374_s1 + $0x30] sm:$0xff]   ;;  %v286_v17 = vld [vmem:[%s374_s1 + $0x38] sm:$0xff]   ;;  %v229_v18 = vcombine.low %v24_v11, %v24_v11  ;;  %v247_v21 = vld [vmem:[%s376_s2] ss:$0 sm:$0xff] }
   0x7   :  { %252 = vmatpush3.bf16.msra.mxu0 %v274_v3  ;;  %v248_v24 = vld [vmem:[%s377_s3] ss:$0 sm:$0xff] }
   0x8   :  { %253 = vmatprep.subr.bf16.mxu0 %v275_v4  ;;  %192 = vmatprep.mubr.bf16.mxu0 %v230_v12 }
   0xb   :  { %254 = vmatpush3.bf16.msra.mxu0 %v276_v5 }
   0xc   :  { %255 = vmatprep.subr.bf16.mxu0 %v277_v6 }
   0xf   :  { %256 = vmatpush3.bf16.msra.mxu0 %v278_v7 }
  0x10   :  { %257 = vmatprep.subr.bf16.mxu0 %v279_v8 }
  0x13   :  { %258 = vmatpush3.bf16.msra.mxu0 %v280_v9 }
  0x14   :  { %259 = vmatprep.subr.bf16.mxu0 %v281_v10 }
  0x17   :  { %260 = vmatpush3.bf16.msra.mxu0 %v282_v13 }
  0x18   :  { %261 = vmatprep.subr.bf16.mxu0 %v283_v14 }
  0x1b   :  { %262 = vmatpush3.bf16.msra.mxu0 %v284_v15 }
  0x1c   :  { %263 = vmatprep.subr.bf16.mxu0 %v285_v16 }
  0x1f   :  { %264 = vmatpush3.bf16.msra.mxu0 %v286_v17 }
  0x22   :  { %193 = vmatmul.mubr.bf16.vlgmr.msra.gmra.mrb[0].mxu0 %v229_v18 }
  0xf5   :  { %v265_v19 = vpop.f32.mrb[0].mxu0 }
  0xf6   :  { %v266_v20 = vpop.f32.mrb[1].mxu0 }
  0xf7   :  { %v267_v22 = vadd.f32 %v266_v20, %v265_v19  ;;  %v268_v23 = vpop.f32.mrb[2].mxu0 }
  0xf8   :  { %v269_v25 = vpop.f32.mrb[3].mxu0 }
  0xf9   :  { %v213_v26 = vmul.f32 %v267_v22, %v247_v21 }
  0xfb   :  { %v221_v27 = vadd.f32 %v248_v24, %v213_v26 }
  0xfd   :  { %v222_v28 = vmax.f32 %v221_v27, 0.0 }
  0xff   :  { %v223_v29 = vpack.c.bf16 %v222_v28, %v222_v28 }
 0x101   :  { %224 = vst [vmem:[%s378_s4] sm:$0xf] %v223_v29 }

// kernel: resnet_forward.109
= control target key start
LH: loop header
LB: loop body
LE: loop exit
PB: predicated region body
PF: predicated region fallthrough
CT: control target
= control target key end

     0   :  { %vm25_vm0 = vcmask 1043456   ;;  %v60_v3 = vlaneseq  ;;  %s252_s0 = inlined_call_operand.vmem [shape: bf16[2,4,256], index: 0, kind: input, shape index: {}]   ;;  %s253_s1 = inlined_call_operand.vmem [shape: f32[1,256], index: 1, kind: input, shape index: {}]   ;;  %s254_s2 = inlined_call_operand.vmem [shape: f32[1,256], index: 2, kind: input, shape index: {}]   ;;  %s255_s3 = inlined_call_operand.hbm [shape: f32[2,256], index: 3, kind: output, shape index: {}]  }
   0x1   :  { %v170_v0 = vld [vmem:[%s252_s0] sm:$0xff]  }
   0x2   :  { %v171_v1 = vunpack.c.l.bf16 %v170_v0  ;;  %v172_v2 = vunpack.c.h.bf16 %v170_v0 }
   0x3   :  { %8 = vsyncpa [#allocation3], 0  ;;  %v226_v12 = vshrl.u32 %v60_v3, 7  ;;  %v58_v26 = vld [vmem:[%s253_s1] sm:$0x3]  ;;  %vm99_vm1 = vcmask 1041409  }
   0x4   :  { %v21_v4 = vcombine.high %v171_v1, %v171_v1  ;;  %v22_v5 = vcombine.high %v172_v2, %v172_v2  ;;  %v26_v6 = vsel %vm25_vm0, %v171_v1, 0.0  ;;  %v40_v7 = vsel %vm25_vm0, %v172_v2, 0.0  ;;  %v74_v32 = vld [vmem:[%s254_s2] sm:$0x3]  ;;  %s202_s1 = smov [#allocation2]  }
   0x5   :  { %v27_v8 = vrot.slane %v26_v6, 4  ;;  %v41_v9 = vrot.slane %v40_v7, 4  ;;  %v62_v21 = vsub.s32 0, %v226_v12  ;;  %v66_v27 = vsub.s32 1, %v226_v12  ;;  %s161_s2 = sshll.u32 %s202_s1, 4  ;;  %s162_s2 = int_to_ptr.vmem [resolvable:$true] %s161_s2 }
   0x6   :  { %v33_v10 = vsel %vm25_vm0, %v21_v4, 0.0  ;;  %v47_v11 = vsel %vm25_vm0, %v22_v5, 0.0  ;;  %vm105_vm2 = vcmask 1041408   ;;  %v201_v4 = vmov 1983009808   ;;  %s177_s17 = scalar_lea.vmem %s162_s2, 64  ;;  %p182_p1 = scmp.lt.s32.totalorder %s162_s2, %s162_s2 }
   0x7   :  { %v28_v13 = vadd.f32 %v27_v8, %v26_v6  ;;  %v34_v14 = vrot.slane %v33_v10, 4  ;;  %v42_v15 = vadd.f32 %v41_v9, %v40_v7  ;;  %v48_v16 = vrot.slane %v47_v11, 4  ;;  %p178_p0 = scmp.ne.s32.totalorder %s162_s2, %s177_s17  ;;  %p183_p2 = scmp.lt.s32.totalorder %s177_s17, %s177_s17 }
   0x8   :  { %v63_v33 = vrot.slane %v58_v26, %v62_v21  ;;  %v67_v38 = vrot.slane %v58_v26, %v66_v27  ;;  %v79_v39 = vrot.slane %v74_v32, %v62_v21  ;;  %v83_v44 = vrot.slane %v74_v32, %v66_v27 }
   0x9   :  { %v29_v17 = vrot.slane %v28_v13, 2  ;;  %v35_v18 = vadd.f32 %v34_v14, %v33_v10  ;;  %v43_v19 = vrot.slane %v42_v15, 2  ;;  %v49_v20 = vadd.f32 %v48_v16, %v47_v11  ;;  %p184_p3 = por %p183_p2, %p182_p1 }
   0xa   :  { %v127_v5 = vunpack.c.l.s4 %v201_v4  ;;  %vm147_vm3 = vcmask 1043459   ;;  %vm149_vm4 = vcmask 1045509   ;;  %vm151_vm5 = vcmask 1047559  }
   0xb   :  { %v30_v22 = vadd.f32 %v29_v17, %v28_v13  ;;  %v36_v23 = vrot.slane %v35_v18, 2  ;;  %v44_v24 = vadd.f32 %v43_v19, %v42_v15  ;;  %v50_v25 = vrot.slane %v49_v20, 2  ;;  %p185_p4 = pnand %p184_p3, %p178_p0 }
   0xc   :  { %v128_v10 = vunpack.c.0.s8 %v127_v5 }
   0xd   :  { %v31_v28 = vrot.slane %v30_v22, 1  ;;  %v37_v29 = vadd.f32 %v36_v23, %v35_v18  ;;  %v45_v30 = vrot.slane %v44_v24, 1  ;;  %v51_v31 = vadd.f32 %v50_v25, %v49_v20 }
   0xe   :  { %v131_v15 = vsub.s32 %v128_v10, %v226_v12 }
   0xf   :  { %v32_v34 = vadd.f32 %v31_v28, %v30_v22  ;;  %v38_v35 = vrot.slane %v37_v29, 1  ;;  %v46_v36 = vadd.f32 %v45_v30, %v44_v24  ;;  %v52_v37 = vrot.slane %v51_v31, 1 }
  0x11   :  { %v39_v40 = vadd.f32 %v38_v35, %v37_v29  ;;  %v53_v41 = vadd.f32 %v52_v37, %v51_v31  ;;  %v54_v42 = vmul.f32 0.25, %v32_v34  ;;  %v56_v43 = vmul.f32 0.25, %v46_v36 }
  0x13   :  { %v55_v45 = vmul.f32 0.25, %v39_v40  ;;  %v57_v46 = vmul.f32 0.25, %v53_v41  ;;  %v70_v47 = vmul.f32 %v63_v33, %v54_v42  ;;  %v72_v48 = vmul.f32 %v63_v33, %v56_v43 }
  0x15   :  { %v71_v49 = vmul.f32 %v67_v38, %v55_v45  ;;  %v73_v50 = vmul.f32 %v67_v38, %v57_v46  ;;  %v86_v51 = vadd.f32 %v79_v39, %v70_v47  ;;  %v88_v52 = vadd.f32 %v79_v39, %v72_v48 }
  0x17   :  { %v87_v53 = vadd.f32 %v83_v44, %v71_v49  ;;  %v89_v54 = vadd.f32 %v83_v44, %v73_v50  ;;  %v90_v55 = vmul.f32 %v86_v51, %v86_v51  ;;  %v92_v56 = vmul.f32 %v88_v52, %v88_v52 }
  0x19   :  { %v91_v57 = vmul.f32 %v87_v53, %v87_v53  ;;  %v93_v58 = vmul.f32 %v89_v54, %v89_v54  ;;  %v98_v59 = vrot.slane %v92_v56, 7 }
  0x1b   :  { %v100_v60 = vsel %vm99_vm1, %v98_v59, %v90_v55  ;;  %v101_v61 = vrot.slane %v93_v58, 7 }
  0x1c   :  { %v106_v62 = vsel %vm105_vm2, %v100_v60, 0.0 }
  0x1d   :  { %v102_v63 = vsel %vm99_vm1, %v101_v61, %v91_v57 }
  0x1e   :  { %v107_v0 = vsel %vm105_vm2, %v102_v63, 0.0 }
  0x1f   :  { %v108_v1 = vadd.f32 %v107_v0, %v106_v62 }
  0x21   :  { %109 = vadd.xlane.f32.xlu0 %v108_v1 }
  0xae   :  { %v110_v2 = vpop.xlane.xlu0 %109 }
  0xaf   :  { %v111_v3 = vmax.f32 %v110_v2, 1e-24 }
  0xb1   :  { %175 = vrsqrt.f32 %v111_v3 }
  0xbb   :  { %v176_v6 = vpop.eup %175 }
  0xbc   :  { %v114_v7 = vrot.slane %v176_v6, 1  ;;  %v117_v8 = vmul.f32 %v176_v6, %v86_v51  ;;  %v118_v9 = vmul.f32 %v176_v6, %v87_v53 }
  0xbe   :  { %v119_v11 = vmul.f32 %v114_v7, %v88_v52  ;;  %v120_v13 = vmul.f32 %v114_v7, %v89_v54  ;;  %v125_v14 = vcombine.low %v117_v8, %v118_v9 }
  0xc0   :  { %v133_v16 = vcombine.low %v119_v11, %v120_v13  ;;  %v132_v18 = vrot.slane %v125_v14, %v131_v15 }
  0xc2   :  { %v140_v17 = vrot.slane %v133_v16, %v131_v15 }
  0xc4   :  { %v145_v19 = vrot.slane %v140_v17, 7 }
  0xc6   :  { %v146_v20 = vsel %vm99_vm1, %v145_v19, %v132_v18 }
  0xc7   :  { %v148_v21 = vsel %vm147_vm3, %v145_v19, %v146_v20 }
  0xc8   :  { %v150_v22 = vsel %vm149_vm4, %v145_v19, %v148_v21 }
  0xc9   :  { %v152_v23 = vsel %vm151_vm5, %v145_v19, %v150_v22 }
  0xca   :  { %154 = vst [vmem:[#allocation2] sm:$0xf] %v152_v23 }
  0xcb   :  { %188 = shalt.err (!%p185_p4)
}
  0xcc   :  { %s189_s20 = scalar_lea.hbm %s255_s3, 64 }
  0xcd   :  { %p190_p5 = scmp.ne.s32.totalorder %s255_s3, %s189_s20  ;;  %p193_p6 = scmp.lt.u32.totalorder %s189_s20, %s255_s3 }
  0xcf   :  { %p195_p7 = pnand %p193_p6, %p190_p5 }
  0xd1   :  { %198 = shalt.err (!%p195_p7)
}
  0xd2   :  { %164 = dma.vmem_to_hbm [thread:$0]  %s162_s2, 64, %s255_s3, [#allocation3]  }
  0xd3   :  { %199 = dma.done.wait [#allocation3], 64  }
  0xd4   :  { %200 = vsyncadd [#allocation3], 4294967232 }
  0xd5   :  { %168 = vsyncpa [#allocation3], 1 }

</bundles_post_ra>
